<compile_context>
chip_gen: v7x
topology: tpu7x:2x2x1
jax: 0.10.0
libtpu: 0.0.40
codegen_flags: <defaults>
</compile_context>

<pallas_src>
import math

import jax
import jax.numpy as jnp
from jax.experimental import pallas as pl
from jax.experimental.pallas import tpu as pltpu


# ----------------------------------------------------------------------------
# Fused kernel: layer1 + layer2 + adaptive pool + flatten + fc1/fc2/fc3
# ----------------------------------------------------------------------------
def timecnn_kernel(xe_ref, xo_ref, w1_ref, b1_ref, w2_ref, b2_ref,
                   fw1_ref, fs1_ref, fb1_ref, fw2_ref, fs2_ref, fb2_ref,
                   fw3_ref, fb3_ref, o_ref):
    n = xe_ref.shape[0]
    l1 = xo_ref.shape[1] - 1          # length after MaxPool1d(3, 2)
    c1 = w1_ref.shape[1]              # 64
    c2 = w2_ref.shape[2]              # 256
    l2 = l1 - 2                       # conv2 (valid) output length
    p_out = fw1_ref.shape[0] // c2    # adaptive pool size (8)

    # ---- layer1: Conv1d(1->64, k=3, pad=1) + ReLU + MaxPool1d(3, 2) --------
    # Even/odd phases of the padded input (prepared in the wrapper) give the
    # three conv rows of each pool window from contiguous slices only; the
    # whole layer is broadcast FMAs + elementwise maxima on the VPU.
    k0 = w1_ref[0:1, :]               # (1, 64)
    k1 = w1_ref[1:2, :]
    k2 = w1_ref[2:3, :]
    e0 = xe_ref[:, 0:l1, :]           # xp[2j]        (N, L1, 1)
    e1 = xe_ref[:, 1:l1 + 1, :]       # xp[2j+2]
    e2 = xe_ref[:, 2:l1 + 2, :]       # xp[2j+4]
    o0 = xo_ref[:, 0:l1, :]           # xp[2j+1]
    o1 = xo_ref[:, 1:l1 + 1, :]       # xp[2j+3]
    z0 = e0 * k0 + o0 * k1 + e1 * k2  # conv row 2j     (pre-bias)
    z1 = o0 * k0 + e1 * k1 + o1 * k2  # conv row 2j + 1
    z2 = e1 * k0 + o1 * k1 + e2 * k2  # conv row 2j + 2
    # MaxPool(ReLU(conv)) == ReLU(max(conv) + b): shared bias + monotone ReLU.
    h1 = jnp.maximum(jnp.maximum(jnp.maximum(z0, z1), z2) + b1_ref[...], 0.0)
    # h1: (N, L1, 64) f32

    # ---- layer2: Conv1d(64->256, k=3) + ReLU; batch folded into matmul M ----
    # bf16 activations x bf16 weights on the MXU, f32 accumulation.
    a0 = h1[:, 0:l2, :].reshape(n * l2, c1).astype(jnp.bfloat16)
    a1 = h1[:, 1:l2 + 1, :].reshape(n * l2, c1).astype(jnp.bfloat16)
    a2 = h1[:, 2:l2 + 2, :].reshape(n * l2, c1).astype(jnp.bfloat16)
    y2 = (jnp.dot(a0, w2_ref[0], preferred_element_type=jnp.float32)
          + jnp.dot(a1, w2_ref[1], preferred_element_type=jnp.float32)
          + jnp.dot(a2, w2_ref[2], preferred_element_type=jnp.float32)
          + b2_ref[...])
    y2 = jnp.maximum(y2, 0.0).reshape(n, l2, c2)          # (N, L2, 256) f32

    # ---- AdaptiveMaxPool1d(8) + channel-major flatten fused into fc1 --------
    # torch flat index = c*8 + p; fw1 rows are pre-permuted to p-major
    # (row = p*256 + c), so the pooled windows just concatenate along lanes
    # (256 = 2x128, aligned) and fc1 is a single (N,2048)x(2048,1024) dot.
    # Window bounds are the PyTorch formula [floor(p*L2/P), ceil((p+1)*L2/P)).
    pooled = []
    for p in range(p_out):
        ws = (p * l2) // p_out
        we = -((-(p + 1) * l2) // p_out)                   # ceil
        pooled.append(jnp.max(y2[:, ws:we, :], axis=1))    # (N, 256)
    flat = jnp.concatenate(pooled, axis=1).astype(jnp.bfloat16)   # (N, 2048)

    # int8 -> bf16 is exact; per-output-column scale applied after the matmul.
    w1d = fw1_ref[...].astype(jnp.bfloat16)                # (2048, 1024)
    h = jnp.dot(flat, w1d, preferred_element_type=jnp.float32)
    h = h * fs1_ref[...] + fb1_ref[...]                    # (N, 1024) f32
    # Dropout2d(p=0.0) is the identity (scale 1/(1-p) == 1).

    # ---- fc2 (int8 + scale) -> fc3 (bf16) -----------------------------------
    w2d = fw2_ref[...].astype(jnp.bfloat16)                # (1024, 512)
    h = jnp.dot(h.astype(jnp.bfloat16), w2d, preferred_element_type=jnp.float32)
    h = h * fs2_ref[...] + fb2_ref[...]                    # (N, 512) f32

    o_ref[...] = jnp.dot(h.astype(jnp.bfloat16), fw3_ref[...],
                         preferred_element_type=jnp.float32) + fb3_ref[...]


# ----------------------------------------------------------------------------
# pallas_call wrapper (everything fits in VMEM; no grid needed at these shapes)
# ----------------------------------------------------------------------------
def timecnn_call(xe, xo, params):
    n = xe.shape[0]
    n_out = params["fb3"].shape[1]
    args = (xe, xo, params["w1"], params["b1"], params["w2"], params["b2"],
            params["fw1"], params["fs1"], params["fb1"],
            params["fw2"], params["fs2"], params["fb2"],
            params["fw3"], params["fb3"])
    return pl.pallas_call(
        timecnn_kernel,
        out_shape=jax.ShapeDtypeStruct((n, n_out), jnp.float32),
        in_specs=[pl.BlockSpec(memory_space=pltpu.MemorySpace.VMEM)
                  for _ in args],
        out_specs=pl.BlockSpec(memory_space=pltpu.MemorySpace.VMEM),
        # Actual footprint ~9 MiB (int8 weights + bf16 dequant temporaries);
        # 32 MiB is safe on v5e/v6e (128 MiB VMEM) and v7x (64 MiB VMEM).
        compiler_params=pltpu.CompilerParams(vmem_limit_bytes=32 * 1024 * 1024),
    )(*args)


def timecnn_forward(x, params):
    """x: (N, 1, L) float32 — the PyTorch NCL input (in_channels == 1)."""
    n, _, seq_len = x.shape
    l1 = (seq_len - 3) // 2 + 1                        # MaxPool1d(3, 2) length
    xp = jnp.pad(x[:, 0, :], ((0, 0), (1, 1)))         # Conv1d padding=1 -> (N, L+2)
    # Even / odd phases of the padded signal (tiny wrapper-side strided slices).
    xe = xp[:, 0:2 * l1 + 3:2][..., None]              # (N, L1+2, 1)
    xo = xp[:, 1:2 * l1 + 2:2][..., None]              # (N, L1+1, 1)
    return timecnn_call(xe, xo, params)


# ----------------------------------------------------------------------------
# Parameter init (random, torch-style fan-in uniform) + weight compression
# ----------------------------------------------------------------------------
def init_params(key):
    ks = jax.random.split(key, 10)

    def u(k, shape, fan_in, dtype=jnp.float32):
        bound = 1.0 / math.sqrt(fan_in)
        return jax.random.uniform(k, shape, jnp.float32, -bound, bound).astype(dtype)

    def quant_i8(w):
        """Symmetric per-output-column int8 quantization: w ~= q * scale."""
        amax = jnp.max(jnp.abs(w), axis=0, keepdims=True)
        scale = jnp.maximum(amax, 1e-8) / 127.0
        q = jnp.clip(jnp.round(w / scale), -127, 127).astype(jnp.int8)
        return q, scale.astype(jnp.float32)

    # fc1 weight generated as (in, out) = (2048, 1024) with torch's channel-major
    # input index (c*8 + p); fold the flatten permutation into the rows once
    # (-> p-major: row = p*256 + c), then quantize per output column.
    fw1 = u(ks[4], (256 * 8, 128 * 8), 256 * 8)
    fw1 = jnp.transpose(fw1.reshape(256, 8, 128 * 8), (1, 0, 2)).reshape(2048, 1024)
    fw1_q, fs1 = quant_i8(fw1)

    fw2 = u(ks[6], (128 * 8, 128 * 4), 128 * 8)
    fw2_q, fs2 = quant_i8(fw2)

    return {
        "w1": u(ks[0], (3, 64), 3),                           # conv1 (k, c_out) f32
        "b1": u(ks[1], (1, 64), 3),
        "w2": u(ks[2], (3, 64, 256), 64 * 3, jnp.bfloat16),    # conv2 (k, c_in, c_out)
        "b2": u(ks[3], (1, 256), 64 * 3),
        "fw1": fw1_q,                                          # (2048, 1024) int8
        "fs1": fs1,                                            # (1, 1024) f32
        "fb1": u(ks[5], (1, 128 * 8), 256 * 8),
        "fw2": fw2_q,                                          # (1024, 512) int8
        "fs2": fs2,                                            # (1, 512) f32
        "fb2": u(ks[7], (1, 128 * 4), 128 * 8),
        "fw3": u(ks[8], (128 * 4, 33), 128 * 4, jnp.bfloat16), # (512, 33) bf16
        "fb3": u(ks[9], (1, 33), 128 * 4),
    }


if __name__ == "__main__":
    key = jax.random.PRNGKey(0)
    k_x, k_p = jax.random.split(key)

    N, L = 2, 37                      # batch=2, seq=37 -> L1=18, L2=16, adaptive->8
    x = jax.random.normal(k_x, (N, 1, L), jnp.float32)
    params = init_params(k_p)

    out = jax.jit(timecnn_forward)(x, params)
    out = jax.block_until_ready(out)

    assert out.shape == (N, 33), out.shape
    assert out.dtype == jnp.float32
    assert bool(jnp.all(jnp.isfinite(out)))
    print("KERNEL_OK")
</pallas_src>

<mosaic_0001>
module attributes {stable_mosaic.version = 11 : i64} {
  func.func @timecnn_kernel(%arg0: memref<2x20x1xf32, #tpu.memory_space<vmem>>, %arg1: memref<2x19x1xf32, #tpu.memory_space<vmem>>, %arg2: memref<3x64xf32, #tpu.memory_space<vmem>>, %arg3: memref<1x64xf32, #tpu.memory_space<vmem>>, %arg4: memref<3x64x256xbf16, #tpu.memory_space<vmem>>, %arg5: memref<1x256xf32, #tpu.memory_space<vmem>>, %arg6: memref<2048x1024xi8, #tpu.memory_space<vmem>>, %arg7: memref<1x1024xf32, #tpu.memory_space<vmem>>, %arg8: memref<1x1024xf32, #tpu.memory_space<vmem>>, %arg9: memref<1024x512xi8, #tpu.memory_space<vmem>>, %arg10: memref<1x512xf32, #tpu.memory_space<vmem>>, %arg11: memref<1x512xf32, #tpu.memory_space<vmem>>, %arg12: memref<512x33xbf16, #tpu.memory_space<vmem>>, %arg13: memref<1x33xf32, #tpu.memory_space<vmem>>, %arg14: memref<2x33xf32, #tpu.memory_space<vmem>>) attributes {dimension_semantics = [], scalar_prefetch = 0 : i64, scratch_operands = 0 : i64, tpu.core_type = #tpu.core_type<tc>} {
    %c0 = arith.constant 0 : index
    %c0_0 = arith.constant 0 : index
    %0 = vector.load %arg2[%c0, %c0_0] : memref<3x64xf32, #tpu.memory_space<vmem>>, vector<1x64xf32>
    %c1 = arith.constant 1 : index
    %c0_1 = arith.constant 0 : index
    %1 = vector.load %arg2[%c1, %c0_1] : memref<3x64xf32, #tpu.memory_space<vmem>>, vector<1x64xf32>
    %c2 = arith.constant 2 : index
    %c0_2 = arith.constant 0 : index
    %2 = vector.load %arg2[%c2, %c0_2] : memref<3x64xf32, #tpu.memory_space<vmem>>, vector<1x64xf32>
    %c0_3 = arith.constant 0 : index
    %c0_4 = arith.constant 0 : index
    %c0_5 = arith.constant 0 : index
    %3 = vector.load %arg0[%c0_3, %c0_4, %c0_5] : memref<2x20x1xf32, #tpu.memory_space<vmem>>, vector<2x18x1xf32>
    %c0_6 = arith.constant 0 : index
    %c1_7 = arith.constant 1 : index
    %c0_8 = arith.constant 0 : index
    %4 = vector.load %arg0[%c0_6, %c1_7, %c0_8] : memref<2x20x1xf32, #tpu.memory_space<vmem>>, vector<2x18x1xf32>
    %c0_9 = arith.constant 0 : index
    %c2_10 = arith.constant 2 : index
    %c0_11 = arith.constant 0 : index
    %5 = vector.load %arg0[%c0_9, %c2_10, %c0_11] : memref<2x20x1xf32, #tpu.memory_space<vmem>>, vector<2x18x1xf32>
    %c0_12 = arith.constant 0 : index
    %c0_13 = arith.constant 0 : index
    %c0_14 = arith.constant 0 : index
    %6 = vector.load %arg1[%c0_12, %c0_13, %c0_14] : memref<2x19x1xf32, #tpu.memory_space<vmem>>, vector<2x18x1xf32>
    %c0_15 = arith.constant 0 : index
    %c1_16 = arith.constant 1 : index
    %c0_17 = arith.constant 0 : index
    %7 = vector.load %arg1[%c0_15, %c1_16, %c0_17] : memref<2x19x1xf32, #tpu.memory_space<vmem>>, vector<2x18x1xf32>
    %8 = vector.shape_cast %0 : vector<1x64xf32> to vector<1x1x64xf32>
    %9 = vector.broadcast %3 : vector<2x18x1xf32> to vector<2x18x64xf32>
    %10 = vector.broadcast %8 : vector<1x1x64xf32> to vector<2x18x64xf32>
    %11 = arith.mulf %9, %10 : vector<2x18x64xf32>
    %12 = vector.shape_cast %1 : vector<1x64xf32> to vector<1x1x64xf32>
    %13 = vector.broadcast %6 : vector<2x18x1xf32> to vector<2x18x64xf32>
    %14 = vector.broadcast %12 : vector<1x1x64xf32> to vector<2x18x64xf32>
    %15 = arith.mulf %13, %14 : vector<2x18x64xf32>
    %16 = arith.addf %11, %15 : vector<2x18x64xf32>
    %17 = vector.shape_cast %2 : vector<1x64xf32> to vector<1x1x64xf32>
    %18 = vector.broadcast %4 : vector<2x18x1xf32> to vector<2x18x64xf32>
    %19 = vector.broadcast %17 : vector<1x1x64xf32> to vector<2x18x64xf32>
    %20 = arith.mulf %18, %19 : vector<2x18x64xf32>
    %21 = arith.addf %16, %20 : vector<2x18x64xf32>
    %22 = vector.shape_cast %0 : vector<1x64xf32> to vector<1x1x64xf32>
    %23 = vector.broadcast %6 : vector<2x18x1xf32> to vector<2x18x64xf32>
    %24 = vector.broadcast %22 : vector<1x1x64xf32> to vector<2x18x64xf32>
    %25 = arith.mulf %23, %24 : vector<2x18x64xf32>
    %26 = vector.shape_cast %1 : vector<1x64xf32> to vector<1x1x64xf32>
    %27 = vector.broadcast %4 : vector<2x18x1xf32> to vector<2x18x64xf32>
    %28 = vector.broadcast %26 : vector<1x1x64xf32> to vector<2x18x64xf32>
    %29 = arith.mulf %27, %28 : vector<2x18x64xf32>
    %30 = arith.addf %25, %29 : vector<2x18x64xf32>
    %31 = vector.shape_cast %2 : vector<1x64xf32> to vector<1x1x64xf32>
    %32 = vector.broadcast %7 : vector<2x18x1xf32> to vector<2x18x64xf32>
    %33 = vector.broadcast %31 : vector<1x1x64xf32> to vector<2x18x64xf32>
    %34 = arith.mulf %32, %33 : vector<2x18x64xf32>
    %35 = arith.addf %30, %34 : vector<2x18x64xf32>
    %36 = vector.shape_cast %0 : vector<1x64xf32> to vector<1x1x64xf32>
    %37 = vector.broadcast %4 : vector<2x18x1xf32> to vector<2x18x64xf32>
    %38 = vector.broadcast %36 : vector<1x1x64xf32> to vector<2x18x64xf32>
    %39 = arith.mulf %37, %38 : vector<2x18x64xf32>
    %40 = vector.shape_cast %1 : vector<1x64xf32> to vector<1x1x64xf32>
    %41 = vector.broadcast %7 : vector<2x18x1xf32> to vector<2x18x64xf32>
    %42 = vector.broadcast %40 : vector<1x1x64xf32> to vector<2x18x64xf32>
    %43 = arith.mulf %41, %42 : vector<2x18x64xf32>
    %44 = arith.addf %39, %43 : vector<2x18x64xf32>
    %45 = vector.shape_cast %2 : vector<1x64xf32> to vector<1x1x64xf32>
    %46 = vector.broadcast %5 : vector<2x18x1xf32> to vector<2x18x64xf32>
    %47 = vector.broadcast %45 : vector<1x1x64xf32> to vector<2x18x64xf32>
    %48 = arith.mulf %46, %47 : vector<2x18x64xf32>
    %49 = arith.addf %44, %48 : vector<2x18x64xf32>
    %50 = arith.maximumf %21, %35 : vector<2x18x64xf32>
    %51 = arith.maximumf %50, %49 : vector<2x18x64xf32>
    %c0_18 = arith.constant 0 : index
    %c0_19 = arith.constant 0 : index
    %52 = vector.load %arg3[%c0_18, %c0_19] : memref<1x64xf32, #tpu.memory_space<vmem>>, vector<1x64xf32>
    %53 = vector.shape_cast %52 : vector<1x64xf32> to vector<1x1x64xf32>
    %54 = vector.broadcast %53 : vector<1x1x64xf32> to vector<2x18x64xf32>
    %55 = arith.addf %51, %54 : vector<2x18x64xf32>
    %cst = arith.constant 0.000000e+00 : f32
    %56 = vector.broadcast %cst : f32 to vector<2x18x64xf32>
    %57 = arith.maximumf %55, %56 : vector<2x18x64xf32>
    %58 = vector.extract_strided_slice %57 {offsets = [0, 0, 0], sizes = [2, 16, 64], strides = [1, 1, 1]} : vector<2x18x64xf32> to vector<2x16x64xf32>
    %59 = vector.shape_cast %58 : vector<2x16x64xf32> to vector<32x64xf32>
    %60 = arith.truncf %59 : vector<32x64xf32> to vector<32x64xbf16>
    %61 = vector.extract_strided_slice %57 {offsets = [0, 1, 0], sizes = [2, 16, 64], strides = [1, 1, 1]} : vector<2x18x64xf32> to vector<2x16x64xf32>
    %62 = vector.shape_cast %61 : vector<2x16x64xf32> to vector<32x64xf32>
    %63 = arith.truncf %62 : vector<32x64xf32> to vector<32x64xbf16>
    %64 = vector.extract_strided_slice %57 {offsets = [0, 2, 0], sizes = [2, 16, 64], strides = [1, 1, 1]} : vector<2x18x64xf32> to vector<2x16x64xf32>
    %65 = vector.shape_cast %64 : vector<2x16x64xf32> to vector<32x64xf32>
    %66 = arith.truncf %65 : vector<32x64xf32> to vector<32x64xbf16>
    %c0_20 = arith.constant 0 : index
    %c0_21 = arith.constant 0 : index
    %c0_22 = arith.constant 0 : index
    %67 = vector.load %arg4[%c0_20, %c0_21, %c0_22] : memref<3x64x256xbf16, #tpu.memory_space<vmem>>, vector<1x64x256xbf16>
    %68 = vector.shape_cast %67 : vector<1x64x256xbf16> to vector<64x256xbf16>
    %cst_23 = arith.constant dense<0.000000e+00> : vector<32x256xf32>
    %69 = tpu.matmul %60, %68, %cst_23 {dimension_numbers = #tpu.dot_dimension_numbers<[1], [0], [0], [1], [0, 0, 1, 1], [], []>} : vector<32x64xbf16>, vector<64x256xbf16>, vector<32x256xf32> -> vector<32x256xf32>
    %c1_24 = arith.constant 1 : index
    %c0_25 = arith.constant 0 : index
    %c0_26 = arith.constant 0 : index
    %70 = vector.load %arg4[%c1_24, %c0_25, %c0_26] : memref<3x64x256xbf16, #tpu.memory_space<vmem>>, vector<1x64x256xbf16>
    %71 = vector.shape_cast %70 : vector<1x64x256xbf16> to vector<64x256xbf16>
    %cst_27 = arith.constant dense<0.000000e+00> : vector<32x256xf32>
    %72 = tpu.matmul %63, %71, %cst_27 {dimension_numbers = #tpu.dot_dimension_numbers<[1], [0], [0], [1], [0, 0, 1, 1], [], []>} : vector<32x64xbf16>, vector<64x256xbf16>, vector<32x256xf32> -> vector<32x256xf32>
    %73 = arith.addf %69, %72 : vector<32x256xf32>
    %c2_28 = arith.constant 2 : index
    %c0_29 = arith.constant 0 : index
    %c0_30 = arith.constant 0 : index
    %74 = vector.load %arg4[%c2_28, %c0_29, %c0_30] : memref<3x64x256xbf16, #tpu.memory_space<vmem>>, vector<1x64x256xbf16>
    %75 = vector.shape_cast %74 : vector<1x64x256xbf16> to vector<64x256xbf16>
    %cst_31 = arith.constant dense<0.000000e+00> : vector<32x256xf32>
    %76 = tpu.matmul %66, %75, %cst_31 {dimension_numbers = #tpu.dot_dimension_numbers<[1], [0], [0], [1], [0, 0, 1, 1], [], []>} : vector<32x64xbf16>, vector<64x256xbf16>, vector<32x256xf32> -> vector<32x256xf32>
    %77 = arith.addf %73, %76 : vector<32x256xf32>
    %c0_32 = arith.constant 0 : index
    %c0_33 = arith.constant 0 : index
    %78 = vector.load %arg5[%c0_32, %c0_33] : memref<1x256xf32, #tpu.memory_space<vmem>>, vector<1x256xf32>
    %79 = vector.broadcast %78 : vector<1x256xf32> to vector<32x256xf32>
    %80 = arith.addf %77, %79 : vector<32x256xf32>
    %cst_34 = arith.constant 0.000000e+00 : f32
    %81 = vector.broadcast %cst_34 : f32 to vector<32x256xf32>
    %82 = arith.maximumf %80, %81 : vector<32x256xf32>
    %83 = vector.shape_cast %82 : vector<32x256xf32> to vector<2x16x256xf32>
    %84 = vector.extract_strided_slice %83 {offsets = [0, 0, 0], sizes = [2, 2, 256], strides = [1, 1, 1]} : vector<2x16x256xf32> to vector<2x2x256xf32>
    %cst_35 = arith.constant dense<0xFF800000> : vector<2x256xf32>
    %85 = vector.multi_reduction <maximumf>, %84, %cst_35 [1] : vector<2x2x256xf32> to vector<2x256xf32>
    %86 = vector.extract_strided_slice %83 {offsets = [0, 2, 0], sizes = [2, 2, 256], strides = [1, 1, 1]} : vector<2x16x256xf32> to vector<2x2x256xf32>
    %cst_36 = arith.constant dense<0xFF800000> : vector<2x256xf32>
    %87 = vector.multi_reduction <maximumf>, %86, %cst_36 [1] : vector<2x2x256xf32> to vector<2x256xf32>
    %88 = vector.extract_strided_slice %83 {offsets = [0, 4, 0], sizes = [2, 2, 256], strides = [1, 1, 1]} : vector<2x16x256xf32> to vector<2x2x256xf32>
    %cst_37 = arith.constant dense<0xFF800000> : vector<2x256xf32>
    %89 = vector.multi_reduction <maximumf>, %88, %cst_37 [1] : vector<2x2x256xf32> to vector<2x256xf32>
    %90 = vector.extract_strided_slice %83 {offsets = [0, 6, 0], sizes = [2, 2, 256], strides = [1, 1, 1]} : vector<2x16x256xf32> to vector<2x2x256xf32>
    %cst_38 = arith.constant dense<0xFF800000> : vector<2x256xf32>
    %91 = vector.multi_reduction <maximumf>, %90, %cst_38 [1] : vector<2x2x256xf32> to vector<2x256xf32>
    %92 = vector.extract_strided_slice %83 {offsets = [0, 8, 0], sizes = [2, 2, 256], strides = [1, 1, 1]} : vector<2x16x256xf32> to vector<2x2x256xf32>
    %cst_39 = arith.constant dense<0xFF800000> : vector<2x256xf32>
    %93 = vector.multi_reduction <maximumf>, %92, %cst_39 [1] : vector<2x2x256xf32> to vector<2x256xf32>
    %94 = vector.extract_strided_slice %83 {offsets = [0, 10, 0], sizes = [2, 2, 256], strides = [1, 1, 1]} : vector<2x16x256xf32> to vector<2x2x256xf32>
    %cst_40 = arith.constant dense<0xFF800000> : vector<2x256xf32>
    %95 = vector.multi_reduction <maximumf>, %94, %cst_40 [1] : vector<2x2x256xf32> to vector<2x256xf32>
    %96 = vector.extract_strided_slice %83 {offsets = [0, 12, 0], sizes = [2, 2, 256], strides = [1, 1, 1]} : vector<2x16x256xf32> to vector<2x2x256xf32>
    %cst_41 = arith.constant dense<0xFF800000> : vector<2x256xf32>
    %97 = vector.multi_reduction <maximumf>, %96, %cst_41 [1] : vector<2x2x256xf32> to vector<2x256xf32>
    %98 = vector.extract_strided_slice %83 {offsets = [0, 14, 0], sizes = [2, 2, 256], strides = [1, 1, 1]} : vector<2x16x256xf32> to vector<2x2x256xf32>
    %cst_42 = arith.constant dense<0xFF800000> : vector<2x256xf32>
    %99 = vector.multi_reduction <maximumf>, %98, %cst_42 [1] : vector<2x2x256xf32> to vector<2x256xf32>
    %100 = tpu.concatenate %85, %87, %89, %91, %93, %95, %97, %99 in 1 : vector<2x256xf32>, vector<2x256xf32>, vector<2x256xf32>, vector<2x256xf32>, vector<2x256xf32>, vector<2x256xf32>, vector<2x256xf32>, vector<2x256xf32> -> vector<2x2048xf32>
    %101 = arith.truncf %100 : vector<2x2048xf32> to vector<2x2048xbf16>
    %c0_43 = arith.constant 0 : index
    %c0_44 = arith.constant 0 : index
    %102 = vector.load %arg6[%c0_43, %c0_44] : memref<2048x1024xi8, #tpu.memory_space<vmem>>, vector<2048x1024xi8>
    %103 = arith.sitofp %102 : vector<2048x1024xi8> to vector<2048x1024xbf16>
    %cst_45 = arith.constant dense<0.000000e+00> : vector<2x1024xf32>
    %104 = tpu.matmul %101, %103, %cst_45 {dimension_numbers = #tpu.dot_dimension_numbers<[1], [0], [0], [1], [0, 0, 1, 1], [], []>} : vector<2x2048xbf16>, vector<2048x1024xbf16>, vector<2x1024xf32> -> vector<2x1024xf32>
    %c0_46 = arith.constant 0 : index
    %c0_47 = arith.constant 0 : index
    %105 = vector.load %arg7[%c0_46, %c0_47] : memref<1x1024xf32, #tpu.memory_space<vmem>>, vector<1x1024xf32>
    %106 = vector.broadcast %105 : vector<1x1024xf32> to vector<2x1024xf32>
    %107 = arith.mulf %104, %106 : vector<2x1024xf32>
    %c0_48 = arith.constant 0 : index
    %c0_49 = arith.constant 0 : index
    %108 = vector.load %arg8[%c0_48, %c0_49] : memref<1x1024xf32, #tpu.memory_space<vmem>>, vector<1x1024xf32>
    %109 = vector.broadcast %108 : vector<1x1024xf32> to vector<2x1024xf32>
    %110 = arith.addf %107, %109 : vector<2x1024xf32>
    %c0_50 = arith.constant 0 : index
    %c0_51 = arith.constant 0 : index
    %111 = vector.load %arg9[%c0_50, %c0_51] : memref<1024x512xi8, #tpu.memory_space<vmem>>, vector<1024x512xi8>
    %112 = arith.sitofp %111 : vector<1024x512xi8> to vector<1024x512xbf16>
    %113 = arith.truncf %110 : vector<2x1024xf32> to vector<2x1024xbf16>
    %cst_52 = arith.constant dense<0.000000e+00> : vector<2x512xf32>
    %114 = tpu.matmul %113, %112, %cst_52 {dimension_numbers = #tpu.dot_dimension_numbers<[1], [0], [0], [1], [0, 0, 1, 1], [], []>} : vector<2x1024xbf16>, vector<1024x512xbf16>, vector<2x512xf32> -> vector<2x512xf32>
    %c0_53 = arith.constant 0 : index
    %c0_54 = arith.constant 0 : index
    %115 = vector.load %arg10[%c0_53, %c0_54] : memref<1x512xf32, #tpu.memory_space<vmem>>, vector<1x512xf32>
    %116 = vector.broadcast %115 : vector<1x512xf32> to vector<2x512xf32>
    %117 = arith.mulf %114, %116 : vector<2x512xf32>
    %c0_55 = arith.constant 0 : index
    %c0_56 = arith.constant 0 : index
    %118 = vector.load %arg11[%c0_55, %c0_56] : memref<1x512xf32, #tpu.memory_space<vmem>>, vector<1x512xf32>
    %119 = vector.broadcast %118 : vector<1x512xf32> to vector<2x512xf32>
    %120 = arith.addf %117, %119 : vector<2x512xf32>
    %121 = arith.truncf %120 : vector<2x512xf32> to vector<2x512xbf16>
    %c0_57 = arith.constant 0 : index
    %c0_58 = arith.constant 0 : index
    %122 = vector.load %arg12[%c0_57, %c0_58] : memref<512x33xbf16, #tpu.memory_space<vmem>>, vector<512x33xbf16>
    %cst_59 = arith.constant dense<0.000000e+00> : vector<2x33xf32>
    %123 = tpu.matmul %121, %122, %cst_59 {dimension_numbers = #tpu.dot_dimension_numbers<[1], [0], [0], [1], [0, 0, 1, 1], [], []>} : vector<2x512xbf16>, vector<512x33xbf16>, vector<2x33xf32> -> vector<2x33xf32>
    %c0_60 = arith.constant 0 : index
    %c0_61 = arith.constant 0 : index
    %124 = vector.load %arg13[%c0_60, %c0_61] : memref<1x33xf32, #tpu.memory_space<vmem>>, vector<1x33xf32>
    %125 = vector.broadcast %124 : vector<1x33xf32> to vector<2x33xf32>
    %126 = arith.addf %123, %125 : vector<2x33xf32>
    %c0_62 = arith.constant 0 : index
    %c0_63 = arith.constant 0 : index
    %127 = vector.load %arg14[%c0_62, %c0_63] : memref<2x33xf32, #tpu.memory_space<vmem>>, vector<2x33xf32>
    tpu.vector_store %arg14[%c0_62, %c0_63], %126 {strides = array<i32>} : memref<2x33xf32, #tpu.memory_space<vmem>>, vector<2x33xf32>,
    return
  }
}

</mosaic_0001>

<bundles_post_ra>
// kernel: timecnn_forward.1
= control target key start
LH: loop header
LB: loop body
LE: loop exit
PB: predicated region body
PF: predicated region fallthrough
CT: control target
= control target key end

     0   :  { %19 = vsyncpa [#allocation3], 0  ;;  %s6999_s0 = inlined_call_operand.vmem [shape: f32[2,20,1], index: 0, kind: input, shape index: {}]   ;;  %s7000_s1 = inlined_call_operand.vmem [shape: f32[2,19,1], index: 1, kind: input, shape index: {}]   ;;  %s7001_s2 = inlined_call_operand.hbm [shape: f32[3,64], index: 2, kind: input, shape index: {}]   ;;  %s7002_s3 = inlined_call_operand.hbm [shape: f32[1,64], index: 3, kind: input, shape index: {}]   ;;  %s7003_s4 = inlined_call_operand.hbm [shape: bf16[3,64,256], index: 4, kind: input, shape index: {}]   ;;  %s7004_s5 = inlined_call_operand.hbm [shape: f32[1,256], index: 5, kind: input, shape index: {}]   ;;  %s7005_s6 = inlined_call_operand.hbm [shape: s8[2048,1024], index: 6, kind: input, shape index: {}]   ;;  %s7006_s7 = inlined_call_operand.hbm [shape: f32[1,1024], index: 7, kind: input, shape index: {}]   ;;  %s7007_s8 = inlined_call_operand.hbm [shape: f32[1,1024], index: 8, kind: input, shape index: {}]   ;;  %s7008_s9 = inlined_call_operand.hbm [shape: s8[1024,512], index: 9, kind: input, shape index: {}]   ;;  %s7009_s10 = inlined_call_operand.hbm [shape: f32[1,512], index: 10, kind: input, shape index: {}]   ;;  %s7010_s11 = inlined_call_operand.hbm [shape: f32[1,512], index: 11, kind: input, shape index: {}]   ;;  %s7011_s12 = inlined_call_operand.vmem [shape: bf16[512,33], index: 12, kind: input, shape index: {}]   ;;  %s7012_s13 = inlined_call_operand.hbm [shape: f32[1,33], index: 13, kind: input, shape index: {}]   ;;  %s7013_s14 = inlined_call_operand.hbm [shape: f32[2,33], index: 14, kind: output, shape index: {}]  }
   0x1   :  { %20 = vsyncpa [#allocation6], 0 }
   0x2   :  { %21 = vsyncpa [#allocation9], 0 }
   0x3   :  { %22 = vsyncpa [#allocation12], 0 }
   0x4   :  { %23 = vsyncpa [#allocation15], 0 }
   0x5   :  { %24 = vsyncpa [#allocation18], 0 }
   0x6   :  { %25 = vsyncpa [#allocation4], 0  ;;  %s5930_s29 = smov [#allocation5]   ;;  %s5931_s15 = smov [#allocation8]  }
   0x7   :  { %s46_s30 = sshll.u32 %s5930_s29, 4  ;;  %s68_s16 = sshll.u32 %s5931_s15, 4  ;;  %s47_s30 = int_to_ptr.vmem [resolvable:$true] %s46_s30  ;;  %s69_s16 = int_to_ptr.vmem [resolvable:$true] %s68_s16 }
   0x8   :  { %s5652_s19 = scalar_lea.hbm %s7002_s3, 16 }
   0x9   :  { %p5653_p0 = scmp.ne.s32.totalorder %s7002_s3, %s5652_s19  ;;  %p5656_p1 = scmp.lt.u32.totalorder %s5652_s19, %s7002_s3 }
   0xb   :  { %p5658_p2 = pnand %p5656_p1, %p5653_p0 }
   0xd   :  { %5661 = shalt.err (!%p5658_p2)
}
   0xe   :  { %s5662_s24 = scalar_lea.vmem %s47_s30, 16  ;;  %s5666_s25 = scalar_lea.vmem %s47_s30, 32 }
   0xf   :  { %p5663_p3 = scmp.ne.s32.totalorder %s47_s30, %s5662_s24  ;;  %p5667_p4 = scmp.lt.s32.totalorder %s47_s30, %s47_s30 }
  0x10   :  { %p5668_p5 = scmp.lt.s32.totalorder %s5666_s25, %s5662_s24 }
  0x12   :  { %p5669_p6 = por %p5668_p5, %p5667_p4 }
  0x14   :  { %p5670_p7 = pnand %p5669_p6, %p5663_p3 }
  0x16   :  { %5673 = shalt.err (!%p5670_p7)
}
  0x17   :  { %49 = dma.hbm_to_vmem [thread:$0]  %s7002_s3, 16, %s47_s30, [#allocation6]  }
  0x18   :  { %s5674_s15 = scalar_lea.hbm %s7004_s5, 32 }
  0x19   :  { %p5675_p8 = scmp.ne.s32.totalorder %s7004_s5, %s5674_s15  ;;  %p5678_p9 = scmp.lt.u32.totalorder %s5674_s15, %s7004_s5 }
  0x1b   :  { %p5680_p10 = pnand %p5678_p9, %p5675_p8 }
  0x1d   :  { %5683 = shalt.err (!%p5680_p10)
}
  0x1e   :  { %s5684_s21 = scalar_lea.vmem %s69_s16, 32  ;;  %p5689_p12 = scmp.lt.s32.totalorder %s69_s16, %s69_s16 }
  0x1f   :  { %p5685_p11 = scmp.ne.s32.totalorder %s69_s16, %s5684_s21  ;;  %p5690_p13 = scmp.lt.s32.totalorder %s5684_s21, %s5684_s21 }
  0x21   :  { %p5691_p0 = por %p5690_p13, %p5689_p12 }
  0x23   :  { %p5692_p1 = pnand %p5691_p0, %p5685_p11 }
  0x25   :  { %5695 = shalt.err (!%p5692_p1)
}
  0x26   :  { %71 = dma.hbm_to_vmem [thread:$0]  %s7004_s5, 32, %s69_s16, [#allocation9]  }
  0x27   :  { %s5932_s22 = smov [#allocation11]   ;;  %s5933_s24 = smov [#allocation14]  }
  0x28   :  { %s90_s23 = sshll.u32 %s5932_s22, 4  ;;  %s109_s25 = sshll.u32 %s5933_s24, 4  ;;  %s91_s23 = int_to_ptr.vmem [resolvable:$true] %s90_s23  ;;  %s6048_s25 = int_to_ptr.vmem [resolvable:$true] %s109_s25 }
  0x29   :  { %s5696_s28 = scalar_lea.hbm %s7006_s7, 128 }
  0x2a   :  { %p5697_p2 = scmp.ne.s32.totalorder %s7006_s7, %s5696_s28  ;;  %p5700_p3 = scmp.lt.u32.totalorder %s5696_s28, %s7006_s7 }
  0x2c   :  { %p5702_p4 = pnand %p5700_p3, %p5697_p2 }
  0x2e   :  { %5705 = shalt.err (!%p5702_p4)
}
  0x2f   :  { %s5706_s5 = scalar_lea.vmem %s91_s23, 128  ;;  %p5711_p6 = scmp.lt.s32.totalorder %s91_s23, %s91_s23 }
  0x30   :  { %p5707_p5 = scmp.ne.s32.totalorder %s91_s23, %s5706_s5  ;;  %p5712_p7 = scmp.lt.s32.totalorder %s5706_s5, %s5706_s5 }
  0x32   :  { %p5713_p8 = por %p5712_p7, %p5711_p6 }
  0x34   :  { %p5714_p9 = pnand %p5713_p8, %p5707_p5 }
  0x36   :  { %5717 = shalt.err (!%p5714_p9)
}
  0x37   :  { %93 = dma.hbm_to_vmem [thread:$0]  %s7006_s7, 128, %s91_s23, [#allocation12]  }
  0x38   :  { %s5718_s3 = scalar_lea.hbm %s7008_s9, 16384 }
  0x39   :  { %p5719_p10 = scmp.ne.s32.totalorder %s7008_s9, %s5718_s3  ;;  %p5722_p11 = scmp.lt.u32.totalorder %s5718_s3, %s7008_s9 }
  0x3b   :  { %p5724_p12 = pnand %p5722_p11, %p5719_p10 }
  0x3d   :  { %5727 = shalt.err (!%p5724_p12)
}
  0x3e   :  { %s5728_s27 = scalar_lea.vmem %s6048_s25, 16384  ;;  %p5733_p0 = scmp.lt.s32.totalorder %s6048_s25, %s6048_s25 }
  0x3f   :  { %p5729_p13 = scmp.ne.s32.totalorder %s6048_s25, %s5728_s27  ;;  %p5734_p1 = scmp.lt.s32.totalorder %s5728_s27, %s5728_s27 }
  0x41   :  { %p5735_p2 = por %p5734_p1, %p5733_p0 }
  0x43   :  { %p5736_p3 = pnand %p5735_p2, %p5729_p13 }
  0x45   :  { %5739 = shalt.err (!%p5736_p3)
}
  0x46   :  { %s5934_s7 = smov 512   ;;  %s5935_s23 = smov 32  }
  0x47   :  { %115 = dma.hbm_to_vmem [thread:$0]  %s7008_s9, 16384, %s6048_s25, [#allocation15], %s5934_s7, %s5934_s7, %s5935_s23  }
  0x48   :  { %s5936_s15 = smov [#allocation17]   ;;  %s5937_s18 = smov [#allocation2]  }
  0x49   :  { %s132_s17 = sshll.u32 %s5936_s15, 4  ;;  %s36_s5 = sshll.u32 %s5937_s18, 4  ;;  %s133_s17 = int_to_ptr.vmem [resolvable:$true] %s132_s17  ;;  %s37_s5 = int_to_ptr.vmem [resolvable:$true] %s36_s5 }
  0x4a   :  { %s5740_s20 = scalar_lea.hbm %s7010_s11, 64 }
  0x4b   :  { %p5741_p4 = scmp.ne.s32.totalorder %s7010_s11, %s5740_s20  ;;  %p5744_p5 = scmp.lt.u32.totalorder %s5740_s20, %s7010_s11 }
  0x4d   :  { %p5746_p6 = pnand %p5744_p5, %p5741_p4 }
  0x4f   :  { %5749 = shalt.err (!%p5746_p6)
}
  0x50   :  { %s5750_s9 = scalar_lea.vmem %s133_s17, 64  ;;  %p5755_p8 = scmp.lt.s32.totalorder %s133_s17, %s133_s17 }
  0x51   :  { %p5751_p7 = scmp.ne.s32.totalorder %s133_s17, %s5750_s9  ;;  %p5756_p9 = scmp.lt.s32.totalorder %s5750_s9, %s5750_s9 }
  0x53   :  { %p5757_p10 = por %p5756_p9, %p5755_p8 }
  0x55   :  { %p5758_p11 = pnand %p5757_p10, %p5751_p7 }
  0x57   :  { %5761 = shalt.err (!%p5758_p11)
}
  0x58   :  { %135 = dma.hbm_to_vmem [thread:$0]  %s7010_s11, 64, %s133_s17, [#allocation18]  }
  0x59   :  { %s5762_s7 = scalar_lea.hbm %s7001_s2, 64 }
  0x5a   :  { %p5763_p12 = scmp.ne.s32.totalorder %s7001_s2, %s5762_s7  ;;  %p5766_p13 = scmp.lt.u32.totalorder %s5762_s7, %s7001_s2 }
  0x5c   :  { %p5768_p0 = pnand %p5766_p13, %p5763_p12 }
  0x5e   :  { %5771 = shalt.err (!%p5768_p0)
}
  0x5f   :  { %s5772_s18 = scalar_lea.vmem %s37_s5, 64  ;;  %p5777_p2 = scmp.lt.s32.totalorder %s37_s5, %s37_s5 }
  0x60   :  { %p5773_p1 = scmp.ne.s32.totalorder %s37_s5, %s5772_s18  ;;  %p5778_p3 = scmp.lt.s32.totalorder %s5772_s18, %s5772_s18 }
  0x62   :  { %p5779_p4 = por %p5778_p3, %p5777_p2 }
  0x64   :  { %p5780_p5 = pnand %p5779_p4, %p5773_p1 }
  0x66   :  { %5783 = shalt.err (!%p5780_p5)
}
  0x67   :  { %39 = dma.hbm_to_vmem [thread:$0]  %s7001_s2, 64, %s37_s5, [#allocation3]  }
  0x68   :  { %s5938_s16 = smov [#allocation7]   ;;  %s5784_s3 = scalar_lea.hbm %s7003_s4, 3072 }
  0x69   :  { %s55_s19 = sshll.u32 %s5938_s16, 4  ;;  %p5785_p6 = scmp.ne.s32.totalorder %s7003_s4, %s5784_s3  ;;  %s56_s19 = int_to_ptr.vmem [resolvable:$true] %s55_s19 }
  0x6a   :  { %p5788_p7 = scmp.lt.u32.totalorder %s5784_s3, %s7003_s4 }
  0x6c   :  { %p5790_p8 = pnand %p5788_p7, %p5785_p6 }
  0x6e   :  { %5793 = shalt.err (!%p5790_p8)
}
  0x6f   :  { %s5794_s24 = scalar_lea.vmem %s56_s19, 3072  ;;  %p5799_p10 = scmp.lt.s32.totalorder %s56_s19, %s56_s19 }
  0x70   :  { %p5795_p9 = scmp.ne.s32.totalorder %s56_s19, %s5794_s24  ;;  %p5800_p11 = scmp.lt.s32.totalorder %s5794_s24, %s5794_s24 }
  0x72   :  { %p5801_p12 = por %p5800_p11, %p5799_p10 }
  0x74   :  { %p5802_p13 = pnand %p5801_p12, %p5795_p9 }
  0x76   :  { %5805 = shalt.err (!%p5802_p13)
}
  0x77   :  { %s5939_s2 = smov 128   ;;  %s5940_s5 = smov 8  }
  0x78   :  { %61 = dma.hbm_to_vmem [thread:$0]  %s7003_s4, 3072, %s56_s19, [#allocation6], %s5939_s2, %s5939_s2, %s5940_s5  }
  0x79   :  { %s5941_s7 = smov [#allocation10]   ;;  %s5806_s15 = scalar_lea.hbm %s7005_s6, 65536 }
  0x7a   :  { %s77_s23 = sshll.u32 %s5941_s7, 4  ;;  %p5807_p0 = scmp.ne.s32.totalorder %s7005_s6, %s5806_s15  ;;  %s78_s23 = int_to_ptr.vmem [resolvable:$true] %s77_s23 }
  0x7b   :  { %p5810_p1 = scmp.lt.u32.totalorder %s5806_s15, %s7005_s6 }
  0x7d   :  { %p5812_p2 = pnand %p5810_p1, %p5807_p0 }
  0x7f   :  { %5815 = shalt.err (!%p5812_p2)
}
  0x80   :  { %s5816_s20 = scalar_lea.vmem %s78_s23, 65536  ;;  %p5821_p4 = scmp.lt.s32.totalorder %s78_s23, %s78_s23 }
  0x81   :  { %p5817_p3 = scmp.ne.s32.totalorder %s78_s23, %s5816_s20  ;;  %p5822_p5 = scmp.lt.s32.totalorder %s5816_s20, %s5816_s20 }
  0x83   :  { %p5823_p6 = por %p5822_p5, %p5821_p4 }
  0x85   :  { %p5824_p7 = pnand %p5823_p6, %p5817_p3 }
  0x87   :  { %5827 = shalt.err (!%p5824_p7)
}
  0x88   :  { %s5942_s4 = smov 1024   ;;  %s5943_s19 = smov 64  }
  0x89   :  { %83 = dma.hbm_to_vmem [thread:$0]  %s7005_s6, 65536, %s78_s23, [#allocation9], %s5942_s4, %s5942_s4, %s5943_s19  }
  0x8a   :  { %s5944_s30 = smov [#allocation13]   ;;  %s5945_s9 = smov [#allocation16]  }
  0x8b   :  { %s100_s22 = sshll.u32 %s5944_s30, 4  ;;  %s122_s25 = sshll.u32 %s5945_s9, 4  ;;  %s101_s22 = int_to_ptr.vmem [resolvable:$true] %s100_s22  ;;  %s123_s25 = int_to_ptr.vmem [resolvable:$true] %s122_s25 }
  0x8c   :  { %s5828_s5 = scalar_lea.hbm %s7007_s8, 128 }
  0x8d   :  { %p5829_p8 = scmp.ne.s32.totalorder %s7007_s8, %s5828_s5  ;;  %p5832_p9 = scmp.lt.u32.totalorder %s5828_s5, %s7007_s8 }
  0x8f   :  { %p5834_p10 = pnand %p5832_p9, %p5829_p8 }
  0x91   :  { %5837 = shalt.err (!%p5834_p10)
}
  0x92   :  { %s5838_s6 = scalar_lea.vmem %s101_s22, 128  ;;  %p5843_p12 = scmp.lt.s32.totalorder %s101_s22, %s101_s22 }
  0x93   :  { %p5839_p11 = scmp.ne.s32.totalorder %s101_s22, %s5838_s6  ;;  %p5844_p13 = scmp.lt.s32.totalorder %s5838_s6, %s5838_s6 }
  0x95   :  { %p5845_p0 = por %p5844_p13, %p5843_p12 }
  0x97   :  { %p5846_p1 = pnand %p5845_p0, %p5839_p11 }
  0x99   :  { %5849 = shalt.err (!%p5846_p1)
}
  0x9a   :  { %103 = dma.hbm_to_vmem [thread:$0]  %s7007_s8, 128, %s101_s22, [#allocation12]  }
  0x9b   :  { %s5850_s11 = scalar_lea.hbm %s7009_s10, 64 }
  0x9c   :  { %p5851_p2 = scmp.ne.s32.totalorder %s7009_s10, %s5850_s11  ;;  %p5854_p3 = scmp.lt.u32.totalorder %s5850_s11, %s7009_s10 }
  0x9e   :  { %p5856_p4 = pnand %p5854_p3, %p5851_p2 }
  0xa0   :  { %5859 = shalt.err (!%p5856_p4)
}
  0xa1   :  { %s5860_s19 = scalar_lea.vmem %s123_s25, 64  ;;  %p5865_p6 = scmp.lt.s32.totalorder %s123_s25, %s123_s25 }
  0xa2   :  { %p5861_p5 = scmp.ne.s32.totalorder %s123_s25, %s5860_s19  ;;  %p5866_p7 = scmp.lt.s32.totalorder %s5860_s19, %s5860_s19 }
  0xa4   :  { %p5867_p8 = por %p5866_p7, %p5865_p6 }
  0xa6   :  { %p5868_p9 = pnand %p5867_p8, %p5861_p5 }
  0xa8   :  { %5871 = shalt.err (!%p5868_p9)
}
  0xa9   :  { %125 = dma.hbm_to_vmem [thread:$0]  %s7009_s10, 64, %s123_s25, [#allocation15]  }
  0xaa   :  { %s5946_s3 = smov [#allocation19]   ;;  %s5872_s24 = scalar_lea.hbm %s7012_s13, 16 }
  0xab   :  { %s144_s30 = sshll.u32 %s5946_s3, 4  ;;  %p5873_p10 = scmp.ne.s32.totalorder %s7012_s13, %s5872_s24  ;;  %s145_s30 = int_to_ptr.vmem [resolvable:$true] %s144_s30 }
  0xac   :  { %p5876_p11 = scmp.lt.u32.totalorder %s5872_s24, %s7012_s13 }
  0xae   :  { %p5878_p12 = pnand %p5876_p11, %p5873_p10 }
  0xb0   :  { %5881 = shalt.err (!%p5878_p12)
}
  0xb1   :  { %s5882_s7 = scalar_lea.vmem %s145_s30, 16  ;;  %s5886_s10 = scalar_lea.vmem %s145_s30, 32 }
  0xb2   :  { %p5883_p13 = scmp.ne.s32.totalorder %s145_s30, %s5882_s7  ;;  %p5887_p0 = scmp.lt.s32.totalorder %s145_s30, %s145_s30 }
  0xb3   :  { %p5888_p1 = scmp.lt.s32.totalorder %s5886_s10, %s5882_s7 }
  0xb5   :  { %p5889_p2 = por %p5888_p1, %p5887_p0 }
  0xb7   :  { %p5890_p3 = pnand %p5889_p2, %p5883_p13 }
  0xb9   :  { %5893 = shalt.err (!%p5890_p3)
}
  0xba   :  { %147 = dma.hbm_to_vmem [thread:$0]  %s7012_s13, 16, %s145_s30, [#allocation18]  }
  0xbb   :  { %5916 = dma.done.wait [#allocation3], 64  }
  0xbc   :  { %5917 = vsyncadd [#allocation3], 4294967232 }
  0xbd   :  { %5918 = dma.done.wait [#allocation6], 3088  }
  0xbe   :  { %5919 = vsyncadd [#allocation6], 4294964208 }
  0xbf   :  { %5920 = dma.done.wait [#allocation9], 65568  }
  0xc0   :  { %5921 = vsyncadd [#allocation9], 4294901728 }
  0xc1   :  { %5922 = dma.done.wait [#allocation12], 256  }
  0xc2   :  { %5923 = vsyncadd [#allocation12], 4294967040 }
  0xc3   :  { %5924 = dma.done.wait [#allocation15], 16448  }
  0xc4   :  { %5925 = vsyncadd [#allocation15], 4294950848 }
  0xc5   :  { %5926 = dma.done.wait [#allocation18], 80  }
  0xc6   :  { %5927 = vsyncadd [#allocation18], 4294967216  ;;  %v5947_v0 = vmov 0   ;;  %v187_v1 = vld [vmem:[%s6999_s0 + $0x10] sm:$0x3]  ;;  %v185_v2 = vld [vmem:[%s6999_s0] sm:$0xff] }
  0xc7   :  { %5581 = vset.pattern.permute.xlu1 %v5947_v0  ;;  %5580 = vset.pattern.permute.xlu0 %v5947_v0  ;;  %v203_v3 = vld [vmem:[%s7000_s1] sm:$0xff]  ;;  %v186_v4 = vld [vmem:[%s6999_s0 + $0x8] sm:$0xff]  ;;  %v205_v5 = vld [vmem:[%s7000_s1 + $0x10] sm:$0x3]  ;;  %vm506_vm0 = vcmask 1046528   ;;  %vm597_vm1 = vcmask 523264  }
  0xc8   :  { %636 = vmatprep.mubr.bf16.mxu0 %v5947_v0  ;;  %227 = vperm.xlu1 %5581, %v187_v1   ;;  %v204_v6 = vld [vmem:[%s7000_s1 + $0x8] sm:$0xff]  ;;  %v193_v10 = vld [vmem:[%s6999_s0 + $0x11] sm:$0x3]  ;;  %v188_v15 = vld [vmem:[%s6999_s0 + $0x18] sm:$0xff]  ;;  %vm523_vm2 = vcmask 1045504   ;;  %vm900_vm3 = vcmask 1041408  }
  0xc9   :  { %217 = vperm.xlu0 %5580, %v185_v2   ;;  %v192_v7 = vld [vmem:[%s6999_s0 + $0x9] sm:$0xff]  ;;  %v191_v8 = vld [vmem:[%s6999_s0 + $0x1] sm:$0xff]  ;;  %v211_v11 = vld [vmem:[%s7000_s1 + $0x11] sm:$0x3]  ;;  %vm929_vm4 = vcmask 1043458   ;;  %vm958_vm5 = vcmask 1045508  }
  0xca   :  { %v209_v9 = vld [vmem:[%s7000_s1 + $0x1] sm:$0xff]  ;;  %v210_v12 = vld [vmem:[%s7000_s1 + $0x9] sm:$0xff]  ;;  %v199_v16 = vld [vmem:[%s6999_s0 + $0x12] sm:$0x3]  ;;  %vm987_vm6 = vcmask 1047558   ;;  %vm1132_vm7 = vcmask 1041409  }
  0xcb   :  { %v198_v13 = vld [vmem:[%s6999_s0 + $0xa] sm:$0xff]  ;;  %v197_v14 = vld [vmem:[%s6999_s0 + $0x2] sm:$0xff]  ;;  %v206_v23 = vld [vmem:[%s7000_s1 + $0x18] sm:$0xff]  ;;  %s5948_s4 = smov [#allocation20]   ;;  %vm5276_vm8 = vcmask 263168  }
  0xcc   :  { %257 = vperm.xlu1 %5581, %v203_v3   ;;  %v5582_v17 = vld [vmem:[#allocation7 + $0x44] ss:$8 sps:$4 sm:$0xff]   ;;  %v190_v18 = vld [vmem:[%s6999_s0 + $0x28] sm:$0x3]  ;;  %v189_v19 = vld [vmem:[%s6999_s0 + $0x20] sm:$0xff]  ;;  %s5284_s19 = sshll.u32 %s5948_s4, 4  ;;  %s5285_s19 = int_to_ptr.vmem [resolvable:$true] %s5284_s19 }
  0xcd   :  { %222 = vperm.xlu0 %5580, %v186_v4   ;;  %v5584_v20 = vld [vmem:[#allocation7 + $0x40] ss:$8 sps:$4 sm:$0xff]   ;;  %604 = vmatprep.subr.bf16.mxu0 %v5582_v17  ;;  %v5585_v21 = vld [vmem:[#allocation7 + $0x54] ss:$8 sps:$4 sm:$0xff]   ;;  %v5587_v24 = vld [vmem:[#allocation7 + $0x50] ss:$8 sps:$4 sm:$0xff]   ;;  %p5899_p5 = scmp.lt.s32.totalorder %s5285_s19, %s5285_s19 }
  0xce   :  { %605 = vmatpush1.bf16.msra.mxu0 %v5584_v20  ;;  %v207_v22 = vld [vmem:[%s7000_s1 + $0x20] sm:$0xff]  ;;  %v5588_v25 = vld [vmem:[#allocation7 + $0x64] ss:$8 sps:$4 sm:$0xff]   ;;  %v208_v28 = vld [vmem:[%s7000_s1 + $0x28] sm:$0x3] }
  0xcf   :  { %606 = vmatprep.subr.bf16.mxu0 %v5585_v21  ;;  %v194_v26 = vld [vmem:[%s6999_s0 + $0x19] sm:$0xff]  ;;  %v5590_v27 = vld [vmem:[#allocation7 + $0x60] ss:$8 sps:$4 sm:$0xff]   ;;  %v202_v37 = vld [vmem:[%s6999_s0 + $0x2a] sm:$0x3] }
  0xd0   :  { %267 = vperm.xlu1 %5581, %v205_v5   ;;  %v5591_v29 = vld [vmem:[#allocation7 + $0x74] ss:$8 sps:$4 sm:$0xff]   ;;  %v196_v30 = vld [vmem:[%s6999_s0 + $0x29] sm:$0x3]  ;;  %v5593_v32 = vld [vmem:[#allocation7 + $0x70] ss:$8 sps:$4 sm:$0xff]  }
  0xd1   :  { %262 = vperm.xlu0 %5580, %v204_v6   ;;  %v195_v31 = vld [vmem:[%s6999_s0 + $0x21] sm:$0xff]  ;;  %v212_v34 = vld [vmem:[%s7000_s1 + $0x19] sm:$0xff]  ;;  %v214_v36 = vld [vmem:[%s7000_s1 + $0x29] sm:$0x3] }
  0xd2   :  { %607 = vmatpush1.bf16.msra.mxu0 %v5587_v24  ;;  %v213_v33 = vld [vmem:[%s7000_s1 + $0x21] sm:$0xff]  ;;  %v5596_v39 = vld [vmem:[#allocation7 + $0x4] ss:$8 sps:$4 sm:$0xff]  }
  0xd3   :  { %608 = vmatprep.subr.bf16.mxu0 %v5588_v25  ;;  %v200_v35 = vld [vmem:[%s6999_s0 + $0x1a] sm:$0xff]  ;;  %v201_v38 = vld [vmem:[%s6999_s0 + $0x22] sm:$0xff]  ;;  %v1210_v40 = vld [vmem:[#allocation10 + $0x8] sm:$0xff] }
  0xd4   :  { %308 = vperm.xlu1 %5581, %v192_v7   ;;  %v1209_v41 = vld [vmem:[#allocation10] sm:$0xff]  ;;  %v1722_v42 = vunpack.c.l.s8.bf16 %v1210_v40  ;;  %v1730_v43 = vunpack.c.h.s8.bf16 %v1210_v40  ;;  %v1218_v45 = vld [vmem:[#allocation10 + $0x48] sm:$0xff] }
  0xd5   :  { %303 = vperm.xlu0 %5580, %v191_v8   ;;  %v1721_v44 = vunpack.c.l.s8.bf16 %v1209_v41  ;;  %v1729_v46 = vunpack.c.h.s8.bf16 %v1209_v41  ;;  %v1738_v47 = vunpack.c.l.s8.bf16 %v1218_v45  ;;  %v1217_v48 = vld [vmem:[#allocation10 + $0x40] sm:$0xff]  ;;  %v1746_v50 = vunpack.c.h.s8.bf16 %v1218_v45  ;;  %v1226_v51 = vld [vmem:[#allocation10 + $0x88] sm:$0xff] }
  0xd6   :  { %609 = vmatpush1.bf16.msra.mxu0 %v5590_v27  ;;  %2745 = vmatprep.subr.bf16.mxu1 %v1722_v42  ;;  %v1737_v49 = vunpack.c.l.s8.bf16 %v1217_v48  ;;  %v1745_v52 = vunpack.c.h.s8.bf16 %v1217_v48  ;;  %v1754_v53 = vunpack.c.l.s8.bf16 %v1226_v51  ;;  %v1225_v54 = vld [vmem:[#allocation10 + $0x80] sm:$0xff]  ;;  %v1762_v56 = vunpack.c.h.s8.bf16 %v1226_v51  ;;  %v1234_v57 = vld [vmem:[#allocation10 + $0xc8] sm:$0xff] }
  0xd7   :  { %610 = vmatprep.subr.bf16.mxu0 %v5591_v29  ;;  %2746 = vmatpush1.bf16.msra.mxu1 %v1721_v44  ;;  %v1753_v55 = vunpack.c.l.s8.bf16 %v1225_v54  ;;  %v1761_v58 = vunpack.c.h.s8.bf16 %v1225_v54  ;;  %v1770_v59 = vunpack.c.l.s8.bf16 %v1234_v57  ;;  %v1233_v60 = vld [vmem:[#allocation10 + $0xc0] sm:$0xff]  ;;  %v1778_v1 = vunpack.c.h.s8.bf16 %v1234_v57  ;;  %v6256_v2 = vld [vmem:[#allocation10 + $0x108] sm:$0xff] }
  0xd8   :  { %367 = vperm.xlu1 %5581, %v209_v9   ;;  %2747 = vmatprep.subr.bf16.mxu1 %v1730_v43  ;;  %v1769_v63 = vunpack.c.l.s8.bf16 %v1233_v60  ;;  %v1777_v5 = vunpack.c.h.s8.bf16 %v1233_v60  ;;  %v1786_v6 = vunpack.c.l.s8.bf16 %v6256_v2  ;;  %v6259_v7 = vld [vmem:[#allocation10 + $0x100] sm:$0xff] }
  0xd9   :  { %313 = vperm.xlu0 %5580, %v193_v10   ;;  %v1785_v10 = vunpack.c.l.s8.bf16 %v6259_v7 }
  0xda   :  { %611 = vmatpush1.bf16.msra.mxu0 %v5593_v32 }
  0xdb   :  { %703 = vmatprep.subr.bf16.mxu0 %v5596_v39  ;;  %2748 = vmatpush1.bf16.msra.mxu1 %v1729_v46 }
  0xdc   :  { %377 = vperm.xlu1 %5581, %v211_v11   ;;  %2749 = vmatprep.subr.bf16.mxu1 %v1738_v47  ;;  %v6262_v11 = vld [vmem:[#allocation2 + $0x1] ss:$0 sm:$0xff] }
  0xdd   :  { %372 = vperm.xlu0 %5580, %v210_v12  }
  0xdf   :  { %2750 = vmatpush1.bf16.msra.mxu1 %v1737_v49 }
  0xe0   :  { %432 = vperm.xlu1 %5581, %v198_v13   ;;  %2751 = vmatprep.subr.bf16.mxu1 %v1746_v50 }
  0xe1   :  { %427 = vperm.xlu0 %5580, %v197_v14   ;;  %v6264_v14 = vld [vmem:[#allocation2] ss:$0 sm:$0xff] }
  0xe3   :  { %2752 = vmatpush1.bf16.msra.mxu1 %v1745_v52 }
  0xe4   :  { %232 = vperm.xlu1 %5581, %v188_v15   ;;  %2753 = vmatprep.subr.bf16.mxu1 %v1754_v53 }
  0xe5   :  { %437 = vperm.xlu0 %5580, %v199_v16   ;;  %v6267_v16 = vld [vmem:[#allocation2 + $0x2] ss:$0 sm:$0xff] }
  0xe7   :  { %2754 = vmatpush1.bf16.msra.mxu1 %v1753_v55 }
  0xe8   :  { %242 = vperm.xlu1 %5581, %v190_v18   ;;  %2755 = vmatprep.subr.bf16.mxu1 %v1762_v56 }
  0xe9   :  { %237 = vperm.xlu0 %5580, %v189_v19  }
  0xeb   :  { %2756 = vmatpush1.bf16.msra.mxu1 %v1761_v58 }
  0xec   :  { %277 = vperm.xlu1 %5581, %v207_v22   ;;  %2757 = vmatprep.subr.bf16.mxu1 %v1770_v59 }
  0xed   :  { %272 = vperm.xlu0 %5580, %v206_v23  }
  0xef   :  { %2758 = vmatpush1.bf16.msra.mxu1 %v1769_v63 }
  0xf0   :  { %318 = vperm.xlu1 %5581, %v194_v26   ;;  %2759 = vmatprep.subr.bf16.mxu1 %v1778_v1 }
  0xf1   :  { %282 = vperm.xlu0 %5580, %v208_v28  }
  0xf3   :  { %2760 = vmatpush1.bf16.msra.mxu1 %v1777_v5 }
  0xf4   :  { %328 = vperm.xlu1 %5581, %v196_v30   ;;  %2761 = vmatprep.subr.bf16.mxu1 %v1786_v6 }
  0xf5   :  { %323 = vperm.xlu0 %5580, %v195_v31  }
  0xf7   :  { %2762 = vmatpush1.bf16.msra.mxu1 %v1785_v10 }
  0xf8   :  { %387 = vperm.xlu1 %5581, %v213_v33  }
  0xf9   :  { %382 = vperm.xlu0 %5580, %v212_v34  }
  0xfc   :  { %442 = vperm.xlu1 %5581, %v200_v35  }
  0xfd   :  { %392 = vperm.xlu0 %5580, %v214_v36  }
 0x100   :  { %452 = vperm.xlu1 %5581, %v202_v37  }
 0x101   :  { %447 = vperm.xlu0 %5580, %v201_v38  }
 0x147   :  { %v228_v61 = vpop.permute.xlu1 %227 }
 0x148   :  { %v218_v62 = vpop.permute.xlu0 %217  ;;  %v251_v23 = vmul.f32 %v6264_v14, %v228_v61 }
 0x149   :  { %v249_v20 = vmul.f32 %v6264_v14, %v218_v62 }
 0x14b   :  { %v258_v3 = vpop.permute.xlu1 %257 }
 0x14c   :  { %v223_v4 = vpop.permute.xlu0 %222  ;;  %v289_v15 = vmul.f32 %v6262_v11, %v258_v3  ;;  %v347_v24 = vmul.f32 %v6264_v14, %v258_v3 }
 0x14d   :  { %v250_v27 = vmul.f32 %v6264_v14, %v223_v4  ;;  %v6294_v4 = vld [vmem:[#allocation5] ss:$0 sm:$0xff] }
 0x14e   :  { %v295_v26 = vadd.f32 %v289_v15, %v249_v20 }
 0x14f   :  { %v268_v8 = vpop.permute.xlu1 %267 }
 0x150   :  { %v263_v9 = vpop.permute.xlu0 %262  ;;  %v291_v36 = vmul.f32 %v6262_v11, %v268_v8  ;;  %v349_v40 = vmul.f32 %v6264_v14, %v268_v8 }
 0x151   :  { %v290_v21 = vmul.f32 %v6262_v11, %v263_v9  ;;  %v348_v28 = vmul.f32 %v6264_v14, %v263_v9 }
 0x152   :  { %v297_v58 = vadd.f32 %v291_v36, %v251_v23 }
 0x153   :  { %v309_v12 = vpop.permute.xlu1 %308  ;;  %v296_v37 = vadd.f32 %v290_v21, %v250_v27 }
 0x154   :  { %v304_v13 = vpop.permute.xlu0 %303  ;;  %v354_v22 = vmul.f32 %v6262_v11, %v309_v12  ;;  %v336_v29 = vmul.f32 %v6267_v16, %v309_v12  ;;  %v408_v45 = vmul.f32 %v6264_v14, %v309_v12 }
 0x155   :  { %v353_v17 = vmul.f32 %v6262_v11, %v304_v13  ;;  %v335_v30 = vmul.f32 %v6267_v16, %v304_v13  ;;  %v407_v41 = vmul.f32 %v6264_v14, %v304_v13 }
 0x156   :  { %v360_v38 = vadd.f32 %v354_v22, %v348_v28  ;;  %v342_v44 = vadd.f32 %v336_v29, %v296_v37 }
 0x157   :  { %v368_v18 = vpop.permute.xlu1 %367  ;;  %v359_v31 = vadd.f32 %v353_v17, %v347_v24  ;;  %v341_v48 = vadd.f32 %v335_v30, %v295_v26 }
 0x158   :  { %v314_v19 = vpop.permute.xlu0 %313  ;;  %v395_v25 = vmul.f32 %v6267_v16, %v368_v18  ;;  %v413_v32 = vmul.f32 %v6262_v11, %v368_v18 }
 0x159   :  { %v355_v33 = vmul.f32 %v6262_v11, %v314_v19  ;;  %v337_v50 = vmul.f32 %v6267_v16, %v314_v19  ;;  %v409_v60 = vmul.f32 %v6264_v14, %v314_v19 }
 0x15a   :  { %v401_v42 = vadd.f32 %v395_v25, %v359_v31  ;;  %v419_v49 = vadd.f32 %v413_v32, %v407_v41 }
 0x15b   :  { %v378_v34 = vpop.permute.xlu1 %377  ;;  %v361_v51 = vadd.f32 %v355_v33, %v349_v40  ;;  %v343_v3 = vadd.f32 %v337_v50, %v297_v58  ;;  %v5599_v40 = vld [vmem:[#allocation7 + $0x14] ss:$8 sps:$4 sm:$0xff]  }
 0x15c   :  { %v373_v35 = vpop.permute.xlu0 %372  ;;  %v397_v46 = vmul.f32 %v6267_v16, %v378_v34  ;;  %v415_v54 = vmul.f32 %v6262_v11, %v378_v34  ;;  %v467_v59 = vmax.f32 %v341_v48, %v401_v42 }
 0x15d   :  { %v396_v39 = vmul.f32 %v6267_v16, %v373_v35  ;;  %v414_v43 = vmul.f32 %v6262_v11, %v373_v35  ;;  %v5594_v35 = vld [vmem:[#allocation7] ss:$8 sps:$4 sm:$0xff]  }
 0x15e   :  { %v403_v61 = vadd.f32 %v397_v46, %v361_v51  ;;  %v421_v8 = vadd.f32 %v415_v54, %v409_v60  ;;  %v5597_v46 = vld [vmem:[#allocation7 + $0x10] ss:$8 sps:$4 sm:$0xff]  }
 0x15f   :  { %v402_v47 = vadd.f32 %v396_v39, %v360_v38  ;;  %v433_v52 = vpop.permute.xlu1 %432  ;;  %v420_v55 = vadd.f32 %v414_v43, %v408_v45 }
 0x160   :  { %v428_v53 = vpop.permute.xlu0 %427  ;;  %v456_v56 = vmul.f32 %v6267_v16, %v433_v52  ;;  %v469_v13 = vmax.f32 %v343_v3, %v403_v61 }
 0x161   :  { %v455_v57 = vmul.f32 %v6267_v16, %v428_v53  ;;  %v468_v62 = vmax.f32 %v342_v44, %v402_v47  ;;  %v5602_v53 = vld [vmem:[#allocation7 + $0x24] ss:$8 sps:$4 sm:$0xff]  }
 0x162   :  { %v462_v63 = vadd.f32 %v456_v56, %v420_v55 }
 0x163   :  { %v461_v1 = vadd.f32 %v455_v57, %v419_v49  ;;  %v233_v5 = vpop.permute.xlu1 %232 }
 0x164   :  { %v438_v6 = vpop.permute.xlu0 %437  ;;  %v474_v9 = vmax.f32 %v468_v62, %v462_v63  ;;  %v252_v42 = vmul.f32 %v6264_v14, %v233_v5  ;;  %v5600_v5 = vld [vmem:[#allocation7 + $0x20] ss:$8 sps:$4 sm:$0xff]  }
 0x165   :  { %v473_v10 = vmax.f32 %v467_v59, %v461_v1  ;;  %v457_v12 = vmul.f32 %v6267_v16, %v438_v6 }
 0x166   :  { %v487_v15 = vadd.f32 %v6294_v4, %v474_v9 }
 0x167   :  { %v486_v17 = vadd.f32 %v6294_v4, %v473_v10  ;;  %v463_v18 = vadd.f32 %v457_v12, %v421_v8  ;;  %v243_v19 = vpop.permute.xlu1 %242 }
 0x168   :  { %v238_v20 = vpop.permute.xlu0 %237  ;;  %v6299_v22 = vmax.f32 %v487_v15, 0.0  ;;  %v254_v47 = vmul.f32 %v6264_v14, %v243_v19  ;;  %v5605_v15 = vld [vmem:[#allocation7 + $0x34] ss:$8 sps:$4 sm:$0xff]  }
 0x169   :  { %v475_v21 = vmax.f32 %v469_v13, %v463_v18  ;;  %v6301_v23 = vmax.f32 %v486_v17, 0.0  ;;  %v253_v48 = vmul.f32 %v6264_v14, %v238_v20 }
 0x16a   :  { %v508_v28 = vrot.slane %v6299_v22, 1 }
 0x16b   :  { %v6304_v24 = vadd.f32 %v6294_v4, %v475_v21  ;;  %v278_v25 = vpop.permute.xlu1 %277  ;;  %v507_v29 = vrot.slane %v6301_v23, 1 }
 0x16c   :  { %v273_v26 = vpop.permute.xlu0 %272  ;;  %v293_v43 = vmul.f32 %v6262_v11, %v278_v25  ;;  %v351_v59 = vmul.f32 %v6264_v14, %v278_v25 }
 0x16d   :  { %v494_v27 = vmax.f32 %v6304_v24, 0.0  ;;  %v509_v34 = vsel %vm506_vm0, %v507_v29, %v508_v28  ;;  %v292_v36 = vmul.f32 %v6262_v11, %v273_v26  ;;  %v350_v44 = vmul.f32 %v6264_v14, %v273_v26 }
 0x16e   :  { %v299_v58 = vadd.f32 %v293_v43, %v253_v48 }
 0x16f   :  { %v510_v30 = vrot.slane %v494_v27, 1  ;;  %v319_v31 = vpop.permute.xlu1 %318  ;;  %v298_v49 = vadd.f32 %v292_v36, %v252_v42 }
 0x170   :  { %v283_v32 = vpop.permute.xlu0 %282  ;;  %v356_v41 = vmul.f32 %v6262_v11, %v319_v31  ;;  %v338_v45 = vmul.f32 %v6267_v16, %v319_v31  ;;  %v410_v63 = vmul.f32 %v6264_v14, %v319_v31 }
 0x171   :  { %v511_v33 = vsel %vm506_vm0, %v508_v28, %v510_v30  ;;  %v294_v60 = vmul.f32 %v6262_v11, %v283_v32  ;;  %v352_v1 = vmul.f32 %v6264_v14, %v283_v32 }
 0x172   :  { %v521_v39 = vpack.c.bf16 %v511_v33, %v509_v34  ;;  %v362_v54 = vadd.f32 %v356_v41, %v350_v44  ;;  %v344_v62 = vadd.f32 %v338_v45, %v298_v49  ;;  %v5603_v33 = vld [vmem:[#allocation7 + $0x30] ss:$8 sps:$4 sm:$0xff]   ;;  %v5608_v41 = vld [vmem:[#allocation7 + $0x84] ss:$8 sps:$4 sm:$0xff]  }
 0x173   :  { %v329_v37 = vpop.permute.xlu1 %328  ;;  %v300_v21 = vadd.f32 %v294_v60, %v254_v47  ;;  %v498_v60 = vpack.c.bf16 %v6299_v22, %v6301_v23 }
 0x174   :  { %v324_v38 = vpop.permute.xlu0 %323  ;;  %5310 = vmatmul.mubr.msk.bf16.vlgmr.msra.gmra.mrb[0].mxu0 %vm597_vm1, %v521_v39  ;;  %v358_v55 = vmul.f32 %v6262_v11, %v329_v37  ;;  %v340_v6 = vmul.f32 %v6267_v16, %v329_v37  ;;  %v412_v29 = vmul.f32 %v6264_v14, %v329_v37 }
 0x175   :  { %704 = vmatpush1.bf16.msra.mxu0 %v5594_v35  ;;  %646 = vmatprep.mubr.bf16.mxu0 %v5947_v0  ;;  %v357_v50 = vmul.f32 %v6262_v11, %v324_v38  ;;  %v339_v8 = vmul.f32 %v6267_v16, %v324_v38  ;;  %v411_v25 = vmul.f32 %v6264_v14, %v324_v38 }
 0x176   :  { %705 = vmatprep.subr.bf16.mxu0 %v5599_v40  ;;  %v364_v17 = vadd.f32 %v358_v55, %v352_v1  ;;  %v346_v34 = vadd.f32 %v340_v6, %v300_v21  ;;  %v1212_v6 = vld [vmem:[#allocation10 + $0x18] sm:$0xff] }
 0x177   :  { %v388_v51 = vpop.permute.xlu1 %387  ;;  %v363_v9 = vadd.f32 %v357_v50, %v351_v59  ;;  %v345_v35 = vadd.f32 %v339_v8, %v299_v58  ;;  %v5606_v59 = vld [vmem:[#allocation7 + $0x80] ss:$8 sps:$4 sm:$0xff]   ;;  %v525_v8 = vrot.slane %v6299_v22, 2 }
 0x178   :  { %v383_v52 = vpop.permute.xlu0 %382  ;;  %v399_v61 = vmul.f32 %v6267_v16, %v388_v51  ;;  %v417_v10 = vmul.f32 %v6262_v11, %v388_v51 }
 0x179   :  { %v398_v56 = vmul.f32 %v6267_v16, %v383_v52  ;;  %v416_v57 = vmul.f32 %v6262_v11, %v383_v52  ;;  %706 = vmatpush1.bf16.msra.mxu0 %v5597_v46 }
 0x17a   :  { %707 = vmatprep.subr.bf16.mxu0 %v5602_v53  ;;  %v405_v26 = vadd.f32 %v399_v61, %v363_v9  ;;  %v423_v36 = vadd.f32 %v417_v10, %v411_v25  ;;  %v5611_v61 = vld [vmem:[#allocation7 + $0x94] ss:$8 sps:$4 sm:$0xff]   ;;  %v524_v9 = vrot.slane %v6301_v23, 2  ;;  %v5615_v10 = vld [vmem:[#allocation7 + $0xb0] ss:$8 sps:$4 sm:$0xff]  }
 0x17b   :  { %v404_v3 = vadd.f32 %v398_v56, %v362_v54  ;;  %v443_v12 = vpop.permute.xlu1 %442  ;;  %v422_v18 = vadd.f32 %v416_v57, %v410_v63  ;;  %v5612_v63 = vld [vmem:[#allocation7 + $0xa0] ss:$8 sps:$4 sm:$0xff]  }
 0x17c   :  { %v393_v13 = vpop.permute.xlu0 %392  ;;  %v458_v19 = vmul.f32 %v6267_v16, %v443_v12  ;;  %v471_v44 = vmax.f32 %v345_v35, %v405_v26  ;;  %v1724_v12 = vunpack.c.l.s8.bf16 %v1212_v6  ;;  %v526_v24 = vsel %vm523_vm2, %v524_v9, %v525_v8  ;;  %v1220_v23 = vld [vmem:[#allocation10 + $0x58] sm:$0xff]  ;;  %v1219_v26 = vld [vmem:[#allocation10 + $0x50] sm:$0xff] }
 0x17d   :  { %v400_v20 = vmul.f32 %v6267_v16, %v393_v13  ;;  %v418_v28 = vmul.f32 %v6262_v11, %v393_v13  ;;  %v470_v30 = vmax.f32 %v344_v62, %v404_v3  ;;  %708 = vmatpush1.bf16.msra.mxu0 %v5600_v5  ;;  %v5614_v62 = vld [vmem:[#allocation7 + $0xa4] ss:$8 sps:$4 sm:$0xff]   ;;  %v5617_v3 = vld [vmem:[#allocation7 + $0xb4] ss:$8 sps:$4 sm:$0xff]   ;;  %v527_v5 = vrot.slane %v494_v27, 2 }
 0x17e   :  { %v464_v31 = vadd.f32 %v458_v19, %v422_v18  ;;  %709 = vmatprep.subr.bf16.mxu0 %v5605_v15  ;;  %v1211_v13 = vld [vmem:[#allocation10 + $0x10] sm:$0xff]  ;;  %v1732_v18 = vunpack.c.h.s8.bf16 %v1212_v6  ;;  %v1740_v25 = vunpack.c.l.s8.bf16 %v1220_v23 }
 0x17f   :  { %v406_v32 = vadd.f32 %v400_v20, %v364_v17  ;;  %v453_v39 = vpop.permute.xlu1 %452  ;;  %v424_v43 = vadd.f32 %v418_v28, %v412_v29  ;;  %v528_v15 = vsel %vm523_vm2, %v525_v8, %v527_v5  ;;  %v1723_v27 = vunpack.c.l.s8.bf16 %v1211_v13  ;;  %v1227_v35 = vld [vmem:[#allocation10 + $0x90] sm:$0xff] }
 0x180   :  { %v448_v40 = vpop.permute.xlu0 %447  ;;  %v476_v42 = vmax.f32 %v470_v30, %v464_v31  ;;  %v460_v38 = vmul.f32 %v6267_v16, %v453_v39  ;;  %v538_v17 = vpack.c.bf16 %v528_v15, %v526_v24  ;;  %v1731_v21 = vunpack.c.h.s8.bf16 %v1211_v13  ;;  %v1268_v13 = vld [vmem:[#allocation10 + $0x1d8] sm:$0xff] }
 0x181   :  { %v459_v11 = vmul.f32 %v6267_v16, %v448_v40  ;;  %v472_v37 = vmax.f32 %v346_v34, %v406_v32  ;;  %710 = vmatpush1.bf16.msra.mxu0 %v5603_v33  ;;  %v1739_v30 = vunpack.c.l.s8.bf16 %v1219_v26  ;;  %v1748_v32 = vunpack.c.h.s8.bf16 %v1220_v23  ;;  %v1228_v33 = vld [vmem:[#allocation10 + $0x98] sm:$0xff] }
 0x182   :  { %v489_v14 = vadd.f32 %v6294_v4, %v476_v42  ;;  %v466_v45 = vadd.f32 %v460_v38, %v424_v43  ;;  %811 = vmatprep.subr.bf16.mxu0 %v5608_v41  ;;  %v1747_v34 = vunpack.c.h.s8.bf16 %v1219_v26  ;;  %v1764_v39 = vunpack.c.h.s8.bf16 %v1228_v33  ;;  %v1236_v40 = vld [vmem:[#allocation10 + $0xd8] sm:$0xff]  ;;  %v1235_v43 = vld [vmem:[#allocation10 + $0xd0] sm:$0xff] }
 0x183   :  { %v465_v46 = vadd.f32 %v459_v11, %v423_v36  ;;  %v1755_v36 = vunpack.c.l.s8.bf16 %v1227_v35  ;;  %v1763_v41 = vunpack.c.h.s8.bf16 %v1227_v35  ;;  %v1772_v42 = vunpack.c.l.s8.bf16 %v1236_v40  ;;  %v6370_v26 = vld [vmem:[#allocation10 + $0x218] sm:$0xff] }
 0x184   :  { %v478_v47 = vmax.f32 %v472_v37, %v466_v45  ;;  %v495_v49 = vmax.f32 %v489_v14, 0.0  ;;  %v1771_v38 = vunpack.c.l.s8.bf16 %v1235_v43  ;;  %v1780_v11 = vunpack.c.h.s8.bf16 %v1236_v40  ;;  %v1243_v45 = vld [vmem:[#allocation10 + $0x110] sm:$0xff] }
 0x185   :  { %v477_v48 = vmax.f32 %v471_v44, %v465_v46  ;;  %v1244_v44 = vld [vmem:[#allocation10 + $0x118] sm:$0xff]  ;;  %v1779_v14 = vunpack.c.h.s8.bf16 %v1235_v43  ;;  %v1787_v46 = vunpack.c.l.s8.bf16 %v1243_v45  ;;  %v1836_v24 = vunpack.c.l.s8.bf16 %v1268_v13 }
 0x186   :  { %v491_v50 = vadd.f32 %v6294_v4, %v478_v47  ;;  %v512_v54 = vrot.slane %v495_v49, 1  ;;  %v529_v20 = vrot.slane %v495_v49, 2  ;;  %v1788_v37 = vunpack.c.l.s8.bf16 %v1244_v44 }
 0x187   :  { %v490_v51 = vadd.f32 %v6294_v4, %v477_v48  ;;  %v5609_v4 = vld [vmem:[#allocation7 + $0x90] ss:$8 sps:$4 sm:$0xff]   ;;  %v1794_v47 = vunpack.c.h.s8.bf16 %v6256_v2  ;;  %v1796_v48 = vunpack.c.h.s8.bf16 %v1244_v44  ;;  %v1844_v23 = vunpack.c.h.s8.bf16 %v1268_v13 }
 0x188   :  { %v497_v52 = vmax.f32 %v491_v50, 0.0  ;;  %v1795_v50 = vunpack.c.h.s8.bf16 %v1243_v45 }
 0x189   :  { %v496_v53 = vmax.f32 %v490_v51, 0.0  ;;  %2763 = vmatprep.subr.bf16.mxu1 %v1794_v47  ;;  %v1250_v51 = vld [vmem:[#allocation10 + $0x148] sm:$0xff] }
 0x18a   :  { %v515_v55 = vrot.slane %v497_v52, 1  ;;  %v532_v22 = vrot.slane %v497_v52, 2  ;;  %v1252_v52 = vld [vmem:[#allocation10 + $0x158] sm:$0xff]  ;;  %v1810_v2 = vunpack.c.h.s8.bf16 %v1250_v51 }
 0x18b   :  { %v513_v16 = vrot.slane %v496_v53, 1  ;;  %v499_v1 = vpack.c.bf16 %v496_v53, %v495_v49  ;;  %v530_v19 = vrot.slane %v496_v53, 2  ;;  %v1793_v49 = vunpack.c.h.s8.bf16 %v6259_v7 }
 0x18c   :  { %v1802_v53 = vunpack.c.l.s8.bf16 %v1250_v51  ;;  %v6403_v51 = vld [vmem:[#allocation10 + $0x200] sm:$0xff] }
 0x18d   :  { %v514_v56 = vsel %vm506_vm0, %v512_v54, %v513_v16  ;;  %v516_v57 = vsel %vm506_vm0, %v513_v16, %v515_v55  ;;  %v531_v28 = vsel %vm523_vm2, %v529_v20, %v530_v19  ;;  %v533_v29 = vsel %vm523_vm2, %v530_v19, %v532_v22  ;;  %2764 = vmatpush1.bf16.msra.mxu1 %v1793_v49  ;;  %v1249_v55 = vld [vmem:[#allocation10 + $0x140] sm:$0xff]  ;;  %v1251_v16 = vld [vmem:[#allocation10 + $0x150] sm:$0xff] }
 0x18e   :  { %v522_v58 = vpack.c.bf16 %v516_v57, %v514_v56  ;;  %v539_v31 = vpack.c.bf16 %v533_v29, %v531_v28  ;;  %v1804_v54 = vunpack.c.l.s8.bf16 %v1252_v52  ;;  %v1801_v56 = vunpack.c.l.s8.bf16 %v1249_v55  ;;  %2765 = vmatprep.subr.bf16.mxu1 %v1802_v53 }
 0x18f   :  { %v1803_v57 = vunpack.c.l.s8.bf16 %v1251_v16  ;;  %v1809_v7 = vunpack.c.h.s8.bf16 %v1249_v55  ;;  %v1852_v29 = vunpack.c.l.s8.bf16 %v6370_v26 }
 0x190   :  { %5311 = vmatmul.mubr.msk.bf16.gmra.mrb[4].mxu0 %vm597_vm1, %v522_v58  ;;  %v1812_v58 = vunpack.c.h.s8.bf16 %v1252_v52 }
 0x191   :  { %735 = vmatprep.mubr.bf16.mxu0 %v5947_v0  ;;  %2766 = vmatpush1.bf16.msra.mxu1 %v1801_v56  ;;  %v6419_v56 = vld [vmem:[#allocation10 + $0x248] sm:$0xff] }
 0x192   :  { %2767 = vmatprep.subr.bf16.mxu1 %v1810_v2 }
 0x195   :  { %2768 = vmatpush1.bf16.msra.mxu1 %v1809_v7  ;;  %v6425_v7 = vld [vmem:[#allocation10 + $0x240] sm:$0xff] }
 0x196   :  { %7042 = vst [vmem:[#allocation32_spill] sm:$0xff] %v6425_v7 }
 0x198   :  { %5320 = vmatmul.mubr.msk.bf16.vlgmr.msra.gmra.mrb[0].mxu0 %vm597_vm1, %v498_v60  ;;  %v1258_v60 = vld [vmem:[#allocation10 + $0x188] sm:$0xff] }
 0x199   :  { %812 = vmatpush1.bf16.msra.mxu0 %v5606_v59  ;;  %745 = vmatprep.mubr.bf16.mxu0 %v5947_v0  ;;  %v1811_v59 = vunpack.c.h.s8.bf16 %v1251_v16  ;;  %v1826_v6 = vunpack.c.h.s8.bf16 %v1258_v60  ;;  %v6417_v16 = vld [vmem:[#allocation10 + $0x210] sm:$0xff] }
 0x19a   :  { %813 = vmatprep.subr.bf16.mxu0 %v5611_v61  ;;  %v1260_v61 = vld [vmem:[#allocation10 + $0x198] sm:$0xff] }
 0x19b   :  { %v1828_v8 = vunpack.c.h.s8.bf16 %v1260_v61 }
 0x19d   :  { %814 = vmatpush1.bf16.msra.mxu0 %v5609_v4  ;;  %v1818_v4 = vunpack.c.l.s8.bf16 %v1258_v60 }
 0x19e   :  { %815 = vmatprep.subr.bf16.mxu0 %v5614_v62  ;;  %v1820_v62 = vunpack.c.l.s8.bf16 %v1260_v61 }
 0x19f   :  { %2769 = vmatprep.subr.bf16.mxu1 %v1818_v4 }
 0x1a0   :  { %5321 = vmatmul.mubr.msk.bf16.gmra.mrb[4].mxu0 %vm597_vm1, %v499_v1  ;;  %v1259_v1 = vld [vmem:[#allocation10 + $0x190] sm:$0xff] }
 0x1a1   :  { %816 = vmatpush1.bf16.msra.mxu0 %v5612_v63  ;;  %843 = vmatprep.mubr.bf16.mxu0 %v5947_v0  ;;  %v1257_v63 = vld [vmem:[#allocation10 + $0x180] sm:$0xff]  ;;  %v1819_v5 = vunpack.c.l.s8.bf16 %v1259_v1 }
 0x1a2   :  { %817 = vmatprep.subr.bf16.mxu0 %v5617_v3  ;;  %v1817_v3 = vunpack.c.l.s8.bf16 %v1257_v63  ;;  %v1825_v9 = vunpack.c.h.s8.bf16 %v1257_v63 }
 0x1a4   :  { %2770 = vmatpush1.bf16.msra.mxu1 %v1817_v3 }
 0x1a5   :  { %818 = vmatpush1.bf16.msra.mxu0 %v5615_v10  ;;  %v1827_v10 = vunpack.c.h.s8.bf16 %v1259_v1  ;;  %2771 = vmatprep.subr.bf16.mxu1 %v1826_v6  ;;  %v6436_v6 = vld [vmem:[#allocation10 + $0x288] sm:$0xff] }
 0x1a6   :  { %3073 = vmatprep.subr.bf16.mxu0 %v1724_v12  ;;  %v1266_v12 = vld [vmem:[#allocation10 + $0x1c8] sm:$0xff]  ;;  %7044 = vst [vmem:[#allocation34_spill] sm:$0xff] %v6436_v6 }
 0x1a7   :  { %v1834_v15 = vunpack.c.l.s8.bf16 %v1266_v12  ;;  %v1842_v19 = vunpack.c.h.s8.bf16 %v1266_v12 }
 0x1a8   :  { %5330 = vmatmul.mubr.msk.bf16.vlgmr.msra.gmra.mrb[0].mxu0 %vm597_vm1, %v538_v17  ;;  %2772 = vmatpush1.bf16.msra.mxu1 %v1825_v9  ;;  %v1267_v17 = vld [vmem:[#allocation10 + $0x1d0] sm:$0xff] }
 0x1a9   :  { %853 = vmatprep.mubr.bf16.mxu0 %v5947_v0  ;;  %3074 = vmatpush1.bf16.msra.mxu0 %v1723_v27  ;;  %v1756_v0 = vunpack.c.l.s8.bf16 %v1228_v33  ;;  %v1265_v27 = vld [vmem:[#allocation10 + $0x1c0] sm:$0xff]  ;;  %v1835_v22 = vunpack.c.l.s8.bf16 %v1267_v17  ;;  %v872_v33 = vld [vmem:[#allocation8] sm:$0x3] }
 0x1aa   :  { %3075 = vmatprep.subr.bf16.mxu0 %v1732_v18  ;;  %v1833_v18 = vunpack.c.l.s8.bf16 %v1265_v27  ;;  %2773 = vmatprep.subr.bf16.mxu1 %v1834_v15  ;;  %v1841_v20 = vunpack.c.h.s8.bf16 %v1265_v27  ;;  %v6444_v15 = vld [vmem:[#allocation10 + $0x280] sm:$0xff] }
 0x1ab   :  { %7046 = vst [vmem:[#allocation36_spill] sm:$0xff] %v6444_v15 }
 0x1ac   :  { %2774 = vmatpush1.bf16.msra.mxu1 %v1833_v18  ;;  %v6492_v18 = vld [vmem:[#allocation10 + $0x2d0] sm:$0xff] }
 0x1ad   :  { %3076 = vmatpush1.bf16.msra.mxu0 %v1731_v21  ;;  %v1843_v21 = vunpack.c.h.s8.bf16 %v1267_v17  ;;  %2775 = vmatprep.subr.bf16.mxu1 %v1842_v19 }
 0x1ae   :  { %3077 = vmatprep.subr.bf16.mxu0 %v1740_v25  ;;  %v6368_v25 = vld [vmem:[#allocation10 + $0x208] sm:$0xff] }
 0x1af   :  { %v1850_v28 = vunpack.c.l.s8.bf16 %v6368_v25 }
 0x1b0   :  { %5331 = vmatmul.mubr.msk.bf16.gmra.mrb[4].mxu0 %vm597_vm1, %v539_v31  ;;  %2776 = vmatpush1.bf16.msra.mxu1 %v1841_v20 }
 0x1b1   :  { %3078 = vmatpush1.bf16.msra.mxu0 %v1739_v30  ;;  %2786 = vmatprep.subr.bf16.mxu1 %v1850_v28  ;;  %v874_v30 = vlaneseq }
 0x1b2   :  { %3079 = vmatprep.subr.bf16.mxu0 %v1748_v32 }
 0x1b3   :  { %v6374_v31 = vshrl.u32 %v874_v30, 7 }
 0x1b5   :  { %3080 = vmatpush1.bf16.msra.mxu0 %v1747_v34  ;;  %7038 = vst [vmem:[#allocation28_spill] sm:$0xff] %v6374_v31  ;;  %v6377_v32 = vsub.s32 0, %v6374_v31  ;;  %v6380_v34 = vsub.s32 1, %v6374_v31 }
 0x1b6   :  { %3081 = vmatprep.subr.bf16.mxu0 %v1756_v0 }
 0x1b7   :  { %7039 = vst [vmem:[#allocation29_spill] sm:$0xff] %v6377_v32  ;;  %7040 = vst [vmem:[#allocation30_spill] sm:$0xff] %v6380_v34  ;;  %v6383_v35 = vrot.slane %v872_v33, %v6377_v32 }
 0x1b9   :  { %3082 = vmatpush1.bf16.msra.mxu0 %v1755_v36 }
 0x1ba   :  { %3083 = vmatprep.subr.bf16.mxu0 %v1764_v39  ;;  %v6386_v39 = vrot.slane %v872_v33, %v6380_v34 }
 0x1bd   :  { %3084 = vmatpush1.bf16.msra.mxu0 %v1763_v41 }
 0x1be   :  { %3085 = vmatprep.subr.bf16.mxu0 %v1772_v42 }
 0x1c1   :  { %3086 = vmatpush1.bf16.msra.mxu0 %v1771_v38 }
 0x1c2   :  { %3087 = vmatprep.subr.bf16.mxu0 %v1780_v11 }
 0x1c5   :  { %3088 = vmatpush1.bf16.msra.mxu0 %v1779_v14 }
 0x1c6   :  { %3089 = vmatprep.subr.bf16.mxu0 %v1788_v37 }
 0x1c9   :  { %3090 = vmatpush1.bf16.msra.mxu0 %v1787_v46 }
 0x1ca   :  { %3091 = vmatprep.subr.bf16.mxu0 %v1796_v48 }
 0x1cd   :  { %3092 = vmatpush1.bf16.msra.mxu0 %v1795_v50 }
 0x1ce   :  { %3093 = vmatprep.subr.bf16.mxu0 %v1804_v54 }
 0x1d1   :  { %3094 = vmatpush1.bf16.msra.mxu0 %v1803_v57  ;;  %v6421_v57 = vld [vmem:[#allocation10 + $0x258] sm:$0xff] }
 0x1d2   :  { %3095 = vmatprep.subr.bf16.mxu0 %v1812_v58  ;;  %7041 = vst [vmem:[#allocation31_spill] sm:$0xff] %v6421_v57 }
 0x1d5   :  { %3096 = vmatpush1.bf16.msra.mxu0 %v1811_v59 }
 0x1d6   :  { %3097 = vmatprep.subr.bf16.mxu0 %v1820_v62  ;;  %v6430_v62 = vld [vmem:[#allocation10 + $0x250] sm:$0xff] }
 0x1d7   :  { %7043 = vst [vmem:[#allocation33_spill] sm:$0xff] %v6430_v62 }
 0x1d9   :  { %3098 = vmatpush1.bf16.msra.mxu0 %v1819_v5 }
 0x1da   :  { %3099 = vmatprep.subr.bf16.mxu0 %v1828_v8  ;;  %v6438_v8 = vld [vmem:[#allocation10 + $0x298] sm:$0xff] }
 0x1db   :  { %7045 = vst [vmem:[#allocation35_spill] sm:$0xff] %v6438_v8 }
 0x1dd   :  { %3100 = vmatpush1.bf16.msra.mxu0 %v1827_v10 }
 0x1de   :  { %3101 = vmatprep.subr.bf16.mxu0 %v1836_v24  ;;  %v6446_v24 = vld [vmem:[#allocation10 + $0x290] sm:$0xff] }
 0x1df   :  { %7047 = vst [vmem:[#allocation37_spill] sm:$0xff] %v6446_v24 }
 0x1e1   :  { %3102 = vmatpush1.bf16.msra.mxu0 %v1835_v22 }
 0x1e2   :  { %3103 = vmatprep.subr.bf16.mxu0 %v1844_v23 }
 0x1e5   :  { %3104 = vmatpush1.bf16.msra.mxu0 %v1843_v21 }
 0x1e6   :  { %3114 = vmatprep.subr.bf16.mxu0 %v1852_v29 }
 0x27b   :  { %v845_v0 = vpop.f32.mrb[0].mxu0 }
 0x27c   :  { %v847_v36 = vpop.f32.mrb[1].mxu0  ;;  %v884_v50 = vadd.f32 %v6383_v35, %v845_v0  ;;  %v6459_v0 = vld [vmem:[#allocation10 + $0x2c8] sm:$0xff] }
 0x27d   :  { %v849_v40 = vpop.f32.mrb[2].mxu0  ;;  %v885_v2 = vadd.f32 %v6386_v39, %v847_v36  ;;  %v6461_v36 = vld [vmem:[#allocation10 + $0x2d8] sm:$0xff] }
 0x27e   :  { %v886_v41 = vadd.f32 %v6383_v35, %v849_v40  ;;  %v851_v42 = vpop.f32.mrb[3].mxu0  ;;  %v892_v59 = vmax.f32 %v884_v50, 0.0  ;;  %7048 = vst [vmem:[#allocation38_spill] sm:$0xff] %v6461_v36 }
 0x27f   :  { %v887_v43 = vadd.f32 %v6386_v39, %v851_v42  ;;  %v893_v27 = vmax.f32 %v885_v2, 0.0 }
 0x280   :  { %v894_v37 = vmax.f32 %v886_v41, 0.0  ;;  %v901_v19 = vsel %vm900_vm3, %v892_v59, -inf  ;;  %v930_v28 = vsel %vm929_vm4, %v892_v59, -inf  ;;  %v959_v50 = vsel %vm958_vm5, %v892_v59, -inf }
 0x281   :  { %v895_v45 = vmax.f32 %v887_v43, 0.0  ;;  %v931_v33 = vrot.slane %v930_v28, 4  ;;  %v995_v30 = vsel %vm987_vm6, %v893_v27, -inf  ;;  %v960_v17 = vrot.slane %v959_v50, 4 }
 0x282   :  { %v6391_v46 = vsel %vm900_vm3, %v894_v37, -inf  ;;  %v6394_v47 = vsel %vm929_vm4, %v894_v37, -inf  ;;  %v6397_v48 = vsel %vm958_vm5, %v894_v37, -inf  ;;  %v6400_v49 = vsel %vm987_vm6, %v894_v37, -inf }
 0x283   :  { %v855_v38 = vpop.f32.mrb[4].mxu0  ;;  %v6406_v52 = vsel %vm900_vm3, %v895_v45, -inf  ;;  %v6409_v53 = vsel %vm929_vm4, %v895_v45, -inf  ;;  %v6412_v54 = vsel %vm958_vm5, %v895_v45, -inf  ;;  %v6415_v55 = vsel %vm987_vm6, %v895_v45, -inf }
 0x284   :  { %v857_v11 = vpop.f32.mrb[5].mxu0  ;;  %v888_v9 = vadd.f32 %v6383_v35, %v855_v38  ;;  %v902_v38 = vrot.slane %v901_v19, 4  ;;  %v966_v37 = vsel %vm958_vm5, %v893_v27, -inf  ;;  %v932_v13 = vmax.f32 %v930_v28, %v931_v33 }
 0x285   :  { %v859_v44 = vpop.f32.mrb[6].mxu0  ;;  %v889_v10 = vadd.f32 %v6386_v39, %v857_v11  ;;  %v908_v11 = vsel %vm900_vm3, %v893_v27, -inf  ;;  %v996_v63 = vrot.slane %v995_v30, 4  ;;  %v961_v28 = vmax.f32 %v959_v50, %v960_v17 }
 0x286   :  { %v861_v14 = vpop.f32.mrb[7].mxu0  ;;  %v6463_v40 = vmax.f32 %v888_v9, 0.0  ;;  %v890_v42 = vadd.f32 %v6383_v35, %v859_v44  ;;  %v988_v35 = vsel %vm987_vm6, %v892_v59, -inf  ;;  %v6485_v9 = vld [vmem:[#allocation10 + $0x2c0] sm:$0xff]  ;;  %v933_v34 = vrot.slane %v932_v13, 2 }
 0x287   :  { %v6465_v41 = vmax.f32 %v889_v10, 0.0  ;;  %v891_v43 = vadd.f32 %v6386_v39, %v861_v14  ;;  %v937_v39 = vsel %vm929_vm4, %v893_v27, -inf  ;;  %v909_v14 = vrot.slane %v908_v11, 4  ;;  %7049 = vst [vmem:[#allocation39_spill] sm:$0xff] %v6485_v9 }
 0x288   :  { %v915_v44 = vsel %vm900_vm3, %v6463_v40, -inf  ;;  %v903_v10 = vmax.f32 %v901_v19, %v902_v38  ;;  %v944_v59 = vsel %vm929_vm4, %v6463_v40, -inf  ;;  %v938_v21 = vrot.slane %v937_v39, 4 }
 0x289   :  { %v922_v45 = vsel %vm900_vm3, %v6465_v41, -inf  ;;  %v951_v2 = vsel %vm929_vm4, %v6465_v41, -inf  ;;  %v980_v29 = vsel %vm958_vm5, %v6465_v41, -inf  ;;  %v916_v20 = vrot.slane %v915_v44, 4 }
 0x28a   :  { %v923_v23 = vrot.slane %v922_v45, 4  ;;  %v952_v22 = vrot.slane %v951_v2, 4  ;;  %v989_v12 = vrot.slane %v988_v35, 4  ;;  %v910_v19 = vmax.f32 %v908_v11, %v909_v14 }
 0x28b   :  { %v967_v38 = vrot.slane %v966_v37, 4  ;;  %v945_v27 = vrot.slane %v944_v59, 4  ;;  %v981_v3 = vrot.slane %v980_v29, 4  ;;  %v904_v1 = vrot.slane %v903_v10, 2 }
 0x28c   :  { %v939_v60 = vmax.f32 %v937_v39, %v938_v21  ;;  %v917_v58 = vmax.f32 %v915_v44, %v916_v20  ;;  %v924_v32 = vmax.f32 %v922_v45, %v923_v23  ;;  %v953_v31 = vmax.f32 %v951_v2, %v952_v22 }
 0x28d   :  { %v990_v33 = vmax.f32 %v988_v35, %v989_v12  ;;  %v911_v5 = vrot.slane %v910_v19, 2  ;;  %v968_v11 = vmax.f32 %v966_v37, %v967_v38  ;;  %v946_v14 = vmax.f32 %v944_v59, %v945_v27 }
 0x28e   :  { %v982_v15 = vmax.f32 %v980_v29, %v981_v3  ;;  %v905_v8 = vmax.f32 %v903_v10, %v904_v1  ;;  %v997_v6 = vmax.f32 %v995_v30, %v996_v63  ;;  %v898_v62 = vmax.f32 %v890_v42, 0.0 }
 0x28f   :  { %v899_v7 = vmax.f32 %v891_v43, 0.0  ;;  %v940_v4 = vrot.slane %v939_v60, 2  ;;  %v918_v57 = vrot.slane %v917_v58, 2  ;;  %v925_v61 = vrot.slane %v924_v32, 2 }
 0x290   :  { %v954_v21 = vrot.slane %v953_v31, 2  ;;  %v6499_v23 = vsel %vm900_vm3, %v898_v62, -inf  ;;  %v6502_v17 = vsel %vm929_vm4, %v898_v62, -inf  ;;  %v6505_v12 = vsel %vm958_vm5, %v898_v62, -inf }
 0x291   :  { %v6508_v22 = vsel %vm987_vm6, %v898_v62, -inf  ;;  %v912_v1 = vmax.f32 %v910_v19, %v911_v5  ;;  %v969_v63 = vrot.slane %v968_v11, 2  ;;  %v947_v3 = vrot.slane %v946_v14, 2 }
 0x292   :  { %v983_v20 = vrot.slane %v982_v15, 2  ;;  %v6511_v29 = vsel %vm900_vm3, %v899_v7, -inf  ;;  %v6514_v30 = vsel %vm929_vm4, %v899_v7, -inf  ;;  %v6517_v42 = vsel %vm958_vm5, %v899_v7, -inf }
 0x293   :  { %v6520_v43 = vsel %vm987_vm6, %v899_v7, -inf  ;;  %v941_v37 = vmax.f32 %v939_v60, %v940_v4  ;;  %v919_v62 = vmax.f32 %v917_v58, %v918_v57  ;;  %v926_v45 = vmax.f32 %v924_v32, %v925_v61 }
 0x294   :  { %v955_v5 = vmax.f32 %v953_v31, %v954_v21  ;;  %v934_v50 = vmax.f32 %v932_v13, %v933_v34  ;;  %v962_v2 = vrot.slane %v961_v28, 2  ;;  %v991_v10 = vrot.slane %v990_v33, 2 }
 0x295   :  { %v906_v39 = vrot.slane %v905_v8, 1  ;;  %v913_v44 = vrot.slane %v912_v1, 1  ;;  %v970_v59 = vmax.f32 %v968_v11, %v969_v63  ;;  %v998_v19 = vrot.slane %v997_v6, 2 }
 0x296   :  { %v948_v38 = vmax.f32 %v946_v14, %v947_v3  ;;  %v973_v27 = vsel %vm958_vm5, %v6463_v40, -inf  ;;  %v984_v7 = vmax.f32 %v982_v15, %v983_v20  ;;  %v1009_v60 = vsel %vm987_vm6, %v6465_v41, -inf }
 0x297   :  { %v942_v57 = vrot.slane %v941_v37, 1  ;;  %v920_v32 = vrot.slane %v919_v62, 1  ;;  %v927_v31 = vrot.slane %v926_v45, 1  ;;  %v956_v34 = vrot.slane %v955_v5, 1 }
 0x298   :  { %v935_v58 = vrot.slane %v934_v50, 1  ;;  %v6527_v61 = vmax.f32 %v961_v28, %v962_v2  ;;  %v6529_v4 = vmax.f32 %v990_v33, %v991_v10  ;;  %v1907_v13 = vunpack.c.h.s8.bf16 %v6492_v18 }
 0x299   :  { %v971_v11 = vrot.slane %v970_v59, 1  ;;  %v6532_v14 = vmax.f32 %v997_v6, %v998_v19  ;;  %v974_v21 = vrot.slane %v973_v27, 4  ;;  %v1010_v63 = vrot.slane %v1009_v60, 4 }
 0x29a   :  { %v949_v15 = vrot.slane %v948_v38, 1  ;;  %v985_v3 = vrot.slane %v984_v7, 1  ;;  %v914_v20 = vmax.f32 %v912_v1, %v913_v44  ;;  %v907_v41 = vmax.f32 %v905_v8, %v906_v39 }
 0x29b   :  { %v928_v35 = vmax.f32 %v926_v45, %v927_v31  ;;  %v921_v24 = vmax.f32 %v919_v62, %v920_v32  ;;  %v943_v9 = vmax.f32 %v941_v37, %v942_v57  ;;  %v957_v36 = vmax.f32 %v955_v5, %v956_v34 }
 0x29c   :  { %v1017_v28 = vrot.slane %v6391_v46, 4  ;;  %v1045_v33 = vrot.slane %v6394_v47, 4  ;;  %v1073_v2 = vrot.slane %v6397_v48, 4  ;;  %v1101_v10 = vrot.slane %v6400_v49, 4 }
 0x29d   :  { %v1002_v6 = vsel %vm987_vm6, %v6463_v40, -inf  ;;  %v1134_v19 = vsel %vm1132_vm7, %v928_v35, %v914_v20  ;;  %v1133_v1 = vsel %vm1132_vm7, %v921_v24, %v907_v41  ;;  %v1142_v8 = vsel %vm1132_vm7, %v957_v36, %v943_v9 }
 0x29e   :  { %v975_v62 = vmax.f32 %v973_v27, %v974_v21  ;;  %v6543_v37 = vpack.c.bf16 %v1134_v19, %v1134_v19  ;;  %v936_v45 = vmax.f32 %v934_v50, %v935_v58  ;;  %v950_v5 = vmax.f32 %v948_v38, %v949_v15 }
 0x29f   :  { %v1011_v39 = vmax.f32 %v1009_v60, %v1010_v63  ;;  %v6545_v44 = vpack.c.bf16 %v1133_v1, %v1133_v1  ;;  %v972_v57 = vmax.f32 %v970_v59, %v971_v11  ;;  %v986_v32 = vmax.f32 %v984_v7, %v985_v3 }
 0x2a0   :  { %v1018_v31 = vmax.f32 %v6391_v46, %v1017_v28  ;;  %v1046_v40 = vmax.f32 %v6394_v47, %v1045_v33  ;;  %v1024_v35 = vrot.slane %v6406_v52, 4  ;;  %2777 = vmatprep.mubr.bf16.mxu1 %v6543_v37  ;;  %3105 = vmatprep.mubr.bf16.mxu0 %v6543_v37  ;;  %v6553_v24 = vsel %vm1132_vm7, %v950_v5, %v936_v45 }
 0x2a1   :  { %v1074_v36 = vmax.f32 %v6397_v48, %v1073_v2  ;;  %v1003_v9 = vrot.slane %v1002_v6, 4  ;;  %2778 = vmatmul.mubr.bf16.vlgmr.msra.gmra.mrb[0].mxu1 %v6545_v44  ;;  %3106 = vmatmul.mubr.bf16.vlgmr.msra.gmra.mrb[8].mxu0 %v6545_v44  ;;  %v6558_v50 = vpack.c.bf16 %v1142_v8, %v1142_v8  ;;  %v6561_v46 = vsel %vm1132_vm7, %v986_v32, %v972_v57 }
 0x2a2   :  { %v964_v47 = vrot.slane %v6527_v61, 1  ;;  %v1102_v59 = vmax.f32 %v6400_v49, %v1101_v10  ;;  %v976_v38 = vrot.slane %v975_v62, 2  ;;  %v1038_v27 = vrot.slane %v6511_v29, 4 }
 0x2a3   :  { %v7050_v7 = vunpack.c.l.s8.bf16 %v6403_v51  ;;  %v7051_v48 = vunpack.c.l.s8.bf16 %v6417_v16  ;;  %v993_v60 = vrot.slane %v6529_v4, 1  ;;  %v1052_v34 = vrot.slane %v6409_v53, 4  ;;  %2818 = vmatprep.mubr.bf16.mxu1 %v6558_v50  ;;  %3146 = vmatprep.mubr.bf16.mxu0 %v6558_v50 }
 0x2a4   :  { %v1012_v58 = vrot.slane %v1011_v39, 2  ;;  %v1031_v11 = vrot.slane %v6499_v23, 4  ;;  %v1000_v49 = vrot.slane %v6532_v14, 1  ;;  %v1025_v21 = vmax.f32 %v6406_v52, %v1024_v35 }
 0x2a5   :  { %2787 = vmatpush1.bf16.msra.mxu1 %v7050_v7  ;;  %3115 = vmatpush1.bf16.msra.mxu0 %v7051_v48  ;;  %v1080_v63 = vrot.slane %v6412_v54, 4  ;;  %v1108_v15 = vrot.slane %v6415_v55, 4  ;;  %v7052_v3 = vunpack.c.h.s8.bf16 %v6368_v25  ;;  %v7053_v20 = vunpack.c.h.s8.bf16 %v6370_v26 }
 0x2a6   :  { %v1019_v41 = vrot.slane %v1018_v31, 2  ;;  %v1047_v28 = vrot.slane %v1046_v40, 2  ;;  %v1075_v33 = vrot.slane %v1074_v36, 2  ;;  %v1004_v2 = vmax.f32 %v1002_v6, %v1003_v9 }
 0x2a7   :  { %2788 = vmatprep.subr.bf16.mxu1 %v7052_v3  ;;  %3116 = vmatprep.subr.bf16.mxu0 %v7053_v20  ;;  %v1103_v10 = vrot.slane %v1102_v59, 2  ;;  %v977_v19 = vmax.f32 %v975_v62, %v976_v38  ;;  %v1039_v1 = vmax.f32 %v6511_v29, %v1038_v27  ;;  %v1066_v52 = vrot.slane %v6514_v30, 4  ;;  %v7057_v62 = vld [vmem:[#allocation31_spill] sm:$0xff] }
 0x2a8   :  { %v7054_v8 = vunpack.c.h.s8.bf16 %v6403_v51  ;;  %v7055_v45 = vunpack.c.h.s8.bf16 %v6417_v16  ;;  %v1053_v25 = vmax.f32 %v6409_v53, %v1052_v34  ;;  %v1013_v26 = vmax.f32 %v1011_v39, %v1012_v58  ;;  %v7059_v34 = vld [vmem:[#allocation32_spill] sm:$0xff] }
 0x2a9   :  { %v1032_v5 = vmax.f32 %v6499_v23, %v1031_v11  ;;  %v1059_v57 = vrot.slane %v6502_v17, 4  ;;  %v7056_v6 = vunpack.c.l.s8.bf16 %v6419_v56  ;;  %v7058_v29 = vunpack.c.l.s8.bf16 %v7057_v62 }
 0x2aa   :  { %2789 = vmatpush1.bf16.msra.mxu1 %v7054_v8  ;;  %3117 = vmatpush1.bf16.msra.mxu0 %v7055_v45  ;;  %v1026_v32 = vrot.slane %v1025_v21, 2  ;;  %v1081_v51 = vmax.f32 %v6412_v54, %v1080_v63  ;;  %v1109_v35 = vmax.f32 %v6415_v55, %v1108_v15  ;;  %v1094_v16 = vrot.slane %v6517_v42, 4  ;;  %v7061_v54 = vld [vmem:[#allocation33_spill] sm:$0xff] }
 0x2ab   :  { %2790 = vmatprep.subr.bf16.mxu1 %v7056_v6  ;;  %3118 = vmatprep.subr.bf16.mxu0 %v7058_v29  ;;  %v6599_v9 = vmax.f32 %v1018_v31, %v1019_v41  ;;  %v1005_v53 = vrot.slane %v1004_v2, 2  ;;  %v1087_v23 = vrot.slane %v6505_v12, 4  ;;  %v1122_v39 = vrot.slane %v6520_v43, 4  ;;  %v7069_v6 = vld [vmem:[#allocation35_spill] sm:$0xff] }
 0x2ac   :  { %v6603_v38 = vmax.f32 %v1046_v40, %v1047_v28  ;;  %v978_v27 = vrot.slane %v977_v19, 1  ;;  %v1040_v7 = vrot.slane %v1039_v1, 2  ;;  %v1067_v48 = vmax.f32 %v6514_v30, %v1066_v52 }
 0x2ad   :  { %v7060_v58 = vunpack.c.l.s8.bf16 %v7059_v34  ;;  %v7062_v55 = vunpack.c.l.s8.bf16 %v7061_v54  ;;  %v6610_v11 = vmax.f32 %v1074_v36, %v1075_v33  ;;  %v1014_v31 = vrot.slane %v1013_v26, 1 }
 0x2ae   :  { %v1033_v63 = vrot.slane %v1032_v5, 2  ;;  %v1060_v15 = vmax.f32 %v6502_v17, %v1059_v57  ;;  %v7063_v3 = vunpack.c.h.s8.bf16 %v6419_v56  ;;  %v7064_v40 = vunpack.c.h.s8.bf16 %v7057_v62 }
 0x2af   :  { %2791 = vmatpush1.bf16.msra.mxu1 %v7060_v58  ;;  %3119 = vmatpush1.bf16.msra.mxu0 %v7062_v55  ;;  %v6617_v20 = vmax.f32 %v1102_v59, %v1103_v10  ;;  %v1027_v30 = vmax.f32 %v1025_v21, %v1026_v32  ;;  %v1054_v41 = vrot.slane %v1053_v25, 2  ;;  %v1095_v28 = vmax.f32 %v6517_v42, %v1094_v16 }
 0x2b0   :  { %2792 = vmatprep.subr.bf16.mxu1 %v7063_v3  ;;  %3120 = vmatprep.subr.bf16.mxu0 %v7064_v40  ;;  %v1006_v52 = vmax.f32 %v1004_v2, %v1005_v53  ;;  %v1088_v36 = vmax.f32 %v6505_v12, %v1087_v23  ;;  %v1115_v33 = vrot.slane %v6508_v22, 4  ;;  %v1123_v8 = vmax.f32 %v6520_v43, %v1122_v39  ;;  %v7067_v12 = vld [vmem:[#allocation34_spill] sm:$0xff] }
 0x2b1   :  { %v1041_v17 = vmax.f32 %v1039_v1, %v1040_v7  ;;  %v1068_v45 = vrot.slane %v1067_v48, 2  ;;  %v7065_v56 = vunpack.c.h.s8.bf16 %v7059_v34  ;;  %v7066_v57 = vunpack.c.h.s8.bf16 %v7061_v54  ;;  %v7071_v34 = vld [vmem:[#allocation36_spill] sm:$0xff] }
 0x2b2   :  { %v965_v59 = vmax.f32 %v6527_v61, %v964_v47  ;;  %v979_v42 = vmax.f32 %v977_v19, %v978_v27  ;;  %v1034_v21 = vmax.f32 %v1032_v5, %v1033_v63  ;;  %v1061_v2 = vrot.slane %v1060_v15, 2 }
 0x2b3   :  { %2793 = vmatpush1.bf16.msra.mxu1 %v7065_v56  ;;  %3121 = vmatpush1.bf16.msra.mxu0 %v7066_v57  ;;  %v7068_v10 = vunpack.c.l.s8.bf16 %v7067_v12  ;;  %v7070_v43 = vunpack.c.l.s8.bf16 %v7069_v6  ;;  %v1001_v1 = vmax.f32 %v6532_v14, %v1000_v49  ;;  %v1015_v62 = vmax.f32 %v1013_v26, %v1014_v31  ;;  %v7073_v49 = vld [vmem:[#allocation37_spill] sm:$0xff] }
 0x2b4   :  { %v1082_v29 = vrot.slane %v1081_v51, 2  ;;  %v1110_v32 = vrot.slane %v1109_v35, 2  ;;  %v1096_v16 = vrot.slane %v1095_v28, 2  ;;  %v6636_v53 = vsel %vm1132_vm7, %v979_v42, %v965_v59 }
 0x2b5   :  { %2794 = vmatprep.subr.bf16.mxu1 %v7068_v10  ;;  %3122 = vmatprep.subr.bf16.mxu0 %v7070_v43  ;;  %v1055_v23 = vmax.f32 %v1053_v25, %v1054_v41  ;;  %v1089_v61 = vrot.slane %v1088_v36, 2  ;;  %v1116_v47 = vmax.f32 %v6508_v22, %v1115_v33  ;;  %v6640_v19 = vsel %vm1132_vm7, %v1015_v62, %v1001_v1 }
 0x2b6   :  { %v1028_v5 = vrot.slane %v1027_v30, 1  ;;  %v1007_v39 = vrot.slane %v1006_v52, 1  ;;  %v1042_v27 = vrot.slane %v1041_v17, 1  ;;  %v1069_v7 = vmax.f32 %v1067_v48, %v1068_v45 }
 0x2b7   :  { %v7072_v14 = vunpack.c.l.s8.bf16 %v7071_v34  ;;  %v7074_v26 = vunpack.c.l.s8.bf16 %v7073_v49  ;;  %v1021_v58 = vrot.slane %v6599_v9, 1  ;;  %v1035_v54 = vrot.slane %v1034_v21, 1 }
 0x2b8   :  { %v1062_v25 = vmax.f32 %v1060_v15, %v1061_v2  ;;  %v1124_v55 = vrot.slane %v1123_v8, 2  ;;  %v7075_v22 = vunpack.c.h.s8.bf16 %v7067_v12  ;;  %v7076_v31 = vunpack.c.h.s8.bf16 %v7069_v6  ;;  %v1306_v6 = vld [vmem:[#allocation10 + $0x308] sm:$0xff] }
 0x2b9   :  { %2795 = vmatpush1.bf16.msra.mxu1 %v7072_v14  ;;  %3123 = vmatpush1.bf16.msra.mxu0 %v7074_v26  ;;  %v1049_v63 = vrot.slane %v6603_v38, 1  ;;  %v1083_v48 = vmax.f32 %v1081_v51, %v1082_v29  ;;  %v1111_v3 = vmax.f32 %v1109_v35, %v1110_v32  ;;  %v1097_v40 = vmax.f32 %v1095_v28, %v1096_v16  ;;  %v7082_v16 = vld [vmem:[#allocation39_spill] sm:$0xff]  ;;  %v1305_v26 = vld [vmem:[#allocation10 + $0x300] sm:$0xff] }
 0x2ba   :  { %2796 = vmatprep.subr.bf16.mxu1 %v7075_v22  ;;  %3124 = vmatprep.subr.bf16.mxu0 %v7076_v31  ;;  %v1056_v41 = vrot.slane %v1055_v23, 1  ;;  %v1090_v33 = vmax.f32 %v1088_v36, %v1089_v61  ;;  %v1117_v45 = vrot.slane %v1116_v47, 2  ;;  %v994_v56 = vmax.f32 %v6529_v4, %v993_v60  ;;  %v7080_v36 = vld [vmem:[#allocation38_spill] sm:$0xff]  ;;  %v1308_v4 = vld [vmem:[#allocation10 + $0x318] sm:$0xff] }
 0x2bb   :  { %v1070_v15 = vrot.slane %v1069_v7, 1  ;;  %v7077_v57 = vunpack.c.h.s8.bf16 %v7071_v34  ;;  %v7078_v59 = vunpack.c.h.s8.bf16 %v7073_v49  ;;  %v1008_v42 = vmax.f32 %v1006_v52, %v1007_v39 }
 0x2bc   :  { %v1029_v2 = vmax.f32 %v1027_v30, %v1028_v5  ;;  %v1043_v12 = vmax.f32 %v1041_v17, %v1042_v27  ;;  %v1063_v51 = vrot.slane %v1062_v25, 1  ;;  %v1125_v35 = vmax.f32 %v1123_v8, %v1124_v55 }
 0x2bd   :  { %2797 = vmatpush1.bf16.msra.mxu1 %v7077_v57  ;;  %3125 = vmatpush1.bf16.msra.mxu0 %v7078_v59  ;;  %v7079_v28 = vunpack.c.l.s8.bf16 %v6459_v0  ;;  %v7081_v10 = vunpack.c.l.s8.bf16 %v7080_v36  ;;  %v1022_v60 = vmax.f32 %v6599_v9, %v1021_v58  ;;  %v1036_v43 = vmax.f32 %v1034_v21, %v1035_v54  ;;  %v1307_v58 = vld [vmem:[#allocation10 + $0x310] sm:$0xff]  ;;  %v1314_v59 = vld [vmem:[#allocation10 + $0x348] sm:$0xff] }
 0x2be   :  { %v1084_v1 = vrot.slane %v1083_v48, 1  ;;  %v1098_v62 = vrot.slane %v1097_v40, 1  ;;  %v6665_v29 = vsel %vm1132_vm7, %v1008_v42, %v994_v56  ;;  %v6668_v30 = vsel %vm1132_vm7, %v1043_v12, %v1029_v2  ;;  %v1316_v42 = vld [vmem:[#allocation10 + $0x358] sm:$0xff] }
 0x2bf   :  { %2798 = vmatprep.subr.bf16.mxu1 %v7079_v28  ;;  %3126 = vmatprep.subr.bf16.mxu0 %v7081_v10  ;;  %v1077_v52 = vrot.slane %v6610_v11, 1  ;;  %v1091_v8 = vrot.slane %v1090_v33, 1  ;;  %v1118_v17 = vmax.f32 %v1116_v47, %v1117_v45  ;;  %v6672_v32 = vsel %vm1132_vm7, %v1036_v43, %v1022_v60  ;;  %v1313_v10 = vld [vmem:[#allocation10 + $0x340] sm:$0xff]  ;;  %v1322_v43 = vld [vmem:[#allocation10 + $0x388] sm:$0xff] }
 0x2c0   :  { %v7083_v61 = vunpack.c.l.s8.bf16 %v7082_v16  ;;  %v7084_v9 = vunpack.c.l.s8.bf16 %v6492_v18  ;;  %v1914_v21 = vunpack.c.l.s8.bf16 %v1306_v6  ;;  %v1916_v5 = vunpack.c.l.s8.bf16 %v1308_v4 }
 0x2c1   :  { %v1057_v39 = vmax.f32 %v1055_v23, %v1056_v41  ;;  %v1071_v27 = vmax.f32 %v1069_v7, %v1070_v15  ;;  %v1112_v34 = vrot.slane %v1111_v3, 1  ;;  %v1126_v14 = vrot.slane %v1125_v35, 1 }
 0x2c2   :  { %2799 = vmatpush1.bf16.msra.mxu1 %v7083_v61  ;;  %3127 = vmatpush1.bf16.msra.mxu0 %v7084_v9  ;;  %v7085_v49 = vunpack.c.h.s8.bf16 %v6459_v0  ;;  %v7086_v47 = vunpack.c.h.s8.bf16 %v7080_v36  ;;  %v1050_v54 = vmax.f32 %v6603_v38, %v1049_v63  ;;  %v1064_v55 = vmax.f32 %v1062_v25, %v1063_v51  ;;  %v1323_v61 = vld [vmem:[#allocation10 + $0x390] sm:$0xff] }
 0x2c3   :  { %v1105_v22 = vrot.slane %v6617_v20, 1  ;;  %v6685_v31 = vsel %vm1132_vm7, %v1071_v27, %v1057_v39  ;;  %v1085_v23 = vmax.f32 %v1083_v48, %v1084_v1  ;;  %v1099_v7 = vmax.f32 %v1097_v40, %v1098_v62  ;;  %v1324_v1 = vld [vmem:[#allocation10 + $0x398] sm:$0xff]  ;;  %v1330_v27 = vld [vmem:[#allocation10 + $0x3c8] sm:$0xff] }
 0x2c4   :  { %2800 = vmatprep.subr.bf16.mxu1 %v7085_v49  ;;  %3128 = vmatprep.subr.bf16.mxu0 %v7086_v47  ;;  %v1119_v41 = vrot.slane %v1118_v17, 1  ;;  %v6688_v45 = vsel %vm1132_vm7, %v1064_v55, %v1050_v54  ;;  %v1078_v0 = vmax.f32 %v6610_v11, %v1077_v52  ;;  %v1092_v56 = vmax.f32 %v1090_v33, %v1091_v8  ;;  %v1331_v54 = vld [vmem:[#allocation10 + $0x3d0] sm:$0xff] }
 0x2c5   :  { %v7087_v15 = vunpack.c.h.s8.bf16 %v7082_v16  ;;  %v1913_v38 = vunpack.c.l.s8.bf16 %v1305_v26  ;;  %v1915_v25 = vunpack.c.l.s8.bf16 %v1307_v58  ;;  %v1922_v63 = vunpack.c.h.s8.bf16 %v1306_v6  ;;  %v1315_v6 = vld [vmem:[#allocation10 + $0x350] sm:$0xff]  ;;  %v1321_v16 = vld [vmem:[#allocation10 + $0x380] sm:$0xff] }
 0x2c6   :  { %3129 = vmatpush1.bf16.msra.mxu0 %v1907_v13  ;;  %v6696_v57 = vsel %vm1132_vm7, %v1099_v7, %v1085_v23  ;;  %v1924_v48 = vunpack.c.h.s8.bf16 %v1308_v4  ;;  %v6699_v40 = vsel %vm1132_vm7, %v1092_v56, %v1078_v0  ;;  %v1113_v11 = vmax.f32 %v1111_v3, %v1112_v34  ;;  %v1332_v34 = vld [vmem:[#allocation10 + $0x3d8] sm:$0xff] }
 0x2c7   :  { %2801 = vmatpush1.bf16.msra.mxu1 %v7087_v15  ;;  %3130 = vmatprep.subr.bf16.mxu0 %v1916_v5  ;;  %v1127_v33 = vmax.f32 %v1125_v35, %v1126_v14  ;;  %v1106_v18 = vmax.f32 %v6617_v20, %v1105_v22  ;;  %v1120_v13 = vmax.f32 %v1118_v17, %v1119_v41  ;;  %v1921_v12 = vunpack.c.h.s8.bf16 %v1305_v26  ;;  %v1338_v41 = vld [vmem:[#allocation10 + $0x408] sm:$0xff]  ;;  %v1340_v0 = vld [vmem:[#allocation10 + $0x418] sm:$0xff] }
 0x2c8   :  { %2802 = vmatprep.subr.bf16.mxu1 %v1914_v21  ;;  %v1923_v51 = vunpack.c.h.s8.bf16 %v1307_v58  ;;  %v1930_v28 = vunpack.c.l.s8.bf16 %v1314_v59  ;;  %v1932_v36 = vunpack.c.l.s8.bf16 %v1316_v42  ;;  %v1929_v35 = vunpack.c.l.s8.bf16 %v1313_v10  ;;  %v1329_v58 = vld [vmem:[#allocation10 + $0x3c0] sm:$0xff] }
 0x2c9   :  { %v6702_v2 = vsel %vm1132_vm7, %v1127_v33, %v1113_v11  ;;  %v6706_v3 = vsel %vm1132_vm7, %v1120_v13, %v1106_v18  ;;  %v1931_v4 = vunpack.c.l.s8.bf16 %v1315_v6  ;;  %v1938_v20 = vunpack.c.h.s8.bf16 %v1314_v59 }
 0x2ca   :  { %3131 = vmatpush1.bf16.msra.mxu0 %v1915_v25  ;;  %v1940_v60 = vunpack.c.h.s8.bf16 %v1316_v42  ;;  %v1937_v62 = vunpack.c.h.s8.bf16 %v1313_v10  ;;  %v1939_v52 = vunpack.c.h.s8.bf16 %v1315_v6  ;;  %v1946_v8 = vunpack.c.l.s8.bf16 %v1322_v43  ;;  %v1345_v10 = vld [vmem:[#allocation10 + $0x440] sm:$0xff]  ;;  %v1347_v6 = vld [vmem:[#allocation10 + $0x450] sm:$0xff] }
 0x2cb   :  { %2803 = vmatpush1.bf16.msra.mxu1 %v1913_v38  ;;  %3132 = vmatprep.subr.bf16.mxu0 %v1924_v48  ;;  %v1948_v17 = vunpack.c.l.s8.bf16 %v1324_v1  ;;  %v1945_v9 = vunpack.c.l.s8.bf16 %v1321_v16  ;;  %v1947_v21 = vunpack.c.l.s8.bf16 %v1323_v61  ;;  %v1954_v5 = vunpack.c.h.s8.bf16 %v1322_v43  ;;  %v1339_v48 = vld [vmem:[#allocation10 + $0x410] sm:$0xff]  ;;  %v1354_v43 = vld [vmem:[#allocation10 + $0x488] sm:$0xff] }
 0x2cc   :  { %2804 = vmatprep.subr.bf16.mxu1 %v1922_v63  ;;  %v1956_v39 = vunpack.c.h.s8.bf16 %v1324_v1  ;;  %v1953_v14 = vunpack.c.h.s8.bf16 %v1321_v16  ;;  %v1955_v49 = vunpack.c.h.s8.bf16 %v1323_v61  ;;  %v1962_v47 = vunpack.c.l.s8.bf16 %v1330_v27  ;;  %v1337_v63 = vld [vmem:[#allocation10 + $0x400] sm:$0xff]  ;;  %v1356_v1 = vld [vmem:[#allocation10 + $0x498] sm:$0xff]  ;;  %v1355_v61 = vld [vmem:[#allocation10 + $0x490] sm:$0xff] }
 0x2cd   :  { %v1964_v26 = vunpack.c.l.s8.bf16 %v1332_v34  ;;  %v1961_v55 = vunpack.c.l.s8.bf16 %v1329_v58  ;;  %v1963_v22 = vunpack.c.l.s8.bf16 %v1331_v54  ;;  %v1970_v23 = vunpack.c.h.s8.bf16 %v1330_v27  ;;  %v1362_v27 = vld [vmem:[#allocation10 + $0x4c8] sm:$0xff] }
 0x2ce   :  { %3133 = vmatpush1.bf16.msra.mxu0 %v1923_v51  ;;  %v1972_v7 = vunpack.c.h.s8.bf16 %v1332_v34  ;;  %v1969_v56 = vunpack.c.h.s8.bf16 %v1329_v58  ;;  %v1971_v15 = vunpack.c.h.s8.bf16 %v1331_v54  ;;  %v1978_v38 = vunpack.c.l.s8.bf16 %v1338_v41  ;;  %v1348_v51 = vld [vmem:[#allocation10 + $0x458] sm:$0xff]  ;;  %v1363_v54 = vld [vmem:[#allocation10 + $0x4d0] sm:$0xff] }
 0x2cf   :  { %2805 = vmatpush1.bf16.msra.mxu1 %v1921_v12  ;;  %3134 = vmatprep.subr.bf16.mxu0 %v1932_v36  ;;  %v1980_v25 = vunpack.c.l.s8.bf16 %v1340_v0  ;;  %v1977_v11 = vunpack.c.l.s8.bf16 %v1337_v63  ;;  %v6710_v33 = vpack.c.bf16 %v6553_v24, %v6553_v24  ;;  %v1979_v59 = vunpack.c.l.s8.bf16 %v1339_v48  ;;  %v1346_v12 = vld [vmem:[#allocation10 + $0x448] sm:$0xff]  ;;  %v1364_v34 = vld [vmem:[#allocation10 + $0x4d8] sm:$0xff] }
 0x2d0   :  { %2806 = vmatprep.subr.bf16.mxu1 %v1930_v28  ;;  %v6714_v42 = vpack.c.bf16 %v6561_v46, %v6561_v46  ;;  %v1986_v18 = vunpack.c.h.s8.bf16 %v1338_v41  ;;  %v1988_v13 = vunpack.c.h.s8.bf16 %v1340_v0  ;;  %v1985_v24 = vunpack.c.h.s8.bf16 %v1337_v63  ;;  %v1370_v41 = vld [vmem:[#allocation10 + $0x508] sm:$0xff]  ;;  %v1372_v0 = vld [vmem:[#allocation10 + $0x518] sm:$0xff] }
 0x2d1   :  { %v1987_v28 = vunpack.c.h.s8.bf16 %v1339_v48  ;;  %v1994_v36 = vunpack.c.l.s8.bf16 %v1346_v12  ;;  %v1996_v46 = vunpack.c.l.s8.bf16 %v1348_v51  ;;  %v2012_v16 = vunpack.c.l.s8.bf16 %v1356_v1  ;;  %v1371_v48 = vld [vmem:[#allocation10 + $0x510] sm:$0xff] }
 0x2d2   :  { %3135 = vmatpush1.bf16.msra.mxu0 %v1931_v4  ;;  %v1995_v4 = vunpack.c.l.s8.bf16 %v1347_v6  ;;  %v2028_v58 = vunpack.c.l.s8.bf16 %v1364_v34  ;;  %v2044_v63 = vunpack.c.l.s8.bf16 %v1372_v0 }
 0x2d3   :  { %2807 = vmatpush1.bf16.msra.mxu1 %v1929_v35  ;;  %3136 = vmatprep.subr.bf16.mxu0 %v1940_v60  ;;  %v1993_v35 = vunpack.c.l.s8.bf16 %v1345_v10  ;;  %v2004_v60 = vunpack.c.h.s8.bf16 %v1348_v51  ;;  %v1380_v51 = vld [vmem:[#allocation10 + $0x558] sm:$0xff] }
 0x2d4   :  { %2808 = vmatprep.subr.bf16.mxu1 %v1938_v20  ;;  %v2002_v20 = vunpack.c.h.s8.bf16 %v1346_v12  ;;  %v1378_v12 = vld [vmem:[#allocation10 + $0x548] sm:$0xff] }
 0x2d6   :  { %3137 = vmatpush1.bf16.msra.mxu0 %v1939_v52  ;;  %v2003_v52 = vunpack.c.h.s8.bf16 %v1347_v6  ;;  %v1379_v6 = vld [vmem:[#allocation10 + $0x550] sm:$0xff] }
 0x2d7   :  { %2809 = vmatpush1.bf16.msra.mxu1 %v1937_v62  ;;  %3138 = vmatprep.subr.bf16.mxu0 %v1948_v17  ;;  %v2001_v62 = vunpack.c.h.s8.bf16 %v1345_v10  ;;  %v1353_v17 = vld [vmem:[#allocation10 + $0x480] sm:$0xff] }
 0x2d8   :  { %2810 = vmatprep.subr.bf16.mxu1 %v1946_v8  ;;  %v2010_v8 = vunpack.c.l.s8.bf16 %v1354_v43  ;;  %v1377_v10 = vld [vmem:[#allocation10 + $0x540] sm:$0xff] }
 0x2da   :  { %3139 = vmatpush1.bf16.msra.mxu0 %v1947_v21  ;;  %v2011_v21 = vunpack.c.l.s8.bf16 %v1355_v61 }
 0x2db   :  { %2811 = vmatpush1.bf16.msra.mxu1 %v1945_v9  ;;  %3140 = vmatprep.subr.bf16.mxu0 %v1956_v39  ;;  %v2009_v9 = vunpack.c.l.s8.bf16 %v1353_v17  ;;  %v2020_v39 = vunpack.c.h.s8.bf16 %v1356_v1  ;;  %v1388_v1 = vld [vmem:[#allocation10 + $0x598] sm:$0xff] }
 0x2dc   :  { %2812 = vmatprep.subr.bf16.mxu1 %v1954_v5  ;;  %v2018_v5 = vunpack.c.h.s8.bf16 %v1354_v43  ;;  %v1386_v43 = vld [vmem:[#allocation10 + $0x588] sm:$0xff] }
 0x2de   :  { %3141 = vmatpush1.bf16.msra.mxu0 %v1955_v49  ;;  %v2019_v49 = vunpack.c.h.s8.bf16 %v1355_v61  ;;  %v1387_v61 = vld [vmem:[#allocation10 + $0x590] sm:$0xff] }
 0x2df   :  { %2813 = vmatpush1.bf16.msra.mxu1 %v1953_v14  ;;  %3142 = vmatprep.subr.bf16.mxu0 %v1964_v26  ;;  %v2017_v14 = vunpack.c.h.s8.bf16 %v1353_v17  ;;  %v1361_v26 = vld [vmem:[#allocation10 + $0x4c0] sm:$0xff] }
 0x2e0   :  { %2814 = vmatprep.subr.bf16.mxu1 %v1962_v47  ;;  %v2026_v47 = vunpack.c.l.s8.bf16 %v1362_v27  ;;  %v1385_v17 = vld [vmem:[#allocation10 + $0x580] sm:$0xff] }
 0x2e2   :  { %3143 = vmatpush1.bf16.msra.mxu0 %v1963_v22  ;;  %v2027_v22 = vunpack.c.l.s8.bf16 %v1363_v54 }
 0x2e3   :  { %2815 = vmatpush1.bf16.msra.mxu1 %v1961_v55  ;;  %3144 = vmatprep.subr.bf16.mxu0 %v1972_v7  ;;  %v2025_v55 = vunpack.c.l.s8.bf16 %v1361_v26  ;;  %v2036_v7 = vunpack.c.h.s8.bf16 %v1364_v34  ;;  %v1396_v34 = vld [vmem:[#allocation10 + $0x5d8] sm:$0xff] }
 0x2e4   :  { %2816 = vmatprep.subr.bf16.mxu1 %v1970_v23  ;;  %v2034_v23 = vunpack.c.h.s8.bf16 %v1362_v27  ;;  %v1394_v27 = vld [vmem:[#allocation10 + $0x5c8] sm:$0xff] }
 0x2e6   :  { %3145 = vmatpush1.bf16.msra.mxu0 %v1971_v15  ;;  %v2035_v15 = vunpack.c.h.s8.bf16 %v1363_v54  ;;  %v1395_v54 = vld [vmem:[#allocation10 + $0x5d0] sm:$0xff] }
 0x2e7   :  { %2817 = vmatpush1.bf16.msra.mxu1 %v1969_v56  ;;  %3155 = vmatprep.subr.bf16.mxu0 %v1980_v25  ;;  %v2033_v56 = vunpack.c.h.s8.bf16 %v1361_v26  ;;  %v1369_v25 = vld [vmem:[#allocation10 + $0x500] sm:$0xff] }
 0x2e8   :  { %2827 = vmatprep.subr.bf16.mxu1 %v1978_v38  ;;  %v2042_v38 = vunpack.c.l.s8.bf16 %v1370_v41  ;;  %v1393_v26 = vld [vmem:[#allocation10 + $0x5c0] sm:$0xff] }
 0x2e9   :  { %3147 = vmatmul.mubr.bf16.vlgmr.msra.gmra.mrb[8].mxu0 %v6710_v33 }
 0x2ea   :  { %2819 = vmatmul.mubr.bf16.vlgmr.msra.gmra.mrb[0].mxu1 %v6710_v33  ;;  %3156 = vmatpush1.bf16.msra.mxu0 %v1979_v59  ;;  %v2043_v59 = vunpack.c.l.s8.bf16 %v1371_v48 }
 0x2eb   :  { %2828 = vmatpush1.bf16.msra.mxu1 %v1977_v11  ;;  %2859 = vmatprep.mubr.bf16.mxu1 %v6714_v42  ;;  %v2041_v11 = vunpack.c.l.s8.bf16 %v1369_v25 }
 0x2ec   :  { %3187 = vmatprep.mubr.bf16.mxu0 %v6714_v42  ;;  %2829 = vmatprep.subr.bf16.mxu1 %v1986_v18  ;;  %v2050_v18 = vunpack.c.h.s8.bf16 %v1370_v41  ;;  %v1402_v41 = vld [vmem:[#allocation10 + $0x608] sm:$0xff] }
 0x2ed   :  { %3157 = vmatprep.subr.bf16.mxu0 %v1988_v13  ;;  %v2052_v13 = vunpack.c.h.s8.bf16 %v1372_v0  ;;  %v1404_v0 = vld [vmem:[#allocation10 + $0x618] sm:$0xff] }
 0x2ee   :  { %3158 = vmatpush1.bf16.msra.mxu0 %v1987_v28  ;;  %v2051_v28 = vunpack.c.h.s8.bf16 %v1371_v48  ;;  %v1403_v48 = vld [vmem:[#allocation10 + $0x610] sm:$0xff] }
 0x2ef   :  { %2830 = vmatpush1.bf16.msra.mxu1 %v1985_v24  ;;  %3159 = vmatprep.subr.bf16.mxu0 %v1996_v46  ;;  %v2049_v24 = vunpack.c.h.s8.bf16 %v1369_v25  ;;  %v2060_v46 = vunpack.c.l.s8.bf16 %v1380_v51  ;;  %v1401_v25 = vld [vmem:[#allocation10 + $0x600] sm:$0xff] }
 0x2f0   :  { %2831 = vmatprep.subr.bf16.mxu1 %v1994_v36  ;;  %v2058_v36 = vunpack.c.l.s8.bf16 %v1378_v12 }
 0x2f2   :  { %3160 = vmatpush1.bf16.msra.mxu0 %v1995_v4  ;;  %v2059_v4 = vunpack.c.l.s8.bf16 %v1379_v6 }
 0x2f3   :  { %2832 = vmatpush1.bf16.msra.mxu1 %v1993_v35  ;;  %3161 = vmatprep.subr.bf16.mxu0 %v2004_v60  ;;  %v2057_v35 = vunpack.c.l.s8.bf16 %v1377_v10  ;;  %v2068_v60 = vunpack.c.h.s8.bf16 %v1380_v51  ;;  %v6727_v51 = vpack.c.bf16 %v6640_v19, %v6640_v19 }
 0x2f4   :  { %2833 = vmatprep.subr.bf16.mxu1 %v2002_v20  ;;  %v2066_v20 = vunpack.c.h.s8.bf16 %v1378_v12  ;;  %v1410_v12 = vld [vmem:[#allocation10 + $0x648] sm:$0xff] }
 0x2f6   :  { %3162 = vmatpush1.bf16.msra.mxu0 %v2003_v52  ;;  %v2067_v52 = vunpack.c.h.s8.bf16 %v1379_v6 }
 0x2f7   :  { %2834 = vmatpush1.bf16.msra.mxu1 %v2001_v62  ;;  %3163 = vmatprep.subr.bf16.mxu0 %v2012_v16  ;;  %v2065_v62 = vunpack.c.h.s8.bf16 %v1377_v10  ;;  %v2076_v16 = vunpack.c.l.s8.bf16 %v1388_v1  ;;  %v2122_v10 = vunpack.c.l.s8.bf16 %v1410_v12 }
 0x2f8   :  { %2835 = vmatprep.subr.bf16.mxu1 %v2010_v8  ;;  %v2074_v8 = vunpack.c.l.s8.bf16 %v1386_v43 }
 0x2fa   :  { %3164 = vmatpush1.bf16.msra.mxu0 %v2011_v21  ;;  %v2075_v21 = vunpack.c.l.s8.bf16 %v1387_v61 }
 0x2fb   :  { %2836 = vmatpush1.bf16.msra.mxu1 %v2009_v9  ;;  %3165 = vmatprep.subr.bf16.mxu0 %v2020_v39  ;;  %v2073_v9 = vunpack.c.l.s8.bf16 %v1385_v17  ;;  %v2084_v39 = vunpack.c.h.s8.bf16 %v1388_v1  ;;  %v1420_v1 = vld [vmem:[#allocation10 + $0x698] sm:$0xff] }
 0x2fc   :  { %2837 = vmatprep.subr.bf16.mxu1 %v2018_v5  ;;  %v2082_v5 = vunpack.c.h.s8.bf16 %v1386_v43  ;;  %v1418_v43 = vld [vmem:[#allocation10 + $0x688] sm:$0xff] }
 0x2fe   :  { %3166 = vmatpush1.bf16.msra.mxu0 %v2019_v49  ;;  %v2083_v49 = vunpack.c.h.s8.bf16 %v1387_v61  ;;  %v1419_v61 = vld [vmem:[#allocation10 + $0x690] sm:$0xff] }
 0x2ff   :  { %2838 = vmatpush1.bf16.msra.mxu1 %v2017_v14  ;;  %3167 = vmatprep.subr.bf16.mxu0 %v2028_v58  ;;  %v2081_v14 = vunpack.c.h.s8.bf16 %v1385_v17  ;;  %v2092_v58 = vunpack.c.l.s8.bf16 %v1396_v34  ;;  %v1417_v17 = vld [vmem:[#allocation10 + $0x680] sm:$0xff] }
 0x300   :  { %2839 = vmatprep.subr.bf16.mxu1 %v2026_v47  ;;  %v2090_v47 = vunpack.c.l.s8.bf16 %v1394_v27 }
 0x302   :  { %3168 = vmatpush1.bf16.msra.mxu0 %v2027_v22  ;;  %v2091_v22 = vunpack.c.l.s8.bf16 %v1395_v54 }
 0x303   :  { %2840 = vmatpush1.bf16.msra.mxu1 %v2025_v55  ;;  %3169 = vmatprep.subr.bf16.mxu0 %v2036_v7  ;;  %v2089_v55 = vunpack.c.l.s8.bf16 %v1393_v26  ;;  %v2100_v7 = vunpack.c.h.s8.bf16 %v1396_v34  ;;  %v1428_v34 = vld [vmem:[#allocation10 + $0x6d8] sm:$0xff] }
 0x304   :  { %2841 = vmatprep.subr.bf16.mxu1 %v2034_v23  ;;  %v2098_v23 = vunpack.c.h.s8.bf16 %v1394_v27  ;;  %v1426_v27 = vld [vmem:[#allocation10 + $0x6c8] sm:$0xff] }
 0x306   :  { %3170 = vmatpush1.bf16.msra.mxu0 %v2035_v15  ;;  %v2099_v15 = vunpack.c.h.s8.bf16 %v1395_v54  ;;  %v1427_v54 = vld [vmem:[#allocation10 + $0x6d0] sm:$0xff] }
 0x307   :  { %2842 = vmatpush1.bf16.msra.mxu1 %v2033_v56  ;;  %3171 = vmatprep.subr.bf16.mxu0 %v2044_v63  ;;  %v2097_v56 = vunpack.c.h.s8.bf16 %v1393_v26  ;;  %v2108_v63 = vunpack.c.l.s8.bf16 %v1404_v0  ;;  %v1425_v26 = vld [vmem:[#allocation10 + $0x6c0] sm:$0xff] }
 0x308   :  { %2843 = vmatprep.subr.bf16.mxu1 %v2042_v38  ;;  %v2106_v38 = vunpack.c.l.s8.bf16 %v1402_v41 }
 0x30a   :  { %3172 = vmatpush1.bf16.msra.mxu0 %v2043_v59  ;;  %v6722_v59 = vpack.c.bf16 %v6636_v53, %v6636_v53  ;;  %v2115_v53 = vunpack.c.h.s8.bf16 %v1403_v48 }
 0x30b   :  { %2844 = vmatpush1.bf16.msra.mxu1 %v2041_v11  ;;  %3173 = vmatprep.subr.bf16.mxu0 %v2052_v13  ;;  %v2105_v11 = vunpack.c.l.s8.bf16 %v1401_v25  ;;  %v2114_v13 = vunpack.c.h.s8.bf16 %v1402_v41  ;;  %v1434_v41 = vld [vmem:[#allocation10 + $0x708] sm:$0xff] }
 0x30c   :  { %2845 = vmatprep.subr.bf16.mxu1 %v2050_v18  ;;  %v2107_v18 = vunpack.c.l.s8.bf16 %v1403_v48  ;;  %v1435_v48 = vld [vmem:[#allocation10 + $0x710] sm:$0xff] }
 0x30e   :  { %3174 = vmatpush1.bf16.msra.mxu0 %v2051_v28  ;;  %v1412_v28 = vld [vmem:[#allocation10 + $0x658] sm:$0xff] }
 0x30f   :  { %2846 = vmatpush1.bf16.msra.mxu1 %v2049_v24  ;;  %3175 = vmatprep.subr.bf16.mxu0 %v2060_v46  ;;  %v2116_v24 = vunpack.c.h.s8.bf16 %v1404_v0  ;;  %v1409_v46 = vld [vmem:[#allocation10 + $0x640] sm:$0xff]  ;;  %v2124_v6 = vunpack.c.l.s8.bf16 %v1412_v28  ;;  %v1436_v0 = vld [vmem:[#allocation10 + $0x718] sm:$0xff] }
 0x310   :  { %2847 = vmatprep.subr.bf16.mxu1 %v2058_v36  ;;  %v2113_v36 = vunpack.c.h.s8.bf16 %v1401_v25  ;;  %v2121_v19 = vunpack.c.l.s8.bf16 %v1409_v46  ;;  %v1433_v25 = vld [vmem:[#allocation10 + $0x700] sm:$0xff] }
 0x312   :  { %3176 = vmatpush1.bf16.msra.mxu0 %v2059_v4 }
 0x313   :  { %2848 = vmatpush1.bf16.msra.mxu1 %v2057_v35  ;;  %3177 = vmatprep.subr.bf16.mxu0 %v2068_v60  ;;  %v1411_v35 = vld [vmem:[#allocation10 + $0x650] sm:$0xff]  ;;  %v2132_v60 = vunpack.c.h.s8.bf16 %v1412_v28  ;;  %v1444_v28 = vld [vmem:[#allocation10 + $0x758] sm:$0xff] }
 0x314   :  { %2849 = vmatprep.subr.bf16.mxu1 %v2066_v20  ;;  %v2123_v4 = vunpack.c.l.s8.bf16 %v1411_v35  ;;  %v2130_v20 = vunpack.c.h.s8.bf16 %v1410_v12  ;;  %v2180_v12 = vunpack.c.h.s8.bf16 %v1436_v0 }
 0x316   :  { %3178 = vmatpush1.bf16.msra.mxu0 %v2067_v52  ;;  %v2131_v52 = vunpack.c.h.s8.bf16 %v1411_v35  ;;  %v1443_v35 = vld [vmem:[#allocation10 + $0x750] sm:$0xff] }
 0x317   :  { %2850 = vmatpush1.bf16.msra.mxu1 %v2065_v62  ;;  %3179 = vmatprep.subr.bf16.mxu0 %v2076_v16  ;;  %v2129_v62 = vunpack.c.h.s8.bf16 %v1409_v46  ;;  %v2140_v16 = vunpack.c.l.s8.bf16 %v1420_v1  ;;  %v1441_v46 = vld [vmem:[#allocation10 + $0x740] sm:$0xff] }
 0x318   :  { %2851 = vmatprep.subr.bf16.mxu1 %v2074_v8  ;;  %v2138_v8 = vunpack.c.l.s8.bf16 %v1418_v43 }
 0x31a   :  { %3180 = vmatpush1.bf16.msra.mxu0 %v2075_v21  ;;  %v2139_v21 = vunpack.c.l.s8.bf16 %v1419_v61 }
 0x31b   :  { %2852 = vmatpush1.bf16.msra.mxu1 %v2073_v9  ;;  %3181 = vmatprep.subr.bf16.mxu0 %v2084_v39  ;;  %v2137_v9 = vunpack.c.l.s8.bf16 %v1417_v17  ;;  %v2148_v39 = vunpack.c.h.s8.bf16 %v1420_v1  ;;  %v1452_v1 = vld [vmem:[#allocation10 + $0x798] sm:$0xff] }
 0x31c   :  { %2853 = vmatprep.subr.bf16.mxu1 %v2082_v5  ;;  %v2146_v5 = vunpack.c.h.s8.bf16 %v1418_v43  ;;  %v1450_v43 = vld [vmem:[#allocation10 + $0x788] sm:$0xff] }
 0x31e   :  { %3182 = vmatpush1.bf16.msra.mxu0 %v2083_v49  ;;  %v2147_v49 = vunpack.c.h.s8.bf16 %v1419_v61  ;;  %v1451_v61 = vld [vmem:[#allocation10 + $0x790] sm:$0xff] }
 0x31f   :  { %2854 = vmatpush1.bf16.msra.mxu1 %v2081_v14  ;;  %3183 = vmatprep.subr.bf16.mxu0 %v2092_v58  ;;  %v2145_v14 = vunpack.c.h.s8.bf16 %v1417_v17  ;;  %v2156_v58 = vunpack.c.l.s8.bf16 %v1428_v34  ;;  %v1449_v17 = vld [vmem:[#allocation10 + $0x780] sm:$0xff] }
 0x320   :  { %2855 = vmatprep.subr.bf16.mxu1 %v2090_v47  ;;  %v2154_v47 = vunpack.c.l.s8.bf16 %v1426_v27 }
 0x322   :  { %3184 = vmatpush1.bf16.msra.mxu0 %v2091_v22  ;;  %v2155_v22 = vunpack.c.l.s8.bf16 %v1427_v54 }
 0x323   :  { %2856 = vmatpush1.bf16.msra.mxu1 %v2089_v55  ;;  %3185 = vmatprep.subr.bf16.mxu0 %v2100_v7  ;;  %v2153_v55 = vunpack.c.l.s8.bf16 %v1425_v26  ;;  %v2164_v7 = vunpack.c.h.s8.bf16 %v1428_v34  ;;  %v1460_v34 = vld [vmem:[#allocation10 + $0x7d8] sm:$0xff] }
 0x324   :  { %2857 = vmatprep.subr.bf16.mxu1 %v2098_v23  ;;  %v2162_v23 = vunpack.c.h.s8.bf16 %v1426_v27  ;;  %v1458_v27 = vld [vmem:[#allocation10 + $0x7c8] sm:$0xff] }
 0x326   :  { %3186 = vmatpush1.bf16.msra.mxu0 %v2099_v15  ;;  %v2163_v15 = vunpack.c.h.s8.bf16 %v1427_v54  ;;  %v1459_v54 = vld [vmem:[#allocation10 + $0x7d0] sm:$0xff] }
 0x327   :  { %2858 = vmatpush1.bf16.msra.mxu1 %v2097_v56  ;;  %3196 = vmatprep.subr.bf16.mxu0 %v2108_v63  ;;  %v2161_v56 = vunpack.c.h.s8.bf16 %v1425_v26  ;;  %v2172_v63 = vunpack.c.l.s8.bf16 %v1436_v0  ;;  %v1457_v26 = vld [vmem:[#allocation10 + $0x7c0] sm:$0xff]  ;;  %v1468_v0 = vld [vmem:[#allocation10 + $0x818] sm:$0xff] }
 0x328   :  { %2868 = vmatprep.subr.bf16.mxu1 %v2106_v38  ;;  %v2170_v38 = vunpack.c.l.s8.bf16 %v1434_v41 }
 0x329   :  { %3188 = vmatmul.mubr.bf16.vlgmr.msra.gmra.mrb[8].mxu0 %v6722_v59 }
 0x32a   :  { %2860 = vmatmul.mubr.bf16.vlgmr.msra.gmra.mrb[0].mxu1 %v6722_v59  ;;  %3197 = vmatpush1.bf16.msra.mxu0 %v2107_v18  ;;  %v2171_v18 = vunpack.c.l.s8.bf16 %v1435_v48 }
 0x32b   :  { %2869 = vmatpush1.bf16.msra.mxu1 %v2105_v11  ;;  %2900 = vmatprep.mubr.bf16.mxu1 %v6727_v51  ;;  %v2169_v11 = vunpack.c.l.s8.bf16 %v1433_v25 }
 0x32c   :  { %3228 = vmatprep.mubr.bf16.mxu0 %v6727_v51  ;;  %2870 = vmatprep.subr.bf16.mxu1 %v2114_v13  ;;  %v2178_v13 = vunpack.c.h.s8.bf16 %v1434_v41  ;;  %v1466_v41 = vld [vmem:[#allocation10 + $0x808] sm:$0xff] }
 0x32d   :  { %3198 = vmatprep.subr.bf16.mxu0 %v2116_v24  ;;  %v1442_v24 = vld [vmem:[#allocation10 + $0x748] sm:$0xff] }
 0x32e   :  { %3199 = vmatpush1.bf16.msra.mxu0 %v2115_v53  ;;  %v2179_v53 = vunpack.c.h.s8.bf16 %v1435_v48  ;;  %v1467_v48 = vld [vmem:[#allocation10 + $0x810] sm:$0xff] }
 0x32f   :  { %2871 = vmatpush1.bf16.msra.mxu1 %v2113_v36  ;;  %3200 = vmatprep.subr.bf16.mxu0 %v2124_v6  ;;  %v2177_v36 = vunpack.c.h.s8.bf16 %v1433_v25  ;;  %v2188_v6 = vunpack.c.l.s8.bf16 %v1444_v28  ;;  %v1465_v25 = vld [vmem:[#allocation10 + $0x800] sm:$0xff] }
 0x330   :  { %2872 = vmatprep.subr.bf16.mxu1 %v2122_v10  ;;  %v2186_v10 = vunpack.c.l.s8.bf16 %v1442_v24 }
 0x332   :  { %3201 = vmatpush1.bf16.msra.mxu0 %v2123_v4  ;;  %v2187_v4 = vunpack.c.l.s8.bf16 %v1443_v35 }
 0x333   :  { %2873 = vmatpush1.bf16.msra.mxu1 %v2121_v19  ;;  %3202 = vmatprep.subr.bf16.mxu0 %v2132_v60  ;;  %v2185_v19 = vunpack.c.l.s8.bf16 %v1441_v46  ;;  %v2196_v60 = vunpack.c.h.s8.bf16 %v1444_v28  ;;  %v6739_v28 = vpack.c.bf16 %v6668_v30, %v6668_v30 }
 0x334   :  { %2874 = vmatprep.subr.bf16.mxu1 %v2130_v20  ;;  %v2194_v20 = vunpack.c.h.s8.bf16 %v1442_v24  ;;  %v1474_v24 = vld [vmem:[#allocation10 + $0x848] sm:$0xff] }
 0x336   :  { %3203 = vmatpush1.bf16.msra.mxu0 %v2131_v52  ;;  %v2195_v52 = vunpack.c.h.s8.bf16 %v1443_v35 }
 0x337   :  { %2875 = vmatpush1.bf16.msra.mxu1 %v2129_v62  ;;  %3204 = vmatprep.subr.bf16.mxu0 %v2140_v16  ;;  %v2193_v62 = vunpack.c.h.s8.bf16 %v1441_v46  ;;  %v2204_v16 = vunpack.c.l.s8.bf16 %v1452_v1  ;;  %v2250_v46 = vunpack.c.l.s8.bf16 %v1474_v24 }
 0x338   :  { %2876 = vmatprep.subr.bf16.mxu1 %v2138_v8  ;;  %v2202_v8 = vunpack.c.l.s8.bf16 %v1450_v43 }
 0x33a   :  { %3205 = vmatpush1.bf16.msra.mxu0 %v2139_v21  ;;  %v2203_v21 = vunpack.c.l.s8.bf16 %v1451_v61 }
 0x33b   :  { %2877 = vmatpush1.bf16.msra.mxu1 %v2137_v9  ;;  %3206 = vmatprep.subr.bf16.mxu0 %v2148_v39  ;;  %v2201_v9 = vunpack.c.l.s8.bf16 %v1449_v17  ;;  %v2212_v39 = vunpack.c.h.s8.bf16 %v1452_v1  ;;  %v1484_v1 = vld [vmem:[#allocation10 + $0x898] sm:$0xff] }
 0x33c   :  { %2878 = vmatprep.subr.bf16.mxu1 %v2146_v5  ;;  %v2210_v5 = vunpack.c.h.s8.bf16 %v1450_v43  ;;  %v1482_v43 = vld [vmem:[#allocation10 + $0x888] sm:$0xff] }
 0x33e   :  { %3207 = vmatpush1.bf16.msra.mxu0 %v2147_v49  ;;  %v2211_v49 = vunpack.c.h.s8.bf16 %v1451_v61  ;;  %v1483_v61 = vld [vmem:[#allocation10 + $0x890] sm:$0xff] }
 0x33f   :  { %2879 = vmatpush1.bf16.msra.mxu1 %v2145_v14  ;;  %3208 = vmatprep.subr.bf16.mxu0 %v2156_v58  ;;  %v2209_v14 = vunpack.c.h.s8.bf16 %v1449_v17  ;;  %v2220_v58 = vunpack.c.l.s8.bf16 %v1460_v34  ;;  %v1481_v17 = vld [vmem:[#allocation10 + $0x880] sm:$0xff] }
 0x340   :  { %2880 = vmatprep.subr.bf16.mxu1 %v2154_v47  ;;  %v2218_v47 = vunpack.c.l.s8.bf16 %v1458_v27 }
 0x342   :  { %3209 = vmatpush1.bf16.msra.mxu0 %v2155_v22  ;;  %v2219_v22 = vunpack.c.l.s8.bf16 %v1459_v54 }
 0x343   :  { %2881 = vmatpush1.bf16.msra.mxu1 %v2153_v55  ;;  %3210 = vmatprep.subr.bf16.mxu0 %v2164_v7  ;;  %v2217_v55 = vunpack.c.l.s8.bf16 %v1457_v26  ;;  %v2228_v7 = vunpack.c.h.s8.bf16 %v1460_v34  ;;  %v1492_v34 = vld [vmem:[#allocation10 + $0x8d8] sm:$0xff] }
 0x344   :  { %2882 = vmatprep.subr.bf16.mxu1 %v2162_v23  ;;  %v2226_v23 = vunpack.c.h.s8.bf16 %v1458_v27  ;;  %v1490_v27 = vld [vmem:[#allocation10 + $0x8c8] sm:$0xff] }
 0x346   :  { %3211 = vmatpush1.bf16.msra.mxu0 %v2163_v15  ;;  %v2227_v15 = vunpack.c.h.s8.bf16 %v1459_v54  ;;  %v1491_v54 = vld [vmem:[#allocation10 + $0x8d0] sm:$0xff] }
 0x347   :  { %2883 = vmatpush1.bf16.msra.mxu1 %v2161_v56  ;;  %3212 = vmatprep.subr.bf16.mxu0 %v2172_v63  ;;  %v2225_v56 = vunpack.c.h.s8.bf16 %v1457_v26  ;;  %v2236_v63 = vunpack.c.l.s8.bf16 %v1468_v0  ;;  %v1489_v26 = vld [vmem:[#allocation10 + $0x8c0] sm:$0xff] }
 0x348   :  { %2884 = vmatprep.subr.bf16.mxu1 %v2170_v38  ;;  %v2234_v38 = vunpack.c.l.s8.bf16 %v1466_v41 }
 0x34a   :  { %3213 = vmatpush1.bf16.msra.mxu0 %v2171_v18  ;;  %v6734_v18 = vpack.c.bf16 %v6665_v29, %v6665_v29  ;;  %v2243_v29 = vunpack.c.h.s8.bf16 %v1467_v48 }
 0x34b   :  { %2885 = vmatpush1.bf16.msra.mxu1 %v2169_v11  ;;  %3214 = vmatprep.subr.bf16.mxu0 %v2180_v12  ;;  %v2233_v11 = vunpack.c.l.s8.bf16 %v1465_v25  ;;  %v2242_v12 = vunpack.c.h.s8.bf16 %v1466_v41  ;;  %v1498_v41 = vld [vmem:[#allocation10 + $0x908] sm:$0xff] }
 0x34c   :  { %2886 = vmatprep.subr.bf16.mxu1 %v2178_v13  ;;  %v2235_v13 = vunpack.c.l.s8.bf16 %v1467_v48  ;;  %v1499_v48 = vld [vmem:[#allocation10 + $0x910] sm:$0xff] }
 0x34e   :  { %3215 = vmatpush1.bf16.msra.mxu0 %v2179_v53  ;;  %v1476_v53 = vld [vmem:[#allocation10 + $0x858] sm:$0xff] }
 0x34f   :  { %2887 = vmatpush1.bf16.msra.mxu1 %v2177_v36  ;;  %3216 = vmatprep.subr.bf16.mxu0 %v2188_v6  ;;  %v2244_v36 = vunpack.c.h.s8.bf16 %v1468_v0  ;;  %v1473_v6 = vld [vmem:[#allocation10 + $0x840] sm:$0xff]  ;;  %v2252_v35 = vunpack.c.l.s8.bf16 %v1476_v53  ;;  %v1500_v0 = vld [vmem:[#allocation10 + $0x918] sm:$0xff] }
 0x350   :  { %2888 = vmatprep.subr.bf16.mxu1 %v2186_v10  ;;  %v2241_v10 = vunpack.c.h.s8.bf16 %v1465_v25  ;;  %v2249_v30 = vunpack.c.l.s8.bf16 %v1473_v6  ;;  %v1497_v25 = vld [vmem:[#allocation10 + $0x900] sm:$0xff] }
 0x352   :  { %3217 = vmatpush1.bf16.msra.mxu0 %v2187_v4 }
 0x353   :  { %2889 = vmatpush1.bf16.msra.mxu1 %v2185_v19  ;;  %3218 = vmatprep.subr.bf16.mxu0 %v2196_v60  ;;  %v1475_v19 = vld [vmem:[#allocation10 + $0x850] sm:$0xff]  ;;  %v2260_v60 = vunpack.c.h.s8.bf16 %v1476_v53  ;;  %v1508_v53 = vld [vmem:[#allocation10 + $0x958] sm:$0xff] }
 0x354   :  { %2890 = vmatprep.subr.bf16.mxu1 %v2194_v20  ;;  %v2251_v4 = vunpack.c.l.s8.bf16 %v1475_v19  ;;  %v2258_v20 = vunpack.c.h.s8.bf16 %v1474_v24  ;;  %v2308_v24 = vunpack.c.h.s8.bf16 %v1500_v0 }
 0x356   :  { %3219 = vmatpush1.bf16.msra.mxu0 %v2195_v52  ;;  %v2259_v52 = vunpack.c.h.s8.bf16 %v1475_v19  ;;  %v1507_v19 = vld [vmem:[#allocation10 + $0x950] sm:$0xff] }
 0x357   :  { %2891 = vmatpush1.bf16.msra.mxu1 %v2193_v62  ;;  %3220 = vmatprep.subr.bf16.mxu0 %v2204_v16  ;;  %v2257_v62 = vunpack.c.h.s8.bf16 %v1473_v6  ;;  %v2268_v16 = vunpack.c.l.s8.bf16 %v1484_v1  ;;  %v1505_v6 = vld [vmem:[#allocation10 + $0x940] sm:$0xff] }
 0x358   :  { %2892 = vmatprep.subr.bf16.mxu1 %v2202_v8  ;;  %v2266_v8 = vunpack.c.l.s8.bf16 %v1482_v43 }
 0x35a   :  { %3221 = vmatpush1.bf16.msra.mxu0 %v2203_v21  ;;  %v2267_v21 = vunpack.c.l.s8.bf16 %v1483_v61 }
 0x35b   :  { %2893 = vmatpush1.bf16.msra.mxu1 %v2201_v9  ;;  %3222 = vmatprep.subr.bf16.mxu0 %v2212_v39  ;;  %v2265_v9 = vunpack.c.l.s8.bf16 %v1481_v17  ;;  %v2276_v39 = vunpack.c.h.s8.bf16 %v1484_v1  ;;  %v1516_v1 = vld [vmem:[#allocation10 + $0x998] sm:$0xff] }
 0x35c   :  { %2894 = vmatprep.subr.bf16.mxu1 %v2210_v5  ;;  %v2274_v5 = vunpack.c.h.s8.bf16 %v1482_v43  ;;  %v1514_v43 = vld [vmem:[#allocation10 + $0x988] sm:$0xff] }
 0x35e   :  { %3223 = vmatpush1.bf16.msra.mxu0 %v2211_v49  ;;  %v2275_v49 = vunpack.c.h.s8.bf16 %v1483_v61  ;;  %v1515_v61 = vld [vmem:[#allocation10 + $0x990] sm:$0xff] }
 0x35f   :  { %2895 = vmatpush1.bf16.msra.mxu1 %v2209_v14  ;;  %3224 = vmatprep.subr.bf16.mxu0 %v2220_v58  ;;  %v2273_v14 = vunpack.c.h.s8.bf16 %v1481_v17  ;;  %v2284_v58 = vunpack.c.l.s8.bf16 %v1492_v34  ;;  %v1513_v17 = vld [vmem:[#allocation10 + $0x980] sm:$0xff] }
 0x360   :  { %2896 = vmatprep.subr.bf16.mxu1 %v2218_v47  ;;  %v2282_v47 = vunpack.c.l.s8.bf16 %v1490_v27 }
 0x362   :  { %3225 = vmatpush1.bf16.msra.mxu0 %v2219_v22  ;;  %v2283_v22 = vunpack.c.l.s8.bf16 %v1491_v54 }
 0x363   :  { %2897 = vmatpush1.bf16.msra.mxu1 %v2217_v55  ;;  %3226 = vmatprep.subr.bf16.mxu0 %v2228_v7  ;;  %v2281_v55 = vunpack.c.l.s8.bf16 %v1489_v26  ;;  %v2292_v7 = vunpack.c.h.s8.bf16 %v1492_v34  ;;  %v1524_v34 = vld [vmem:[#allocation10 + $0x9d8] sm:$0xff] }
 0x364   :  { %2898 = vmatprep.subr.bf16.mxu1 %v2226_v23  ;;  %v2290_v23 = vunpack.c.h.s8.bf16 %v1490_v27  ;;  %v1522_v27 = vld [vmem:[#allocation10 + $0x9c8] sm:$0xff] }
 0x366   :  { %3227 = vmatpush1.bf16.msra.mxu0 %v2227_v15  ;;  %v2291_v15 = vunpack.c.h.s8.bf16 %v1491_v54  ;;  %v1523_v54 = vld [vmem:[#allocation10 + $0x9d0] sm:$0xff] }
 0x367   :  { %2899 = vmatpush1.bf16.msra.mxu1 %v2225_v56  ;;  %3237 = vmatprep.subr.bf16.mxu0 %v2236_v63  ;;  %v2289_v56 = vunpack.c.h.s8.bf16 %v1489_v26  ;;  %v2300_v63 = vunpack.c.l.s8.bf16 %v1500_v0  ;;  %v1521_v26 = vld [vmem:[#allocation10 + $0x9c0] sm:$0xff]  ;;  %v1532_v0 = vld [vmem:[#allocation10 + $0xa18] sm:$0xff] }
 0x368   :  { %2909 = vmatprep.subr.bf16.mxu1 %v2234_v38  ;;  %v2298_v38 = vunpack.c.l.s8.bf16 %v1498_v41 }
 0x369   :  { %3229 = vmatmul.mubr.bf16.vlgmr.msra.gmra.mrb[8].mxu0 %v6734_v18 }
 0x36a   :  { %2901 = vmatmul.mubr.bf16.vlgmr.msra.gmra.mrb[0].mxu1 %v6734_v18  ;;  %3238 = vmatpush1.bf16.msra.mxu0 %v2235_v13  ;;  %v2299_v13 = vunpack.c.l.s8.bf16 %v1499_v48 }
 0x36b   :  { %2910 = vmatpush1.bf16.msra.mxu1 %v2233_v11  ;;  %2941 = vmatprep.mubr.bf16.mxu1 %v6739_v28  ;;  %v2297_v11 = vunpack.c.l.s8.bf16 %v1497_v25 }
 0x36c   :  { %3269 = vmatprep.mubr.bf16.mxu0 %v6739_v28  ;;  %2911 = vmatprep.subr.bf16.mxu1 %v2242_v12  ;;  %v2306_v12 = vunpack.c.h.s8.bf16 %v1498_v41  ;;  %v1530_v41 = vld [vmem:[#allocation10 + $0xa08] sm:$0xff] }
 0x36d   :  { %3239 = vmatprep.subr.bf16.mxu0 %v2244_v36  ;;  %v1506_v36 = vld [vmem:[#allocation10 + $0x948] sm:$0xff] }
 0x36e   :  { %3240 = vmatpush1.bf16.msra.mxu0 %v2243_v29  ;;  %v2307_v29 = vunpack.c.h.s8.bf16 %v1499_v48  ;;  %v1531_v48 = vld [vmem:[#allocation10 + $0xa10] sm:$0xff] }
 0x36f   :  { %2912 = vmatpush1.bf16.msra.mxu1 %v2241_v10  ;;  %3241 = vmatprep.subr.bf16.mxu0 %v2252_v35  ;;  %v2305_v10 = vunpack.c.h.s8.bf16 %v1497_v25  ;;  %v2316_v35 = vunpack.c.l.s8.bf16 %v1508_v53  ;;  %v1529_v25 = vld [vmem:[#allocation10 + $0xa00] sm:$0xff] }
 0x370   :  { %2913 = vmatprep.subr.bf16.mxu1 %v2250_v46  ;;  %v2314_v46 = vunpack.c.l.s8.bf16 %v1506_v36 }
 0x372   :  { %3242 = vmatpush1.bf16.msra.mxu0 %v2251_v4  ;;  %v2315_v4 = vunpack.c.l.s8.bf16 %v1507_v19 }
 0x373   :  { %2914 = vmatpush1.bf16.msra.mxu1 %v2249_v30  ;;  %3243 = vmatprep.subr.bf16.mxu0 %v2260_v60  ;;  %v2313_v30 = vunpack.c.l.s8.bf16 %v1505_v6  ;;  %v2324_v60 = vunpack.c.h.s8.bf16 %v1508_v53  ;;  %v6751_v53 = vpack.c.bf16 %v6685_v31, %v6685_v31 }
 0x374   :  { %2915 = vmatprep.subr.bf16.mxu1 %v2258_v20  ;;  %v2322_v20 = vunpack.c.h.s8.bf16 %v1506_v36  ;;  %v1538_v36 = vld [vmem:[#allocation10 + $0xa48] sm:$0xff] }
 0x376   :  { %3244 = vmatpush1.bf16.msra.mxu0 %v2259_v52  ;;  %v2323_v52 = vunpack.c.h.s8.bf16 %v1507_v19 }
 0x377   :  { %2916 = vmatpush1.bf16.msra.mxu1 %v2257_v62  ;;  %3245 = vmatprep.subr.bf16.mxu0 %v2268_v16  ;;  %v2321_v62 = vunpack.c.h.s8.bf16 %v1505_v6  ;;  %v2332_v16 = vunpack.c.l.s8.bf16 %v1516_v1  ;;  %v2378_v6 = vunpack.c.l.s8.bf16 %v1538_v36 }
 0x378   :  { %2917 = vmatprep.subr.bf16.mxu1 %v2266_v8  ;;  %v2330_v8 = vunpack.c.l.s8.bf16 %v1514_v43 }
 0x37a   :  { %3246 = vmatpush1.bf16.msra.mxu0 %v2267_v21  ;;  %v2331_v21 = vunpack.c.l.s8.bf16 %v1515_v61 }
 0x37b   :  { %2918 = vmatpush1.bf16.msra.mxu1 %v2265_v9  ;;  %3247 = vmatprep.subr.bf16.mxu0 %v2276_v39  ;;  %v2329_v9 = vunpack.c.l.s8.bf16 %v1513_v17  ;;  %v2340_v39 = vunpack.c.h.s8.bf16 %v1516_v1  ;;  %v1548_v1 = vld [vmem:[#allocation10 + $0xa98] sm:$0xff] }
 0x37c   :  { %2919 = vmatprep.subr.bf16.mxu1 %v2274_v5  ;;  %v2338_v5 = vunpack.c.h.s8.bf16 %v1514_v43  ;;  %v1546_v43 = vld [vmem:[#allocation10 + $0xa88] sm:$0xff] }
 0x37e   :  { %3248 = vmatpush1.bf16.msra.mxu0 %v2275_v49  ;;  %v2339_v49 = vunpack.c.h.s8.bf16 %v1515_v61  ;;  %v1547_v61 = vld [vmem:[#allocation10 + $0xa90] sm:$0xff] }
 0x37f   :  { %2920 = vmatpush1.bf16.msra.mxu1 %v2273_v14  ;;  %3249 = vmatprep.subr.bf16.mxu0 %v2284_v58  ;;  %v2337_v14 = vunpack.c.h.s8.bf16 %v1513_v17  ;;  %v2348_v58 = vunpack.c.l.s8.bf16 %v1524_v34  ;;  %v1545_v17 = vld [vmem:[#allocation10 + $0xa80] sm:$0xff] }
 0x380   :  { %2921 = vmatprep.subr.bf16.mxu1 %v2282_v47  ;;  %v2346_v47 = vunpack.c.l.s8.bf16 %v1522_v27 }
 0x382   :  { %3250 = vmatpush1.bf16.msra.mxu0 %v2283_v22  ;;  %v2347_v22 = vunpack.c.l.s8.bf16 %v1523_v54 }
 0x383   :  { %2922 = vmatpush1.bf16.msra.mxu1 %v2281_v55  ;;  %3251 = vmatprep.subr.bf16.mxu0 %v2292_v7  ;;  %v2345_v55 = vunpack.c.l.s8.bf16 %v1521_v26  ;;  %v2356_v7 = vunpack.c.h.s8.bf16 %v1524_v34  ;;  %v1556_v34 = vld [vmem:[#allocation10 + $0xad8] sm:$0xff] }
 0x384   :  { %2923 = vmatprep.subr.bf16.mxu1 %v2290_v23  ;;  %v2354_v23 = vunpack.c.h.s8.bf16 %v1522_v27  ;;  %v1554_v27 = vld [vmem:[#allocation10 + $0xac8] sm:$0xff] }
 0x386   :  { %3252 = vmatpush1.bf16.msra.mxu0 %v2291_v15  ;;  %v2355_v15 = vunpack.c.h.s8.bf16 %v1523_v54  ;;  %v1555_v54 = vld [vmem:[#allocation10 + $0xad0] sm:$0xff] }
 0x387   :  { %2924 = vmatpush1.bf16.msra.mxu1 %v2289_v56  ;;  %3253 = vmatprep.subr.bf16.mxu0 %v2300_v63  ;;  %v2353_v56 = vunpack.c.h.s8.bf16 %v1521_v26  ;;  %v2364_v63 = vunpack.c.l.s8.bf16 %v1532_v0  ;;  %v1553_v26 = vld [vmem:[#allocation10 + $0xac0] sm:$0xff] }
 0x388   :  { %2925 = vmatprep.subr.bf16.mxu1 %v2298_v38  ;;  %v2362_v38 = vunpack.c.l.s8.bf16 %v1530_v41 }
 0x38a   :  { %3254 = vmatpush1.bf16.msra.mxu0 %v2299_v13  ;;  %v6746_v13 = vpack.c.bf16 %v6672_v32, %v6672_v32  ;;  %v2371_v32 = vunpack.c.h.s8.bf16 %v1531_v48 }
 0x38b   :  { %2926 = vmatpush1.bf16.msra.mxu1 %v2297_v11  ;;  %3255 = vmatprep.subr.bf16.mxu0 %v2308_v24  ;;  %v2361_v11 = vunpack.c.l.s8.bf16 %v1529_v25  ;;  %v2370_v24 = vunpack.c.h.s8.bf16 %v1530_v41  ;;  %v1562_v41 = vld [vmem:[#allocation10 + $0xb08] sm:$0xff] }
 0x38c   :  { %2927 = vmatprep.subr.bf16.mxu1 %v2306_v12  ;;  %v2363_v12 = vunpack.c.l.s8.bf16 %v1531_v48  ;;  %v1563_v48 = vld [vmem:[#allocation10 + $0xb10] sm:$0xff] }
 0x38e   :  { %3256 = vmatpush1.bf16.msra.mxu0 %v2307_v29  ;;  %v1540_v29 = vld [vmem:[#allocation10 + $0xa58] sm:$0xff] }
 0x38f   :  { %2928 = vmatpush1.bf16.msra.mxu1 %v2305_v10  ;;  %3257 = vmatprep.subr.bf16.mxu0 %v2316_v35  ;;  %v2372_v10 = vunpack.c.h.s8.bf16 %v1532_v0  ;;  %v1537_v35 = vld [vmem:[#allocation10 + $0xa40] sm:$0xff]  ;;  %v2380_v19 = vunpack.c.l.s8.bf16 %v1540_v29  ;;  %v1564_v0 = vld [vmem:[#allocation10 + $0xb18] sm:$0xff] }
 0x390   :  { %2929 = vmatprep.subr.bf16.mxu1 %v2314_v46  ;;  %v2369_v46 = vunpack.c.h.s8.bf16 %v1529_v25  ;;  %v2377_v31 = vunpack.c.l.s8.bf16 %v1537_v35  ;;  %v1561_v25 = vld [vmem:[#allocation10 + $0xb00] sm:$0xff] }
 0x392   :  { %3258 = vmatpush1.bf16.msra.mxu0 %v2315_v4 }
 0x393   :  { %2930 = vmatpush1.bf16.msra.mxu1 %v2313_v30  ;;  %3259 = vmatprep.subr.bf16.mxu0 %v2324_v60  ;;  %v1539_v30 = vld [vmem:[#allocation10 + $0xa50] sm:$0xff]  ;;  %v2388_v60 = vunpack.c.h.s8.bf16 %v1540_v29  ;;  %v1572_v29 = vld [vmem:[#allocation10 + $0xb58] sm:$0xff] }
 0x394   :  { %2931 = vmatprep.subr.bf16.mxu1 %v2322_v20  ;;  %v2379_v4 = vunpack.c.l.s8.bf16 %v1539_v30  ;;  %v2386_v20 = vunpack.c.h.s8.bf16 %v1538_v36  ;;  %v2436_v36 = vunpack.c.h.s8.bf16 %v1564_v0 }
 0x396   :  { %3260 = vmatpush1.bf16.msra.mxu0 %v2323_v52  ;;  %v2387_v52 = vunpack.c.h.s8.bf16 %v1539_v30  ;;  %v1571_v30 = vld [vmem:[#allocation10 + $0xb50] sm:$0xff] }
 0x397   :  { %2932 = vmatpush1.bf16.msra.mxu1 %v2321_v62  ;;  %3261 = vmatprep.subr.bf16.mxu0 %v2332_v16  ;;  %v2385_v62 = vunpack.c.h.s8.bf16 %v1537_v35  ;;  %v2396_v16 = vunpack.c.l.s8.bf16 %v1548_v1  ;;  %v1569_v35 = vld [vmem:[#allocation10 + $0xb40] sm:$0xff] }
 0x398   :  { %2933 = vmatprep.subr.bf16.mxu1 %v2330_v8  ;;  %v2394_v8 = vunpack.c.l.s8.bf16 %v1546_v43 }
 0x39a   :  { %3262 = vmatpush1.bf16.msra.mxu0 %v2331_v21  ;;  %v2395_v21 = vunpack.c.l.s8.bf16 %v1547_v61 }
 0x39b   :  { %2934 = vmatpush1.bf16.msra.mxu1 %v2329_v9  ;;  %3263 = vmatprep.subr.bf16.mxu0 %v2340_v39  ;;  %v2393_v9 = vunpack.c.l.s8.bf16 %v1545_v17  ;;  %v2404_v39 = vunpack.c.h.s8.bf16 %v1548_v1  ;;  %v1580_v1 = vld [vmem:[#allocation10 + $0xb98] sm:$0xff] }
 0x39c   :  { %2935 = vmatprep.subr.bf16.mxu1 %v2338_v5  ;;  %v2402_v5 = vunpack.c.h.s8.bf16 %v1546_v43  ;;  %v1578_v43 = vld [vmem:[#allocation10 + $0xb88] sm:$0xff] }
 0x39e   :  { %3264 = vmatpush1.bf16.msra.mxu0 %v2339_v49  ;;  %v2403_v49 = vunpack.c.h.s8.bf16 %v1547_v61  ;;  %v1579_v61 = vld [vmem:[#allocation10 + $0xb90] sm:$0xff] }
 0x39f   :  { %2936 = vmatpush1.bf16.msra.mxu1 %v2337_v14  ;;  %3265 = vmatprep.subr.bf16.mxu0 %v2348_v58  ;;  %v2401_v14 = vunpack.c.h.s8.bf16 %v1545_v17  ;;  %v2412_v58 = vunpack.c.l.s8.bf16 %v1556_v34  ;;  %v1577_v17 = vld [vmem:[#allocation10 + $0xb80] sm:$0xff] }
 0x3a0   :  { %2937 = vmatprep.subr.bf16.mxu1 %v2346_v47  ;;  %v2410_v47 = vunpack.c.l.s8.bf16 %v1554_v27 }
 0x3a2   :  { %3266 = vmatpush1.bf16.msra.mxu0 %v2347_v22  ;;  %v2411_v22 = vunpack.c.l.s8.bf16 %v1555_v54 }
 0x3a3   :  { %2938 = vmatpush1.bf16.msra.mxu1 %v2345_v55  ;;  %3267 = vmatprep.subr.bf16.mxu0 %v2356_v7  ;;  %v2409_v55 = vunpack.c.l.s8.bf16 %v1553_v26  ;;  %v2420_v7 = vunpack.c.h.s8.bf16 %v1556_v34  ;;  %v1588_v34 = vld [vmem:[#allocation10 + $0xbd8] sm:$0xff] }
 0x3a4   :  { %2939 = vmatprep.subr.bf16.mxu1 %v2354_v23  ;;  %v2418_v23 = vunpack.c.h.s8.bf16 %v1554_v27  ;;  %v1586_v27 = vld [vmem:[#allocation10 + $0xbc8] sm:$0xff] }
 0x3a6   :  { %3268 = vmatpush1.bf16.msra.mxu0 %v2355_v15  ;;  %v2419_v15 = vunpack.c.h.s8.bf16 %v1555_v54  ;;  %v1587_v54 = vld [vmem:[#allocation10 + $0xbd0] sm:$0xff] }
 0x3a7   :  { %2940 = vmatpush1.bf16.msra.mxu1 %v2353_v56  ;;  %3278 = vmatprep.subr.bf16.mxu0 %v2364_v63  ;;  %v2417_v56 = vunpack.c.h.s8.bf16 %v1553_v26  ;;  %v2428_v63 = vunpack.c.l.s8.bf16 %v1564_v0  ;;  %v1585_v26 = vld [vmem:[#allocation10 + $0xbc0] sm:$0xff]  ;;  %v1596_v0 = vld [vmem:[#allocation10 + $0xc18] sm:$0xff] }
 0x3a8   :  { %2950 = vmatprep.subr.bf16.mxu1 %v2362_v38  ;;  %v2426_v38 = vunpack.c.l.s8.bf16 %v1562_v41 }
 0x3a9   :  { %3270 = vmatmul.mubr.bf16.vlgmr.msra.gmra.mrb[8].mxu0 %v6746_v13 }
 0x3aa   :  { %2942 = vmatmul.mubr.bf16.vlgmr.msra.gmra.mrb[0].mxu1 %v6746_v13  ;;  %3279 = vmatpush1.bf16.msra.mxu0 %v2363_v12  ;;  %v2427_v12 = vunpack.c.l.s8.bf16 %v1563_v48 }
 0x3ab   :  { %2951 = vmatpush1.bf16.msra.mxu1 %v2361_v11  ;;  %2982 = vmatprep.mubr.bf16.mxu1 %v6751_v53  ;;  %v2425_v11 = vunpack.c.l.s8.bf16 %v1561_v25 }
 0x3ac   :  { %3310 = vmatprep.mubr.bf16.mxu0 %v6751_v53  ;;  %2952 = vmatprep.subr.bf16.mxu1 %v2370_v24  ;;  %v2434_v24 = vunpack.c.h.s8.bf16 %v1562_v41  ;;  %v1594_v41 = vld [vmem:[#allocation10 + $0xc08] sm:$0xff] }
 0x3ad   :  { %3280 = vmatprep.subr.bf16.mxu0 %v2372_v10  ;;  %v1570_v10 = vld [vmem:[#allocation10 + $0xb48] sm:$0xff] }
 0x3ae   :  { %3281 = vmatpush1.bf16.msra.mxu0 %v2371_v32  ;;  %v2435_v32 = vunpack.c.h.s8.bf16 %v1563_v48  ;;  %v1595_v48 = vld [vmem:[#allocation10 + $0xc10] sm:$0xff] }
 0x3af   :  { %2953 = vmatpush1.bf16.msra.mxu1 %v2369_v46  ;;  %3282 = vmatprep.subr.bf16.mxu0 %v2380_v19  ;;  %v2433_v46 = vunpack.c.h.s8.bf16 %v1561_v25  ;;  %v2444_v19 = vunpack.c.l.s8.bf16 %v1572_v29  ;;  %v1593_v25 = vld [vmem:[#allocation10 + $0xc00] sm:$0xff] }
 0x3b0   :  { %2954 = vmatprep.subr.bf16.mxu1 %v2378_v6  ;;  %v2442_v6 = vunpack.c.l.s8.bf16 %v1570_v10 }
 0x3b2   :  { %3283 = vmatpush1.bf16.msra.mxu0 %v2379_v4  ;;  %v2443_v4 = vunpack.c.l.s8.bf16 %v1571_v30 }
 0x3b3   :  { %2955 = vmatpush1.bf16.msra.mxu1 %v2377_v31  ;;  %3284 = vmatprep.subr.bf16.mxu0 %v2388_v60  ;;  %v2441_v31 = vunpack.c.l.s8.bf16 %v1569_v35  ;;  %v2452_v60 = vunpack.c.h.s8.bf16 %v1572_v29  ;;  %v6763_v29 = vpack.c.bf16 %v6696_v57, %v6696_v57 }
 0x3b4   :  { %2956 = vmatprep.subr.bf16.mxu1 %v2386_v20  ;;  %v2450_v20 = vunpack.c.h.s8.bf16 %v1570_v10  ;;  %v1602_v10 = vld [vmem:[#allocation10 + $0xc48] sm:$0xff] }
 0x3b6   :  { %3285 = vmatpush1.bf16.msra.mxu0 %v2387_v52  ;;  %v2451_v52 = vunpack.c.h.s8.bf16 %v1571_v30 }
 0x3b7   :  { %2957 = vmatpush1.bf16.msra.mxu1 %v2385_v62  ;;  %3286 = vmatprep.subr.bf16.mxu0 %v2396_v16  ;;  %v2449_v62 = vunpack.c.h.s8.bf16 %v1569_v35  ;;  %v2460_v16 = vunpack.c.l.s8.bf16 %v1580_v1  ;;  %v2506_v35 = vunpack.c.l.s8.bf16 %v1602_v10 }
 0x3b8   :  { %2958 = vmatprep.subr.bf16.mxu1 %v2394_v8  ;;  %v2458_v8 = vunpack.c.l.s8.bf16 %v1578_v43 }
 0x3ba   :  { %3287 = vmatpush1.bf16.msra.mxu0 %v2395_v21  ;;  %v2459_v21 = vunpack.c.l.s8.bf16 %v1579_v61 }
 0x3bb   :  { %2959 = vmatpush1.bf16.msra.mxu1 %v2393_v9  ;;  %3288 = vmatprep.subr.bf16.mxu0 %v2404_v39  ;;  %v2457_v9 = vunpack.c.l.s8.bf16 %v1577_v17  ;;  %v2468_v39 = vunpack.c.h.s8.bf16 %v1580_v1  ;;  %v1612_v1 = vld [vmem:[#allocation10 + $0xc98] sm:$0xff] }
 0x3bc   :  { %2960 = vmatprep.subr.bf16.mxu1 %v2402_v5  ;;  %v2466_v5 = vunpack.c.h.s8.bf16 %v1578_v43  ;;  %v1610_v43 = vld [vmem:[#allocation10 + $0xc88] sm:$0xff] }
 0x3be   :  { %3289 = vmatpush1.bf16.msra.mxu0 %v2403_v49  ;;  %v2467_v49 = vunpack.c.h.s8.bf16 %v1579_v61  ;;  %v1611_v61 = vld [vmem:[#allocation10 + $0xc90] sm:$0xff] }
 0x3bf   :  { %2961 = vmatpush1.bf16.msra.mxu1 %v2401_v14  ;;  %3290 = vmatprep.subr.bf16.mxu0 %v2412_v58  ;;  %v2465_v14 = vunpack.c.h.s8.bf16 %v1577_v17  ;;  %v2476_v58 = vunpack.c.l.s8.bf16 %v1588_v34  ;;  %v1609_v17 = vld [vmem:[#allocation10 + $0xc80] sm:$0xff] }
 0x3c0   :  { %2962 = vmatprep.subr.bf16.mxu1 %v2410_v47  ;;  %v2474_v47 = vunpack.c.l.s8.bf16 %v1586_v27 }
 0x3c2   :  { %3291 = vmatpush1.bf16.msra.mxu0 %v2411_v22  ;;  %v2475_v22 = vunpack.c.l.s8.bf16 %v1587_v54 }
 0x3c3   :  { %2963 = vmatpush1.bf16.msra.mxu1 %v2409_v55  ;;  %3292 = vmatprep.subr.bf16.mxu0 %v2420_v7  ;;  %v2473_v55 = vunpack.c.l.s8.bf16 %v1585_v26  ;;  %v2484_v7 = vunpack.c.h.s8.bf16 %v1588_v34  ;;  %v1620_v34 = vld [vmem:[#allocation10 + $0xcd8] sm:$0xff] }
 0x3c4   :  { %2964 = vmatprep.subr.bf16.mxu1 %v2418_v23  ;;  %v2482_v23 = vunpack.c.h.s8.bf16 %v1586_v27  ;;  %v1618_v27 = vld [vmem:[#allocation10 + $0xcc8] sm:$0xff] }
 0x3c6   :  { %3293 = vmatpush1.bf16.msra.mxu0 %v2419_v15  ;;  %v2483_v15 = vunpack.c.h.s8.bf16 %v1587_v54  ;;  %v1619_v54 = vld [vmem:[#allocation10 + $0xcd0] sm:$0xff] }
 0x3c7   :  { %2965 = vmatpush1.bf16.msra.mxu1 %v2417_v56  ;;  %3294 = vmatprep.subr.bf16.mxu0 %v2428_v63  ;;  %v2481_v56 = vunpack.c.h.s8.bf16 %v1585_v26  ;;  %v2492_v63 = vunpack.c.l.s8.bf16 %v1596_v0  ;;  %v1617_v26 = vld [vmem:[#allocation10 + $0xcc0] sm:$0xff] }
 0x3c8   :  { %2966 = vmatprep.subr.bf16.mxu1 %v2426_v38  ;;  %v2490_v38 = vunpack.c.l.s8.bf16 %v1594_v41 }
 0x3ca   :  { %3295 = vmatpush1.bf16.msra.mxu0 %v2427_v12  ;;  %v6758_v12 = vpack.c.bf16 %v6688_v45, %v6688_v45  ;;  %v2499_v45 = vunpack.c.h.s8.bf16 %v1595_v48 }
 0x3cb   :  { %2967 = vmatpush1.bf16.msra.mxu1 %v2425_v11  ;;  %3296 = vmatprep.subr.bf16.mxu0 %v2436_v36  ;;  %v2489_v11 = vunpack.c.l.s8.bf16 %v1593_v25  ;;  %v2498_v36 = vunpack.c.h.s8.bf16 %v1594_v41  ;;  %v1626_v41 = vld [vmem:[#allocation10 + $0xd08] sm:$0xff] }
 0x3cc   :  { %2968 = vmatprep.subr.bf16.mxu1 %v2434_v24  ;;  %v2491_v24 = vunpack.c.l.s8.bf16 %v1595_v48  ;;  %v1627_v48 = vld [vmem:[#allocation10 + $0xd10] sm:$0xff] }
 0x3ce   :  { %3297 = vmatpush1.bf16.msra.mxu0 %v2435_v32  ;;  %v1604_v32 = vld [vmem:[#allocation10 + $0xc58] sm:$0xff] }
 0x3cf   :  { %2969 = vmatpush1.bf16.msra.mxu1 %v2433_v46  ;;  %3298 = vmatprep.subr.bf16.mxu0 %v2444_v19  ;;  %v2500_v46 = vunpack.c.h.s8.bf16 %v1596_v0  ;;  %v1601_v19 = vld [vmem:[#allocation10 + $0xc40] sm:$0xff]  ;;  %v2508_v30 = vunpack.c.l.s8.bf16 %v1604_v32  ;;  %v1628_v0 = vld [vmem:[#allocation10 + $0xd18] sm:$0xff] }
 0x3d0   :  { %2970 = vmatprep.subr.bf16.mxu1 %v2442_v6  ;;  %v2497_v6 = vunpack.c.h.s8.bf16 %v1593_v25  ;;  %v2505_v57 = vunpack.c.l.s8.bf16 %v1601_v19  ;;  %v1625_v25 = vld [vmem:[#allocation10 + $0xd00] sm:$0xff] }
 0x3d2   :  { %3299 = vmatpush1.bf16.msra.mxu0 %v2443_v4 }
 0x3d3   :  { %2971 = vmatpush1.bf16.msra.mxu1 %v2441_v31  ;;  %3300 = vmatprep.subr.bf16.mxu0 %v2452_v60  ;;  %v1603_v31 = vld [vmem:[#allocation10 + $0xc50] sm:$0xff]  ;;  %v2516_v60 = vunpack.c.h.s8.bf16 %v1604_v32  ;;  %v1636_v32 = vld [vmem:[#allocation10 + $0xd58] sm:$0xff] }
 0x3d4   :  { %2972 = vmatprep.subr.bf16.mxu1 %v2450_v20  ;;  %v2507_v4 = vunpack.c.l.s8.bf16 %v1603_v31  ;;  %v2514_v20 = vunpack.c.h.s8.bf16 %v1602_v10  ;;  %v2564_v10 = vunpack.c.h.s8.bf16 %v1628_v0 }
 0x3d6   :  { %3301 = vmatpush1.bf16.msra.mxu0 %v2451_v52  ;;  %v2515_v52 = vunpack.c.h.s8.bf16 %v1603_v31  ;;  %v1635_v31 = vld [vmem:[#allocation10 + $0xd50] sm:$0xff] }
 0x3d7   :  { %2973 = vmatpush1.bf16.msra.mxu1 %v2449_v62  ;;  %3302 = vmatprep.subr.bf16.mxu0 %v2460_v16  ;;  %v2513_v62 = vunpack.c.h.s8.bf16 %v1601_v19  ;;  %v2524_v16 = vunpack.c.l.s8.bf16 %v1612_v1  ;;  %v1633_v19 = vld [vmem:[#allocation10 + $0xd40] sm:$0xff] }
 0x3d8   :  { %2974 = vmatprep.subr.bf16.mxu1 %v2458_v8  ;;  %v2522_v8 = vunpack.c.l.s8.bf16 %v1610_v43 }
 0x3da   :  { %3303 = vmatpush1.bf16.msra.mxu0 %v2459_v21  ;;  %v2523_v21 = vunpack.c.l.s8.bf16 %v1611_v61 }
 0x3db   :  { %2975 = vmatpush1.bf16.msra.mxu1 %v2457_v9  ;;  %3304 = vmatprep.subr.bf16.mxu0 %v2468_v39  ;;  %v2521_v9 = vunpack.c.l.s8.bf16 %v1609_v17  ;;  %v2532_v39 = vunpack.c.h.s8.bf16 %v1612_v1  ;;  %v1644_v1 = vld [vmem:[#allocation10 + $0xd98] sm:$0xff] }
 0x3dc   :  { %2976 = vmatprep.subr.bf16.mxu1 %v2466_v5  ;;  %v2530_v5 = vunpack.c.h.s8.bf16 %v1610_v43  ;;  %v1642_v43 = vld [vmem:[#allocation10 + $0xd88] sm:$0xff] }
 0x3de   :  { %3305 = vmatpush1.bf16.msra.mxu0 %v2467_v49  ;;  %v2531_v49 = vunpack.c.h.s8.bf16 %v1611_v61  ;;  %v1643_v61 = vld [vmem:[#allocation10 + $0xd90] sm:$0xff] }
 0x3df   :  { %2977 = vmatpush1.bf16.msra.mxu1 %v2465_v14  ;;  %3306 = vmatprep.subr.bf16.mxu0 %v2476_v58  ;;  %v2529_v14 = vunpack.c.h.s8.bf16 %v1609_v17  ;;  %v2540_v58 = vunpack.c.l.s8.bf16 %v1620_v34  ;;  %v1641_v17 = vld [vmem:[#allocation10 + $0xd80] sm:$0xff] }
 0x3e0   :  { %2978 = vmatprep.subr.bf16.mxu1 %v2474_v47  ;;  %v2538_v47 = vunpack.c.l.s8.bf16 %v1618_v27 }
 0x3e2   :  { %3307 = vmatpush1.bf16.msra.mxu0 %v2475_v22  ;;  %v2539_v22 = vunpack.c.l.s8.bf16 %v1619_v54 }
 0x3e3   :  { %2979 = vmatpush1.bf16.msra.mxu1 %v2473_v55  ;;  %3308 = vmatprep.subr.bf16.mxu0 %v2484_v7  ;;  %v2537_v55 = vunpack.c.l.s8.bf16 %v1617_v26  ;;  %v2548_v7 = vunpack.c.h.s8.bf16 %v1620_v34  ;;  %v1652_v34 = vld [vmem:[#allocation10 + $0xdd8] sm:$0xff] }
 0x3e4   :  { %2980 = vmatprep.subr.bf16.mxu1 %v2482_v23  ;;  %v2546_v23 = vunpack.c.h.s8.bf16 %v1618_v27  ;;  %v1650_v27 = vld [vmem:[#allocation10 + $0xdc8] sm:$0xff] }
 0x3e6   :  { %3309 = vmatpush1.bf16.msra.mxu0 %v2483_v15  ;;  %v2547_v15 = vunpack.c.h.s8.bf16 %v1619_v54  ;;  %v1651_v54 = vld [vmem:[#allocation10 + $0xdd0] sm:$0xff] }
 0x3e7   :  { %2981 = vmatpush1.bf16.msra.mxu1 %v2481_v56  ;;  %3319 = vmatprep.subr.bf16.mxu0 %v2492_v63  ;;  %v2545_v56 = vunpack.c.h.s8.bf16 %v1617_v26  ;;  %v2556_v63 = vunpack.c.l.s8.bf16 %v1628_v0  ;;  %v1649_v26 = vld [vmem:[#allocation10 + $0xdc0] sm:$0xff]  ;;  %v1660_v0 = vld [vmem:[#allocation10 + $0xe18] sm:$0xff] }
 0x3e8   :  { %2991 = vmatprep.subr.bf16.mxu1 %v2490_v38  ;;  %v2554_v38 = vunpack.c.l.s8.bf16 %v1626_v41 }
 0x3e9   :  { %3311 = vmatmul.mubr.bf16.vlgmr.msra.gmra.mrb[8].mxu0 %v6758_v12 }
 0x3ea   :  { %2983 = vmatmul.mubr.bf16.vlgmr.msra.gmra.mrb[0].mxu1 %v6758_v12  ;;  %3320 = vmatpush1.bf16.msra.mxu0 %v2491_v24  ;;  %v2555_v24 = vunpack.c.l.s8.bf16 %v1627_v48 }
 0x3eb   :  { %2992 = vmatpush1.bf16.msra.mxu1 %v2489_v11  ;;  %3023 = vmatprep.mubr.bf16.mxu1 %v6763_v29  ;;  %v2553_v11 = vunpack.c.l.s8.bf16 %v1625_v25 }
 0x3ec   :  { %3351 = vmatprep.mubr.bf16.mxu0 %v6763_v29  ;;  %2993 = vmatprep.subr.bf16.mxu1 %v2498_v36  ;;  %v2562_v36 = vunpack.c.h.s8.bf16 %v1626_v41  ;;  %v1658_v41 = vld [vmem:[#allocation10 + $0xe08] sm:$0xff] }
 0x3ed   :  { %3321 = vmatprep.subr.bf16.mxu0 %v2500_v46  ;;  %v1634_v46 = vld [vmem:[#allocation10 + $0xd48] sm:$0xff] }
 0x3ee   :  { %3322 = vmatpush1.bf16.msra.mxu0 %v2499_v45  ;;  %v2563_v45 = vunpack.c.h.s8.bf16 %v1627_v48  ;;  %v1659_v48 = vld [vmem:[#allocation10 + $0xe10] sm:$0xff] }
 0x3ef   :  { %2994 = vmatpush1.bf16.msra.mxu1 %v2497_v6  ;;  %3323 = vmatprep.subr.bf16.mxu0 %v2508_v30  ;;  %v2561_v6 = vunpack.c.h.s8.bf16 %v1625_v25  ;;  %v2572_v30 = vunpack.c.l.s8.bf16 %v1636_v32  ;;  %v1657_v25 = vld [vmem:[#allocation10 + $0xe00] sm:$0xff] }
 0x3f0   :  { %2995 = vmatprep.subr.bf16.mxu1 %v2506_v35  ;;  %v2570_v35 = vunpack.c.l.s8.bf16 %v1634_v46 }
 0x3f2   :  { %3324 = vmatpush1.bf16.msra.mxu0 %v2507_v4  ;;  %v2571_v4 = vunpack.c.l.s8.bf16 %v1635_v31 }
 0x3f3   :  { %2996 = vmatpush1.bf16.msra.mxu1 %v2505_v57  ;;  %3325 = vmatprep.subr.bf16.mxu0 %v2516_v60  ;;  %v2569_v57 = vunpack.c.l.s8.bf16 %v1633_v19  ;;  %v2580_v60 = vunpack.c.h.s8.bf16 %v1636_v32  ;;  %v6775_v32 = vpack.c.bf16 %v6702_v2, %v6702_v2 }
 0x3f4   :  { %2997 = vmatprep.subr.bf16.mxu1 %v2514_v20  ;;  %v2578_v20 = vunpack.c.h.s8.bf16 %v1634_v46  ;;  %v1666_v46 = vld [vmem:[#allocation10 + $0xe48] sm:$0xff] }
 0x3f6   :  { %3326 = vmatpush1.bf16.msra.mxu0 %v2515_v52  ;;  %v2579_v52 = vunpack.c.h.s8.bf16 %v1635_v31 }
 0x3f7   :  { %2998 = vmatpush1.bf16.msra.mxu1 %v2513_v62  ;;  %3327 = vmatprep.subr.bf16.mxu0 %v2524_v16  ;;  %v2577_v62 = vunpack.c.h.s8.bf16 %v1633_v19  ;;  %v2588_v16 = vunpack.c.l.s8.bf16 %v1644_v1  ;;  %v2634_v19 = vunpack.c.l.s8.bf16 %v1666_v46 }
 0x3f8   :  { %2999 = vmatprep.subr.bf16.mxu1 %v2522_v8  ;;  %v2586_v8 = vunpack.c.l.s8.bf16 %v1642_v43 }
 0x3fa   :  { %3328 = vmatpush1.bf16.msra.mxu0 %v2523_v21  ;;  %v2587_v21 = vunpack.c.l.s8.bf16 %v1643_v61 }
 0x3fb   :  { %3000 = vmatpush1.bf16.msra.mxu1 %v2521_v9  ;;  %3329 = vmatprep.subr.bf16.mxu0 %v2532_v39  ;;  %v2585_v9 = vunpack.c.l.s8.bf16 %v1641_v17  ;;  %v2596_v39 = vunpack.c.h.s8.bf16 %v1644_v1  ;;  %v1676_v1 = vld [vmem:[#allocation10 + $0xe98] sm:$0xff] }
 0x3fc   :  { %3001 = vmatprep.subr.bf16.mxu1 %v2530_v5  ;;  %v2594_v5 = vunpack.c.h.s8.bf16 %v1642_v43  ;;  %v1674_v43 = vld [vmem:[#allocation10 + $0xe88] sm:$0xff] }
 0x3fe   :  { %3330 = vmatpush1.bf16.msra.mxu0 %v2531_v49  ;;  %v2595_v49 = vunpack.c.h.s8.bf16 %v1643_v61  ;;  %v1675_v61 = vld [vmem:[#allocation10 + $0xe90] sm:$0xff] }
 0x3ff   :  { %3002 = vmatpush1.bf16.msra.mxu1 %v2529_v14  ;;  %3331 = vmatprep.subr.bf16.mxu0 %v2540_v58  ;;  %v2593_v14 = vunpack.c.h.s8.bf16 %v1641_v17  ;;  %v2604_v58 = vunpack.c.l.s8.bf16 %v1652_v34  ;;  %v1673_v17 = vld [vmem:[#allocation10 + $0xe80] sm:$0xff] }
 0x400   :  { %3003 = vmatprep.subr.bf16.mxu1 %v2538_v47  ;;  %v2602_v47 = vunpack.c.l.s8.bf16 %v1650_v27 }
 0x402   :  { %3332 = vmatpush1.bf16.msra.mxu0 %v2539_v22  ;;  %v2603_v22 = vunpack.c.l.s8.bf16 %v1651_v54 }
 0x403   :  { %3004 = vmatpush1.bf16.msra.mxu1 %v2537_v55  ;;  %3333 = vmatprep.subr.bf16.mxu0 %v2548_v7  ;;  %v2601_v55 = vunpack.c.l.s8.bf16 %v1649_v26  ;;  %v2612_v7 = vunpack.c.h.s8.bf16 %v1652_v34  ;;  %v1684_v34 = vld [vmem:[#allocation10 + $0xed8] sm:$0xff] }
 0x404   :  { %3005 = vmatprep.subr.bf16.mxu1 %v2546_v23  ;;  %v2610_v23 = vunpack.c.h.s8.bf16 %v1650_v27  ;;  %v1682_v27 = vld [vmem:[#allocation10 + $0xec8] sm:$0xff] }
 0x406   :  { %3334 = vmatpush1.bf16.msra.mxu0 %v2547_v15  ;;  %v2611_v15 = vunpack.c.h.s8.bf16 %v1651_v54  ;;  %v1683_v54 = vld [vmem:[#allocation10 + $0xed0] sm:$0xff] }
 0x407   :  { %3006 = vmatpush1.bf16.msra.mxu1 %v2545_v56  ;;  %3335 = vmatprep.subr.bf16.mxu0 %v2556_v63  ;;  %v2609_v56 = vunpack.c.h.s8.bf16 %v1649_v26  ;;  %v2620_v63 = vunpack.c.l.s8.bf16 %v1660_v0  ;;  %v1681_v26 = vld [vmem:[#allocation10 + $0xec0] sm:$0xff] }
 0x408   :  { %3007 = vmatprep.subr.bf16.mxu1 %v2554_v38  ;;  %v2618_v38 = vunpack.c.l.s8.bf16 %v1658_v41 }
 0x40a   :  { %3336 = vmatpush1.bf16.msra.mxu0 %v2555_v24  ;;  %v6770_v24 = vpack.c.bf16 %v6699_v40, %v6699_v40  ;;  %v2627_v40 = vunpack.c.h.s8.bf16 %v1659_v48 }
 0x40b   :  { %3008 = vmatpush1.bf16.msra.mxu1 %v2553_v11  ;;  %3337 = vmatprep.subr.bf16.mxu0 %v2564_v10  ;;  %v2617_v11 = vunpack.c.l.s8.bf16 %v1657_v25  ;;  %v2626_v10 = vunpack.c.h.s8.bf16 %v1658_v41  ;;  %v1690_v41 = vld [vmem:[#allocation10 + $0xf08] sm:$0xff] }
 0x40c   :  { %3009 = vmatprep.subr.bf16.mxu1 %v2562_v36  ;;  %v2619_v36 = vunpack.c.l.s8.bf16 %v1659_v48  ;;  %v1691_v48 = vld [vmem:[#allocation10 + $0xf10] sm:$0xff] }
 0x40e   :  { %3338 = vmatpush1.bf16.msra.mxu0 %v2563_v45  ;;  %v1668_v45 = vld [vmem:[#allocation10 + $0xe58] sm:$0xff] }
 0x40f   :  { %3010 = vmatpush1.bf16.msra.mxu1 %v2561_v6  ;;  %3339 = vmatprep.subr.bf16.mxu0 %v2572_v30  ;;  %v2628_v6 = vunpack.c.h.s8.bf16 %v1660_v0  ;;  %v1665_v30 = vld [vmem:[#allocation10 + $0xe40] sm:$0xff]  ;;  %v2636_v31 = vunpack.c.l.s8.bf16 %v1668_v45  ;;  %v1692_v0 = vld [vmem:[#allocation10 + $0xf18] sm:$0xff] }
 0x410   :  { %3011 = vmatprep.subr.bf16.mxu1 %v2570_v35  ;;  %v2625_v35 = vunpack.c.h.s8.bf16 %v1657_v25  ;;  %v2633_v2 = vunpack.c.l.s8.bf16 %v1665_v30  ;;  %v1689_v25 = vld [vmem:[#allocation10 + $0xf00] sm:$0xff] }
 0x412   :  { %3340 = vmatpush1.bf16.msra.mxu0 %v2571_v4 }
 0x413   :  { %3012 = vmatpush1.bf16.msra.mxu1 %v2569_v57  ;;  %3341 = vmatprep.subr.bf16.mxu0 %v2580_v60  ;;  %v1667_v57 = vld [vmem:[#allocation10 + $0xe50] sm:$0xff]  ;;  %v2644_v60 = vunpack.c.h.s8.bf16 %v1668_v45  ;;  %v1700_v45 = vld [vmem:[#allocation10 + $0xf58] sm:$0xff] }
 0x414   :  { %3013 = vmatprep.subr.bf16.mxu1 %v2578_v20  ;;  %v2635_v4 = vunpack.c.l.s8.bf16 %v1667_v57  ;;  %v2642_v20 = vunpack.c.h.s8.bf16 %v1666_v46  ;;  %v2692_v46 = vunpack.c.h.s8.bf16 %v1692_v0 }
 0x416   :  { %3342 = vmatpush1.bf16.msra.mxu0 %v2579_v52  ;;  %v2643_v52 = vunpack.c.h.s8.bf16 %v1667_v57  ;;  %v1699_v57 = vld [vmem:[#allocation10 + $0xf50] sm:$0xff] }
 0x417   :  { %3014 = vmatpush1.bf16.msra.mxu1 %v2577_v62  ;;  %3343 = vmatprep.subr.bf16.mxu0 %v2588_v16  ;;  %v2641_v62 = vunpack.c.h.s8.bf16 %v1665_v30  ;;  %v2652_v16 = vunpack.c.l.s8.bf16 %v1676_v1  ;;  %v1697_v30 = vld [vmem:[#allocation10 + $0xf40] sm:$0xff] }
 0x418   :  { %3015 = vmatprep.subr.bf16.mxu1 %v2586_v8  ;;  %v2650_v8 = vunpack.c.l.s8.bf16 %v1674_v43 }
 0x41a   :  { %3344 = vmatpush1.bf16.msra.mxu0 %v2587_v21  ;;  %v2651_v21 = vunpack.c.l.s8.bf16 %v1675_v61 }
 0x41b   :  { %3016 = vmatpush1.bf16.msra.mxu1 %v2585_v9  ;;  %3345 = vmatprep.subr.bf16.mxu0 %v2596_v39  ;;  %v2649_v9 = vunpack.c.l.s8.bf16 %v1673_v17  ;;  %v2660_v39 = vunpack.c.h.s8.bf16 %v1676_v1  ;;  %v1708_v1 = vld [vmem:[#allocation10 + $0xf98] sm:$0xff] }
 0x41c   :  { %3017 = vmatprep.subr.bf16.mxu1 %v2594_v5  ;;  %v2658_v5 = vunpack.c.h.s8.bf16 %v1674_v43  ;;  %v1706_v43 = vld [vmem:[#allocation10 + $0xf88] sm:$0xff] }
 0x41e   :  { %3346 = vmatpush1.bf16.msra.mxu0 %v2595_v49  ;;  %v2659_v49 = vunpack.c.h.s8.bf16 %v1675_v61  ;;  %v1707_v61 = vld [vmem:[#allocation10 + $0xf90] sm:$0xff] }
 0x41f   :  { %3018 = vmatpush1.bf16.msra.mxu1 %v2593_v14  ;;  %3347 = vmatprep.subr.bf16.mxu0 %v2604_v58  ;;  %v2657_v14 = vunpack.c.h.s8.bf16 %v1673_v17  ;;  %v2668_v58 = vunpack.c.l.s8.bf16 %v1684_v34  ;;  %v1705_v17 = vld [vmem:[#allocation10 + $0xf80] sm:$0xff] }
 0x420   :  { %3019 = vmatprep.subr.bf16.mxu1 %v2602_v47  ;;  %v2666_v47 = vunpack.c.l.s8.bf16 %v1682_v27 }
 0x422   :  { %3348 = vmatpush1.bf16.msra.mxu0 %v2603_v22  ;;  %v2667_v22 = vunpack.c.l.s8.bf16 %v1683_v54 }
 0x423   :  { %3020 = vmatpush1.bf16.msra.mxu1 %v2601_v55  ;;  %3349 = vmatprep.subr.bf16.mxu0 %v2612_v7  ;;  %v2665_v55 = vunpack.c.l.s8.bf16 %v1681_v26  ;;  %v2676_v7 = vunpack.c.h.s8.bf16 %v1684_v34  ;;  %v1716_v34 = vld [vmem:[#allocation10 + $0xfd8] sm:$0xff] }
 0x424   :  { %3021 = vmatprep.subr.bf16.mxu1 %v2610_v23  ;;  %v2674_v23 = vunpack.c.h.s8.bf16 %v1682_v27  ;;  %v1714_v27 = vld [vmem:[#allocation10 + $0xfc8] sm:$0xff] }
 0x426   :  { %3350 = vmatpush1.bf16.msra.mxu0 %v2611_v15  ;;  %v2675_v15 = vunpack.c.h.s8.bf16 %v1683_v54  ;;  %v1715_v54 = vld [vmem:[#allocation10 + $0xfd0] sm:$0xff] }
 0x427   :  { %3022 = vmatpush1.bf16.msra.mxu1 %v2609_v56  ;;  %3360 = vmatprep.subr.bf16.mxu0 %v2620_v63  ;;  %v2673_v56 = vunpack.c.h.s8.bf16 %v1681_v26  ;;  %v2684_v63 = vunpack.c.l.s8.bf16 %v1692_v0  ;;  %v1713_v26 = vld [vmem:[#allocation10 + $0xfc0] sm:$0xff]  ;;  %v1216_v0 = vld [vmem:[#allocation10 + $0x38] sm:$0xff] }
 0x428   :  { %3032 = vmatprep.subr.bf16.mxu1 %v2618_v38  ;;  %v2682_v38 = vunpack.c.l.s8.bf16 %v1690_v41 }
 0x429   :  { %3352 = vmatmul.mubr.bf16.vlgmr.msra.gmra.mrb[8].mxu0 %v6770_v24 }
 0x42a   :  { %3024 = vmatmul.mubr.bf16.vlgmr.msra.gmra.mrb[0].mxu1 %v6770_v24  ;;  %3361 = vmatpush1.bf16.msra.mxu0 %v2619_v36  ;;  %v2683_v36 = vunpack.c.l.s8.bf16 %v1691_v48 }
 0x42b   :  { %3033 = vmatpush1.bf16.msra.mxu1 %v2617_v11  ;;  %3064 = vmatprep.mubr.bf16.mxu1 %v6775_v32  ;;  %v2681_v11 = vunpack.c.l.s8.bf16 %v1689_v25 }
 0x42c   :  { %3392 = vmatprep.mubr.bf16.mxu0 %v6775_v32  ;;  %3034 = vmatprep.subr.bf16.mxu1 %v2626_v10  ;;  %v2690_v10 = vunpack.c.h.s8.bf16 %v1690_v41  ;;  %v1214_v41 = vld [vmem:[#allocation10 + $0x28] sm:$0xff] }
 0x42d   :  { %3362 = vmatprep.subr.bf16.mxu0 %v2628_v6  ;;  %v1698_v6 = vld [vmem:[#allocation10 + $0xf48] sm:$0xff] }
 0x42e   :  { %3363 = vmatpush1.bf16.msra.mxu0 %v2627_v40  ;;  %v2691_v40 = vunpack.c.h.s8.bf16 %v1691_v48  ;;  %v1215_v48 = vld [vmem:[#allocation10 + $0x30] sm:$0xff] }
 0x42f   :  { %3035 = vmatpush1.bf16.msra.mxu1 %v2625_v35  ;;  %3364 = vmatprep.subr.bf16.mxu0 %v2636_v31  ;;  %v2689_v35 = vunpack.c.h.s8.bf16 %v1689_v25  ;;  %v2700_v31 = vunpack.c.l.s8.bf16 %v1700_v45  ;;  %v1213_v25 = vld [vmem:[#allocation10 + $0x20] sm:$0xff] }
 0x430   :  { %3036 = vmatprep.subr.bf16.mxu1 %v2634_v19  ;;  %v2698_v19 = vunpack.c.l.s8.bf16 %v1698_v6 }
 0x432   :  { %3365 = vmatpush1.bf16.msra.mxu0 %v2635_v4  ;;  %v2699_v4 = vunpack.c.l.s8.bf16 %v1699_v57 }
 0x433   :  { %3037 = vmatpush1.bf16.msra.mxu1 %v2633_v2  ;;  %3366 = vmatprep.subr.bf16.mxu0 %v2644_v60  ;;  %v2697_v2 = vunpack.c.l.s8.bf16 %v1697_v30  ;;  %v2708_v60 = vunpack.c.h.s8.bf16 %v1700_v45  ;;  %v1736_v45 = vunpack.c.h.s8.bf16 %v1216_v0 }
 0x434   :  { %3038 = vmatprep.subr.bf16.mxu1 %v2642_v20  ;;  %v2706_v20 = vunpack.c.h.s8.bf16 %v1698_v6  ;;  %v1222_v6 = vld [vmem:[#allocation10 + $0x68] sm:$0xff] }
 0x436   :  { %3367 = vmatpush1.bf16.msra.mxu0 %v2643_v52  ;;  %v2707_v52 = vunpack.c.h.s8.bf16 %v1699_v57  ;;  %v1223_v57 = vld [vmem:[#allocation10 + $0x70] sm:$0xff] }
 0x437   :  { %3039 = vmatpush1.bf16.msra.mxu1 %v2641_v62  ;;  %3368 = vmatprep.subr.bf16.mxu0 %v2652_v16  ;;  %v2705_v62 = vunpack.c.h.s8.bf16 %v1697_v30  ;;  %v2716_v16 = vunpack.c.l.s8.bf16 %v1708_v1  ;;  %v1742_v30 = vunpack.c.l.s8.bf16 %v1222_v6 }
 0x438   :  { %3040 = vmatprep.subr.bf16.mxu1 %v2650_v8  ;;  %v2714_v8 = vunpack.c.l.s8.bf16 %v1706_v43 }
 0x43a   :  { %3369 = vmatpush1.bf16.msra.mxu0 %v2651_v21  ;;  %v2715_v21 = vunpack.c.l.s8.bf16 %v1707_v61 }
 0x43b   :  { %3041 = vmatpush1.bf16.msra.mxu1 %v2649_v9  ;;  %3370 = vmatprep.subr.bf16.mxu0 %v2660_v39  ;;  %v2713_v9 = vunpack.c.l.s8.bf16 %v1705_v17  ;;  %v2724_v39 = vunpack.c.h.s8.bf16 %v1708_v1  ;;  %v1232_v1 = vld [vmem:[#allocation10 + $0xb8] sm:$0xff] }
 0x43c   :  { %3042 = vmatprep.subr.bf16.mxu1 %v2658_v5  ;;  %v2722_v5 = vunpack.c.h.s8.bf16 %v1706_v43  ;;  %v1230_v43 = vld [vmem:[#allocation10 + $0xa8] sm:$0xff] }
 0x43e   :  { %3371 = vmatpush1.bf16.msra.mxu0 %v2659_v49  ;;  %v2723_v49 = vunpack.c.h.s8.bf16 %v1707_v61 }
 0x43f   :  { %3043 = vmatpush1.bf16.msra.mxu1 %v2657_v14  ;;  %3372 = vmatprep.subr.bf16.mxu0 %v2668_v58  ;;  %v2721_v14 = vunpack.c.h.s8.bf16 %v1705_v17  ;;  %v2732_v58 = vunpack.c.l.s8.bf16 %v1716_v34  ;;  %v1760_v17 = vunpack.c.l.s8.bf16 %v1232_v1 }
 0x440   :  { %3044 = vmatprep.subr.bf16.mxu1 %v2666_v47  ;;  %v2730_v47 = vunpack.c.l.s8.bf16 %v1714_v27 }
 0x442   :  { %3373 = vmatpush1.bf16.msra.mxu0 %v2667_v22  ;;  %v2731_v22 = vunpack.c.l.s8.bf16 %v1715_v54 }
 0x443   :  { %3045 = vmatpush1.bf16.msra.mxu1 %v2665_v55  ;;  %3374 = vmatprep.subr.bf16.mxu0 %v2676_v7  ;;  %v2729_v55 = vunpack.c.l.s8.bf16 %v1713_v26  ;;  %v2740_v7 = vunpack.c.h.s8.bf16 %v1716_v34 }
 0x444   :  { %3046 = vmatprep.subr.bf16.mxu1 %v2674_v23  ;;  %v2738_v23 = vunpack.c.h.s8.bf16 %v1714_v27  ;;  %v1240_v27 = vld [vmem:[#allocation10 + $0xf8] sm:$0xff] }
 0x446   :  { %3375 = vmatpush1.bf16.msra.mxu0 %v2675_v15  ;;  %v2739_v15 = vunpack.c.h.s8.bf16 %v1715_v54 }
 0x447   :  { %3047 = vmatpush1.bf16.msra.mxu1 %v2673_v56  ;;  %3376 = vmatprep.subr.bf16.mxu0 %v2684_v63  ;;  %v2737_v56 = vunpack.c.h.s8.bf16 %v1713_v26  ;;  %v1728_v63 = vunpack.c.l.s8.bf16 %v1216_v0  ;;  %v1776_v26 = vunpack.c.l.s8.bf16 %v1240_v27 }
 0x448   :  { %3048 = vmatprep.subr.bf16.mxu1 %v2682_v38  ;;  %v1726_v38 = vunpack.c.l.s8.bf16 %v1214_v41 }
 0x44a   :  { %3377 = vmatpush1.bf16.msra.mxu0 %v2683_v36  ;;  %v6782_v36 = vpack.c.bf16 %v6706_v3, %v6706_v3  ;;  %v1221_v3 = vld [vmem:[#allocation10 + $0x60] sm:$0xff] }
 0x44b   :  { %3049 = vmatpush1.bf16.msra.mxu1 %v2681_v11  ;;  %3378 = vmatprep.subr.bf16.mxu0 %v2692_v46  ;;  %v1725_v11 = vunpack.c.l.s8.bf16 %v1213_v25  ;;  %v1734_v46 = vunpack.c.h.s8.bf16 %v1214_v41  ;;  %v1248_v41 = vld [vmem:[#allocation10 + $0x138] sm:$0xff] }
 0x44c   :  { %3050 = vmatprep.subr.bf16.mxu1 %v2690_v10  ;;  %v1727_v10 = vunpack.c.l.s8.bf16 %v1215_v48 }
 0x44e   :  { %3379 = vmatpush1.bf16.msra.mxu0 %v2691_v40  ;;  %v1733_v40 = vunpack.c.h.s8.bf16 %v1213_v25  ;;  %v1792_v25 = vunpack.c.l.s8.bf16 %v1248_v41 }
 0x44f   :  { %3051 = vmatpush1.bf16.msra.mxu1 %v2689_v35  ;;  %3380 = vmatprep.subr.bf16.mxu0 %v2700_v31  ;;  %v1224_v35 = vld [vmem:[#allocation10 + $0x78] sm:$0xff] }
 0x450   :  { %3052 = vmatprep.subr.bf16.mxu1 %v2698_v19  ;;  %v1735_v19 = vunpack.c.h.s8.bf16 %v1215_v48  ;;  %v1744_v31 = vunpack.c.l.s8.bf16 %v1224_v35 }
 0x452   :  { %3381 = vmatpush1.bf16.msra.mxu0 %v2699_v4  ;;  %v1743_v4 = vunpack.c.l.s8.bf16 %v1223_v57 }
 0x453   :  { %3053 = vmatpush1.bf16.msra.mxu1 %v2697_v2  ;;  %3382 = vmatprep.subr.bf16.mxu0 %v2708_v60  ;;  %v1741_v2 = vunpack.c.l.s8.bf16 %v1221_v3  ;;  %v1752_v60 = vunpack.c.h.s8.bf16 %v1224_v35 }
 0x454   :  { %3054 = vmatprep.subr.bf16.mxu1 %v2706_v20  ;;  %v1750_v20 = vunpack.c.h.s8.bf16 %v1222_v6  ;;  %v1254_v6 = vld [vmem:[#allocation10 + $0x168] sm:$0xff] }
 0x456   :  { %3383 = vmatpush1.bf16.msra.mxu0 %v2707_v52  ;;  %v1751_v52 = vunpack.c.h.s8.bf16 %v1223_v57 }
 0x457   :  { %3055 = vmatpush1.bf16.msra.mxu1 %v2705_v62  ;;  %3384 = vmatprep.subr.bf16.mxu0 %v2716_v16  ;;  %v1749_v62 = vunpack.c.h.s8.bf16 %v1221_v3  ;;  %v1231_v16 = vld [vmem:[#allocation10 + $0xb0] sm:$0xff] }
 0x458   :  { %3056 = vmatprep.subr.bf16.mxu1 %v2714_v8  ;;  %v1229_v8 = vld [vmem:[#allocation10 + $0xa0] sm:$0xff] }
 0x459   :  { %v1757_v61 = vunpack.c.l.s8.bf16 %v1229_v8  ;;  %v1765_v34 = vunpack.c.h.s8.bf16 %v1229_v8 }
 0x45a   :  { %3385 = vmatpush1.bf16.msra.mxu0 %v2715_v21  ;;  %v1766_v21 = vunpack.c.h.s8.bf16 %v1230_v43 }
 0x45b   :  { %3057 = vmatpush1.bf16.msra.mxu1 %v2713_v9  ;;  %3386 = vmatprep.subr.bf16.mxu0 %v2724_v39  ;;  %v1759_v9 = vunpack.c.l.s8.bf16 %v1231_v16  ;;  %v1238_v39 = vld [vmem:[#allocation10 + $0xe8] sm:$0xff] }
 0x45c   :  { %3058 = vmatprep.subr.bf16.mxu1 %v2722_v5  ;;  %v1768_v5 = vunpack.c.h.s8.bf16 %v1232_v1 }
 0x45e   :  { %3387 = vmatpush1.bf16.msra.mxu0 %v2723_v49  ;;  %v1774_v49 = vunpack.c.l.s8.bf16 %v1238_v39 }
 0x45f   :  { %3059 = vmatpush1.bf16.msra.mxu1 %v2721_v14  ;;  %3388 = vmatprep.subr.bf16.mxu0 %v2732_v58  ;;  %v1767_v14 = vunpack.c.h.s8.bf16 %v1231_v16  ;;  %v1239_v58 = vld [vmem:[#allocation10 + $0xf0] sm:$0xff] }
 0x460   :  { %3060 = vmatprep.subr.bf16.mxu1 %v2730_v47  ;;  %v1237_v47 = vld [vmem:[#allocation10 + $0xe0] sm:$0xff] }
 0x461   :  { %v1773_v54 = vunpack.c.l.s8.bf16 %v1237_v47  ;;  %v1781_v0 = vunpack.c.h.s8.bf16 %v1237_v47 }
 0x462   :  { %3389 = vmatpush1.bf16.msra.mxu0 %v2731_v22  ;;  %v1782_v22 = vunpack.c.h.s8.bf16 %v1238_v39  ;;  %v1272_v39 = vld [vmem:[#allocation10 + $0x1f8] sm:$0xff] }
 0x463   :  { %3061 = vmatpush1.bf16.msra.mxu1 %v2729_v55  ;;  %3390 = vmatprep.subr.bf16.mxu0 %v2740_v7  ;;  %v1775_v55 = vunpack.c.l.s8.bf16 %v1239_v58  ;;  %v1246_v7 = vld [vmem:[#allocation10 + $0x128] sm:$0xff]  ;;  %v1840_v47 = vunpack.c.l.s8.bf16 %v1272_v39 }
 0x464   :  { %3062 = vmatprep.subr.bf16.mxu1 %v2738_v23  ;;  %v1784_v23 = vunpack.c.h.s8.bf16 %v1240_v27 }
 0x466   :  { %3391 = vmatpush1.bf16.msra.mxu0 %v2739_v15  ;;  %v1790_v15 = vunpack.c.l.s8.bf16 %v1246_v7 }
 0x467   :  { %3063 = vmatpush1.bf16.msra.mxu1 %v2737_v56  ;;  %3729 = vmatprep.subr.bf16.mxu0 %v1728_v63  ;;  %v1783_v56 = vunpack.c.h.s8.bf16 %v1239_v58  ;;  %v1247_v63 = vld [vmem:[#allocation10 + $0x130] sm:$0xff] }
 0x468   :  { %3401 = vmatprep.subr.bf16.mxu1 %v1726_v38  ;;  %v1245_v38 = vld [vmem:[#allocation10 + $0x120] sm:$0xff] }
 0x469   :  { %3393 = vmatmul.mubr.bf16.vlgmr.msra.gmra.mrb[8].mxu0 %v6782_v36  ;;  %v1789_v48 = vunpack.c.l.s8.bf16 %v1245_v38  ;;  %v1797_v35 = vunpack.c.h.s8.bf16 %v1245_v38 }
 0x46a   :  { %3065 = vmatmul.mubr.bf16.vlgmr.msra.gmra.mrb[0].mxu1 %v6782_v36  ;;  %3730 = vmatpush1.bf16.msra.mxu0 %v1727_v10  ;;  %v1798_v10 = vunpack.c.h.s8.bf16 %v1246_v7  ;;  %v1280_v7 = vld [vmem:[#allocation10 + $0x238] sm:$0xff] }
 0x46b   :  { %3402 = vmatpush1.bf16.msra.mxu1 %v1725_v11  ;;  %3433 = vmatprep.mubr.bf16.mxu1 %v6543_v37  ;;  %v1791_v11 = vunpack.c.l.s8.bf16 %v1247_v63  ;;  %v1856_v38 = vunpack.c.l.s8.bf16 %v1280_v7 }
 0x46c   :  { %3761 = vmatprep.mubr.bf16.mxu0 %v6543_v37  ;;  %3403 = vmatprep.subr.bf16.mxu1 %v1734_v46  ;;  %v1758_v37 = vunpack.c.l.s8.bf16 %v1230_v43  ;;  %v1800_v46 = vunpack.c.h.s8.bf16 %v1248_v41  ;;  %v1264_v43 = vld [vmem:[#allocation10 + $0x1b8] sm:$0xff] }
 0x46d   :  { %3731 = vmatprep.subr.bf16.mxu0 %v1736_v45  ;;  %v1256_v45 = vld [vmem:[#allocation10 + $0x178] sm:$0xff]  ;;  %v1824_v8 = vunpack.c.l.s8.bf16 %v1264_v43 }
 0x46e   :  { %3732 = vmatpush1.bf16.msra.mxu0 %v1735_v19  ;;  %v1806_v19 = vunpack.c.l.s8.bf16 %v1254_v6  ;;  %v1808_v3 = vunpack.c.l.s8.bf16 %v1256_v45 }
 0x46f   :  { %3404 = vmatpush1.bf16.msra.mxu1 %v1733_v40  ;;  %3733 = vmatprep.subr.bf16.mxu0 %v1744_v31  ;;  %v1799_v40 = vunpack.c.h.s8.bf16 %v1247_v63  ;;  %v1255_v31 = vld [vmem:[#allocation10 + $0x170] sm:$0xff] }
 0x470   :  { %3405 = vmatprep.subr.bf16.mxu1 %v1742_v30  ;;  %v1253_v30 = vld [vmem:[#allocation10 + $0x160] sm:$0xff] }
 0x471   :  { %v1805_v57 = vunpack.c.l.s8.bf16 %v1253_v30  ;;  %v1813_v1 = vunpack.c.h.s8.bf16 %v1253_v30 }
 0x472   :  { %3734 = vmatpush1.bf16.msra.mxu0 %v1743_v4  ;;  %v1814_v4 = vunpack.c.h.s8.bf16 %v1254_v6  ;;  %v1288_v6 = vld [vmem:[#allocation10 + $0x278] sm:$0xff] }
 0x473   :  { %3406 = vmatpush1.bf16.msra.mxu1 %v1741_v2  ;;  %3735 = vmatprep.subr.bf16.mxu0 %v1752_v60  ;;  %v1807_v2 = vunpack.c.l.s8.bf16 %v1255_v31  ;;  %v1262_v60 = vld [vmem:[#allocation10 + $0x1a8] sm:$0xff]  ;;  %v1872_v30 = vunpack.c.l.s8.bf16 %v1288_v6 }
 0x474   :  { %3407 = vmatprep.subr.bf16.mxu1 %v1750_v20  ;;  %v1816_v20 = vunpack.c.h.s8.bf16 %v1256_v45 }
 0x476   :  { %3736 = vmatpush1.bf16.msra.mxu0 %v1751_v52  ;;  %v1822_v52 = vunpack.c.l.s8.bf16 %v1262_v60 }
 0x477   :  { %3408 = vmatpush1.bf16.msra.mxu1 %v1749_v62  ;;  %3737 = vmatprep.subr.bf16.mxu0 %v1760_v17  ;;  %v1815_v62 = vunpack.c.h.s8.bf16 %v1255_v31  ;;  %v1263_v17 = vld [vmem:[#allocation10 + $0x1b0] sm:$0xff] }
 0x478   :  { %3409 = vmatprep.subr.bf16.mxu1 %v1758_v37  ;;  %v1261_v37 = vld [vmem:[#allocation10 + $0x1a0] sm:$0xff] }
 0x479   :  { %v1821_v16 = vunpack.c.l.s8.bf16 %v1261_v37  ;;  %v1829_v27 = vunpack.c.h.s8.bf16 %v1261_v37 }
 0x47a   :  { %3738 = vmatpush1.bf16.msra.mxu0 %v1759_v9  ;;  %v1830_v9 = vunpack.c.h.s8.bf16 %v1262_v60 }
 0x47b   :  { %3410 = vmatpush1.bf16.msra.mxu1 %v1757_v61  ;;  %3739 = vmatprep.subr.bf16.mxu0 %v1768_v5  ;;  %v1823_v61 = vunpack.c.l.s8.bf16 %v1263_v17  ;;  %v1270_v5 = vld [vmem:[#allocation10 + $0x1e8] sm:$0xff] }
 0x47c   :  { %3411 = vmatprep.subr.bf16.mxu1 %v1766_v21  ;;  %v1832_v21 = vunpack.c.h.s8.bf16 %v1264_v43 }
 0x47e   :  { %3740 = vmatpush1.bf16.msra.mxu0 %v1767_v14  ;;  %v1838_v14 = vunpack.c.l.s8.bf16 %v1270_v5 }
 0x47f   :  { %3412 = vmatpush1.bf16.msra.mxu1 %v1765_v34  ;;  %3741 = vmatprep.subr.bf16.mxu0 %v1776_v26  ;;  %v1831_v34 = vunpack.c.h.s8.bf16 %v1263_v17  ;;  %v1271_v26 = vld [vmem:[#allocation10 + $0x1f0] sm:$0xff] }
 0x480   :  { %3413 = vmatprep.subr.bf16.mxu1 %v1774_v49  ;;  %v1269_v49 = vld [vmem:[#allocation10 + $0x1e0] sm:$0xff] }
 0x481   :  { %v1837_v58 = vunpack.c.l.s8.bf16 %v1269_v49  ;;  %v1845_v41 = vunpack.c.h.s8.bf16 %v1269_v49 }
 0x482   :  { %3742 = vmatpush1.bf16.msra.mxu0 %v1775_v55  ;;  %v1846_v55 = vunpack.c.h.s8.bf16 %v1270_v5 }
 0x483   :  { %3414 = vmatpush1.bf16.msra.mxu1 %v1773_v54  ;;  %3743 = vmatprep.subr.bf16.mxu0 %v1784_v23  ;;  %v1839_v54 = vunpack.c.l.s8.bf16 %v1271_v26  ;;  %v1278_v23 = vld [vmem:[#allocation10 + $0x228] sm:$0xff] }
 0x484   :  { %3415 = vmatprep.subr.bf16.mxu1 %v1782_v22  ;;  %v1848_v22 = vunpack.c.h.s8.bf16 %v1272_v39 }
 0x486   :  { %3744 = vmatpush1.bf16.msra.mxu0 %v1783_v56  ;;  %v1854_v56 = vunpack.c.l.s8.bf16 %v1278_v23 }
 0x487   :  { %3416 = vmatpush1.bf16.msra.mxu1 %v1781_v0  ;;  %3745 = vmatprep.subr.bf16.mxu0 %v1792_v25  ;;  %v1847_v0 = vunpack.c.h.s8.bf16 %v1271_v26  ;;  %v1279_v25 = vld [vmem:[#allocation10 + $0x230] sm:$0xff] }
 0x488   :  { %3417 = vmatprep.subr.bf16.mxu1 %v1790_v15  ;;  %v1277_v15 = vld [vmem:[#allocation10 + $0x220] sm:$0xff] }
 0x489   :  { %v1853_v63 = vunpack.c.l.s8.bf16 %v1277_v15  ;;  %v1861_v45 = vunpack.c.h.s8.bf16 %v1277_v15 }
 0x48a   :  { %3746 = vmatpush1.bf16.msra.mxu0 %v1791_v11  ;;  %v1862_v11 = vunpack.c.h.s8.bf16 %v1278_v23 }
 0x48b   :  { %3418 = vmatpush1.bf16.msra.mxu1 %v1789_v48  ;;  %3747 = vmatprep.subr.bf16.mxu0 %v1800_v46  ;;  %v1855_v48 = vunpack.c.l.s8.bf16 %v1279_v25  ;;  %v1864_v46 = vunpack.c.h.s8.bf16 %v1280_v7 }
 0x48c   :  { %3419 = vmatprep.subr.bf16.mxu1 %v1798_v10  ;;  %v1286_v10 = vld [vmem:[#allocation10 + $0x268] sm:$0xff] }
 0x48e   :  { %3748 = vmatpush1.bf16.msra.mxu0 %v1799_v40  ;;  %v1870_v40 = vunpack.c.l.s8.bf16 %v1286_v10 }
 0x48f   :  { %3420 = vmatpush1.bf16.msra.mxu1 %v1797_v35  ;;  %3749 = vmatprep.subr.bf16.mxu0 %v1808_v3  ;;  %v1863_v35 = vunpack.c.h.s8.bf16 %v1279_v25  ;;  %v1287_v3 = vld [vmem:[#allocation10 + $0x270] sm:$0xff] }
 0x490   :  { %3421 = vmatprep.subr.bf16.mxu1 %v1806_v19  ;;  %v1285_v19 = vld [vmem:[#allocation10 + $0x260] sm:$0xff]  ;;  %v1879_v43 = vunpack.c.h.s8.bf16 %v1287_v3 }
 0x491   :  { %v1869_v31 = vunpack.c.l.s8.bf16 %v1285_v19  ;;  %v1877_v60 = vunpack.c.h.s8.bf16 %v1285_v19 }
 0x492   :  { %3750 = vmatpush1.bf16.msra.mxu0 %v1807_v2  ;;  %v1880_v2 = vunpack.c.h.s8.bf16 %v1288_v6 }
 0x493   :  { %3422 = vmatpush1.bf16.msra.mxu1 %v1805_v57  ;;  %3751 = vmatprep.subr.bf16.mxu0 %v1816_v20  ;;  %v1871_v57 = vunpack.c.l.s8.bf16 %v1287_v3  ;;  %v1296_v20 = vld [vmem:[#allocation10 + $0x2b8] sm:$0xff] }
 0x494   :  { %3423 = vmatprep.subr.bf16.mxu1 %v1814_v4  ;;  %v1294_v4 = vld [vmem:[#allocation10 + $0x2a8] sm:$0xff] }
 0x495   :  { %v1894_v17 = vunpack.c.h.s8.bf16 %v1294_v4 }
 0x496   :  { %3752 = vmatpush1.bf16.msra.mxu0 %v1815_v62  ;;  %v1888_v62 = vunpack.c.l.s8.bf16 %v1296_v20 }
 0x497   :  { %3424 = vmatpush1.bf16.msra.mxu1 %v1813_v1  ;;  %3753 = vmatprep.subr.bf16.mxu0 %v1824_v8  ;;  %v1293_v1 = vld [vmem:[#allocation10 + $0x2a0] sm:$0xff] }
 0x498   :  { %3425 = vmatprep.subr.bf16.mxu1 %v1822_v52  ;;  %v1295_v52 = vld [vmem:[#allocation10 + $0x2b0] sm:$0xff]  ;;  %v1885_v37 = vunpack.c.l.s8.bf16 %v1293_v1 }
 0x499   :  { %v1887_v8 = vunpack.c.l.s8.bf16 %v1295_v52  ;;  %v1895_v5 = vunpack.c.h.s8.bf16 %v1295_v52 }
 0x49a   :  { %3754 = vmatpush1.bf16.msra.mxu0 %v1823_v61  ;;  %v1302_v61 = vld [vmem:[#allocation10 + $0x2e8] sm:$0xff] }
 0x49b   :  { %3426 = vmatpush1.bf16.msra.mxu1 %v1821_v16  ;;  %3755 = vmatprep.subr.bf16.mxu0 %v1832_v21  ;;  %v1896_v16 = vunpack.c.h.s8.bf16 %v1296_v20  ;;  %v1893_v21 = vunpack.c.h.s8.bf16 %v1293_v1  ;;  %v1902_v39 = vunpack.c.l.s8.bf16 %v1302_v61  ;;  %v1910_v26 = vunpack.c.h.s8.bf16 %v1302_v61 }
 0x49c   :  { %3427 = vmatprep.subr.bf16.mxu1 %v1830_v9  ;;  %v1304_v9 = vld [vmem:[#allocation10 + $0x2f8] sm:$0xff] }
 0x49e   :  { %3756 = vmatpush1.bf16.msra.mxu0 %v1831_v34  ;;  %v1904_v34 = vunpack.c.l.s8.bf16 %v1304_v9 }
 0x49f   :  { %3428 = vmatpush1.bf16.msra.mxu1 %v1829_v27  ;;  %3757 = vmatprep.subr.bf16.mxu0 %v1840_v47  ;;  %v1301_v27 = vld [vmem:[#allocation10 + $0x2e0] sm:$0xff] }
 0x4a0   :  { %3429 = vmatprep.subr.bf16.mxu1 %v1838_v14  ;;  %v1303_v14 = vld [vmem:[#allocation10 + $0x2f0] sm:$0xff]  ;;  %v1901_v49 = vunpack.c.l.s8.bf16 %v1301_v27 }
 0x4a1   :  { %v1903_v47 = vunpack.c.l.s8.bf16 %v1303_v14  ;;  %v1911_v23 = vunpack.c.h.s8.bf16 %v1303_v14 }
 0x4a2   :  { %3758 = vmatpush1.bf16.msra.mxu0 %v1839_v54  ;;  %v1310_v54 = vld [vmem:[#allocation10 + $0x328] sm:$0xff] }
 0x4a3   :  { %3430 = vmatpush1.bf16.msra.mxu1 %v1837_v58  ;;  %3759 = vmatprep.subr.bf16.mxu0 %v1848_v22  ;;  %v1912_v58 = vunpack.c.h.s8.bf16 %v1304_v9  ;;  %v1909_v22 = vunpack.c.h.s8.bf16 %v1301_v27  ;;  %v1918_v7 = vunpack.c.l.s8.bf16 %v1310_v54  ;;  %v1926_v25 = vunpack.c.h.s8.bf16 %v1310_v54 }
 0x4a4   :  { %3431 = vmatprep.subr.bf16.mxu1 %v1846_v55  ;;  %v1312_v55 = vld [vmem:[#allocation10 + $0x338] sm:$0xff] }
 0x4a6   :  { %3760 = vmatpush1.bf16.msra.mxu0 %v1847_v0  ;;  %v1920_v0 = vunpack.c.l.s8.bf16 %v1312_v55 }
 0x4a7   :  { %3432 = vmatpush1.bf16.msra.mxu1 %v1845_v41  ;;  %3770 = vmatprep.subr.bf16.mxu0 %v1856_v38  ;;  %v1309_v41 = vld [vmem:[#allocation10 + $0x320] sm:$0xff] }
 0x4a8   :  { %3442 = vmatprep.subr.bf16.mxu1 %v1854_v56  ;;  %v1311_v56 = vld [vmem:[#allocation10 + $0x330] sm:$0xff]  ;;  %v1917_v15 = vunpack.c.l.s8.bf16 %v1309_v41 }
 0x4a9   :  { %3762 = vmatmul.mubr.bf16.vlgmr.msra.gmra.mrb[12].mxu0 %v6545_v44  ;;  %v1919_v38 = vunpack.c.l.s8.bf16 %v1311_v56 }
 0x4aa   :  { %3434 = vmatmul.mubr.bf16.vlgmr.msra.gmra.mrb[4].mxu1 %v6545_v44  ;;  %3771 = vmatpush1.bf16.msra.mxu0 %v1855_v48  ;;  %v1878_v44 = vunpack.c.h.s8.bf16 %v1286_v10  ;;  %v1318_v48 = vld [vmem:[#allocation10 + $0x368] sm:$0xff]  ;;  %v1925_v10 = vunpack.c.h.s8.bf16 %v1309_v41 }
 0x4ab   :  { %3443 = vmatpush1.bf16.msra.mxu1 %v1853_v63  ;;  %3474 = vmatprep.mubr.bf16.mxu1 %v6558_v50  ;;  %v1928_v63 = vunpack.c.h.s8.bf16 %v1312_v55  ;;  %v1934_v6 = vunpack.c.l.s8.bf16 %v1318_v48  ;;  %v1942_v3 = vunpack.c.h.s8.bf16 %v1318_v48 }
 0x4ac   :  { %3802 = vmatprep.mubr.bf16.mxu0 %v6558_v50  ;;  %3444 = vmatprep.subr.bf16.mxu1 %v1862_v11  ;;  %v1886_v50 = vunpack.c.l.s8.bf16 %v1294_v4  ;;  %v1320_v11 = vld [vmem:[#allocation10 + $0x378] sm:$0xff] }
 0x4ad   :  { %3772 = vmatprep.subr.bf16.mxu0 %v1864_v46  ;;  %v1927_v46 = vunpack.c.h.s8.bf16 %v1311_v56 }
 0x4ae   :  { %3773 = vmatpush1.bf16.msra.mxu0 %v1863_v35  ;;  %v1936_v35 = vunpack.c.l.s8.bf16 %v1320_v11 }
 0x4af   :  { %3445 = vmatpush1.bf16.msra.mxu1 %v1861_v45  ;;  %3774 = vmatprep.subr.bf16.mxu0 %v1872_v30  ;;  %v1317_v45 = vld [vmem:[#allocation10 + $0x360] sm:$0xff] }
 0x4b0   :  { %3446 = vmatprep.subr.bf16.mxu1 %v1870_v40  ;;  %v1319_v40 = vld [vmem:[#allocation10 + $0x370] sm:$0xff]  ;;  %v1933_v19 = vunpack.c.l.s8.bf16 %v1317_v45 }
 0x4b1   :  { %v1935_v30 = vunpack.c.l.s8.bf16 %v1319_v40  ;;  %v1943_v4 = vunpack.c.h.s8.bf16 %v1319_v40 }
 0x4b2   :  { %3775 = vmatpush1.bf16.msra.mxu0 %v1871_v57  ;;  %v1326_v57 = vld [vmem:[#allocation10 + $0x3a8] sm:$0xff] }
 0x4b3   :  { %3447 = vmatpush1.bf16.msra.mxu1 %v1869_v31  ;;  %3776 = vmatprep.subr.bf16.mxu0 %v1880_v2  ;;  %v1944_v31 = vunpack.c.h.s8.bf16 %v1320_v11  ;;  %v1941_v2 = vunpack.c.h.s8.bf16 %v1317_v45  ;;  %v1950_v20 = vunpack.c.l.s8.bf16 %v1326_v57  ;;  %v1958_v52 = vunpack.c.h.s8.bf16 %v1326_v57  ;;  %v1357_v57 = vld [vmem:[#allocation10 + $0x4a0] sm:$0xff] }
 0x4b4   :  { %3448 = vmatprep.subr.bf16.mxu1 %v1878_v44  ;;  %v1328_v44 = vld [vmem:[#allocation10 + $0x3b8] sm:$0xff] }
 0x4b6   :  { %3777 = vmatpush1.bf16.msra.mxu0 %v1879_v43  ;;  %v1952_v43 = vunpack.c.l.s8.bf16 %v1328_v44 }
 0x4b7   :  { %3449 = vmatpush1.bf16.msra.mxu1 %v1877_v60  ;;  %3778 = vmatprep.subr.bf16.mxu0 %v1888_v62  ;;  %v1325_v60 = vld [vmem:[#allocation10 + $0x3a0] sm:$0xff] }
 0x4b8   :  { %3450 = vmatprep.subr.bf16.mxu1 %v1886_v50  ;;  %v1327_v50 = vld [vmem:[#allocation10 + $0x3b0] sm:$0xff]  ;;  %v1949_v1 = vunpack.c.l.s8.bf16 %v1325_v60 }
 0x4b9   :  { %v1951_v62 = vunpack.c.l.s8.bf16 %v1327_v50  ;;  %v1959_v61 = vunpack.c.h.s8.bf16 %v1327_v50  ;;  %v1366_v50 = vld [vmem:[#allocation10 + $0x4e8] sm:$0xff] }
 0x4ba   :  { %3779 = vmatpush1.bf16.msra.mxu0 %v1887_v8  ;;  %v1334_v8 = vld [vmem:[#allocation10 + $0x3e8] sm:$0xff] }
 0x4bb   :  { %3451 = vmatpush1.bf16.msra.mxu1 %v1885_v37  ;;  %3780 = vmatprep.subr.bf16.mxu0 %v1896_v16  ;;  %v1960_v37 = vunpack.c.h.s8.bf16 %v1328_v44  ;;  %v1957_v16 = vunpack.c.h.s8.bf16 %v1325_v60  ;;  %v1966_v9 = vunpack.c.l.s8.bf16 %v1334_v8  ;;  %v1974_v14 = vunpack.c.h.s8.bf16 %v1334_v8  ;;  %v1365_v8 = vld [vmem:[#allocation10 + $0x4e0] sm:$0xff] }
 0x4bc   :  { %3452 = vmatprep.subr.bf16.mxu1 %v1894_v17  ;;  %v1336_v17 = vld [vmem:[#allocation10 + $0x3f8] sm:$0xff] }
 0x4be   :  { %3781 = vmatpush1.bf16.msra.mxu0 %v1895_v5  ;;  %v1968_v5 = vunpack.c.l.s8.bf16 %v1336_v17 }
 0x4bf   :  { %3453 = vmatpush1.bf16.msra.mxu1 %v1893_v21  ;;  %3782 = vmatprep.subr.bf16.mxu0 %v1904_v34  ;;  %v1333_v21 = vld [vmem:[#allocation10 + $0x3e0] sm:$0xff] }
 0x4c0   :  { %3454 = vmatprep.subr.bf16.mxu1 %v1902_v39  ;;  %v1335_v39 = vld [vmem:[#allocation10 + $0x3f0] sm:$0xff]  ;;  %v1965_v27 = vunpack.c.l.s8.bf16 %v1333_v21 }
 0x4c1   :  { %v1967_v34 = vunpack.c.l.s8.bf16 %v1335_v39  ;;  %v1975_v54 = vunpack.c.h.s8.bf16 %v1335_v39  ;;  %v1374_v39 = vld [vmem:[#allocation10 + $0x528] sm:$0xff] }
 0x4c2   :  { %3783 = vmatpush1.bf16.msra.mxu0 %v1903_v47  ;;  %v1342_v47 = vld [vmem:[#allocation10 + $0x428] sm:$0xff] }
 0x4c3   :  { %3455 = vmatpush1.bf16.msra.mxu1 %v1901_v49  ;;  %3784 = vmatprep.subr.bf16.mxu0 %v1912_v58  ;;  %v1976_v49 = vunpack.c.h.s8.bf16 %v1336_v17  ;;  %v1973_v58 = vunpack.c.h.s8.bf16 %v1333_v21  ;;  %v1982_v55 = vunpack.c.l.s8.bf16 %v1342_v47  ;;  %v1990_v56 = vunpack.c.h.s8.bf16 %v1342_v47  ;;  %v1373_v47 = vld [vmem:[#allocation10 + $0x520] sm:$0xff] }
 0x4c4   :  { %3456 = vmatprep.subr.bf16.mxu1 %v1910_v26  ;;  %v1344_v26 = vld [vmem:[#allocation10 + $0x438] sm:$0xff]  ;;  %v2038_v21 = vunpack.c.h.s8.bf16 %v1366_v50 }
 0x4c6   :  { %3785 = vmatpush1.bf16.msra.mxu0 %v1911_v23  ;;  %v1984_v23 = vunpack.c.l.s8.bf16 %v1344_v26 }
 0x4c7   :  { %3457 = vmatpush1.bf16.msra.mxu1 %v1909_v22  ;;  %3786 = vmatprep.subr.bf16.mxu0 %v1920_v0  ;;  %v1341_v22 = vld [vmem:[#allocation10 + $0x420] sm:$0xff] }
 0x4c8   :  { %3458 = vmatprep.subr.bf16.mxu1 %v1918_v7  ;;  %v1343_v7 = vld [vmem:[#allocation10 + $0x430] sm:$0xff]  ;;  %v1981_v41 = vunpack.c.l.s8.bf16 %v1341_v22 }
 0x4c9   :  { %v1983_v0 = vunpack.c.l.s8.bf16 %v1343_v7  ;;  %v1991_v48 = vunpack.c.h.s8.bf16 %v1343_v7  ;;  %v1382_v7 = vld [vmem:[#allocation10 + $0x568] sm:$0xff] }
 0x4ca   :  { %3787 = vmatpush1.bf16.msra.mxu0 %v1919_v38  ;;  %v1992_v38 = vunpack.c.h.s8.bf16 %v1344_v26 }
 0x4cb   :  { %3459 = vmatpush1.bf16.msra.mxu1 %v1917_v15  ;;  %3788 = vmatprep.subr.bf16.mxu0 %v1928_v63  ;;  %v1350_v15 = vld [vmem:[#allocation10 + $0x468] sm:$0xff]  ;;  %v1989_v63 = vunpack.c.h.s8.bf16 %v1341_v22  ;;  %v2054_v22 = vunpack.c.h.s8.bf16 %v1374_v39 }
 0x4cc   :  { %3460 = vmatprep.subr.bf16.mxu1 %v1926_v25  ;;  %v1352_v25 = vld [vmem:[#allocation10 + $0x478] sm:$0xff]  ;;  %v1998_v11 = vunpack.c.l.s8.bf16 %v1350_v15 }
 0x4cd   :  { %v2008_v40 = vunpack.c.h.s8.bf16 %v1352_v25 }
 0x4ce   :  { %3789 = vmatpush1.bf16.msra.mxu0 %v1927_v46  ;;  %v2000_v46 = vunpack.c.l.s8.bf16 %v1352_v25 }
 0x4cf   :  { %3461 = vmatpush1.bf16.msra.mxu1 %v1925_v10  ;;  %3790 = vmatprep.subr.bf16.mxu0 %v1936_v35  ;;  %v1349_v10 = vld [vmem:[#allocation10 + $0x460] sm:$0xff] }
 0x4d0   :  { %3462 = vmatprep.subr.bf16.mxu1 %v1934_v6  ;;  %v1351_v6 = vld [vmem:[#allocation10 + $0x470] sm:$0xff]  ;;  %v1997_v45 = vunpack.c.l.s8.bf16 %v1349_v10 }
 0x4d1   :  { %v1999_v35 = vunpack.c.l.s8.bf16 %v1351_v6 }
 0x4d2   :  { %3791 = vmatpush1.bf16.msra.mxu0 %v1935_v30  ;;  %v1360_v30 = vld [vmem:[#allocation10 + $0x4b8] sm:$0xff] }
 0x4d3   :  { %3463 = vmatpush1.bf16.msra.mxu1 %v1933_v19  ;;  %3792 = vmatprep.subr.bf16.mxu0 %v1944_v31  ;;  %v1358_v19 = vld [vmem:[#allocation10 + $0x4a8] sm:$0xff]  ;;  %v2007_v31 = vunpack.c.h.s8.bf16 %v1351_v6  ;;  %v2016_v44 = vunpack.c.l.s8.bf16 %v1360_v30 }
 0x4d4   :  { %3464 = vmatprep.subr.bf16.mxu1 %v1942_v3  ;;  %v2005_v3 = vunpack.c.h.s8.bf16 %v1349_v10  ;;  %v2022_v60 = vunpack.c.h.s8.bf16 %v1358_v19  ;;  %v2070_v10 = vunpack.c.h.s8.bf16 %v1382_v7  ;;  %v1390_v6 = vld [vmem:[#allocation10 + $0x5a8] sm:$0xff] }
 0x4d6   :  { %3793 = vmatpush1.bf16.msra.mxu0 %v1943_v4  ;;  %v2013_v4 = vunpack.c.l.s8.bf16 %v1357_v57 }
 0x4d7   :  { %3465 = vmatpush1.bf16.msra.mxu1 %v1941_v2  ;;  %3794 = vmatprep.subr.bf16.mxu0 %v1952_v43  ;;  %v1359_v2 = vld [vmem:[#allocation10 + $0x4b0] sm:$0xff]  ;;  %v2024_v43 = vunpack.c.h.s8.bf16 %v1360_v30 }
 0x4d8   :  { %3466 = vmatprep.subr.bf16.mxu1 %v1950_v20  ;;  %v2015_v20 = vunpack.c.l.s8.bf16 %v1359_v2 }
 0x4da   :  { %3795 = vmatpush1.bf16.msra.mxu0 %v1951_v62  ;;  %v2021_v62 = vunpack.c.h.s8.bf16 %v1357_v57  ;;  %v2086_v57 = vunpack.c.h.s8.bf16 %v1390_v6 }
 0x4db   :  { %3467 = vmatpush1.bf16.msra.mxu1 %v1949_v1  ;;  %3796 = vmatprep.subr.bf16.mxu0 %v1960_v37  ;;  %v1368_v1 = vld [vmem:[#allocation10 + $0x4f8] sm:$0xff]  ;;  %v2030_v37 = vunpack.c.l.s8.bf16 %v1366_v50  ;;  %v1397_v50 = vld [vmem:[#allocation10 + $0x5e0] sm:$0xff] }
 0x4dc   :  { %3468 = vmatprep.subr.bf16.mxu1 %v1958_v52  ;;  %v2023_v52 = vunpack.c.h.s8.bf16 %v1359_v2  ;;  %v2032_v17 = vunpack.c.l.s8.bf16 %v1368_v1  ;;  %v1398_v2 = vld [vmem:[#allocation10 + $0x5e8] sm:$0xff] }
 0x4de   :  { %3797 = vmatpush1.bf16.msra.mxu0 %v1959_v61  ;;  %v2029_v61 = vunpack.c.l.s8.bf16 %v1365_v8 }
 0x4df   :  { %3469 = vmatpush1.bf16.msra.mxu1 %v1957_v16  ;;  %3798 = vmatprep.subr.bf16.mxu0 %v1968_v5  ;;  %v1367_v16 = vld [vmem:[#allocation10 + $0x4f0] sm:$0xff]  ;;  %v2040_v5 = vunpack.c.h.s8.bf16 %v1368_v1 }
 0x4e0   :  { %3470 = vmatprep.subr.bf16.mxu1 %v1966_v9  ;;  %v2031_v9 = vunpack.c.l.s8.bf16 %v1367_v16 }
 0x4e2   :  { %3799 = vmatpush1.bf16.msra.mxu0 %v1967_v34  ;;  %v2037_v34 = vunpack.c.h.s8.bf16 %v1365_v8  ;;  %v2102_v8 = vunpack.c.h.s8.bf16 %v1398_v2 }
 0x4e3   :  { %3471 = vmatpush1.bf16.msra.mxu1 %v1965_v27  ;;  %3800 = vmatprep.subr.bf16.mxu0 %v1976_v49  ;;  %v1376_v27 = vld [vmem:[#allocation10 + $0x538] sm:$0xff]  ;;  %v2046_v49 = vunpack.c.l.s8.bf16 %v1374_v39  ;;  %v1405_v39 = vld [vmem:[#allocation10 + $0x620] sm:$0xff] }
 0x4e4   :  { %3472 = vmatprep.subr.bf16.mxu1 %v1974_v14  ;;  %v2039_v14 = vunpack.c.h.s8.bf16 %v1367_v16  ;;  %v2048_v26 = vunpack.c.l.s8.bf16 %v1376_v27  ;;  %v1406_v16 = vld [vmem:[#allocation10 + $0x628] sm:$0xff] }
 0x4e6   :  { %3801 = vmatpush1.bf16.msra.mxu0 %v1975_v54  ;;  %v2045_v54 = vunpack.c.l.s8.bf16 %v1373_v47 }
 0x4e7   :  { %3473 = vmatpush1.bf16.msra.mxu1 %v1973_v58  ;;  %3811 = vmatprep.subr.bf16.mxu0 %v1984_v23  ;;  %v1375_v58 = vld [vmem:[#allocation10 + $0x530] sm:$0xff]  ;;  %v2056_v23 = vunpack.c.h.s8.bf16 %v1376_v27 }
 0x4e8   :  { %3483 = vmatprep.subr.bf16.mxu1 %v1982_v55  ;;  %v2047_v55 = vunpack.c.l.s8.bf16 %v1375_v58 }
 0x4e9   :  { %3803 = vmatmul.mubr.bf16.vlgmr.msra.gmra.mrb[12].mxu0 %v6710_v33 }
 0x4ea   :  { %3475 = vmatmul.mubr.bf16.vlgmr.msra.gmra.mrb[4].mxu1 %v6710_v33  ;;  %3812 = vmatpush1.bf16.msra.mxu0 %v1983_v0  ;;  %v2006_v33 = vunpack.c.h.s8.bf16 %v1350_v15  ;;  %v2053_v0 = vunpack.c.h.s8.bf16 %v1373_v47  ;;  %v2062_v15 = vunpack.c.l.s8.bf16 %v1382_v7  ;;  %v2118_v47 = vunpack.c.h.s8.bf16 %v1406_v16  ;;  %v1413_v7 = vld [vmem:[#allocation10 + $0x660] sm:$0xff] }
 0x4eb   :  { %3484 = vmatpush1.bf16.msra.mxu1 %v1981_v41  ;;  %3515 = vmatprep.mubr.bf16.mxu1 %v6714_v42  ;;  %v1384_v41 = vld [vmem:[#allocation10 + $0x578] sm:$0xff] }
 0x4ec   :  { %3843 = vmatprep.mubr.bf16.mxu0 %v6714_v42  ;;  %3485 = vmatprep.subr.bf16.mxu1 %v1990_v56  ;;  %v2014_v42 = vunpack.c.l.s8.bf16 %v1358_v19  ;;  %v2055_v56 = vunpack.c.h.s8.bf16 %v1375_v58  ;;  %v2064_v25 = vunpack.c.l.s8.bf16 %v1384_v41  ;;  %v1389_v19 = vld [vmem:[#allocation10 + $0x5a0] sm:$0xff] }
 0x4ed   :  { %3813 = vmatprep.subr.bf16.mxu0 %v1992_v38  ;;  %v1381_v38 = vld [vmem:[#allocation10 + $0x560] sm:$0xff] }
 0x4ee   :  { %3814 = vmatpush1.bf16.msra.mxu0 %v1991_v48  ;;  %v2061_v48 = vunpack.c.l.s8.bf16 %v1381_v38 }
 0x4ef   :  { %3486 = vmatpush1.bf16.msra.mxu1 %v1989_v63  ;;  %3815 = vmatprep.subr.bf16.mxu0 %v2000_v46  ;;  %v1383_v63 = vld [vmem:[#allocation10 + $0x570] sm:$0xff]  ;;  %v2072_v46 = vunpack.c.h.s8.bf16 %v1384_v41 }
 0x4f0   :  { %3487 = vmatprep.subr.bf16.mxu1 %v1998_v11  ;;  %v2063_v11 = vunpack.c.l.s8.bf16 %v1383_v63 }
 0x4f2   :  { %3816 = vmatpush1.bf16.msra.mxu0 %v1999_v35  ;;  %v2069_v35 = vunpack.c.h.s8.bf16 %v1381_v38 }
 0x4f3   :  { %3488 = vmatpush1.bf16.msra.mxu1 %v1997_v45  ;;  %3817 = vmatprep.subr.bf16.mxu0 %v2008_v40  ;;  %v1392_v45 = vld [vmem:[#allocation10 + $0x5b8] sm:$0xff]  ;;  %v2078_v40 = vunpack.c.l.s8.bf16 %v1390_v6  ;;  %v1423_v6 = vld [vmem:[#allocation10 + $0x6b0] sm:$0xff] }
 0x4f4   :  { %3489 = vmatprep.subr.bf16.mxu1 %v2006_v33  ;;  %v2071_v33 = vunpack.c.h.s8.bf16 %v1383_v63  ;;  %v2080_v30 = vunpack.c.l.s8.bf16 %v1392_v45  ;;  %v1424_v63 = vld [vmem:[#allocation10 + $0x6b8] sm:$0xff] }
 0x4f6   :  { %3818 = vmatpush1.bf16.msra.mxu0 %v2007_v31  ;;  %v2077_v31 = vunpack.c.l.s8.bf16 %v1389_v19 }
 0x4f7   :  { %3490 = vmatpush1.bf16.msra.mxu1 %v2005_v3  ;;  %3819 = vmatprep.subr.bf16.mxu0 %v2016_v44  ;;  %v1391_v3 = vld [vmem:[#allocation10 + $0x5b0] sm:$0xff]  ;;  %v2088_v44 = vunpack.c.h.s8.bf16 %v1392_v45 }
 0x4f8   :  { %3491 = vmatprep.subr.bf16.mxu1 %v2014_v42  ;;  %v2079_v42 = vunpack.c.l.s8.bf16 %v1391_v3 }
 0x4fa   :  { %3820 = vmatpush1.bf16.msra.mxu0 %v2015_v20  ;;  %v2085_v20 = vunpack.c.h.s8.bf16 %v1389_v19  ;;  %v1430_v19 = vld [vmem:[#allocation10 + $0x6e8] sm:$0xff] }
 0x4fb   :  { %3492 = vmatpush1.bf16.msra.mxu1 %v2013_v4  ;;  %3821 = vmatprep.subr.bf16.mxu0 %v2024_v43  ;;  %v1400_v4 = vld [vmem:[#allocation10 + $0x5f8] sm:$0xff]  ;;  %v2094_v43 = vunpack.c.l.s8.bf16 %v1398_v2 }
 0x4fc   :  { %3493 = vmatprep.subr.bf16.mxu1 %v2022_v60  ;;  %v2087_v60 = vunpack.c.h.s8.bf16 %v1391_v3  ;;  %v2096_v1 = vunpack.c.l.s8.bf16 %v1400_v4 }
 0x4fe   :  { %3822 = vmatpush1.bf16.msra.mxu0 %v2023_v52  ;;  %v2093_v52 = vunpack.c.l.s8.bf16 %v1397_v50 }
 0x4ff   :  { %3494 = vmatpush1.bf16.msra.mxu1 %v2021_v62  ;;  %3823 = vmatprep.subr.bf16.mxu0 %v2032_v17  ;;  %v1399_v62 = vld [vmem:[#allocation10 + $0x5f0] sm:$0xff]  ;;  %v2104_v17 = vunpack.c.h.s8.bf16 %v1400_v4 }
 0x500   :  { %3495 = vmatprep.subr.bf16.mxu1 %v2030_v37  ;;  %v2095_v37 = vunpack.c.l.s8.bf16 %v1399_v62  ;;  %v1431_v4 = vld [vmem:[#allocation10 + $0x6f0] sm:$0xff] }
 0x502   :  { %3824 = vmatpush1.bf16.msra.mxu0 %v2031_v9  ;;  %v2101_v9 = vunpack.c.h.s8.bf16 %v1397_v50 }
 0x503   :  { %3496 = vmatpush1.bf16.msra.mxu1 %v2029_v61  ;;  %3825 = vmatprep.subr.bf16.mxu0 %v2040_v5  ;;  %v1408_v61 = vld [vmem:[#allocation10 + $0x638] sm:$0xff]  ;;  %v2110_v5 = vunpack.c.l.s8.bf16 %v1406_v16 }
 0x504   :  { %3497 = vmatprep.subr.bf16.mxu1 %v2038_v21  ;;  %v2103_v21 = vunpack.c.h.s8.bf16 %v1399_v62  ;;  %v2112_v27 = vunpack.c.l.s8.bf16 %v1408_v61  ;;  %v2120_v58 = vunpack.c.h.s8.bf16 %v1408_v61  ;;  %v1438_v61 = vld [vmem:[#allocation10 + $0x728] sm:$0xff] }
 0x506   :  { %3826 = vmatpush1.bf16.msra.mxu0 %v2039_v14  ;;  %v2109_v14 = vunpack.c.l.s8.bf16 %v1405_v39 }
 0x507   :  { %3498 = vmatpush1.bf16.msra.mxu1 %v2037_v34  ;;  %3827 = vmatprep.subr.bf16.mxu0 %v2048_v26  ;;  %v1407_v34 = vld [vmem:[#allocation10 + $0x630] sm:$0xff]  ;;  %v1414_v26 = vld [vmem:[#allocation10 + $0x668] sm:$0xff] }
 0x508   :  { %3499 = vmatprep.subr.bf16.mxu1 %v2046_v49  ;;  %v2111_v49 = vunpack.c.l.s8.bf16 %v1407_v34 }
 0x50a   :  { %3828 = vmatpush1.bf16.msra.mxu0 %v2047_v55  ;;  %v2117_v55 = vunpack.c.h.s8.bf16 %v1405_v39  ;;  %v2174_v39 = vunpack.c.l.s8.bf16 %v1438_v61 }
 0x50b   :  { %3500 = vmatpush1.bf16.msra.mxu1 %v2045_v54  ;;  %3829 = vmatprep.subr.bf16.mxu0 %v2056_v23  ;;  %v1416_v54 = vld [vmem:[#allocation10 + $0x678] sm:$0xff]  ;;  %v2126_v23 = vunpack.c.l.s8.bf16 %v1414_v26 }
 0x50c   :  { %3501 = vmatprep.subr.bf16.mxu1 %v2054_v22  ;;  %v2119_v22 = vunpack.c.h.s8.bf16 %v1407_v34  ;;  %v2128_v41 = vunpack.c.l.s8.bf16 %v1416_v54  ;;  %v2136_v38 = vunpack.c.h.s8.bf16 %v1416_v54  ;;  %v1446_v54 = vld [vmem:[#allocation10 + $0x768] sm:$0xff] }
 0x50e   :  { %3830 = vmatpush1.bf16.msra.mxu0 %v2055_v56  ;;  %v2125_v56 = vunpack.c.l.s8.bf16 %v1413_v7 }
 0x50f   :  { %3502 = vmatpush1.bf16.msra.mxu1 %v2053_v0  ;;  %3831 = vmatprep.subr.bf16.mxu0 %v2064_v25  ;;  %v1415_v0 = vld [vmem:[#allocation10 + $0x670] sm:$0xff]  ;;  %v1422_v25 = vld [vmem:[#allocation10 + $0x6a8] sm:$0xff] }
 0x510   :  { %3503 = vmatprep.subr.bf16.mxu1 %v2062_v15  ;;  %v2127_v15 = vunpack.c.l.s8.bf16 %v1415_v0 }
 0x512   :  { %3832 = vmatpush1.bf16.msra.mxu0 %v2063_v11  ;;  %v2135_v11 = vunpack.c.h.s8.bf16 %v1415_v0 }
 0x513   :  { %3504 = vmatpush1.bf16.msra.mxu1 %v2061_v48  ;;  %3833 = vmatprep.subr.bf16.mxu0 %v2072_v46  ;;  %v2133_v48 = vunpack.c.h.s8.bf16 %v1413_v7  ;;  %v2144_v46 = vunpack.c.l.s8.bf16 %v1424_v63  ;;  %v2190_v7 = vunpack.c.l.s8.bf16 %v1446_v54 }
 0x514   :  { %3505 = vmatprep.subr.bf16.mxu1 %v2070_v10  ;;  %v1421_v10 = vld [vmem:[#allocation10 + $0x6a0] sm:$0xff] }
 0x515   :  { %v2141_v45 = vunpack.c.l.s8.bf16 %v1421_v10  ;;  %v2149_v3 = vunpack.c.h.s8.bf16 %v1421_v10 }
 0x516   :  { %3834 = vmatpush1.bf16.msra.mxu0 %v2071_v33  ;;  %v2150_v33 = vunpack.c.h.s8.bf16 %v1422_v25 }
 0x517   :  { %3506 = vmatpush1.bf16.msra.mxu1 %v2069_v35  ;;  %3835 = vmatprep.subr.bf16.mxu0 %v2080_v30  ;;  %v2143_v35 = vunpack.c.l.s8.bf16 %v1423_v6  ;;  %v1432_v30 = vld [vmem:[#allocation10 + $0x6f8] sm:$0xff] }
 0x518   :  { %3507 = vmatprep.subr.bf16.mxu1 %v2078_v40  ;;  %v2152_v40 = vunpack.c.h.s8.bf16 %v1424_v63  ;;  %v2160_v2 = vunpack.c.l.s8.bf16 %v1432_v30  ;;  %v2168_v16 = vunpack.c.h.s8.bf16 %v1432_v30  ;;  %v1454_v63 = vld [vmem:[#allocation10 + $0x7a8] sm:$0xff] }
 0x519   :  { %v2206_v10 = vunpack.c.l.s8.bf16 %v1454_v63  ;;  %v1462_v30 = vld [vmem:[#allocation10 + $0x7e8] sm:$0xff] }
 0x51a   :  { %3836 = vmatpush1.bf16.msra.mxu0 %v2079_v42  ;;  %v2158_v42 = vunpack.c.l.s8.bf16 %v1430_v19 }
 0x51b   :  { %3508 = vmatpush1.bf16.msra.mxu1 %v2077_v31  ;;  %3837 = vmatprep.subr.bf16.mxu0 %v2088_v44  ;;  %v2151_v31 = vunpack.c.h.s8.bf16 %v1423_v6 }
 0x51c   :  { %3509 = vmatprep.subr.bf16.mxu1 %v2086_v57  ;;  %v1429_v57 = vld [vmem:[#allocation10 + $0x6e0] sm:$0xff] }
 0x51e   :  { %3838 = vmatpush1.bf16.msra.mxu0 %v2087_v60 }
 0x51f   :  { %3510 = vmatpush1.bf16.msra.mxu1 %v2085_v20  ;;  %3839 = vmatprep.subr.bf16.mxu0 %v2096_v1  ;;  %v2157_v1 = vunpack.c.l.s8.bf16 %v1429_v57 }
 0x520   :  { %3511 = vmatprep.subr.bf16.mxu1 %v2094_v43 }
 0x522   :  { %3840 = vmatpush1.bf16.msra.mxu0 %v2095_v37  ;;  %v2159_v37 = vunpack.c.l.s8.bf16 %v1431_v4 }
 0x523   :  { %3512 = vmatpush1.bf16.msra.mxu1 %v2093_v52  ;;  %3841 = vmatprep.subr.bf16.mxu0 %v2104_v17 }
 0x524   :  { %3513 = vmatprep.subr.bf16.mxu1 %v2102_v8  ;;  %v2166_v8 = vunpack.c.h.s8.bf16 %v1430_v19 }
 0x526   :  { %3842 = vmatpush1.bf16.msra.mxu0 %v2103_v21  ;;  %v2165_v21 = vunpack.c.h.s8.bf16 %v1429_v57  ;;  %v2222_v57 = vunpack.c.l.s8.bf16 %v1462_v30 }
 0x527   :  { %3514 = vmatpush1.bf16.msra.mxu1 %v2101_v9  ;;  %3852 = vmatprep.subr.bf16.mxu0 %v2112_v27  ;;  %v1440_v9 = vld [vmem:[#allocation10 + $0x738] sm:$0xff]  ;;  %v1437_v27 = vld [vmem:[#allocation10 + $0x720] sm:$0xff] }
 0x528   :  { %3524 = vmatprep.subr.bf16.mxu1 %v2110_v5  ;;  %v2167_v5 = vunpack.c.h.s8.bf16 %v1431_v4  ;;  %v2176_v34 = vunpack.c.l.s8.bf16 %v1440_v9 }
 0x529   :  { %3844 = vmatmul.mubr.bf16.vlgmr.msra.gmra.mrb[12].mxu0 %v6722_v59 }
 0x52a   :  { %3516 = vmatmul.mubr.bf16.vlgmr.msra.gmra.mrb[4].mxu1 %v6722_v59  ;;  %3853 = vmatpush1.bf16.msra.mxu0 %v2111_v49  ;;  %v2134_v59 = vunpack.c.h.s8.bf16 %v1414_v26  ;;  %v2173_v49 = vunpack.c.l.s8.bf16 %v1437_v27  ;;  %v2182_v26 = vunpack.c.h.s8.bf16 %v1438_v61 }
 0x52b   :  { %3525 = vmatpush1.bf16.msra.mxu1 %v2109_v14  ;;  %3556 = vmatprep.mubr.bf16.mxu1 %v6727_v51  ;;  %v1439_v14 = vld [vmem:[#allocation10 + $0x730] sm:$0xff] }
 0x52c   :  { %3884 = vmatprep.mubr.bf16.mxu0 %v6727_v51  ;;  %3526 = vmatprep.subr.bf16.mxu1 %v2118_v47  ;;  %v2142_v51 = vunpack.c.l.s8.bf16 %v1422_v25  ;;  %v2175_v47 = vunpack.c.l.s8.bf16 %v1439_v14 }
 0x52d   :  { %3854 = vmatprep.subr.bf16.mxu0 %v2120_v58  ;;  %v2184_v58 = vunpack.c.h.s8.bf16 %v1440_v9 }
 0x52e   :  { %3855 = vmatpush1.bf16.msra.mxu0 %v2119_v22  ;;  %v2181_v22 = vunpack.c.h.s8.bf16 %v1437_v27 }
 0x52f   :  { %3527 = vmatpush1.bf16.msra.mxu1 %v2117_v55  ;;  %3856 = vmatprep.subr.bf16.mxu0 %v2128_v41  ;;  %v1448_v55 = vld [vmem:[#allocation10 + $0x778] sm:$0xff]  ;;  %v1445_v41 = vld [vmem:[#allocation10 + $0x760] sm:$0xff] }
 0x530   :  { %3528 = vmatprep.subr.bf16.mxu1 %v2126_v23  ;;  %v2183_v23 = vunpack.c.h.s8.bf16 %v1439_v14  ;;  %v2192_v0 = vunpack.c.l.s8.bf16 %v1448_v55  ;;  %v2200_v25 = vunpack.c.h.s8.bf16 %v1448_v55 }
 0x532   :  { %3857 = vmatpush1.bf16.msra.mxu0 %v2127_v15  ;;  %v2189_v15 = vunpack.c.l.s8.bf16 %v1445_v41 }
 0x533   :  { %3529 = vmatpush1.bf16.msra.mxu1 %v2125_v56  ;;  %3858 = vmatprep.subr.bf16.mxu0 %v2136_v38  ;;  %v1447_v56 = vld [vmem:[#allocation10 + $0x770] sm:$0xff]  ;;  %v2198_v38 = vunpack.c.h.s8.bf16 %v1446_v54 }
 0x534   :  { %3530 = vmatprep.subr.bf16.mxu1 %v2134_v59  ;;  %v2191_v59 = vunpack.c.l.s8.bf16 %v1447_v56 }
 0x536   :  { %3859 = vmatpush1.bf16.msra.mxu0 %v2135_v11  ;;  %v2197_v11 = vunpack.c.h.s8.bf16 %v1445_v41 }
 0x537   :  { %3531 = vmatpush1.bf16.msra.mxu1 %v2133_v48  ;;  %3860 = vmatprep.subr.bf16.mxu0 %v2144_v46  ;;  %v1456_v48 = vld [vmem:[#allocation10 + $0x7b8] sm:$0xff]  ;;  %v1453_v46 = vld [vmem:[#allocation10 + $0x7a0] sm:$0xff] }
 0x538   :  { %3532 = vmatprep.subr.bf16.mxu1 %v2142_v51  ;;  %v2199_v51 = vunpack.c.h.s8.bf16 %v1447_v56  ;;  %v2208_v6 = vunpack.c.l.s8.bf16 %v1456_v48  ;;  %v2216_v19 = vunpack.c.h.s8.bf16 %v1456_v48 }
 0x53a   :  { %3861 = vmatpush1.bf16.msra.mxu0 %v2143_v35  ;;  %v2205_v35 = vunpack.c.l.s8.bf16 %v1453_v46 }
 0x53b   :  { %3533 = vmatpush1.bf16.msra.mxu1 %v2141_v45  ;;  %3862 = vmatprep.subr.bf16.mxu0 %v2152_v40  ;;  %v1455_v45 = vld [vmem:[#allocation10 + $0x7b0] sm:$0xff]  ;;  %v2214_v40 = vunpack.c.h.s8.bf16 %v1454_v63  ;;  %v1485_v63 = vld [vmem:[#allocation10 + $0x8a0] sm:$0xff] }
 0x53c   :  { %3534 = vmatprep.subr.bf16.mxu1 %v2150_v33  ;;  %v6802_v20 = vpop.f32.mrb[8].mxu0  ;;  %v2207_v33 = vunpack.c.l.s8.bf16 %v1455_v45 }
 0x53d   :  { %v6800_v44 = vpop.f32.mrb[0].mxu1  ;;  %v6806_v43 = vpop.f32.mrb[9].mxu0 }
 0x53e   :  { %v6804_v60 = vpop.f32.mrb[1].mxu1  ;;  %v3398_v62 = vpop.f32.mrb[10].mxu0  ;;  %3863 = vmatpush1.bf16.msra.mxu0 %v2151_v31  ;;  %v2213_v31 = vunpack.c.h.s8.bf16 %v1453_v46 }
 0x53f   :  { %v3070_v50 = vpop.f32.mrb[2].mxu1  ;;  %3535 = vmatpush1.bf16.msra.mxu1 %v2149_v3  ;;  %v3399_v17 = vpop.f32.mrb[11].mxu0  ;;  %3864 = vmatprep.subr.bf16.mxu0 %v2160_v2  ;;  %v1464_v3 = vld [vmem:[#allocation10 + $0x7f8] sm:$0xff]  ;;  %v1461_v2 = vld [vmem:[#allocation10 + $0x7e0] sm:$0xff] }
 0x540   :  { %v3071_v52 = vpop.f32.mrb[3].mxu1  ;;  %3536 = vmatprep.subr.bf16.mxu1 %v2158_v42  ;;  %v2215_v42 = vunpack.c.h.s8.bf16 %v1455_v45  ;;  %v2224_v4 = vunpack.c.l.s8.bf16 %v1464_v3  ;;  %v1463_v50 = vld [vmem:[#allocation10 + $0x7f0] sm:$0xff]  ;;  %v1472_v17 = vld [vmem:[#allocation10 + $0x838] sm:$0xff]  ;;  %v1494_v45 = vld [vmem:[#allocation10 + $0x8e8] sm:$0xff] }
 0x541   :  { %v2223_v62 = vunpack.c.l.s8.bf16 %v1463_v50  ;;  %v2230_v52 = vunpack.c.h.s8.bf16 %v1462_v30  ;;  %v2231_v61 = vunpack.c.h.s8.bf16 %v1463_v50  ;;  %v1493_v30 = vld [vmem:[#allocation10 + $0x8e0] sm:$0xff]  ;;  %v1502_v50 = vld [vmem:[#allocation10 + $0x928] sm:$0xff] }
 0x542   :  { %3865 = vmatpush1.bf16.msra.mxu0 %v2159_v37  ;;  %v2232_v37 = vunpack.c.h.s8.bf16 %v1464_v3 }
 0x543   :  { %3537 = vmatpush1.bf16.msra.mxu1 %v2157_v1  ;;  %3866 = vmatprep.subr.bf16.mxu0 %v2168_v16  ;;  %v2221_v1 = vunpack.c.l.s8.bf16 %v1461_v2  ;;  %v2229_v16 = vunpack.c.h.s8.bf16 %v1461_v2  ;;  %v2294_v2 = vunpack.c.h.s8.bf16 %v1494_v45 }
 0x544   :  { %3538 = vmatprep.subr.bf16.mxu1 %v2166_v8  ;;  %v1470_v8 = vld [vmem:[#allocation10 + $0x828] sm:$0xff] }
 0x545   :  { %v2238_v9 = vunpack.c.l.s8.bf16 %v1470_v8  ;;  %v2246_v14 = vunpack.c.h.s8.bf16 %v1470_v8  ;;  %v1501_v8 = vld [vmem:[#allocation10 + $0x920] sm:$0xff] }
 0x546   :  { %3867 = vmatpush1.bf16.msra.mxu0 %v2167_v5  ;;  %v2240_v5 = vunpack.c.l.s8.bf16 %v1472_v17 }
 0x547   :  { %3539 = vmatpush1.bf16.msra.mxu1 %v2165_v21  ;;  %3868 = vmatprep.subr.bf16.mxu0 %v2176_v34  ;;  %v1469_v21 = vld [vmem:[#allocation10 + $0x820] sm:$0xff] }
 0x548   :  { %3540 = vmatprep.subr.bf16.mxu1 %v2174_v39  ;;  %v1471_v39 = vld [vmem:[#allocation10 + $0x830] sm:$0xff]  ;;  %v2237_v27 = vunpack.c.l.s8.bf16 %v1469_v21 }
 0x549   :  { %v2239_v34 = vunpack.c.l.s8.bf16 %v1471_v39  ;;  %v2247_v54 = vunpack.c.h.s8.bf16 %v1471_v39  ;;  %v1510_v39 = vld [vmem:[#allocation10 + $0x968] sm:$0xff] }
 0x54a   :  { %3869 = vmatpush1.bf16.msra.mxu0 %v2175_v47  ;;  %v2248_v47 = vunpack.c.h.s8.bf16 %v1472_v17 }
 0x54b   :  { %3541 = vmatpush1.bf16.msra.mxu1 %v2173_v49  ;;  %3870 = vmatprep.subr.bf16.mxu0 %v2184_v58  ;;  %v1478_v49 = vld [vmem:[#allocation10 + $0x868] sm:$0xff]  ;;  %v2245_v58 = vunpack.c.h.s8.bf16 %v1469_v21  ;;  %v2310_v21 = vunpack.c.h.s8.bf16 %v1502_v50 }
 0x54c   :  { %3542 = vmatprep.subr.bf16.mxu1 %v2182_v26  ;;  %v1480_v26 = vld [vmem:[#allocation10 + $0x878] sm:$0xff]  ;;  %v2254_v55 = vunpack.c.l.s8.bf16 %v1478_v49 }
 0x54d   :  { %v2264_v56 = vunpack.c.h.s8.bf16 %v1480_v26 }
 0x54e   :  { %3871 = vmatpush1.bf16.msra.mxu0 %v2183_v23  ;;  %v2256_v23 = vunpack.c.l.s8.bf16 %v1480_v26 }
 0x54f   :  { %3543 = vmatpush1.bf16.msra.mxu1 %v2181_v22  ;;  %3872 = vmatprep.subr.bf16.mxu0 %v2192_v0  ;;  %v1477_v22 = vld [vmem:[#allocation10 + $0x860] sm:$0xff] }
 0x550   :  { %3544 = vmatprep.subr.bf16.mxu1 %v2190_v7  ;;  %v1479_v7 = vld [vmem:[#allocation10 + $0x870] sm:$0xff]  ;;  %v2253_v41 = vunpack.c.l.s8.bf16 %v1477_v22 }
 0x551   :  { %v2255_v0 = vunpack.c.l.s8.bf16 %v1479_v7 }
 0x552   :  { %3873 = vmatpush1.bf16.msra.mxu0 %v2191_v59  ;;  %v1488_v59 = vld [vmem:[#allocation10 + $0x8b8] sm:$0xff] }
 0x553   :  { %3545 = vmatpush1.bf16.msra.mxu1 %v2189_v15  ;;  %3874 = vmatprep.subr.bf16.mxu0 %v2200_v25  ;;  %v1486_v15 = vld [vmem:[#allocation10 + $0x8a8] sm:$0xff]  ;;  %v2263_v25 = vunpack.c.h.s8.bf16 %v1479_v7  ;;  %v2272_v48 = vunpack.c.l.s8.bf16 %v1488_v59 }
 0x554   :  { %3546 = vmatprep.subr.bf16.mxu1 %v2198_v38  ;;  %v2261_v38 = vunpack.c.h.s8.bf16 %v1477_v22  ;;  %v2278_v46 = vunpack.c.h.s8.bf16 %v1486_v15  ;;  %v2326_v22 = vunpack.c.h.s8.bf16 %v1510_v39  ;;  %v1518_v7 = vld [vmem:[#allocation10 + $0x9a8] sm:$0xff] }
 0x556   :  { %3875 = vmatpush1.bf16.msra.mxu0 %v2199_v51  ;;  %v2269_v51 = vunpack.c.l.s8.bf16 %v1485_v63 }
 0x557   :  { %3547 = vmatpush1.bf16.msra.mxu1 %v2197_v11  ;;  %3876 = vmatprep.subr.bf16.mxu0 %v2208_v6  ;;  %v1487_v11 = vld [vmem:[#allocation10 + $0x8b0] sm:$0xff]  ;;  %v2280_v6 = vunpack.c.h.s8.bf16 %v1488_v59 }
 0x558   :  { %3548 = vmatprep.subr.bf16.mxu1 %v2206_v10  ;;  %v2271_v10 = vunpack.c.l.s8.bf16 %v1487_v11 }
 0x55a   :  { %3877 = vmatpush1.bf16.msra.mxu0 %v2207_v33  ;;  %v2277_v33 = vunpack.c.h.s8.bf16 %v1485_v63  ;;  %v2342_v63 = vunpack.c.h.s8.bf16 %v1518_v7 }
 0x55b   :  { %3549 = vmatpush1.bf16.msra.mxu1 %v2205_v35  ;;  %3878 = vmatprep.subr.bf16.mxu0 %v2216_v19  ;;  %v1496_v35 = vld [vmem:[#allocation10 + $0x8f8] sm:$0xff]  ;;  %v2286_v19 = vunpack.c.l.s8.bf16 %v1494_v45  ;;  %v1525_v45 = vld [vmem:[#allocation10 + $0x9e0] sm:$0xff] }
 0x55c   :  { %3550 = vmatprep.subr.bf16.mxu1 %v2214_v40  ;;  %v2279_v40 = vunpack.c.h.s8.bf16 %v1487_v11  ;;  %v2288_v3 = vunpack.c.l.s8.bf16 %v1496_v35  ;;  %v1526_v11 = vld [vmem:[#allocation10 + $0x9e8] sm:$0xff] }
 0x55e   :  { %3879 = vmatpush1.bf16.msra.mxu0 %v2215_v42  ;;  %v2285_v42 = vunpack.c.l.s8.bf16 %v1493_v30 }
 0x55f   :  { %3551 = vmatpush1.bf16.msra.mxu1 %v2213_v31  ;;  %3880 = vmatprep.subr.bf16.mxu0 %v2224_v4  ;;  %v1495_v31 = vld [vmem:[#allocation10 + $0x8f0] sm:$0xff]  ;;  %v2296_v4 = vunpack.c.h.s8.bf16 %v1496_v35 }
 0x560   :  { %3552 = vmatprep.subr.bf16.mxu1 %v2222_v57  ;;  %v2287_v57 = vunpack.c.l.s8.bf16 %v1495_v31 }
 0x562   :  { %3881 = vmatpush1.bf16.msra.mxu0 %v2223_v62  ;;  %v2293_v62 = vunpack.c.h.s8.bf16 %v1493_v30  ;;  %v2358_v30 = vunpack.c.h.s8.bf16 %v1526_v11 }
 0x563   :  { %3553 = vmatpush1.bf16.msra.mxu1 %v2221_v1  ;;  %3882 = vmatprep.subr.bf16.mxu0 %v2232_v37  ;;  %v1504_v1 = vld [vmem:[#allocation10 + $0x938] sm:$0xff]  ;;  %v2302_v37 = vunpack.c.l.s8.bf16 %v1502_v50  ;;  %v1533_v50 = vld [vmem:[#allocation10 + $0xa20] sm:$0xff] }
 0x564   :  { %3554 = vmatprep.subr.bf16.mxu1 %v2230_v52  ;;  %v2295_v52 = vunpack.c.h.s8.bf16 %v1495_v31  ;;  %v2304_v17 = vunpack.c.l.s8.bf16 %v1504_v1  ;;  %v1534_v31 = vld [vmem:[#allocation10 + $0xa28] sm:$0xff] }
 0x566   :  { %3883 = vmatpush1.bf16.msra.mxu0 %v2231_v61  ;;  %v2301_v61 = vunpack.c.l.s8.bf16 %v1501_v8 }
 0x567   :  { %3555 = vmatpush1.bf16.msra.mxu1 %v2229_v16  ;;  %3893 = vmatprep.subr.bf16.mxu0 %v2240_v5  ;;  %v1503_v16 = vld [vmem:[#allocation10 + $0x930] sm:$0xff]  ;;  %v2312_v5 = vunpack.c.h.s8.bf16 %v1504_v1 }
 0x568   :  { %3565 = vmatprep.subr.bf16.mxu1 %v2238_v9  ;;  %v2303_v9 = vunpack.c.l.s8.bf16 %v1503_v16 }
 0x569   :  { %3885 = vmatmul.mubr.bf16.vlgmr.msra.gmra.mrb[12].mxu0 %v6734_v18 }
 0x56a   :  { %3557 = vmatmul.mubr.bf16.vlgmr.msra.gmra.mrb[4].mxu1 %v6734_v18  ;;  %3894 = vmatpush1.bf16.msra.mxu0 %v2239_v34  ;;  %v2262_v18 = vunpack.c.h.s8.bf16 %v1478_v49  ;;  %v2309_v34 = vunpack.c.h.s8.bf16 %v1501_v8  ;;  %v2318_v49 = vunpack.c.l.s8.bf16 %v1510_v39  ;;  %v2374_v8 = vunpack.c.h.s8.bf16 %v1534_v31  ;;  %v1541_v39 = vld [vmem:[#allocation10 + $0xa60] sm:$0xff] }
 0x56b   :  { %3566 = vmatpush1.bf16.msra.mxu1 %v2237_v27  ;;  %3597 = vmatprep.mubr.bf16.mxu1 %v6739_v28  ;;  %v1512_v27 = vld [vmem:[#allocation10 + $0x978] sm:$0xff] }
 0x56c   :  { %3925 = vmatprep.mubr.bf16.mxu0 %v6739_v28  ;;  %3567 = vmatprep.subr.bf16.mxu1 %v2246_v14  ;;  %v2270_v28 = vunpack.c.l.s8.bf16 %v1486_v15  ;;  %v2311_v14 = vunpack.c.h.s8.bf16 %v1503_v16  ;;  %v2320_v26 = vunpack.c.l.s8.bf16 %v1512_v27  ;;  %v1517_v15 = vld [vmem:[#allocation10 + $0x9a0] sm:$0xff] }
 0x56d   :  { %3895 = vmatprep.subr.bf16.mxu0 %v2248_v47  ;;  %v1509_v47 = vld [vmem:[#allocation10 + $0x960] sm:$0xff] }
 0x56e   :  { %3896 = vmatpush1.bf16.msra.mxu0 %v2247_v54  ;;  %v2317_v54 = vunpack.c.l.s8.bf16 %v1509_v47 }
 0x56f   :  { %3568 = vmatpush1.bf16.msra.mxu1 %v2245_v58  ;;  %3897 = vmatprep.subr.bf16.mxu0 %v2256_v23  ;;  %v1511_v58 = vld [vmem:[#allocation10 + $0x970] sm:$0xff]  ;;  %v2328_v23 = vunpack.c.h.s8.bf16 %v1512_v27 }
 0x570   :  { %3569 = vmatprep.subr.bf16.mxu1 %v2254_v55  ;;  %v2319_v55 = vunpack.c.l.s8.bf16 %v1511_v58 }
 0x572   :  { %3898 = vmatpush1.bf16.msra.mxu0 %v2255_v0  ;;  %v2325_v0 = vunpack.c.h.s8.bf16 %v1509_v47 }
 0x573   :  { %3570 = vmatpush1.bf16.msra.mxu1 %v2253_v41  ;;  %3899 = vmatprep.subr.bf16.mxu0 %v2264_v56  ;;  %v1520_v41 = vld [vmem:[#allocation10 + $0x9b8] sm:$0xff]  ;;  %v2334_v56 = vunpack.c.l.s8.bf16 %v1518_v7  ;;  %v1551_v7 = vld [vmem:[#allocation10 + $0xab0] sm:$0xff] }
 0x574   :  { %3571 = vmatprep.subr.bf16.mxu1 %v2262_v18  ;;  %v2327_v18 = vunpack.c.h.s8.bf16 %v1511_v58  ;;  %v2336_v59 = vunpack.c.l.s8.bf16 %v1520_v41  ;;  %v1552_v58 = vld [vmem:[#allocation10 + $0xab8] sm:$0xff] }
 0x576   :  { %3900 = vmatpush1.bf16.msra.mxu0 %v2263_v25  ;;  %v2333_v25 = vunpack.c.l.s8.bf16 %v1517_v15 }
 0x577   :  { %3572 = vmatpush1.bf16.msra.mxu1 %v2261_v38  ;;  %3901 = vmatprep.subr.bf16.mxu0 %v2272_v48  ;;  %v1519_v38 = vld [vmem:[#allocation10 + $0x9b0] sm:$0xff]  ;;  %v2344_v48 = vunpack.c.h.s8.bf16 %v1520_v41 }
 0x578   :  { %3573 = vmatprep.subr.bf16.mxu1 %v2270_v28  ;;  %v2335_v28 = vunpack.c.l.s8.bf16 %v1519_v38 }
 0x57a   :  { %3902 = vmatpush1.bf16.msra.mxu0 %v2271_v10  ;;  %v2341_v10 = vunpack.c.h.s8.bf16 %v1517_v15  ;;  %v1558_v15 = vld [vmem:[#allocation10 + $0xae8] sm:$0xff] }
 0x57b   :  { %3574 = vmatpush1.bf16.msra.mxu1 %v2269_v51  ;;  %3903 = vmatprep.subr.bf16.mxu0 %v2280_v6  ;;  %v1528_v51 = vld [vmem:[#allocation10 + $0x9f8] sm:$0xff]  ;;  %v2350_v6 = vunpack.c.l.s8.bf16 %v1526_v11  ;;  %v1559_v11 = vld [vmem:[#allocation10 + $0xaf0] sm:$0xff] }
 0x57c   :  { %3575 = vmatprep.subr.bf16.mxu1 %v2278_v46  ;;  %v2343_v46 = vunpack.c.h.s8.bf16 %v1519_v38  ;;  %v2352_v35 = vunpack.c.l.s8.bf16 %v1528_v51 }
 0x57e   :  { %3904 = vmatpush1.bf16.msra.mxu0 %v2279_v40  ;;  %v2349_v40 = vunpack.c.l.s8.bf16 %v1525_v45 }
 0x57f   :  { %3576 = vmatpush1.bf16.msra.mxu1 %v2277_v33  ;;  %3905 = vmatprep.subr.bf16.mxu0 %v2288_v3  ;;  %v1527_v33 = vld [vmem:[#allocation10 + $0x9f0] sm:$0xff]  ;;  %v2360_v3 = vunpack.c.h.s8.bf16 %v1528_v51 }
 0x580   :  { %3577 = vmatprep.subr.bf16.mxu1 %v2286_v19  ;;  %v2351_v19 = vunpack.c.l.s8.bf16 %v1527_v33 }
 0x582   :  { %3906 = vmatpush1.bf16.msra.mxu0 %v2287_v57  ;;  %v2357_v57 = vunpack.c.h.s8.bf16 %v1525_v45  ;;  %v1566_v45 = vld [vmem:[#allocation10 + $0xb28] sm:$0xff] }
 0x583   :  { %3578 = vmatpush1.bf16.msra.mxu1 %v2285_v42  ;;  %3907 = vmatprep.subr.bf16.mxu0 %v2296_v4  ;;  %v1536_v42 = vld [vmem:[#allocation10 + $0xa38] sm:$0xff]  ;;  %v2366_v4 = vunpack.c.l.s8.bf16 %v1534_v31  ;;  %v1567_v31 = vld [vmem:[#allocation10 + $0xb30] sm:$0xff] }
 0x584   :  { %3579 = vmatprep.subr.bf16.mxu1 %v2294_v2  ;;  %v2359_v2 = vunpack.c.h.s8.bf16 %v1527_v33  ;;  %v2368_v1 = vunpack.c.l.s8.bf16 %v1536_v42  ;;  %v2376_v16 = vunpack.c.h.s8.bf16 %v1536_v42 }
 0x586   :  { %3908 = vmatpush1.bf16.msra.mxu0 %v2295_v52  ;;  %v2365_v52 = vunpack.c.l.s8.bf16 %v1533_v50 }
 0x587   :  { %3580 = vmatpush1.bf16.msra.mxu1 %v2293_v62  ;;  %3909 = vmatprep.subr.bf16.mxu0 %v2304_v17  ;;  %v1535_v62 = vld [vmem:[#allocation10 + $0xa30] sm:$0xff]  ;;  %v1542_v17 = vld [vmem:[#allocation10 + $0xa68] sm:$0xff] }
 0x588   :  { %3581 = vmatprep.subr.bf16.mxu1 %v2302_v37  ;;  %v2367_v37 = vunpack.c.l.s8.bf16 %v1535_v62 }
 0x58a   :  { %3910 = vmatpush1.bf16.msra.mxu0 %v2303_v9  ;;  %v2373_v9 = vunpack.c.h.s8.bf16 %v1533_v50  ;;  %v1574_v50 = vld [vmem:[#allocation10 + $0xb68] sm:$0xff] }
 0x58b   :  { %3582 = vmatpush1.bf16.msra.mxu1 %v2301_v61  ;;  %3911 = vmatprep.subr.bf16.mxu0 %v2312_v5  ;;  %v1544_v61 = vld [vmem:[#allocation10 + $0xa78] sm:$0xff]  ;;  %v2382_v5 = vunpack.c.l.s8.bf16 %v1542_v17 }
 0x58c   :  { %3583 = vmatprep.subr.bf16.mxu1 %v2310_v21  ;;  %v2375_v21 = vunpack.c.h.s8.bf16 %v1535_v62  ;;  %v2384_v27 = vunpack.c.l.s8.bf16 %v1544_v61  ;;  %v2392_v47 = vunpack.c.h.s8.bf16 %v1544_v61 }
 0x58e   :  { %3912 = vmatpush1.bf16.msra.mxu0 %v2311_v14  ;;  %v2381_v14 = vunpack.c.l.s8.bf16 %v1541_v39 }
 0x58f   :  { %3584 = vmatpush1.bf16.msra.mxu1 %v2309_v34  ;;  %3913 = vmatprep.subr.bf16.mxu0 %v2320_v26  ;;  %v1543_v34 = vld [vmem:[#allocation10 + $0xa70] sm:$0xff]  ;;  %v1550_v26 = vld [vmem:[#allocation10 + $0xaa8] sm:$0xff] }
 0x590   :  { %3585 = vmatprep.subr.bf16.mxu1 %v2318_v49  ;;  %v2383_v49 = vunpack.c.l.s8.bf16 %v1543_v34 }
 0x592   :  { %3914 = vmatpush1.bf16.msra.mxu0 %v2319_v55  ;;  %v2391_v55 = vunpack.c.h.s8.bf16 %v1543_v34 }
 0x593   :  { %3586 = vmatpush1.bf16.msra.mxu1 %v2317_v54  ;;  %3915 = vmatprep.subr.bf16.mxu0 %v2328_v23  ;;  %v2389_v54 = vunpack.c.h.s8.bf16 %v1541_v39  ;;  %v2400_v23 = vunpack.c.l.s8.bf16 %v1552_v58  ;;  %v1582_v39 = vld [vmem:[#allocation10 + $0xba8] sm:$0xff] }
 0x594   :  { %3587 = vmatprep.subr.bf16.mxu1 %v2326_v22  ;;  %v1549_v22 = vld [vmem:[#allocation10 + $0xaa0] sm:$0xff] }
 0x595   :  { %v2397_v41 = vunpack.c.l.s8.bf16 %v1549_v22  ;;  %v2405_v38 = vunpack.c.h.s8.bf16 %v1549_v22  ;;  %v1590_v22 = vld [vmem:[#allocation10 + $0xbe8] sm:$0xff] }
 0x596   :  { %3916 = vmatpush1.bf16.msra.mxu0 %v2327_v18  ;;  %v2406_v18 = vunpack.c.h.s8.bf16 %v1550_v26 }
 0x597   :  { %3588 = vmatpush1.bf16.msra.mxu1 %v2325_v0  ;;  %3917 = vmatprep.subr.bf16.mxu0 %v2336_v59  ;;  %v2399_v0 = vunpack.c.l.s8.bf16 %v1551_v7  ;;  %v1560_v59 = vld [vmem:[#allocation10 + $0xaf8] sm:$0xff] }
 0x598   :  { %3589 = vmatprep.subr.bf16.mxu1 %v2334_v56  ;;  %v2408_v56 = vunpack.c.h.s8.bf16 %v1552_v58 }
 0x59a   :  { %3918 = vmatpush1.bf16.msra.mxu0 %v2335_v28  ;;  %v2414_v28 = vunpack.c.l.s8.bf16 %v1558_v15 }
 0x59b   :  { %3590 = vmatpush1.bf16.msra.mxu1 %v2333_v25  ;;  %3919 = vmatprep.subr.bf16.mxu0 %v2344_v48  ;;  %v2407_v25 = vunpack.c.h.s8.bf16 %v1551_v7  ;;  %v2416_v48 = vunpack.c.l.s8.bf16 %v1560_v59 }
 0x59c   :  { %3591 = vmatprep.subr.bf16.mxu1 %v2342_v63  ;;  %v1557_v63 = vld [vmem:[#allocation10 + $0xae0] sm:$0xff] }
 0x59d   :  { %v2413_v51 = vunpack.c.l.s8.bf16 %v1557_v63  ;;  %v2421_v33 = vunpack.c.h.s8.bf16 %v1557_v63  ;;  %v1598_v63 = vld [vmem:[#allocation10 + $0xc28] sm:$0xff] }
 0x59e   :  { %3920 = vmatpush1.bf16.msra.mxu0 %v2343_v46  ;;  %v2422_v46 = vunpack.c.h.s8.bf16 %v1558_v15  ;;  %v1591_v15 = vld [vmem:[#allocation10 + $0xbf0] sm:$0xff] }
 0x59f   :  { %3592 = vmatpush1.bf16.msra.mxu1 %v2341_v10  ;;  %3921 = vmatprep.subr.bf16.mxu0 %v2352_v35  ;;  %v2415_v10 = vunpack.c.l.s8.bf16 %v1559_v11  ;;  %v1568_v35 = vld [vmem:[#allocation10 + $0xb38] sm:$0xff] }
 0x5a0   :  { %3593 = vmatprep.subr.bf16.mxu1 %v2350_v6  ;;  %v2424_v6 = vunpack.c.h.s8.bf16 %v1560_v59 }
 0x5a2   :  { %3922 = vmatpush1.bf16.msra.mxu0 %v2351_v19  ;;  %v2430_v19 = vunpack.c.l.s8.bf16 %v1566_v45 }
 0x5a3   :  { %3594 = vmatpush1.bf16.msra.mxu1 %v2349_v40  ;;  %3923 = vmatprep.subr.bf16.mxu0 %v2360_v3  ;;  %v2423_v40 = vunpack.c.h.s8.bf16 %v1559_v11  ;;  %v2432_v3 = vunpack.c.l.s8.bf16 %v1568_v35 }
 0x5a4   :  { %3595 = vmatprep.subr.bf16.mxu1 %v2358_v30  ;;  %v1565_v30 = vld [vmem:[#allocation10 + $0xb20] sm:$0xff] }
 0x5a5   :  { %v2429_v42 = vunpack.c.l.s8.bf16 %v1565_v30  ;;  %v2437_v62 = vunpack.c.h.s8.bf16 %v1565_v30 }
 0x5a6   :  { %3924 = vmatpush1.bf16.msra.mxu0 %v2359_v2  ;;  %v2438_v2 = vunpack.c.h.s8.bf16 %v1566_v45  ;;  %v1599_v45 = vld [vmem:[#allocation10 + $0xc30] sm:$0xff] }
 0x5a7   :  { %3596 = vmatpush1.bf16.msra.mxu1 %v2357_v57  ;;  %3934 = vmatprep.subr.bf16.mxu0 %v2368_v1  ;;  %v2431_v57 = vunpack.c.l.s8.bf16 %v1567_v31  ;;  %v1576_v1 = vld [vmem:[#allocation10 + $0xb78] sm:$0xff] }
 0x5a8   :  { %3606 = vmatprep.subr.bf16.mxu1 %v2366_v4  ;;  %v2440_v4 = vunpack.c.h.s8.bf16 %v1568_v35 }
 0x5a9   :  { %3926 = vmatmul.mubr.bf16.vlgmr.msra.gmra.mrb[12].mxu0 %v6746_v13 }
 0x5aa   :  { %3598 = vmatmul.mubr.bf16.vlgmr.msra.gmra.mrb[4].mxu1 %v6746_v13  ;;  %3935 = vmatpush1.bf16.msra.mxu0 %v2367_v37  ;;  %v2390_v13 = vunpack.c.h.s8.bf16 %v1542_v17  ;;  %v2446_v37 = vunpack.c.l.s8.bf16 %v1574_v50  ;;  %v2448_v17 = vunpack.c.l.s8.bf16 %v1576_v1 }
 0x5ab   :  { %3607 = vmatpush1.bf16.msra.mxu1 %v2365_v52  ;;  %3638 = vmatprep.mubr.bf16.mxu1 %v6751_v53  ;;  %v2439_v52 = vunpack.c.h.s8.bf16 %v1567_v31 }
 0x5ac   :  { %3966 = vmatprep.mubr.bf16.mxu0 %v6751_v53  ;;  %3608 = vmatprep.subr.bf16.mxu1 %v2374_v8  ;;  %v2398_v53 = vunpack.c.l.s8.bf16 %v1550_v26  ;;  %v1573_v8 = vld [vmem:[#allocation10 + $0xb60] sm:$0xff]  ;;  %v1583_v26 = vld [vmem:[#allocation10 + $0xbb0] sm:$0xff] }
 0x5ad   :  { %3936 = vmatprep.subr.bf16.mxu0 %v2376_v16  ;;  %v1575_v16 = vld [vmem:[#allocation10 + $0xb70] sm:$0xff]  ;;  %v2445_v61 = vunpack.c.l.s8.bf16 %v1573_v8  ;;  %v2453_v34 = vunpack.c.h.s8.bf16 %v1573_v8  ;;  %v1616_v8 = vld [vmem:[#allocation10 + $0xcb8] sm:$0xff] }
 0x5ae   :  { %3937 = vmatpush1.bf16.msra.mxu0 %v2375_v21  ;;  %v2454_v21 = vunpack.c.h.s8.bf16 %v1574_v50  ;;  %v1607_v50 = vld [vmem:[#allocation10 + $0xc70] sm:$0xff] }
 0x5af   :  { %3609 = vmatpush1.bf16.msra.mxu1 %v2373_v9  ;;  %3938 = vmatprep.subr.bf16.mxu0 %v2384_v27  ;;  %v2447_v9 = vunpack.c.l.s8.bf16 %v1575_v16  ;;  %v1584_v27 = vld [vmem:[#allocation10 + $0xbb8] sm:$0xff] }
 0x5b0   :  { %3610 = vmatprep.subr.bf16.mxu1 %v2382_v5  ;;  %v2456_v5 = vunpack.c.h.s8.bf16 %v1576_v1 }
 0x5b2   :  { %3939 = vmatpush1.bf16.msra.mxu0 %v2383_v49  ;;  %v2462_v49 = vunpack.c.l.s8.bf16 %v1582_v39 }
 0x5b3   :  { %3611 = vmatpush1.bf16.msra.mxu1 %v2381_v14  ;;  %3940 = vmatprep.subr.bf16.mxu0 %v2392_v47  ;;  %v2455_v14 = vunpack.c.h.s8.bf16 %v1575_v16  ;;  %v2464_v47 = vunpack.c.l.s8.bf16 %v1584_v27  ;;  %v2519_v16 = vunpack.c.h.s8.bf16 %v1607_v50 }
 0x5b4   :  { %3612 = vmatprep.subr.bf16.mxu1 %v2390_v13  ;;  %v1581_v13 = vld [vmem:[#allocation10 + $0xba0] sm:$0xff] }
 0x5b5   :  { %v2461_v58 = vunpack.c.l.s8.bf16 %v1581_v13  ;;  %v2469_v7 = vunpack.c.h.s8.bf16 %v1581_v13 }
 0x5b6   :  { %3941 = vmatpush1.bf16.msra.mxu0 %v2391_v55  ;;  %v2470_v55 = vunpack.c.h.s8.bf16 %v1582_v39 }
 0x5b7   :  { %3613 = vmatpush1.bf16.msra.mxu1 %v2389_v54  ;;  %3942 = vmatprep.subr.bf16.mxu0 %v2400_v23  ;;  %v2463_v54 = vunpack.c.l.s8.bf16 %v1583_v26  ;;  %v1592_v23 = vld [vmem:[#allocation10 + $0xbf8] sm:$0xff] }
 0x5b8   :  { %3614 = vmatprep.subr.bf16.mxu1 %v2398_v53  ;;  %v2472_v53 = vunpack.c.h.s8.bf16 %v1584_v27 }
 0x5ba   :  { %3943 = vmatpush1.bf16.msra.mxu0 %v2399_v0  ;;  %v2478_v0 = vunpack.c.l.s8.bf16 %v1590_v22 }
 0x5bb   :  { %3615 = vmatpush1.bf16.msra.mxu1 %v2397_v41  ;;  %3944 = vmatprep.subr.bf16.mxu0 %v2408_v56  ;;  %v2471_v41 = vunpack.c.h.s8.bf16 %v1583_v26  ;;  %v2480_v56 = vunpack.c.l.s8.bf16 %v1592_v23 }
 0x5bc   :  { %3616 = vmatprep.subr.bf16.mxu1 %v2406_v18  ;;  %v1589_v18 = vld [vmem:[#allocation10 + $0xbe0] sm:$0xff] }
 0x5bd   :  { %v2477_v59 = vunpack.c.l.s8.bf16 %v1589_v18  ;;  %v2485_v11 = vunpack.c.h.s8.bf16 %v1589_v18 }
 0x5be   :  { %3945 = vmatpush1.bf16.msra.mxu0 %v2407_v25  ;;  %v2486_v25 = vunpack.c.h.s8.bf16 %v1590_v22 }
 0x5bf   :  { %3617 = vmatpush1.bf16.msra.mxu1 %v2405_v38  ;;  %3946 = vmatprep.subr.bf16.mxu0 %v2416_v48  ;;  %v2479_v38 = vunpack.c.l.s8.bf16 %v1591_v15  ;;  %v1600_v48 = vld [vmem:[#allocation10 + $0xc38] sm:$0xff] }
 0x5c0   :  { %3618 = vmatprep.subr.bf16.mxu1 %v2414_v28  ;;  %v2488_v28 = vunpack.c.h.s8.bf16 %v1592_v23  ;;  %v2504_v30 = vunpack.c.h.s8.bf16 %v1600_v48 }
 0x5c2   :  { %3947 = vmatpush1.bf16.msra.mxu0 %v2415_v10  ;;  %v2494_v10 = vunpack.c.l.s8.bf16 %v1598_v63 }
 0x5c3   :  { %3619 = vmatpush1.bf16.msra.mxu1 %v2413_v51  ;;  %3948 = vmatprep.subr.bf16.mxu0 %v2424_v6  ;;  %v2487_v51 = vunpack.c.h.s8.bf16 %v1591_v15  ;;  %v2496_v6 = vunpack.c.l.s8.bf16 %v1600_v48 }
 0x5c4   :  { %3620 = vmatprep.subr.bf16.mxu1 %v2422_v46  ;;  %v1597_v46 = vld [vmem:[#allocation10 + $0xc20] sm:$0xff] }
 0x5c5   :  { %v2493_v35 = vunpack.c.l.s8.bf16 %v1597_v46  ;;  %v2501_v31 = vunpack.c.h.s8.bf16 %v1597_v46 }
 0x5c6   :  { %3949 = vmatpush1.bf16.msra.mxu0 %v2423_v40  ;;  %v2502_v40 = vunpack.c.h.s8.bf16 %v1598_v63 }
 0x5c7   :  { %3621 = vmatpush1.bf16.msra.mxu1 %v2421_v33  ;;  %3950 = vmatprep.subr.bf16.mxu0 %v2432_v3  ;;  %v2495_v33 = vunpack.c.l.s8.bf16 %v1599_v45  ;;  %v1608_v3 = vld [vmem:[#allocation10 + $0xc78] sm:$0xff] }
 0x5c8   :  { %3622 = vmatprep.subr.bf16.mxu1 %v2430_v19  ;;  %v1606_v19 = vld [vmem:[#allocation10 + $0xc68] sm:$0xff] }
 0x5ca   :  { %3951 = vmatpush1.bf16.msra.mxu0 %v2431_v57  ;;  %v2510_v57 = vunpack.c.l.s8.bf16 %v1606_v19 }
 0x5cb   :  { %3623 = vmatpush1.bf16.msra.mxu1 %v2429_v42  ;;  %3952 = vmatprep.subr.bf16.mxu0 %v2440_v4  ;;  %v2503_v42 = vunpack.c.h.s8.bf16 %v1599_v45  ;;  %v2512_v4 = vunpack.c.l.s8.bf16 %v1608_v3 }
 0x5cc   :  { %3624 = vmatprep.subr.bf16.mxu1 %v2438_v2  ;;  %v1605_v2 = vld [vmem:[#allocation10 + $0xc60] sm:$0xff] }
 0x5cd   :  { %v2509_v1 = vunpack.c.l.s8.bf16 %v1605_v2 }
 0x5ce   :  { %3953 = vmatpush1.bf16.msra.mxu0 %v2439_v52  ;;  %v2520_v52 = vunpack.c.h.s8.bf16 %v1608_v3 }
 0x5cf   :  { %3625 = vmatpush1.bf16.msra.mxu1 %v2437_v62  ;;  %3954 = vmatprep.subr.bf16.mxu0 %v2448_v17  ;;  %v2511_v62 = vunpack.c.l.s8.bf16 %v1607_v50  ;;  %v2517_v17 = vunpack.c.h.s8.bf16 %v1605_v2 }
 0x5d0   :  { %3626 = vmatprep.subr.bf16.mxu1 %v2446_v37  ;;  %v1614_v37 = vld [vmem:[#allocation10 + $0xca8] sm:$0xff] }
 0x5d1   :  { %v2534_v27 = vunpack.c.h.s8.bf16 %v1614_v37 }
 0x5d2   :  { %3955 = vmatpush1.bf16.msra.mxu0 %v2447_v9  ;;  %v2528_v9 = vunpack.c.l.s8.bf16 %v1616_v8 }
 0x5d3   :  { %3627 = vmatpush1.bf16.msra.mxu1 %v2445_v61  ;;  %3956 = vmatprep.subr.bf16.mxu0 %v2456_v5  ;;  %v1613_v61 = vld [vmem:[#allocation10 + $0xca0] sm:$0xff] }
 0x5d4   :  { %3628 = vmatprep.subr.bf16.mxu1 %v2454_v21  ;;  %v1615_v21 = vld [vmem:[#allocation10 + $0xcb0] sm:$0xff]  ;;  %v2525_v5 = vunpack.c.l.s8.bf16 %v1613_v61  ;;  %v2533_v13 = vunpack.c.h.s8.bf16 %v1613_v61 }
 0x5d5   :  { %v2527_v39 = vunpack.c.l.s8.bf16 %v1615_v21 }
 0x5d6   :  { %3957 = vmatpush1.bf16.msra.mxu0 %v2455_v14  ;;  %v1622_v14 = vld [vmem:[#allocation10 + $0xce8] sm:$0xff] }
 0x5d7   :  { %3629 = vmatpush1.bf16.msra.mxu1 %v2453_v34  ;;  %3958 = vmatprep.subr.bf16.mxu0 %v2464_v47  ;;  %v2536_v34 = vunpack.c.h.s8.bf16 %v1616_v8  ;;  %v2535_v47 = vunpack.c.h.s8.bf16 %v1615_v21  ;;  %v2542_v26 = vunpack.c.l.s8.bf16 %v1622_v14  ;;  %v2550_v23 = vunpack.c.h.s8.bf16 %v1622_v14 }
 0x5d8   :  { %3630 = vmatprep.subr.bf16.mxu1 %v2462_v49  ;;  %v1624_v49 = vld [vmem:[#allocation10 + $0xcf8] sm:$0xff] }
 0x5da   :  { %3959 = vmatpush1.bf16.msra.mxu0 %v2463_v54  ;;  %v2544_v54 = vunpack.c.l.s8.bf16 %v1624_v49 }
 0x5db   :  { %3631 = vmatpush1.bf16.msra.mxu1 %v2461_v58  ;;  %3960 = vmatprep.subr.bf16.mxu0 %v2472_v53  ;;  %v1621_v58 = vld [vmem:[#allocation10 + $0xce0] sm:$0xff] }
 0x5dc   :  { %3632 = vmatprep.subr.bf16.mxu1 %v2470_v55  ;;  %v1623_v55 = vld [vmem:[#allocation10 + $0xcf0] sm:$0xff]  ;;  %v2541_v53 = vunpack.c.l.s8.bf16 %v1621_v58  ;;  %v2549_v18 = vunpack.c.h.s8.bf16 %v1621_v58 }
 0x5dd   :  { %v2543_v22 = vunpack.c.l.s8.bf16 %v1623_v55 }
 0x5de   :  { %3961 = vmatpush1.bf16.msra.mxu0 %v2471_v41  ;;  %v1630_v41 = vld [vmem:[#allocation10 + $0xd28] sm:$0xff] }
 0x5df   :  { %3633 = vmatpush1.bf16.msra.mxu1 %v2469_v7  ;;  %3962 = vmatprep.subr.bf16.mxu0 %v2480_v56  ;;  %v2552_v7 = vunpack.c.h.s8.bf16 %v1624_v49  ;;  %v2551_v56 = vunpack.c.h.s8.bf16 %v1623_v55  ;;  %v2558_v15 = vunpack.c.l.s8.bf16 %v1630_v41  ;;  %v2566_v48 = vunpack.c.h.s8.bf16 %v1630_v41 }
 0x5e0   :  { %3634 = vmatprep.subr.bf16.mxu1 %v2478_v0  ;;  %v1632_v0 = vld [vmem:[#allocation10 + $0xd38] sm:$0xff] }
 0x5e2   :  { %3963 = vmatpush1.bf16.msra.mxu0 %v2479_v38  ;;  %v2560_v38 = vunpack.c.l.s8.bf16 %v1632_v0 }
 0x5e3   :  { %3635 = vmatpush1.bf16.msra.mxu1 %v2477_v59  ;;  %3964 = vmatprep.subr.bf16.mxu0 %v2488_v28  ;;  %v1629_v59 = vld [vmem:[#allocation10 + $0xd20] sm:$0xff] }
 0x5e4   :  { %3636 = vmatprep.subr.bf16.mxu1 %v2486_v25  ;;  %v1631_v25 = vld [vmem:[#allocation10 + $0xd30] sm:$0xff]  ;;  %v2557_v28 = vunpack.c.l.s8.bf16 %v1629_v59  ;;  %v2565_v46 = vunpack.c.h.s8.bf16 %v1629_v59 }
 0x5e5   :  { %v2559_v63 = vunpack.c.l.s8.bf16 %v1631_v25 }
 0x5e6   :  { %3965 = vmatpush1.bf16.msra.mxu0 %v2487_v51  ;;  %v1638_v51 = vld [vmem:[#allocation10 + $0xd68] sm:$0xff] }
 0x5e7   :  { %3637 = vmatpush1.bf16.msra.mxu1 %v2485_v11  ;;  %3975 = vmatprep.subr.bf16.mxu0 %v2496_v6  ;;  %v2568_v11 = vunpack.c.h.s8.bf16 %v1632_v0  ;;  %v2567_v6 = vunpack.c.h.s8.bf16 %v1631_v25  ;;  %v2574_v45 = vunpack.c.l.s8.bf16 %v1638_v51  ;;  %v2582_v3 = vunpack.c.h.s8.bf16 %v1638_v51 }
 0x5e8   :  { %3647 = vmatprep.subr.bf16.mxu1 %v2494_v10  ;;  %v1640_v10 = vld [vmem:[#allocation10 + $0xd78] sm:$0xff] }
 0x5e9   :  { %3967 = vmatmul.mubr.bf16.vlgmr.msra.gmra.mrb[12].mxu0 %v6758_v12 }
 0x5ea   :  { %3639 = vmatmul.mubr.bf16.vlgmr.msra.gmra.mrb[4].mxu1 %v6758_v12  ;;  %3976 = vmatpush1.bf16.msra.mxu0 %v2495_v33  ;;  %v2518_v12 = vunpack.c.h.s8.bf16 %v1606_v19  ;;  %v2576_v33 = vunpack.c.l.s8.bf16 %v1640_v10 }
 0x5eb   :  { %3648 = vmatpush1.bf16.msra.mxu1 %v2493_v35  ;;  %3679 = vmatprep.mubr.bf16.mxu1 %v6763_v29  ;;  %v1637_v35 = vld [vmem:[#allocation10 + $0xd60] sm:$0xff] }
 0x5ec   :  { %4007 = vmatprep.mubr.bf16.mxu0 %v6763_v29  ;;  %3649 = vmatprep.subr.bf16.mxu1 %v2502_v40  ;;  %v2526_v29 = vunpack.c.l.s8.bf16 %v1614_v37  ;;  %v1639_v40 = vld [vmem:[#allocation10 + $0xd70] sm:$0xff]  ;;  %v2573_v19 = vunpack.c.l.s8.bf16 %v1637_v35  ;;  %v2581_v2 = vunpack.c.h.s8.bf16 %v1637_v35 }
 0x5ed   :  { %3977 = vmatprep.subr.bf16.mxu0 %v2504_v30  ;;  %v2575_v30 = vunpack.c.l.s8.bf16 %v1639_v40 }
 0x5ee   :  { %3978 = vmatpush1.bf16.msra.mxu0 %v2503_v42  ;;  %v1646_v42 = vld [vmem:[#allocation10 + $0xda8] sm:$0xff] }
 0x5ef   :  { %3650 = vmatpush1.bf16.msra.mxu1 %v2501_v31  ;;  %3979 = vmatprep.subr.bf16.mxu0 %v2512_v4  ;;  %v2584_v31 = vunpack.c.h.s8.bf16 %v1640_v10  ;;  %v2583_v4 = vunpack.c.h.s8.bf16 %v1639_v40  ;;  %v2590_v50 = vunpack.c.l.s8.bf16 %v1646_v42  ;;  %v2598_v8 = vunpack.c.h.s8.bf16 %v1646_v42 }
 0x5f0   :  { %3651 = vmatprep.subr.bf16.mxu1 %v2510_v57  ;;  %v1648_v57 = vld [vmem:[#allocation10 + $0xdb8] sm:$0xff] }
 0x5f2   :  { %3980 = vmatpush1.bf16.msra.mxu0 %v2511_v62  ;;  %v2592_v62 = vunpack.c.l.s8.bf16 %v1648_v57 }
 0x5f3   :  { %3652 = vmatpush1.bf16.msra.mxu1 %v2509_v1  ;;  %3981 = vmatprep.subr.bf16.mxu0 %v2520_v52  ;;  %v1645_v1 = vld [vmem:[#allocation10 + $0xda0] sm:$0xff] }
 0x5f4   :  { %3653 = vmatprep.subr.bf16.mxu1 %v2518_v12  ;;  %v1647_v12 = vld [vmem:[#allocation10 + $0xdb0] sm:$0xff]  ;;  %v2589_v52 = vunpack.c.l.s8.bf16 %v1645_v1  ;;  %v2597_v61 = vunpack.c.h.s8.bf16 %v1645_v1 }
 0x5f5   :  { %v2591_v37 = vunpack.c.l.s8.bf16 %v1647_v12 }
 0x5f6   :  { %3982 = vmatpush1.bf16.msra.mxu0 %v2519_v16  ;;  %v1654_v16 = vld [vmem:[#allocation10 + $0xde8] sm:$0xff] }
 0x5f7   :  { %3654 = vmatpush1.bf16.msra.mxu1 %v2517_v17  ;;  %3983 = vmatprep.subr.bf16.mxu0 %v2528_v9  ;;  %v2600_v17 = vunpack.c.h.s8.bf16 %v1648_v57  ;;  %v2599_v9 = vunpack.c.h.s8.bf16 %v1647_v12  ;;  %v2606_v21 = vunpack.c.l.s8.bf16 %v1654_v16  ;;  %v2614_v49 = vunpack.c.h.s8.bf16 %v1654_v16  ;;  %v1686_v57 = vld [vmem:[#allocation10 + $0xee8] sm:$0xff] }
 0x5f8   :  { %3655 = vmatprep.subr.bf16.mxu1 %v2526_v29  ;;  %v1656_v29 = vld [vmem:[#allocation10 + $0xdf8] sm:$0xff]  ;;  %v2670_v1 = vunpack.c.l.s8.bf16 %v1686_v57 }
 0x5fa   :  { %3984 = vmatpush1.bf16.msra.mxu0 %v2527_v39  ;;  %v2608_v39 = vunpack.c.l.s8.bf16 %v1656_v29 }
 0x5fb   :  { %3656 = vmatpush1.bf16.msra.mxu1 %v2525_v5  ;;  %3985 = vmatprep.subr.bf16.mxu0 %v2536_v34  ;;  %v1653_v5 = vld [vmem:[#allocation10 + $0xde0] sm:$0xff] }
 0x5fc   :  { %3657 = vmatprep.subr.bf16.mxu1 %v2534_v27  ;;  %v1655_v27 = vld [vmem:[#allocation10 + $0xdf0] sm:$0xff]  ;;  %v2605_v34 = vunpack.c.l.s8.bf16 %v1653_v5  ;;  %v2613_v58 = vunpack.c.h.s8.bf16 %v1653_v5 }
 0x5fd   :  { %v2607_v14 = vunpack.c.l.s8.bf16 %v1655_v27 }
 0x5fe   :  { %3986 = vmatpush1.bf16.msra.mxu0 %v2535_v47  ;;  %v1662_v47 = vld [vmem:[#allocation10 + $0xe28] sm:$0xff] }
 0x5ff   :  { %3658 = vmatpush1.bf16.msra.mxu1 %v2533_v13  ;;  %3987 = vmatprep.subr.bf16.mxu0 %v2544_v54  ;;  %v2616_v13 = vunpack.c.h.s8.bf16 %v1656_v29  ;;  %v2615_v54 = vunpack.c.h.s8.bf16 %v1655_v27  ;;  %v2622_v55 = vunpack.c.l.s8.bf16 %v1662_v47  ;;  %v2630_v0 = vunpack.c.h.s8.bf16 %v1662_v47  ;;  %v1694_v29 = vld [vmem:[#allocation10 + $0xf28] sm:$0xff] }
 0x600   :  { %3659 = vmatprep.subr.bf16.mxu1 %v2542_v26  ;;  %v1664_v26 = vld [vmem:[#allocation10 + $0xe38] sm:$0xff]  ;;  %v2686_v5 = vunpack.c.l.s8.bf16 %v1694_v29 }
 0x602   :  { %3988 = vmatpush1.bf16.msra.mxu0 %v2543_v22  ;;  %v2624_v22 = vunpack.c.l.s8.bf16 %v1664_v26 }
 0x603   :  { %3660 = vmatpush1.bf16.msra.mxu1 %v2541_v53  ;;  %3989 = vmatprep.subr.bf16.mxu0 %v2552_v7  ;;  %v1661_v53 = vld [vmem:[#allocation10 + $0xe20] sm:$0xff] }
 0x604   :  { %3661 = vmatprep.subr.bf16.mxu1 %v2550_v23  ;;  %v1663_v23 = vld [vmem:[#allocation10 + $0xe30] sm:$0xff]  ;;  %v2621_v7 = vunpack.c.l.s8.bf16 %v1661_v53  ;;  %v2629_v59 = vunpack.c.h.s8.bf16 %v1661_v53 }
 0x605   :  { %v2623_v41 = vunpack.c.l.s8.bf16 %v1663_v23 }
 0x606   :  { %3990 = vmatpush1.bf16.msra.mxu0 %v2551_v56  ;;  %v2632_v56 = vunpack.c.h.s8.bf16 %v1664_v26  ;;  %v1702_v26 = vld [vmem:[#allocation10 + $0xf68] sm:$0xff] }
 0x607   :  { %3662 = vmatpush1.bf16.msra.mxu1 %v2549_v18  ;;  %3991 = vmatprep.subr.bf16.mxu0 %v2560_v38  ;;  %v1670_v18 = vld [vmem:[#allocation10 + $0xe68] sm:$0xff]  ;;  %v2631_v38 = vunpack.c.h.s8.bf16 %v1663_v23  ;;  %v2702_v53 = vunpack.c.l.s8.bf16 %v1702_v26 }
 0x608   :  { %3663 = vmatprep.subr.bf16.mxu1 %v2558_v15  ;;  %v1672_v15 = vld [vmem:[#allocation10 + $0xe78] sm:$0xff]  ;;  %v2638_v25 = vunpack.c.l.s8.bf16 %v1670_v18 }
 0x609   :  { %v2648_v10 = vunpack.c.h.s8.bf16 %v1672_v15 }
 0x60a   :  { %3992 = vmatpush1.bf16.msra.mxu0 %v2559_v63  ;;  %v2640_v63 = vunpack.c.l.s8.bf16 %v1672_v15  ;;  %v1710_v15 = vld [vmem:[#allocation10 + $0xfa8] sm:$0xff] }
 0x60b   :  { %3664 = vmatpush1.bf16.msra.mxu1 %v2557_v28  ;;  %3993 = vmatprep.subr.bf16.mxu0 %v2568_v11  ;;  %v1669_v28 = vld [vmem:[#allocation10 + $0xe60] sm:$0xff] }
 0x60c   :  { %3665 = vmatprep.subr.bf16.mxu1 %v2566_v48  ;;  %v1671_v48 = vld [vmem:[#allocation10 + $0xe70] sm:$0xff]  ;;  %v2637_v11 = vunpack.c.l.s8.bf16 %v1669_v28 }
 0x60d   :  { %v2639_v51 = vunpack.c.l.s8.bf16 %v1671_v48  ;;  %v2647_v35 = vunpack.c.h.s8.bf16 %v1671_v48 }
 0x60e   :  { %3994 = vmatpush1.bf16.msra.mxu0 %v2567_v6  ;;  %v1680_v6 = vld [vmem:[#allocation10 + $0xeb8] sm:$0xff] }
 0x60f   :  { %3666 = vmatpush1.bf16.msra.mxu1 %v2565_v46  ;;  %3995 = vmatprep.subr.bf16.mxu0 %v2576_v33  ;;  %v1678_v46 = vld [vmem:[#allocation10 + $0xea8] sm:$0xff]  ;;  %v1677_v33 = vld [vmem:[#allocation10 + $0xea0] sm:$0xff]  ;;  %v2656_v40 = vunpack.c.l.s8.bf16 %v1680_v6  ;;  %v2664_v42 = vunpack.c.h.s8.bf16 %v1680_v6 }
 0x610   :  { %3667 = vmatprep.subr.bf16.mxu1 %v2574_v45  ;;  %v2645_v45 = vunpack.c.h.s8.bf16 %v1669_v28  ;;  %v2718_v28 = vunpack.c.l.s8.bf16 %v1710_v15  ;;  %v1718_v6 = vld [vmem:[#allocation10 + $0xfe8] sm:$0xff] }
 0x612   :  { %3996 = vmatpush1.bf16.msra.mxu0 %v2575_v30  ;;  %v2653_v30 = vunpack.c.l.s8.bf16 %v1677_v33 }
 0x613   :  { %3668 = vmatpush1.bf16.msra.mxu1 %v2573_v19  ;;  %3997 = vmatprep.subr.bf16.mxu0 %v2584_v31  ;;  %v1679_v19 = vld [vmem:[#allocation10 + $0xeb0] sm:$0xff]  ;;  %v2662_v31 = vunpack.c.h.s8.bf16 %v1678_v46 }
 0x614   :  { %3669 = vmatprep.subr.bf16.mxu1 %v2582_v3  ;;  %v2655_v3 = vunpack.c.l.s8.bf16 %v1679_v19 }
 0x616   :  { %3998 = vmatpush1.bf16.msra.mxu0 %v2583_v4  ;;  %v2661_v4 = vunpack.c.h.s8.bf16 %v1677_v33 }
 0x617   :  { %3670 = vmatpush1.bf16.msra.mxu1 %v2581_v2  ;;  %3999 = vmatprep.subr.bf16.mxu0 %v2592_v62  ;;  %v1688_v2 = vld [vmem:[#allocation10 + $0xef8] sm:$0xff]  ;;  %v1685_v62 = vld [vmem:[#allocation10 + $0xee0] sm:$0xff] }
 0x618   :  { %3671 = vmatprep.subr.bf16.mxu1 %v2590_v50  ;;  %v2663_v50 = vunpack.c.h.s8.bf16 %v1679_v19  ;;  %v2672_v12 = vunpack.c.l.s8.bf16 %v1688_v2  ;;  %v2680_v16 = vunpack.c.h.s8.bf16 %v1688_v2  ;;  %v1717_v19 = vld [vmem:[#allocation10 + $0xfe0] sm:$0xff] }
 0x619   :  { %v2733_v2 = vunpack.c.l.s8.bf16 %v1717_v19 }
 0x61a   :  { %4000 = vmatpush1.bf16.msra.mxu0 %v2591_v37  ;;  %v2669_v37 = vunpack.c.l.s8.bf16 %v1685_v62 }
 0x61b   :  { %3672 = vmatpush1.bf16.msra.mxu1 %v2589_v52  ;;  %4001 = vmatprep.subr.bf16.mxu0 %v2600_v17  ;;  %v1687_v52 = vld [vmem:[#allocation10 + $0xef0] sm:$0xff]  ;;  %v2678_v17 = vunpack.c.h.s8.bf16 %v1686_v57  ;;  %v6828_v57 = vld [vmem:[#allocation13] sm:$0xff] }
 0x61c   :  { %3673 = vmatprep.subr.bf16.mxu1 %v2598_v8  ;;  %v2671_v8 = vunpack.c.l.s8.bf16 %v1687_v52 }
 0x61e   :  { %4002 = vmatpush1.bf16.msra.mxu0 %v2599_v9  ;;  %v2677_v9 = vunpack.c.h.s8.bf16 %v1685_v62  ;;  %v4158_v62 = vld [vmem:[#allocation14 + $0x8] sm:$0xff] }
 0x61f   :  { %3674 = vmatpush1.bf16.msra.mxu1 %v2597_v61  ;;  %4003 = vmatprep.subr.bf16.mxu0 %v2608_v39  ;;  %v1696_v61 = vld [vmem:[#allocation10 + $0xf38] sm:$0xff]  ;;  %v1693_v39 = vld [vmem:[#allocation10 + $0xf20] sm:$0xff] }
 0x620   :  { %3675 = vmatprep.subr.bf16.mxu1 %v2606_v21  ;;  %v2679_v21 = vunpack.c.h.s8.bf16 %v1687_v52  ;;  %v2688_v27 = vunpack.c.l.s8.bf16 %v1696_v61  ;;  %v2696_v47 = vunpack.c.h.s8.bf16 %v1696_v61 }
 0x622   :  { %4004 = vmatpush1.bf16.msra.mxu0 %v2607_v14  ;;  %v2685_v14 = vunpack.c.l.s8.bf16 %v1693_v39 }
 0x623   :  { %3676 = vmatpush1.bf16.msra.mxu1 %v2605_v34  ;;  %4005 = vmatprep.subr.bf16.mxu0 %v2616_v13  ;;  %v1695_v34 = vld [vmem:[#allocation10 + $0xf30] sm:$0xff]  ;;  %v2694_v13 = vunpack.c.h.s8.bf16 %v1694_v29 }
 0x624   :  { %3677 = vmatprep.subr.bf16.mxu1 %v2614_v49  ;;  %v2687_v49 = vunpack.c.l.s8.bf16 %v1695_v34  ;;  %v4157_v29 = vld [vmem:[#allocation14] sm:$0xff] }
 0x626   :  { %4006 = vmatpush1.bf16.msra.mxu0 %v2615_v54  ;;  %v2693_v54 = vunpack.c.h.s8.bf16 %v1693_v39  ;;  %v4290_v39 = vunpack.c.h.s8.bf16 %v4158_v62 }
 0x627   :  { %3678 = vmatpush1.bf16.msra.mxu1 %v2613_v58  ;;  %4016 = vmatprep.subr.bf16.mxu0 %v2624_v22  ;;  %v1704_v58 = vld [vmem:[#allocation10 + $0xf78] sm:$0xff]  ;;  %v1701_v22 = vld [vmem:[#allocation10 + $0xf60] sm:$0xff] }
 0x628   :  { %3688 = vmatprep.subr.bf16.mxu1 %v2622_v55  ;;  %v2695_v55 = vunpack.c.h.s8.bf16 %v1695_v34  ;;  %v2704_v23 = vunpack.c.l.s8.bf16 %v1704_v58 }
 0x629   :  { %4008 = vmatmul.mubr.bf16.vlgmr.msra.gmra.mrb[12].mxu0 %v6770_v24 }
 0x62a   :  { %3680 = vmatmul.mubr.bf16.vlgmr.msra.gmra.mrb[4].mxu1 %v6770_v24  ;;  %4017 = vmatpush1.bf16.msra.mxu0 %v2623_v41  ;;  %v2646_v24 = vunpack.c.h.s8.bf16 %v1670_v18  ;;  %v2701_v41 = vunpack.c.l.s8.bf16 %v1701_v22  ;;  %v2710_v18 = vunpack.c.h.s8.bf16 %v1702_v26 }
 0x62b   :  { %3689 = vmatpush1.bf16.msra.mxu1 %v2621_v7  ;;  %3720 = vmatprep.mubr.bf16.mxu1 %v6775_v32  ;;  %v1703_v7 = vld [vmem:[#allocation10 + $0xf70] sm:$0xff] }
 0x62c   :  { %4048 = vmatprep.mubr.bf16.mxu0 %v6775_v32  ;;  %3690 = vmatprep.subr.bf16.mxu1 %v2630_v0  ;;  %v2654_v32 = vunpack.c.l.s8.bf16 %v1678_v46  ;;  %v2703_v0 = vunpack.c.l.s8.bf16 %v1703_v7 }
 0x62d   :  { %4018 = vmatprep.subr.bf16.mxu0 %v2632_v56  ;;  %v2712_v56 = vunpack.c.h.s8.bf16 %v1704_v58  ;;  %v4161_v58 = vld [vmem:[#allocation14 + $0x20] sm:$0xff] }
 0x62e   :  { %4019 = vmatpush1.bf16.msra.mxu0 %v2631_v38  ;;  %v2709_v38 = vunpack.c.h.s8.bf16 %v1701_v22 }
 0x62f   :  { %3691 = vmatpush1.bf16.msra.mxu1 %v2629_v59  ;;  %4020 = vmatprep.subr.bf16.mxu0 %v2640_v63  ;;  %v1712_v59 = vld [vmem:[#allocation10 + $0xfb8] sm:$0xff]  ;;  %v1709_v63 = vld [vmem:[#allocation10 + $0xfa0] sm:$0xff] }
 0x630   :  { %3692 = vmatprep.subr.bf16.mxu1 %v2638_v25  ;;  %v2711_v25 = vunpack.c.h.s8.bf16 %v1703_v7  ;;  %v2720_v48 = vunpack.c.l.s8.bf16 %v1712_v59  ;;  %v2728_v46 = vunpack.c.h.s8.bf16 %v1712_v59  ;;  %v4166_v7 = vld [vmem:[#allocation14 + $0x48] sm:$0xff] }
 0x632   :  { %4021 = vmatpush1.bf16.msra.mxu0 %v2639_v51  ;;  %v2717_v51 = vunpack.c.l.s8.bf16 %v1709_v63 }
 0x633   :  { %3693 = vmatpush1.bf16.msra.mxu1 %v2637_v11  ;;  %4022 = vmatprep.subr.bf16.mxu0 %v2648_v10  ;;  %v1711_v11 = vld [vmem:[#allocation10 + $0xfb0] sm:$0xff]  ;;  %v2726_v10 = vunpack.c.h.s8.bf16 %v1710_v15 }
 0x634   :  { %3694 = vmatprep.subr.bf16.mxu1 %v2646_v24  ;;  %v2719_v24 = vunpack.c.l.s8.bf16 %v1711_v11  ;;  %v2727_v33 = vunpack.c.h.s8.bf16 %v1711_v11  ;;  %v4165_v15 = vld [vmem:[#allocation14 + $0x40] sm:$0xff]  ;;  %v4170_v11 = vld [vmem:[#allocation14 + $0x68] sm:$0xff] }
 0x636   :  { %4023 = vmatpush1.bf16.msra.mxu0 %v2647_v35  ;;  %v6824_v35 = vld [vmem:[#allocation11] sm:$0xff] }
 0x637   :  { %3695 = vmatpush1.bf16.msra.mxu1 %v2645_v45  ;;  %4024 = vmatprep.subr.bf16.mxu0 %v2656_v40  ;;  %v1720_v45 = vld [vmem:[#allocation10 + $0xff8] sm:$0xff]  ;;  %v2734_v40 = vunpack.c.l.s8.bf16 %v1718_v6 }
 0x638   :  { %3696 = vmatprep.subr.bf16.mxu1 %v2654_v32  ;;  %v2725_v32 = vunpack.c.h.s8.bf16 %v1709_v63  ;;  %v4306_v63 = vunpack.c.h.s8.bf16 %v4166_v7 }
 0x63a   :  { %4025 = vmatpush1.bf16.msra.mxu0 %v2655_v3  ;;  %v1719_v3 = vld [vmem:[#allocation10 + $0xff0] sm:$0xff] }
 0x63b   :  { %3697 = vmatpush1.bf16.msra.mxu1 %v2653_v30  ;;  %4026 = vmatprep.subr.bf16.mxu0 %v2664_v42  ;;  %v2736_v30 = vunpack.c.l.s8.bf16 %v1720_v45 }
 0x63c   :  { %3698 = vmatprep.subr.bf16.mxu1 %v2662_v31  ;;  %v7088_v31 = vld [vmem:[#allocation30_spill] sm:$0xff] }
 0x63d   :  { %v4066_v42 = vrot.slane %v6824_v35, %v7088_v31  ;;  %v4116_v52 = vrot.slane %v6828_v57, %v7088_v31 }
 0x63e   :  { %4027 = vmatpush1.bf16.msra.mxu0 %v2663_v50  ;;  %v2742_v50 = vunpack.c.h.s8.bf16 %v1718_v6  ;;  %v4169_v6 = vld [vmem:[#allocation14 + $0x60] sm:$0xff] }
 0x63f   :  { %3699 = vmatpush1.bf16.msra.mxu1 %v2661_v4  ;;  %4028 = vmatprep.subr.bf16.mxu0 %v2672_v12  ;;  %v2735_v4 = vunpack.c.l.s8.bf16 %v1719_v3  ;;  %v4100_v12 = vmul.f32 %v4066_v42, %v6804_v60  ;;  %v4176_v42 = vld [vmem:[#allocation14 + $0x98] sm:$0xff] }
 0x640   :  { %3700 = vmatprep.subr.bf16.mxu1 %v2670_v1  ;;  %v2744_v1 = vunpack.c.h.s8.bf16 %v1720_v45 }
 0x642   :  { %4029 = vmatpush1.bf16.msra.mxu0 %v2671_v8  ;;  %v2741_v8 = vunpack.c.h.s8.bf16 %v1717_v19  ;;  %v4314_v19 = vunpack.c.h.s8.bf16 %v4170_v11 }
 0x643   :  { %3701 = vmatpush1.bf16.msra.mxu1 %v2669_v37  ;;  %4030 = vmatprep.subr.bf16.mxu0 %v2680_v16  ;;  %v4160_v37 = vld [vmem:[#allocation14 + $0x18] sm:$0xff]  ;;  %v4286_v16 = vunpack.c.l.s8.bf16 %v4158_v62  ;;  %v4320_v62 = vunpack.c.l.s8.bf16 %v4176_v42 }
 0x644   :  { %3702 = vmatprep.subr.bf16.mxu1 %v2678_v17  ;;  %v2743_v17 = vunpack.c.h.s8.bf16 %v1719_v3  ;;  %v4288_v61 = vunpack.c.l.s8.bf16 %v4160_v37  ;;  %v4174_v3 = vld [vmem:[#allocation14 + $0x88] sm:$0xff] }
 0x646   :  { %4031 = vmatpush1.bf16.msra.mxu0 %v2679_v21  ;;  %v4150_v21 = vadd.f32 %v4116_v52, %v4100_v12  ;;  %v4175_v12 = vld [vmem:[#allocation14 + $0x90] sm:$0xff] }
 0x647   :  { %3703 = vmatpush1.bf16.msra.mxu1 %v2677_v9  ;;  %4032 = vmatprep.subr.bf16.mxu0 %v2688_v27  ;;  %v4159_v9 = vld [vmem:[#allocation14 + $0x10] sm:$0xff]  ;;  %v4162_v27 = vld [vmem:[#allocation14 + $0x28] sm:$0xff] }
 0x648   :  { %3704 = vmatprep.subr.bf16.mxu1 %v2686_v5  ;;  %v4285_v5 = vunpack.c.l.s8.bf16 %v4157_v29  ;;  %v4287_v60 = vunpack.c.l.s8.bf16 %v4159_v9  ;;  %v4542_v34 = vpack.c.bf16 %v4150_v21, %v4150_v21  ;;  %v4294_v26 = vunpack.c.l.s8.bf16 %v4162_v27 }
 0x64a   :  { %4033 = vmatpush1.bf16.msra.mxu0 %v2687_v49  ;;  %v4164_v49 = vld [vmem:[#allocation14 + $0x38] sm:$0xff] }
 0x64b   :  { %3705 = vmatpush1.bf16.msra.mxu1 %v2685_v14  ;;  %4034 = vmatprep.subr.bf16.mxu0 %v2696_v47  ;;  %v4292_v14 = vunpack.c.h.s8.bf16 %v4160_v37  ;;  %v4291_v47 = vunpack.c.h.s8.bf16 %v4159_v9  ;;  %v4319_v37 = vunpack.c.l.s8.bf16 %v4175_v12  ;;  %v4323_v9 = vunpack.c.h.s8.bf16 %v4175_v12 }
 0x64c   :  { %3706 = vmatprep.subr.bf16.mxu1 %v2694_v13  ;;  %v4289_v13 = vunpack.c.h.s8.bf16 %v4157_v29  ;;  %v4180_v29 = vld [vmem:[#allocation14 + $0xb8] sm:$0xff] }
 0x64e   :  { %4035 = vmatpush1.bf16.msra.mxu0 %v2695_v55  ;;  %v4163_v55 = vld [vmem:[#allocation14 + $0x30] sm:$0xff] }
 0x64f   :  { %3707 = vmatpush1.bf16.msra.mxu1 %v2693_v54  ;;  %4036 = vmatprep.subr.bf16.mxu0 %v2704_v23  ;;  %v4296_v54 = vunpack.c.l.s8.bf16 %v4164_v49  ;;  %v4295_v22 = vunpack.c.l.s8.bf16 %v4163_v55  ;;  %v4298_v23 = vunpack.c.h.s8.bf16 %v4162_v27 }
 0x650   :  { %3708 = vmatprep.subr.bf16.mxu1 %v2702_v53  ;;  %v4293_v53 = vunpack.c.l.s8.bf16 %v4161_v58 }
 0x652   :  { %4037 = vmatpush1.bf16.msra.mxu0 %v2703_v0  ;;  %v4297_v0 = vunpack.c.h.s8.bf16 %v4161_v58 }
 0x653   :  { %3709 = vmatpush1.bf16.msra.mxu1 %v2701_v41  ;;  %4038 = vmatprep.subr.bf16.mxu0 %v2712_v56  ;;  %v4168_v41 = vld [vmem:[#allocation14 + $0x58] sm:$0xff]  ;;  %v4302_v56 = vunpack.c.l.s8.bf16 %v4166_v7 }
 0x654   :  { %3710 = vmatprep.subr.bf16.mxu1 %v2710_v18  ;;  %v4299_v18 = vunpack.c.h.s8.bf16 %v4163_v55  ;;  %v4304_v59 = vunpack.c.l.s8.bf16 %v4168_v41  ;;  %v4181_v55 = vld [vmem:[#allocation14 + $0xc0] sm:$0xff] }
 0x656   :  { %4039 = vmatpush1.bf16.msra.mxu0 %v2711_v25  ;;  %v4301_v25 = vunpack.c.l.s8.bf16 %v4165_v15 }
 0x657   :  { %3711 = vmatpush1.bf16.msra.mxu1 %v2709_v38  ;;  %4040 = vmatprep.subr.bf16.mxu0 %v2720_v48  ;;  %v4167_v38 = vld [vmem:[#allocation14 + $0x50] sm:$0xff]  ;;  %v4308_v48 = vunpack.c.h.s8.bf16 %v4168_v41 }
 0x658   :  { %3712 = vmatprep.subr.bf16.mxu1 %v2718_v28  ;;  %v4303_v28 = vunpack.c.l.s8.bf16 %v4167_v38 }
 0x65a   :  { %4041 = vmatpush1.bf16.msra.mxu0 %v2719_v24  ;;  %v4305_v24 = vunpack.c.h.s8.bf16 %v4165_v15  ;;  %v4188_v15 = vld [vmem:[#allocation14 + $0xf8] sm:$0xff] }
 0x65b   :  { %3713 = vmatpush1.bf16.msra.mxu1 %v2717_v51  ;;  %4042 = vmatprep.subr.bf16.mxu0 %v2728_v46  ;;  %v4172_v51 = vld [vmem:[#allocation14 + $0x78] sm:$0xff]  ;;  %v4310_v46 = vunpack.c.l.s8.bf16 %v4170_v11  ;;  %v4344_v11 = vunpack.c.l.s8.bf16 %v4188_v15 }
 0x65c   :  { %3714 = vmatprep.subr.bf16.mxu1 %v2726_v10  ;;  %v4307_v10 = vunpack.c.h.s8.bf16 %v4167_v38  ;;  %v4312_v45 = vunpack.c.l.s8.bf16 %v4172_v51  ;;  %v7090_v38 = vld [vmem:[#allocation29_spill] sm:$0xff] }
 0x65e   :  { %4043 = vmatpush1.bf16.msra.mxu0 %v2727_v33  ;;  %v4309_v33 = vunpack.c.l.s8.bf16 %v4169_v6 }
 0x65f   :  { %3715 = vmatpush1.bf16.msra.mxu1 %v2725_v32  ;;  %4044 = vmatprep.subr.bf16.mxu0 %v2736_v30  ;;  %v4171_v32 = vld [vmem:[#allocation14 + $0x70] sm:$0xff]  ;;  %v4316_v30 = vunpack.c.h.s8.bf16 %v4172_v51 }
 0x660   :  { %3716 = vmatprep.subr.bf16.mxu1 %v2734_v40  ;;  %v4311_v40 = vunpack.c.l.s8.bf16 %v4171_v32  ;;  %v4187_v51 = vld [vmem:[#allocation14 + $0xf0] sm:$0xff] }
 0x662   :  { %4045 = vmatpush1.bf16.msra.mxu0 %v2735_v4  ;;  %v4315_v4 = vunpack.c.h.s8.bf16 %v4171_v32 }
 0x663   :  { %3717 = vmatpush1.bf16.msra.mxu1 %v2733_v2  ;;  %4046 = vmatprep.subr.bf16.mxu0 %v2744_v1  ;;  %v4313_v2 = vunpack.c.h.s8.bf16 %v4169_v6  ;;  %v4173_v1 = vld [vmem:[#allocation14 + $0x80] sm:$0xff]  ;;  %v4112_v6 = vrot.slane %v6828_v57, %v7090_v38 }
 0x664   :  { %3718 = vmatprep.subr.bf16.mxu1 %v2742_v50  ;;  %v4318_v50 = vunpack.c.l.s8.bf16 %v4174_v3  ;;  %v4317_v52 = vunpack.c.l.s8.bf16 %v4173_v1 }
 0x666   :  { %4047 = vmatpush1.bf16.msra.mxu0 %v2743_v17  ;;  %v4324_v17 = vunpack.c.h.s8.bf16 %v4176_v42 }
 0x667   :  { %3719 = vmatpush1.bf16.msra.mxu1 %v2741_v8  ;;  %4713 = vmatprep.subr.bf16.mxu0 %v4288_v61  ;;  %v4322_v8 = vunpack.c.h.s8.bf16 %v4174_v3  ;;  %v4321_v61 = vunpack.c.h.s8.bf16 %v4173_v1  ;;  %v4192_v3 = vld [vmem:[#allocation14 + $0x118] sm:$0xff] }
 0x668   :  { %4549 = vmatprep.subr.bf16.mxu1 %v4286_v16  ;;  %v4178_v16 = vld [vmem:[#allocation14 + $0xa8] sm:$0xff]  ;;  %v4352_v1 = vunpack.c.l.s8.bf16 %v4192_v3 }
 0x669   :  { %4049 = vmatmul.mubr.bf16.vlgmr.msra.gmra.mrb[12].mxu0 %v6782_v36  ;;  %v4326_v21 = vunpack.c.l.s8.bf16 %v4178_v16 }
 0x66a   :  { %3721 = vmatmul.mubr.bf16.vlgmr.msra.gmra.mrb[4].mxu1 %v6782_v36  ;;  %4714 = vmatpush1.bf16.msra.mxu0 %v4287_v60  ;;  %v4300_v36 = vunpack.c.h.s8.bf16 %v4164_v49  ;;  %v4328_v60 = vunpack.c.l.s8.bf16 %v4180_v29  ;;  %v4332_v49 = vunpack.c.h.s8.bf16 %v4180_v29  ;;  %v4356_v29 = vunpack.c.h.s8.bf16 %v4192_v3 }
 0x66b   :  { %4550 = vmatpush1.bf16.msra.mxu1 %v4285_v5  ;;  %4581 = vmatprep.mubr.bf16.mxu1 %v4542_v34  ;;  %v4177_v5 = vld [vmem:[#allocation14 + $0xa0] sm:$0xff] }
 0x66c   :  { %4745 = vmatprep.mubr.bf16.mxu0 %v4542_v34  ;;  %4551 = vmatprep.subr.bf16.mxu1 %v4290_v39  ;;  %v4179_v39 = vld [vmem:[#allocation14 + $0xb0] sm:$0xff]  ;;  %v4325_v27 = vunpack.c.l.s8.bf16 %v4177_v5 }
 0x66d   :  { %4715 = vmatprep.subr.bf16.mxu0 %v4292_v14  ;;  %v4327_v34 = vunpack.c.l.s8.bf16 %v4179_v39  ;;  %v4330_v14 = vunpack.c.h.s8.bf16 %v4178_v16  ;;  %v4331_v58 = vunpack.c.h.s8.bf16 %v4179_v39 }
 0x66e   :  { %4716 = vmatpush1.bf16.msra.mxu0 %v4291_v47  ;;  %v4184_v47 = vld [vmem:[#allocation14 + $0xd8] sm:$0xff] }
 0x66f   :  { %4552 = vmatpush1.bf16.msra.mxu1 %v4289_v13  ;;  %4717 = vmatprep.subr.bf16.mxu0 %v4296_v54  ;;  %v4182_v13 = vld [vmem:[#allocation14 + $0xc8] sm:$0xff]  ;;  %v4340_v41 = vunpack.c.h.s8.bf16 %v4184_v47 }
 0x670   :  { %4553 = vmatprep.subr.bf16.mxu1 %v4294_v26  ;;  %v4329_v26 = vunpack.c.h.s8.bf16 %v4177_v5  ;;  %v4334_v54 = vunpack.c.l.s8.bf16 %v4182_v13  ;;  %v4338_v7 = vunpack.c.h.s8.bf16 %v4182_v13 }
 0x672   :  { %4718 = vmatpush1.bf16.msra.mxu0 %v4295_v22  ;;  %v4183_v22 = vld [vmem:[#allocation14 + $0xd0] sm:$0xff] }
 0x673   :  { %4554 = vmatpush1.bf16.msra.mxu1 %v4293_v53  ;;  %4719 = vmatprep.subr.bf16.mxu0 %v4300_v36  ;;  %v4336_v53 = vunpack.c.l.s8.bf16 %v4184_v47  ;;  %v4335_v36 = vunpack.c.l.s8.bf16 %v4183_v22  ;;  %v4198_v47 = vld [vmem:[#allocation14 + $0x148] sm:$0xff] }
 0x674   :  { %4555 = vmatprep.subr.bf16.mxu1 %v4298_v23  ;;  %v4333_v23 = vunpack.c.l.s8.bf16 %v4181_v55 }
 0x676   :  { %4720 = vmatpush1.bf16.msra.mxu0 %v4299_v18  ;;  %v7089_v18 = vld [vmem:[#allocation28_spill] sm:$0xff] }
 0x677   :  { %4556 = vmatpush1.bf16.msra.mxu1 %v4297_v0  ;;  %4721 = vmatprep.subr.bf16.mxu0 %v4304_v59  ;;  %v4186_v0 = vld [vmem:[#allocation14 + $0xe8] sm:$0xff]  ;;  %v4337_v59 = vunpack.c.h.s8.bf16 %v4181_v55  ;;  %v4366_v55 = vunpack.c.l.s8.bf16 %v4198_v47 }
 0x678   :  { %4557 = vmatprep.subr.bf16.mxu1 %v4302_v56  ;;  %v6836_v56 = vsub.s32 3, %v7089_v18  ;;  %v4346_v32 = vunpack.c.h.s8.bf16 %v4186_v0 }
 0x67a   :  { %4722 = vmatpush1.bf16.msra.mxu0 %v4303_v28  ;;  %v4339_v28 = vunpack.c.h.s8.bf16 %v4183_v22 }
 0x67b   :  { %4558 = vmatpush1.bf16.msra.mxu1 %v4301_v25  ;;  %4723 = vmatprep.subr.bf16.mxu0 %v4308_v48  ;;  %v4062_v25 = vrot.slane %v6824_v35, %v7090_v38  ;;  %v4185_v48 = vld [vmem:[#allocation14 + $0xe0] sm:$0xff] }
 0x67c   :  { %4559 = vmatprep.subr.bf16.mxu1 %v4306_v63  ;;  %v4342_v63 = vunpack.c.l.s8.bf16 %v4186_v0  ;;  %v4345_v42 = vunpack.c.h.s8.bf16 %v4185_v48 }
 0x67e   :  { %4724 = vmatpush1.bf16.msra.mxu0 %v4307_v10  ;;  %v4341_v10 = vunpack.c.l.s8.bf16 %v4185_v48  ;;  %v4201_v48 = vld [vmem:[#allocation14 + $0x160] sm:$0xff] }
 0x67f   :  { %4560 = vmatpush1.bf16.msra.mxu1 %v4305_v24  ;;  %4725 = vmatprep.subr.bf16.mxu0 %v4312_v45  ;;  %v4074_v24 = vrot.slane %v6824_v35, %v6836_v56  ;;  %v4343_v45 = vunpack.c.l.s8.bf16 %v4187_v51 }
 0x680   :  { %4561 = vmatprep.subr.bf16.mxu1 %v4310_v46  ;;  %v4099_v46 = vmul.f32 %v4062_v25, %v6800_v44  ;;  %v4347_v44 = vunpack.c.h.s8.bf16 %v4187_v51  ;;  %v4203_v51 = vld [vmem:[#allocation14 + $0x170] sm:$0xff] }
 0x682   :  { %4726 = vmatpush1.bf16.msra.mxu0 %v4311_v40  ;;  %v4190_v40 = vld [vmem:[#allocation14 + $0x108] sm:$0xff] }
 0x683   :  { %4562 = vmatpush1.bf16.msra.mxu1 %v4309_v33  ;;  %4727 = vmatprep.subr.bf16.mxu0 %v4316_v30  ;;  %v4348_v33 = vunpack.c.h.s8.bf16 %v4188_v15  ;;  %v4124_v30 = vrot.slane %v6828_v57, %v6836_v56  ;;  %v4202_v15 = vld [vmem:[#allocation14 + $0x168] sm:$0xff] }
 0x684   :  { %4563 = vmatprep.subr.bf16.mxu1 %v4314_v19  ;;  %v4102_v19 = vmul.f32 %v4074_v24, %v6806_v43  ;;  %v4373_v24 = vunpack.c.l.s8.bf16 %v4201_v48 }
 0x686   :  { %4728 = vmatpush1.bf16.msra.mxu0 %v4315_v4  ;;  %v4350_v4 = vunpack.c.l.s8.bf16 %v4190_v40  ;;  %v4152_v12 = vadd.f32 %v4124_v30, %v4102_v19  ;;  %v4205_v30 = vld [vmem:[#allocation14 + $0x180] sm:$0xff] }
 0x687   :  { %4564 = vmatpush1.bf16.msra.mxu1 %v4313_v2  ;;  %4729 = vmatprep.subr.bf16.mxu0 %v4320_v62  ;;  %v4149_v2 = vadd.f32 %v4112_v6, %v4099_v46  ;;  %v4191_v62 = vld [vmem:[#allocation14 + $0x110] sm:$0xff]  ;;  %v4378_v46 = vunpack.c.h.s8.bf16 %v4202_v15 }
 0x688   :  { %4565 = vmatprep.subr.bf16.mxu1 %v4318_v50  ;;  %v4189_v50 = vld [vmem:[#allocation14 + $0x100] sm:$0xff]  ;;  %v4351_v43 = vunpack.c.l.s8.bf16 %v4191_v62  ;;  %v4544_v16 = vpack.c.bf16 %v4152_v12, %v4152_v12  ;;  %v4385_v12 = vunpack.c.h.s8.bf16 %v4205_v30 }
 0x68a   :  { %4730 = vmatpush1.bf16.msra.mxu0 %v4319_v37  ;;  %v4541_v37 = vpack.c.bf16 %v4149_v2, %v4149_v2  ;;  %v4381_v2 = vunpack.c.l.s8.bf16 %v4205_v30 }
 0x68b   :  { %4566 = vmatpush1.bf16.msra.mxu1 %v4317_v52  ;;  %4731 = vmatprep.subr.bf16.mxu0 %v4324_v17  ;;  %v4349_v52 = vunpack.c.l.s8.bf16 %v4189_v50  ;;  %v4194_v17 = vld [vmem:[#allocation14 + $0x128] sm:$0xff] }
 0x68c   :  { %4567 = vmatprep.subr.bf16.mxu1 %v4322_v8  ;;  %v4354_v8 = vunpack.c.h.s8.bf16 %v4190_v40  ;;  %v4358_v5 = vunpack.c.l.s8.bf16 %v4194_v17  ;;  %v4379_v40 = vunpack.c.h.s8.bf16 %v4203_v51 }
 0x68e   :  { %4732 = vmatpush1.bf16.msra.mxu0 %v4323_v9  ;;  %v4353_v9 = vunpack.c.h.s8.bf16 %v4189_v50 }
 0x68f   :  { %4568 = vmatpush1.bf16.msra.mxu1 %v4321_v61  ;;  %4733 = vmatprep.subr.bf16.mxu0 %v4328_v60  ;;  %v4196_v61 = vld [vmem:[#allocation14 + $0x138] sm:$0xff]  ;;  %v4193_v60 = vld [vmem:[#allocation14 + $0x120] sm:$0xff] }
 0x690   :  { %4569 = vmatprep.subr.bf16.mxu1 %v4326_v21  ;;  %v4355_v21 = vunpack.c.h.s8.bf16 %v4191_v62  ;;  %v4360_v39 = vunpack.c.l.s8.bf16 %v4196_v61  ;;  %v4364_v13 = vunpack.c.h.s8.bf16 %v4196_v61  ;;  %v4212_v62 = vld [vmem:[#allocation14 + $0x1b8] sm:$0xff] }
 0x692   :  { %4734 = vmatpush1.bf16.msra.mxu0 %v4327_v34  ;;  %v4357_v34 = vunpack.c.l.s8.bf16 %v4193_v60 }
 0x693   :  { %4570 = vmatpush1.bf16.msra.mxu1 %v4325_v27  ;;  %4735 = vmatprep.subr.bf16.mxu0 %v4332_v49  ;;  %v4195_v27 = vld [vmem:[#allocation14 + $0x130] sm:$0xff]  ;;  %v4362_v49 = vunpack.c.h.s8.bf16 %v4194_v17 }
 0x694   :  { %4571 = vmatprep.subr.bf16.mxu1 %v4330_v14  ;;  %v4359_v14 = vunpack.c.l.s8.bf16 %v4195_v27  ;;  %v4211_v17 = vld [vmem:[#allocation14 + $0x1b0] sm:$0xff] }
 0x696   :  { %4736 = vmatpush1.bf16.msra.mxu0 %v4331_v58  ;;  %v4361_v58 = vunpack.c.h.s8.bf16 %v4193_v60 }
 0x697   :  { %4572 = vmatpush1.bf16.msra.mxu1 %v4329_v26  ;;  %4737 = vmatprep.subr.bf16.mxu0 %v4336_v53  ;;  %v4200_v26 = vld [vmem:[#allocation14 + $0x158] sm:$0xff]  ;;  %v4197_v53 = vld [vmem:[#allocation14 + $0x140] sm:$0xff] }
 0x698   :  { %4573 = vmatprep.subr.bf16.mxu1 %v4334_v54  ;;  %v4363_v54 = vunpack.c.h.s8.bf16 %v4195_v27  ;;  %v4368_v22 = vunpack.c.l.s8.bf16 %v4200_v26  ;;  %v4372_v0 = vunpack.c.h.s8.bf16 %v4200_v26  ;;  %v4369_v25 = vunpack.c.h.s8.bf16 %v4197_v53 }
 0x69a   :  { %4738 = vmatpush1.bf16.msra.mxu0 %v4335_v36  ;;  %v4365_v36 = vunpack.c.l.s8.bf16 %v4197_v53  ;;  %v4220_v53 = vld [vmem:[#allocation14 + $0x1f8] sm:$0xff] }
 0x69b   :  { %4574 = vmatpush1.bf16.msra.mxu1 %v4333_v23  ;;  %4739 = vmatprep.subr.bf16.mxu0 %v4340_v41  ;;  %v4199_v23 = vld [vmem:[#allocation14 + $0x150] sm:$0xff]  ;;  %v4370_v41 = vunpack.c.h.s8.bf16 %v4198_v47  ;;  %v6849_v47 = vsub.s32 2, %v7089_v18 }
 0x69c   :  { %4575 = vmatprep.subr.bf16.mxu1 %v4338_v7  ;;  %v4367_v7 = vunpack.c.l.s8.bf16 %v4199_v23 }
 0x69e   :  { %4740 = vmatpush1.bf16.msra.mxu0 %v4339_v28  ;;  %v4371_v28 = vunpack.c.h.s8.bf16 %v4199_v23  ;;  %v4070_v23 = vrot.slane %v6824_v35, %v6849_v47  ;;  %v4412_v35 = vunpack.c.h.s8.bf16 %v4220_v53 }
 0x69f   :  { %4576 = vmatpush1.bf16.msra.mxu1 %v4337_v59  ;;  %4741 = vmatprep.subr.bf16.mxu0 %v4344_v11  ;;  %v4204_v59 = vld [vmem:[#allocation14 + $0x178] sm:$0xff] }
 0x6a0   :  { %4577 = vmatprep.subr.bf16.mxu1 %v4342_v63  ;;  %v4374_v63 = vunpack.c.l.s8.bf16 %v4202_v15  ;;  %v4376_v11 = vunpack.c.l.s8.bf16 %v4204_v59  ;;  %v4380_v6 = vunpack.c.h.s8.bf16 %v4204_v59  ;;  %v4219_v15 = vld [vmem:[#allocation14 + $0x1f0] sm:$0xff] }
 0x6a2   :  { %4742 = vmatpush1.bf16.msra.mxu0 %v4343_v45  ;;  %v4206_v45 = vld [vmem:[#allocation14 + $0x188] sm:$0xff] }
 0x6a3   :  { %4578 = vmatpush1.bf16.msra.mxu1 %v4341_v10  ;;  %4743 = vmatprep.subr.bf16.mxu0 %v4348_v33  ;;  %v4375_v10 = vunpack.c.l.s8.bf16 %v4203_v51  ;;  %v4377_v33 = vunpack.c.h.s8.bf16 %v4201_v48  ;;  %v4382_v19 = vunpack.c.l.s8.bf16 %v4206_v45  ;;  %v4224_v51 = vld [vmem:[#allocation14 + $0x218] sm:$0xff] }
 0x6a4   :  { %4579 = vmatprep.subr.bf16.mxu1 %v4346_v32  ;;  %v4208_v32 = vld [vmem:[#allocation14 + $0x198] sm:$0xff]  ;;  %v4420_v30 = vunpack.c.h.s8.bf16 %v4224_v51 }
 0x6a5   :  { %v4384_v3 = vunpack.c.l.s8.bf16 %v4208_v32  ;;  %v4388_v50 = vunpack.c.h.s8.bf16 %v4208_v32  ;;  %v4223_v32 = vld [vmem:[#allocation14 + $0x210] sm:$0xff] }
 0x6a6   :  { %4744 = vmatpush1.bf16.msra.mxu0 %v4347_v44 }
 0x6a7   :  { %4580 = vmatpush1.bf16.msra.mxu1 %v4345_v42  ;;  %4754 = vmatprep.subr.bf16.mxu0 %v4352_v1  ;;  %v4207_v42 = vld [vmem:[#allocation14 + $0x190] sm:$0xff]  ;;  %v4210_v1 = vld [vmem:[#allocation14 + $0x1a8] sm:$0xff] }
 0x6a8   :  { %4590 = vmatprep.subr.bf16.mxu1 %v4350_v4  ;;  %v4383_v44 = vunpack.c.l.s8.bf16 %v4207_v42  ;;  %v4386_v4 = vunpack.c.h.s8.bf16 %v4206_v45  ;;  %v4394_v61 = vunpack.c.h.s8.bf16 %v4210_v1  ;;  %v4221_v45 = vld [vmem:[#allocation14 + $0x200] sm:$0xff] }
 0x6a9   :  { %4746 = vmatmul.mubr.bf16.vlgmr.msra.gmra.mrb[16].mxu0 %v4541_v37 }
 0x6aa   :  { %4582 = vmatmul.mubr.bf16.vlgmr.msra.gmra.mrb[8].mxu1 %v4541_v37  ;;  %4755 = vmatpush1.bf16.msra.mxu0 %v4351_v43  ;;  %v4390_v37 = vunpack.c.l.s8.bf16 %v4210_v1  ;;  %v4209_v43 = vld [vmem:[#allocation14 + $0x1a0] sm:$0xff] }
 0x6ab   :  { %4591 = vmatpush1.bf16.msra.mxu1 %v4349_v52  ;;  %4622 = vmatprep.mubr.bf16.mxu1 %v4544_v16  ;;  %v4387_v52 = vunpack.c.h.s8.bf16 %v4207_v42  ;;  %v4393_v60 = vunpack.c.h.s8.bf16 %v4209_v43  ;;  %v4228_v42 = vld [vmem:[#allocation14 + $0x238] sm:$0xff] }
 0x6ac   :  { %4786 = vmatprep.mubr.bf16.mxu0 %v4544_v16  ;;  %4592 = vmatprep.subr.bf16.mxu1 %v4354_v8  ;;  %v4392_v8 = vunpack.c.l.s8.bf16 %v4212_v62  ;;  %v4389_v16 = vunpack.c.l.s8.bf16 %v4209_v43  ;;  %v4424_v1 = vunpack.c.l.s8.bf16 %v4228_v42  ;;  %v4428_v43 = vunpack.c.h.s8.bf16 %v4228_v42  ;;  %v4246_v42 = vld [vmem:[#allocation14 + $0x2c8] sm:$0xff] }
 0x6ad   :  { %4756 = vmatprep.subr.bf16.mxu0 %v4356_v29  ;;  %v4391_v29 = vunpack.c.l.s8.bf16 %v4211_v17 }
 0x6ae   :  { %4757 = vmatpush1.bf16.msra.mxu0 %v4355_v21  ;;  %v4214_v21 = vld [vmem:[#allocation14 + $0x1c8] sm:$0xff] }
 0x6af   :  { %4593 = vmatpush1.bf16.msra.mxu1 %v4353_v9  ;;  %4758 = vmatprep.subr.bf16.mxu0 %v4360_v39  ;;  %v4396_v9 = vunpack.c.h.s8.bf16 %v4212_v62  ;;  %v4395_v39 = vunpack.c.h.s8.bf16 %v4211_v17  ;;  %v4398_v27 = vunpack.c.l.s8.bf16 %v4214_v21  ;;  %v4227_v62 = vld [vmem:[#allocation14 + $0x230] sm:$0xff]  ;;  %v4232_v17 = vld [vmem:[#allocation14 + $0x258] sm:$0xff] }
 0x6b0   :  { %4594 = vmatprep.subr.bf16.mxu1 %v4358_v5  ;;  %v4216_v5 = vld [vmem:[#allocation14 + $0x1d8] sm:$0xff] }
 0x6b2   :  { %4759 = vmatpush1.bf16.msra.mxu0 %v4359_v14  ;;  %v4400_v14 = vunpack.c.l.s8.bf16 %v4216_v5 }
 0x6b3   :  { %4595 = vmatpush1.bf16.msra.mxu1 %v4357_v34  ;;  %4760 = vmatprep.subr.bf16.mxu0 %v4364_v13  ;;  %v4213_v34 = vld [vmem:[#allocation14 + $0x1c0] sm:$0xff] }
 0x6b4   :  { %4596 = vmatprep.subr.bf16.mxu1 %v4362_v49  ;;  %v4215_v49 = vld [vmem:[#allocation14 + $0x1d0] sm:$0xff]  ;;  %v4397_v13 = vunpack.c.l.s8.bf16 %v4213_v34 }
 0x6b5   :  { %v4399_v26 = vunpack.c.l.s8.bf16 %v4215_v49 }
 0x6b6   :  { %4761 = vmatpush1.bf16.msra.mxu0 %v4363_v54  ;;  %v4404_v54 = vunpack.c.h.s8.bf16 %v4216_v5  ;;  %v4231_v5 = vld [vmem:[#allocation14 + $0x250] sm:$0xff] }
 0x6b7   :  { %4597 = vmatpush1.bf16.msra.mxu1 %v4361_v58  ;;  %4762 = vmatprep.subr.bf16.mxu0 %v4368_v22  ;;  %v4402_v58 = vunpack.c.h.s8.bf16 %v4214_v21  ;;  %v4401_v22 = vunpack.c.h.s8.bf16 %v4213_v34  ;;  %v4432_v21 = vunpack.c.l.s8.bf16 %v4232_v17  ;;  %v4436_v34 = vunpack.c.h.s8.bf16 %v4232_v17  ;;  %v4250_v17 = vld [vmem:[#allocation14 + $0x2e8] sm:$0xff] }
 0x6b8   :  { %4598 = vmatprep.subr.bf16.mxu1 %v4366_v55  ;;  %v4218_v55 = vld [vmem:[#allocation14 + $0x1e8] sm:$0xff] }
 0x6b9   :  { %v4410_v48 = vunpack.c.h.s8.bf16 %v4218_v55 }
 0x6ba   :  { %4763 = vmatpush1.bf16.msra.mxu0 %v4367_v7  ;;  %v4406_v7 = vunpack.c.l.s8.bf16 %v4218_v55 }
 0x6bb   :  { %4599 = vmatpush1.bf16.msra.mxu1 %v4365_v36  ;;  %4764 = vmatprep.subr.bf16.mxu0 %v4372_v0  ;;  %v4403_v36 = vunpack.c.h.s8.bf16 %v4215_v49  ;;  %v4408_v0 = vunpack.c.l.s8.bf16 %v4220_v53  ;;  %v4236_v49 = vld [vmem:[#allocation14 + $0x278] sm:$0xff]  ;;  %v4235_v53 = vld [vmem:[#allocation14 + $0x270] sm:$0xff] }
 0x6bc   :  { %4600 = vmatprep.subr.bf16.mxu1 %v4370_v41  ;;  %v4217_v41 = vld [vmem:[#allocation14 + $0x1e0] sm:$0xff]  ;;  %v4440_v55 = vunpack.c.l.s8.bf16 %v4236_v49 }
 0x6bd   :  { %v4405_v59 = vunpack.c.l.s8.bf16 %v4217_v41 }
 0x6be   :  { %4765 = vmatpush1.bf16.msra.mxu0 %v4371_v28  ;;  %v4120_v28 = vrot.slane %v6828_v57, %v6849_v47  ;;  %v4413_v57 = vunpack.c.l.s8.bf16 %v4221_v45 }
 0x6bf   :  { %4601 = vmatpush1.bf16.msra.mxu1 %v4369_v25  ;;  %4766 = vmatprep.subr.bf16.mxu0 %v4376_v11  ;;  %v4101_v25 = vmul.f32 %v4070_v23, %v6802_v20  ;;  %v4222_v11 = vld [vmem:[#allocation14 + $0x208] sm:$0xff]  ;;  %v4416_v20 = vunpack.c.l.s8.bf16 %v4224_v51  ;;  %v4439_v23 = vunpack.c.l.s8.bf16 %v4235_v53 }
 0x6c0   :  { %4602 = vmatprep.subr.bf16.mxu1 %v4374_v63  ;;  %v4407_v63 = vunpack.c.l.s8.bf16 %v4219_v15 }
 0x6c2   :  { %4767 = vmatpush1.bf16.msra.mxu0 %v4375_v10  ;;  %v4151_v10 = vadd.f32 %v4120_v28, %v4101_v25  ;;  %v4237_v28 = vld [vmem:[#allocation14 + $0x280] sm:$0xff] }
 0x6c3   :  { %4603 = vmatpush1.bf16.msra.mxu1 %v4373_v24  ;;  %4768 = vmatprep.subr.bf16.mxu0 %v4380_v6  ;;  %v4409_v24 = vunpack.c.h.s8.bf16 %v4217_v41  ;;  %v4414_v6 = vunpack.c.l.s8.bf16 %v4222_v11  ;;  %v4238_v41 = vld [vmem:[#allocation14 + $0x288] sm:$0xff] }
 0x6c4   :  { %4604 = vmatprep.subr.bf16.mxu1 %v4378_v46  ;;  %v4411_v46 = vunpack.c.h.s8.bf16 %v4219_v15  ;;  %v4446_v25 = vunpack.c.l.s8.bf16 %v4238_v41  ;;  %v4450_v51 = vunpack.c.h.s8.bf16 %v4238_v41 }
 0x6c6   :  { %4769 = vmatpush1.bf16.msra.mxu0 %v4379_v40  ;;  %v4415_v40 = vunpack.c.l.s8.bf16 %v4223_v32 }
 0x6c7   :  { %4605 = vmatpush1.bf16.msra.mxu1 %v4377_v33  ;;  %4770 = vmatprep.subr.bf16.mxu0 %v4384_v3  ;;  %v4543_v33 = vpack.c.bf16 %v4151_v10, %v4151_v10  ;;  %v4226_v3 = vld [vmem:[#allocation14 + $0x228] sm:$0xff] }
 0x6c8   :  { %4606 = vmatprep.subr.bf16.mxu1 %v4382_v19  ;;  %v4418_v19 = vunpack.c.h.s8.bf16 %v4222_v11  ;;  %v4242_v10 = vld [vmem:[#allocation14 + $0x2a8] sm:$0xff] }
 0x6ca   :  { %4771 = vmatpush1.bf16.msra.mxu0 %v4383_v44  ;;  %v4419_v44 = vunpack.c.h.s8.bf16 %v4223_v32  ;;  %v4241_v32 = vld [vmem:[#allocation14 + $0x2a0] sm:$0xff] }
 0x6cb   :  { %4607 = vmatpush1.bf16.msra.mxu1 %v4381_v2  ;;  %4772 = vmatprep.subr.bf16.mxu0 %v4388_v50  ;;  %v4417_v2 = vunpack.c.h.s8.bf16 %v4221_v45  ;;  %v4225_v50 = vld [vmem:[#allocation14 + $0x220] sm:$0xff] }
 0x6cc   :  { %4608 = vmatprep.subr.bf16.mxu1 %v4386_v4  ;;  %v4422_v4 = vunpack.c.l.s8.bf16 %v4226_v3 }
 0x6ce   :  { %4773 = vmatpush1.bf16.msra.mxu0 %v4387_v52  ;;  %v4423_v52 = vunpack.c.l.s8.bf16 %v4227_v62 }
 0x6cf   :  { %4609 = vmatpush1.bf16.msra.mxu1 %v4385_v12  ;;  %4774 = vmatprep.subr.bf16.mxu0 %v4392_v8  ;;  %v4421_v12 = vunpack.c.l.s8.bf16 %v4225_v50  ;;  %v4230_v8 = vld [vmem:[#allocation14 + $0x248] sm:$0xff] }
 0x6d0   :  { %4610 = vmatprep.subr.bf16.mxu1 %v4390_v37  ;;  %v4426_v37 = vunpack.c.h.s8.bf16 %v4226_v3 }
 0x6d2   :  { %4775 = vmatpush1.bf16.msra.mxu0 %v4391_v29  ;;  %v4427_v29 = vunpack.c.h.s8.bf16 %v4227_v62 }
 0x6d3   :  { %4611 = vmatpush1.bf16.msra.mxu1 %v4389_v16  ;;  %4776 = vmatprep.subr.bf16.mxu0 %v4396_v9  ;;  %v4425_v16 = vunpack.c.h.s8.bf16 %v4225_v50  ;;  %v4229_v9 = vld [vmem:[#allocation14 + $0x240] sm:$0xff]  ;;  %v4462_v50 = vunpack.c.l.s8.bf16 %v4246_v42 }
 0x6d4   :  { %4612 = vmatprep.subr.bf16.mxu1 %v4394_v61  ;;  %v4430_v61 = vunpack.c.l.s8.bf16 %v4230_v8 }
 0x6d6   :  { %4777 = vmatpush1.bf16.msra.mxu0 %v4395_v39  ;;  %v4431_v39 = vunpack.c.l.s8.bf16 %v4231_v5 }
 0x6d7   :  { %4613 = vmatpush1.bf16.msra.mxu1 %v4393_v60  ;;  %4778 = vmatprep.subr.bf16.mxu0 %v4400_v14  ;;  %v4429_v60 = vunpack.c.l.s8.bf16 %v4229_v9  ;;  %v4234_v14 = vld [vmem:[#allocation14 + $0x268] sm:$0xff] }
 0x6d8   :  { %4614 = vmatprep.subr.bf16.mxu1 %v4398_v27  ;;  %v4434_v27 = vunpack.c.h.s8.bf16 %v4230_v8 }
 0x6da   :  { %4779 = vmatpush1.bf16.msra.mxu0 %v4399_v26  ;;  %v4435_v26 = vunpack.c.h.s8.bf16 %v4231_v5 }
 0x6db   :  { %4615 = vmatpush1.bf16.msra.mxu1 %v4397_v13  ;;  %4780 = vmatprep.subr.bf16.mxu0 %v4404_v54  ;;  %v4433_v13 = vunpack.c.h.s8.bf16 %v4229_v9  ;;  %v4233_v54 = vld [vmem:[#allocation14 + $0x260] sm:$0xff]  ;;  %v4470_v9 = vunpack.c.l.s8.bf16 %v4250_v17 }
 0x6dc   :  { %4616 = vmatprep.subr.bf16.mxu1 %v4402_v58  ;;  %v4438_v58 = vunpack.c.l.s8.bf16 %v4234_v14  ;;  %v4441_v15 = vunpack.c.h.s8.bf16 %v4233_v54 }
 0x6de   :  { %4781 = vmatpush1.bf16.msra.mxu0 %v4403_v36  ;;  %v4442_v36 = vunpack.c.h.s8.bf16 %v4234_v14 }
 0x6df   :  { %4617 = vmatpush1.bf16.msra.mxu1 %v4401_v22  ;;  %4782 = vmatprep.subr.bf16.mxu0 %v4408_v0  ;;  %v4437_v22 = vunpack.c.l.s8.bf16 %v4233_v54  ;;  %v4240_v0 = vld [vmem:[#allocation14 + $0x298] sm:$0xff] }
 0x6e0   :  { %4618 = vmatprep.subr.bf16.mxu1 %v4406_v7  ;;  %v4444_v7 = vunpack.c.h.s8.bf16 %v4236_v49  ;;  %v6856_v49 = vld [vmem:[#allocation14 + $0x308] sm:$0xff] }
 0x6e1   :  { %v4478_v54 = vunpack.c.l.s8.bf16 %v6856_v49 }
 0x6e2   :  { %4783 = vmatpush1.bf16.msra.mxu0 %v4407_v63  ;;  %v4448_v63 = vunpack.c.l.s8.bf16 %v4240_v0 }
 0x6e3   :  { %4619 = vmatpush1.bf16.msra.mxu1 %v4405_v59  ;;  %4784 = vmatprep.subr.bf16.mxu0 %v4412_v35  ;;  %v4443_v59 = vunpack.c.h.s8.bf16 %v4235_v53  ;;  %v4445_v35 = vunpack.c.l.s8.bf16 %v4237_v28  ;;  %v4077_v53 = vsub.s32 4, %v7089_v18 }
 0x6e4   :  { %4620 = vmatprep.subr.bf16.mxu1 %v4410_v48  ;;  %v4239_v48 = vld [vmem:[#allocation14 + $0x290] sm:$0xff] }
 0x6e5   :  { %v4447_v11 = vunpack.c.l.s8.bf16 %v4239_v48  ;;  %v4451_v45 = vunpack.c.h.s8.bf16 %v4239_v48 }
 0x6e6   :  { %4785 = vmatpush1.bf16.msra.mxu0 %v4411_v46  ;;  %v4244_v46 = vld [vmem:[#allocation14 + $0x2b8] sm:$0xff] }
 0x6e7   :  { %4621 = vmatpush1.bf16.msra.mxu1 %v4409_v24  ;;  %4795 = vmatprep.subr.bf16.mxu0 %v4416_v20  ;;  %v4452_v24 = vunpack.c.h.s8.bf16 %v4240_v0  ;;  %v4454_v20 = vunpack.c.l.s8.bf16 %v4242_v10  ;;  %v4460_v3 = vunpack.c.h.s8.bf16 %v4244_v46  ;;  %v6869_v0 = vld [vmem:[#allocation13] sm:$0xff] }
 0x6e8   :  { %4631 = vmatprep.subr.bf16.mxu1 %v4414_v6  ;;  %v4449_v6 = vunpack.c.h.s8.bf16 %v4237_v28 }
 0x6e9   :  { %4787 = vmatmul.mubr.bf16.vlgmr.msra.gmra.mrb[16].mxu0 %v4543_v33 }
 0x6ea   :  { %4623 = vmatmul.mubr.bf16.vlgmr.msra.gmra.mrb[8].mxu1 %v4543_v33  ;;  %4796 = vmatpush1.bf16.msra.mxu0 %v4415_v40  ;;  %v4243_v33 = vld [vmem:[#allocation14 + $0x2b0] sm:$0xff]  ;;  %v4453_v40 = vunpack.c.l.s8.bf16 %v4241_v32 }
 0x6eb   :  { %4632 = vmatpush1.bf16.msra.mxu1 %v4413_v57  ;;  %4797 = vmatprep.subr.bf16.mxu0 %v4420_v30  ;;  %v4456_v57 = vunpack.c.l.s8.bf16 %v4244_v46  ;;  %v4458_v30 = vunpack.c.h.s8.bf16 %v4242_v10 }
 0x6ec   :  { %4633 = vmatprep.subr.bf16.mxu1 %v4418_v19  ;;  %v4455_v19 = vunpack.c.l.s8.bf16 %v4243_v33 }
 0x6ee   :  { %4798 = vmatpush1.bf16.msra.mxu0 %v4419_v44  ;;  %v4457_v44 = vunpack.c.h.s8.bf16 %v4241_v32  ;;  %v4253_v32 = vld [vmem:[#allocation14 + $0x300] sm:$0xff] }
 0x6ef   :  { %4634 = vmatpush1.bf16.msra.mxu1 %v4417_v2  ;;  %4799 = vmatprep.subr.bf16.mxu0 %v4424_v1  ;;  %v4248_v2 = vld [vmem:[#allocation14 + $0x2d8] sm:$0xff]  ;;  %v4245_v1 = vld [vmem:[#allocation14 + $0x2c0] sm:$0xff] }
 0x6f0   :  { %4635 = vmatprep.subr.bf16.mxu1 %v4422_v4  ;;  %v4459_v4 = vunpack.c.h.s8.bf16 %v4243_v33  ;;  %v4464_v62 = vunpack.c.l.s8.bf16 %v4248_v2  ;;  %v4468_v8 = vunpack.c.h.s8.bf16 %v4248_v2 }
 0x6f2   :  { %4800 = vmatpush1.bf16.msra.mxu0 %v4423_v52  ;;  %v4461_v52 = vunpack.c.l.s8.bf16 %v4245_v1 }
 0x6f3   :  { %4636 = vmatpush1.bf16.msra.mxu1 %v4421_v12  ;;  %4801 = vmatprep.subr.bf16.mxu0 %v4428_v43  ;;  %v4247_v12 = vld [vmem:[#allocation14 + $0x2d0] sm:$0xff]  ;;  %v4466_v43 = vunpack.c.h.s8.bf16 %v4246_v42 }
 0x6f4   :  { %4637 = vmatprep.subr.bf16.mxu1 %v4426_v37  ;;  %v4463_v37 = vunpack.c.l.s8.bf16 %v4247_v12 }
 0x6f6   :  { %4802 = vmatpush1.bf16.msra.mxu0 %v4427_v29  ;;  %v4465_v29 = vunpack.c.h.s8.bf16 %v4245_v1  ;;  %v4260_v1 = vld [vmem:[#allocation14 + $0x338] sm:$0xff] }
 0x6f7   :  { %4638 = vmatpush1.bf16.msra.mxu1 %v4425_v16  ;;  %4803 = vmatprep.subr.bf16.mxu0 %v4432_v21  ;;  %v4252_v16 = vld [vmem:[#allocation14 + $0x2f8] sm:$0xff]  ;;  %v4249_v21 = vld [vmem:[#allocation14 + $0x2e0] sm:$0xff] }
 0x6f8   :  { %4639 = vmatprep.subr.bf16.mxu1 %v4430_v61  ;;  %v4467_v61 = vunpack.c.h.s8.bf16 %v4247_v12  ;;  %v4472_v5 = vunpack.c.l.s8.bf16 %v4252_v16  ;;  %v4476_v14 = vunpack.c.h.s8.bf16 %v4252_v16  ;;  %v4481_v12 = vunpack.c.h.s8.bf16 %v4253_v32 }
 0x6fa   :  { %4804 = vmatpush1.bf16.msra.mxu0 %v4431_v39  ;;  %v4469_v39 = vunpack.c.l.s8.bf16 %v4249_v21 }
 0x6fb   :  { %4640 = vmatpush1.bf16.msra.mxu1 %v4429_v60  ;;  %4805 = vmatprep.subr.bf16.mxu0 %v4436_v34  ;;  %v4251_v60 = vld [vmem:[#allocation14 + $0x2f0] sm:$0xff]  ;;  %v4474_v34 = vunpack.c.h.s8.bf16 %v4250_v17 }
 0x6fc   :  { %4641 = vmatprep.subr.bf16.mxu1 %v4434_v27  ;;  %v4471_v27 = vunpack.c.l.s8.bf16 %v4251_v60  ;;  %v4259_v17 = vld [vmem:[#allocation14 + $0x330] sm:$0xff] }
 0x6fe   :  { %4806 = vmatpush1.bf16.msra.mxu0 %v4435_v26  ;;  %v4473_v26 = vunpack.c.h.s8.bf16 %v4249_v21  ;;  %v4262_v21 = vld [vmem:[#allocation14 + $0x348] sm:$0xff] }
 0x6ff   :  { %4642 = vmatpush1.bf16.msra.mxu1 %v4433_v13  ;;  %4807 = vmatprep.subr.bf16.mxu0 %v4440_v55  ;;  %v6858_v13 = vld [vmem:[#allocation14 + $0x318] sm:$0xff] }
 0x700   :  { %4643 = vmatprep.subr.bf16.mxu1 %v4438_v58  ;;  %v4475_v58 = vunpack.c.h.s8.bf16 %v4251_v60  ;;  %v4480_v55 = vunpack.c.l.s8.bf16 %v6858_v13 }
 0x702   :  { %4808 = vmatpush1.bf16.msra.mxu0 %v4439_v23  ;;  %v4089_v23 = vsub.s32 7, %v7089_v18 }
 0x703   :  { %4644 = vmatpush1.bf16.msra.mxu1 %v4437_v22  ;;  %4809 = vmatprep.subr.bf16.mxu0 %v4444_v7  ;;  %v4081_v22 = vsub.s32 5, %v7089_v18 }
 0x704   :  { %4645 = vmatprep.subr.bf16.mxu1 %v4442_v36  ;;  %v6865_v36 = vld [vmem:[#allocation11] sm:$0xff] }
 0x705   :  { %v4078_v7 = vrot.slane %v6865_v36, %v4077_v53  ;;  %v4082_v41 = vrot.slane %v6865_v36, %v4081_v22  ;;  %v4132_v28 = vrot.slane %v6869_v0, %v4081_v22 }
 0x706   :  { %4810 = vmatpush1.bf16.msra.mxu0 %v4443_v59  ;;  %v4090_v59 = vrot.slane %v6865_v36, %v4089_v23 }
 0x707   :  { %4646 = vmatpush1.bf16.msra.mxu1 %v4441_v15  ;;  %4811 = vmatprep.subr.bf16.mxu0 %v4448_v63  ;;  %v4128_v15 = vrot.slane %v6869_v0, %v4077_v53  ;;  %v4268_v53 = vld [vmem:[#allocation14 + $0x378] sm:$0xff] }
 0x708   :  { %4647 = vmatprep.subr.bf16.mxu1 %v4446_v25 }
 0x70a   :  { %4812 = vmatpush1.bf16.msra.mxu0 %v4447_v11  ;;  %v4140_v11 = vrot.slane %v6869_v0, %v4089_v23 }
 0x70b   :  { %4648 = vmatpush1.bf16.msra.mxu1 %v4445_v35  ;;  %4813 = vmatprep.subr.bf16.mxu0 %v4452_v24 }
 0x70c   :  { %4649 = vmatprep.subr.bf16.mxu1 %v4450_v51 }
 0x70e   :  { %4814 = vmatpush1.bf16.msra.mxu0 %v4451_v45 }
 0x70f   :  { %4650 = vmatpush1.bf16.msra.mxu1 %v4449_v6  ;;  %4815 = vmatprep.subr.bf16.mxu0 %v4456_v57  ;;  %v4255_v57 = vld [vmem:[#allocation14 + $0x310] sm:$0xff] }
 0x710   :  { %4651 = vmatprep.subr.bf16.mxu1 %v4454_v20  ;;  %v4479_v42 = vunpack.c.l.s8.bf16 %v4255_v57 }
 0x712   :  { %4816 = vmatpush1.bf16.msra.mxu0 %v4455_v19 }
 0x713   :  { %4652 = vmatpush1.bf16.msra.mxu1 %v4453_v40  ;;  %4817 = vmatprep.subr.bf16.mxu0 %v4460_v3  ;;  %v4477_v3 = vunpack.c.l.s8.bf16 %v4253_v32 }
 0x714   :  { %4653 = vmatprep.subr.bf16.mxu1 %v4458_v30 }
 0x716   :  { %4818 = vmatpush1.bf16.msra.mxu0 %v4459_v4  ;;  %v4484_v4 = vunpack.c.h.s8.bf16 %v6858_v13 }
 0x717   :  { %4654 = vmatpush1.bf16.msra.mxu1 %v4457_v44  ;;  %4819 = vmatprep.subr.bf16.mxu0 %v4464_v62  ;;  %v4482_v44 = vunpack.c.h.s8.bf16 %v6856_v49  ;;  %v4263_v49 = vld [vmem:[#allocation14 + $0x350] sm:$0xff] }
 0x718   :  { %4655 = vmatprep.subr.bf16.mxu1 %v4462_v50  ;;  %v4258_v50 = vld [vmem:[#allocation14 + $0x328] sm:$0xff]  ;;  %v4499_v23 = vunpack.c.h.s8.bf16 %v4263_v49 }
 0x71a   :  { %4820 = vmatpush1.bf16.msra.mxu0 %v4463_v37  ;;  %v4486_v37 = vunpack.c.l.s8.bf16 %v4258_v50 }
 0x71b   :  { %4656 = vmatpush1.bf16.msra.mxu1 %v4461_v52  ;;  %4821 = vmatprep.subr.bf16.mxu0 %v4468_v8  ;;  %v4483_v52 = vunpack.c.h.s8.bf16 %v4255_v57  ;;  %v4257_v8 = vld [vmem:[#allocation14 + $0x320] sm:$0xff] }
 0x71c   :  { %4657 = vmatprep.subr.bf16.mxu1 %v4466_v43  ;;  %v4488_v43 = vunpack.c.l.s8.bf16 %v4260_v1  ;;  %v4485_v16 = vunpack.c.l.s8.bf16 %v4257_v8  ;;  %v4489_v60 = vunpack.c.h.s8.bf16 %v4257_v8 }
 0x71e   :  { %4822 = vmatpush1.bf16.msra.mxu0 %v4467_v61  ;;  %v4490_v61 = vunpack.c.h.s8.bf16 %v4258_v50  ;;  %v4275_v50 = vld [vmem:[#allocation14 + $0x3b0] sm:$0xff] }
 0x71f   :  { %4658 = vmatpush1.bf16.msra.mxu1 %v4465_v29  ;;  %4823 = vmatprep.subr.bf16.mxu0 %v4472_v5  ;;  %v4487_v29 = vunpack.c.l.s8.bf16 %v4259_v17  ;;  %v4264_v5 = vld [vmem:[#allocation14 + $0x358] sm:$0xff] }
 0x720   :  { %4659 = vmatprep.subr.bf16.mxu1 %v4470_v9  ;;  %v4492_v9 = vunpack.c.h.s8.bf16 %v4260_v1 }
 0x722   :  { %4824 = vmatpush1.bf16.msra.mxu0 %v4471_v27  ;;  %v4494_v27 = vunpack.c.l.s8.bf16 %v4262_v21 }
 0x723   :  { %4660 = vmatpush1.bf16.msra.mxu1 %v4469_v39  ;;  %4825 = vmatprep.subr.bf16.mxu0 %v4476_v14  ;;  %v4491_v39 = vunpack.c.h.s8.bf16 %v4259_v17  ;;  %v4261_v14 = vld [vmem:[#allocation14 + $0x340] sm:$0xff]  ;;  %v4523_v17 = vunpack.c.h.s8.bf16 %v4275_v50 }
 0x724   :  { %4661 = vmatprep.subr.bf16.mxu1 %v4474_v34  ;;  %v4496_v34 = vunpack.c.l.s8.bf16 %v4264_v5  ;;  %v4493_v13 = vunpack.c.l.s8.bf16 %v4261_v14  ;;  %v4497_v22 = vunpack.c.h.s8.bf16 %v4261_v14  ;;  %v4284_v14 = vld [vmem:[#allocation14 + $0x3f8] sm:$0xff] }
 0x726   :  { %4826 = vmatpush1.bf16.msra.mxu0 %v4475_v58  ;;  %v4498_v58 = vunpack.c.h.s8.bf16 %v4262_v21 }
 0x727   :  { %4662 = vmatpush1.bf16.msra.mxu1 %v4473_v26  ;;  %4836 = vmatprep.subr.bf16.mxu0 %v4480_v55  ;;  %v4495_v26 = vunpack.c.l.s8.bf16 %v4263_v49  ;;  %v4266_v55 = vld [vmem:[#allocation14 + $0x368] sm:$0xff] }
 0x728   :  { %4672 = vmatprep.subr.bf16.mxu1 %v4478_v54  ;;  %v4500_v54 = vunpack.c.h.s8.bf16 %v4264_v5 }
 0x73c   :  { %v6874_v48 = vpop.f32.mrb[12].mxu0 }
 0x73d   :  { %v3722_v25 = vpop.f32.mrb[4].mxu1  ;;  %v4052_v24 = vpop.f32.mrb[13].mxu0 }
 0x73e   :  { %v4103_v63 = vmul.f32 %v4078_v7, %v3722_v25  ;;  %v3724_v35 = vpop.f32.mrb[5].mxu1  ;;  %v4106_v6 = vmul.f32 %v4090_v59, %v4052_v24  ;;  %v4054_v45 = vpop.f32.mrb[14].mxu0  ;;  %v4502_v7 = vunpack.c.l.s8.bf16 %v4266_v55  ;;  %v4267_v59 = vld [vmem:[#allocation14 + $0x370] sm:$0xff] }
 0x73f   :  { %v4104_v51 = vmul.f32 %v4082_v41, %v3724_v35  ;;  %v3726_v10 = vpop.f32.mrb[6].mxu1  ;;  %v4055_v40 = vpop.f32.mrb[15].mxu0  ;;  %v4504_v41 = vunpack.c.l.s8.bf16 %v4268_v53  ;;  %v4508_v35 = vunpack.c.h.s8.bf16 %v4268_v53  ;;  %v4269_v45 = vld [vmem:[#allocation14 + $0x380] sm:$0xff]  ;;  %v4283_v53 = vld [vmem:[#allocation14 + $0x3f0] sm:$0xff] }
 0x740   :  { %v4153_v46 = vadd.f32 %v4128_v15, %v4103_v63  ;;  %v3727_v20 = vpop.f32.mrb[7].mxu1  ;;  %v4156_v19 = vadd.f32 %v4140_v11, %v4106_v6  ;;  %v4265_v15 = vld [vmem:[#allocation14 + $0x360] sm:$0xff]  ;;  %v4506_v63 = vunpack.c.h.s8.bf16 %v4266_v55  ;;  %v4270_v11 = vld [vmem:[#allocation14 + $0x388] sm:$0xff]  ;;  %v4507_v10 = vunpack.c.h.s8.bf16 %v4267_v59 }
 0x741   :  { %v4154_v33 = vadd.f32 %v4132_v28, %v4104_v51  ;;  %v4501_v25 = vunpack.c.l.s8.bf16 %v4265_v15  ;;  %v4503_v28 = vunpack.c.l.s8.bf16 %v4267_v59  ;;  %v4272_v51 = vld [vmem:[#allocation14 + $0x398] sm:$0xff]  ;;  %v4505_v24 = vunpack.c.h.s8.bf16 %v4265_v15  ;;  %v4271_v20 = vld [vmem:[#allocation14 + $0x390] sm:$0xff]  ;;  %v4281_v55 = vld [vmem:[#allocation14 + $0x3e0] sm:$0xff] }
 0x742   :  { %v4545_v2 = vpack.c.bf16 %v4153_v46, %v4153_v46  ;;  %v4548_v62 = vpack.c.bf16 %v4156_v19, %v4156_v19  ;;  %v4510_v46 = vunpack.c.l.s8.bf16 %v4270_v11  ;;  %v4512_v6 = vunpack.c.l.s8.bf16 %v4272_v51  ;;  %v4274_v19 = vld [vmem:[#allocation14 + $0x3a8] sm:$0xff] }
 0x743   :  { %v4546_v30 = vpack.c.bf16 %v4154_v33, %v4154_v33  ;;  %v4509_v32 = vunpack.c.l.s8.bf16 %v4269_v45  ;;  %v4511_v57 = vunpack.c.l.s8.bf16 %v4271_v20  ;;  %v4514_v33 = vunpack.c.h.s8.bf16 %v4270_v11  ;;  %v5622_v11 = vld [vmem:[%s7011_s12 + $0x50] sm:$0xff]  }
 0x744   :  { %v4516_v40 = vunpack.c.h.s8.bf16 %v4272_v51  ;;  %v4540_v15 = vunpack.c.h.s8.bf16 %v4284_v14  ;;  %v4539_v59 = vunpack.c.h.s8.bf16 %v4283_v53  ;;  %v5623_v51 = vld [vmem:[%s7011_s12 + $0x10] sm:$0xff]  }
 0x745   :  { %4663 = vmatprep.mubr.bf16.mxu1 %v4546_v30  ;;  %4827 = vmatprep.mubr.bf16.mxu0 %v4546_v30  ;;  %v4276_v30 = vld [vmem:[#allocation14 + $0x3b8] sm:$0xff] }
 0x746   :  { %4664 = vmatmul.mubr.bf16.vlgmr.msra.gmra.mrb[8].mxu1 %v4545_v2  ;;  %4828 = vmatmul.mubr.bf16.vlgmr.msra.gmra.mrb[16].mxu0 %v4545_v2  ;;  %v4518_v2 = vunpack.c.l.s8.bf16 %v4274_v19 }
 0x747   :  { %4673 = vmatpush1.bf16.msra.mxu1 %v4477_v3  ;;  %4837 = vmatpush1.bf16.msra.mxu0 %v4479_v42  ;;  %v4513_v3 = vunpack.c.h.s8.bf16 %v4269_v45  ;;  %v4515_v42 = vunpack.c.h.s8.bf16 %v4271_v20  ;;  %v5628_v45 = vld [vmem:[%s7011_s12 + $0x68] sm:$0xff]  }
 0x748   :  { %4704 = vmatprep.mubr.bf16.mxu1 %v4548_v62  ;;  %4868 = vmatprep.mubr.bf16.mxu0 %v4548_v62  ;;  %v4519_v62 = vunpack.c.l.s8.bf16 %v4275_v50  ;;  %v5629_v20 = vld [vmem:[%s7011_s12 + $0x28] sm:$0xff]  }
 0x749   :  { %4674 = vmatprep.subr.bf16.mxu1 %v4482_v44  ;;  %4838 = vmatprep.subr.bf16.mxu0 %v4484_v4  ;;  %v4520_v44 = vunpack.c.l.s8.bf16 %v4276_v30  ;;  %v4273_v4 = vld [vmem:[#allocation14 + $0x3a0] sm:$0xff] }
 0x74a   :  { %v4517_v1 = vunpack.c.l.s8.bf16 %v4273_v4  ;;  %v4521_v8 = vunpack.c.h.s8.bf16 %v4273_v4 }
 0x74b   :  { %4675 = vmatpush1.bf16.msra.mxu1 %v4481_v12  ;;  %4839 = vmatpush1.bf16.msra.mxu0 %v4483_v52  ;;  %v4522_v12 = vunpack.c.h.s8.bf16 %v4274_v19  ;;  %v4524_v52 = vunpack.c.h.s8.bf16 %v4276_v30  ;;  %v5634_v19 = vld [vmem:[%s7011_s12 + $0xc0] sm:$0xff]   ;;  %v4877_v30 = vld [vmem:[#allocation16] sm:$0xf] }
 0x74c   :  { %4676 = vmatprep.subr.bf16.mxu1 %v4486_v37  ;;  %4840 = vmatprep.subr.bf16.mxu0 %v4488_v43  ;;  %v4278_v37 = vld [vmem:[#allocation14 + $0x3c8] sm:$0xff]  ;;  %v4280_v43 = vld [vmem:[#allocation14 + $0x3d8] sm:$0xff] }
 0x74f   :  { %4677 = vmatpush1.bf16.msra.mxu1 %v4485_v16  ;;  %4841 = vmatpush1.bf16.msra.mxu0 %v4487_v29  ;;  %v4526_v16 = vunpack.c.l.s8.bf16 %v4278_v37  ;;  %v4528_v29 = vunpack.c.l.s8.bf16 %v4280_v43 }
 0x750   :  { %4678 = vmatprep.subr.bf16.mxu1 %v4490_v61  ;;  %4842 = vmatprep.subr.bf16.mxu0 %v4492_v9  ;;  %v4277_v61 = vld [vmem:[#allocation14 + $0x3c0] sm:$0xff]  ;;  %v4279_v9 = vld [vmem:[#allocation14 + $0x3d0] sm:$0xff] }
 0x751   :  { %v4525_v21 = vunpack.c.l.s8.bf16 %v4277_v61  ;;  %v4527_v5 = vunpack.c.l.s8.bf16 %v4279_v9  ;;  %v4529_v49 = vunpack.c.h.s8.bf16 %v4277_v61 }
 0x753   :  { %4679 = vmatpush1.bf16.msra.mxu1 %v4489_v60  ;;  %4843 = vmatpush1.bf16.msra.mxu0 %v4491_v39  ;;  %v4085_v60 = vsub.s32 6, %v7089_v18  ;;  %v4530_v39 = vunpack.c.h.s8.bf16 %v4278_v37  ;;  %v4533_v18 = vunpack.c.l.s8.bf16 %v4281_v55 }
 0x754   :  { %4680 = vmatprep.subr.bf16.mxu1 %v4494_v27  ;;  %4844 = vmatprep.subr.bf16.mxu0 %v4496_v34  ;;  %v4532_v27 = vunpack.c.h.s8.bf16 %v4280_v43  ;;  %v4282_v34 = vld [vmem:[#allocation14 + $0x3e8] sm:$0xff] }
 0x757   :  { %4681 = vmatpush1.bf16.msra.mxu1 %v4493_v13  ;;  %4845 = vmatpush1.bf16.msra.mxu0 %v4495_v26  ;;  %v4531_v13 = vunpack.c.h.s8.bf16 %v4279_v9  ;;  %v4086_v26 = vrot.slane %v6865_v36, %v4085_v60  ;;  %v4537_v36 = vunpack.c.h.s8.bf16 %v4281_v55  ;;  %v5644_v55 = vld [vmem:[%s7011_s12 + $0xe8] sm:$0xff]  }
 0x758   :  { %4682 = vmatprep.subr.bf16.mxu1 %v4498_v58  ;;  %4846 = vmatprep.subr.bf16.mxu0 %v4500_v54  ;;  %v4534_v58 = vunpack.c.l.s8.bf16 %v4282_v34  ;;  %v4536_v54 = vunpack.c.l.s8.bf16 %v4284_v14  ;;  %v5638_v14 = vld [vmem:[%s7011_s12 + $0xd0] sm:$0xff]  }
 0x75b   :  { %4683 = vmatpush1.bf16.msra.mxu1 %v4497_v22  ;;  %4847 = vmatpush1.bf16.msra.mxu0 %v4499_v23  ;;  %v4535_v22 = vunpack.c.l.s8.bf16 %v4283_v53  ;;  %v4105_v23 = vmul.f32 %v4086_v26, %v6874_v48  ;;  %v5641_v26 = vld [vmem:[%s7011_s12 + $0x98] sm:$0xff]   ;;  %v5645_v53 = vld [vmem:[%s7011_s12 + $0xa8] sm:$0xff]  }
 0x75c   :  { %4684 = vmatprep.subr.bf16.mxu1 %v4502_v7  ;;  %4848 = vmatprep.subr.bf16.mxu0 %v4504_v41  ;;  %v4136_v7 = vrot.slane %v6869_v0, %v4085_v60  ;;  %v4538_v41 = vunpack.c.h.s8.bf16 %v4282_v34  ;;  %v5619_v0 = vld [vmem:[%s7011_s12] sm:$0xff]   ;;  %v5637_v34 = vld [vmem:[%s7011_s12 + $0x88] sm:$0xff]  }
 0x75f   :  { %4685 = vmatpush1.bf16.msra.mxu1 %v4501_v25  ;;  %4849 = vmatpush1.bf16.msra.mxu0 %v4503_v28  ;;  %v4155_v25 = vadd.f32 %v4136_v7, %v4105_v23  ;;  %v5618_v28 = vld [vmem:[%s7011_s12 + $0x40] sm:$0xff]   ;;  %v5647_v23 = vld [vmem:[%s7011_s12 + $0xb0] sm:$0xff]  }
 0x760   :  { %4686 = vmatprep.subr.bf16.mxu1 %v4506_v63  ;;  %4850 = vmatprep.subr.bf16.mxu0 %v4508_v35  ;;  %v5620_v63 = vld [vmem:[%s7011_s12 + $0x48] sm:$0xff]  }
 0x761   :  { %v4547_v48 = vpack.c.bf16 %v4155_v25, %v4155_v25  ;;  %v5621_v35 = vld [vmem:[%s7011_s12 + $0x8] sm:$0xff]  }
 0x763   :  { %4687 = vmatpush1.bf16.msra.mxu1 %v4505_v24  ;;  %4851 = vmatpush1.bf16.msra.mxu0 %v4507_v10  ;;  %v5624_v24 = vld [vmem:[%s7011_s12 + $0x58] sm:$0xff]  }
 0x764   :  { %4688 = vmatprep.subr.bf16.mxu1 %v4510_v46  ;;  %4852 = vmatprep.subr.bf16.mxu0 %v4512_v6  ;;  %v5625_v10 = vld [vmem:[%s7011_s12 + $0x18] sm:$0xff]   ;;  %v5626_v46 = vld [vmem:[%s7011_s12 + $0x60] sm:$0xff]  }
 0x765   :  { %v5627_v6 = vld [vmem:[%s7011_s12 + $0x20] sm:$0xff]  }
 0x767   :  { %4689 = vmatpush1.bf16.msra.mxu1 %v4509_v32  ;;  %4853 = vmatpush1.bf16.msra.mxu0 %v4511_v57  ;;  %v5630_v32 = vld [vmem:[%s7011_s12 + $0x70] sm:$0xff]  }
 0x768   :  { %4690 = vmatprep.subr.bf16.mxu1 %v4514_v33  ;;  %4854 = vmatprep.subr.bf16.mxu0 %v4516_v40  ;;  %v5631_v57 = vld [vmem:[%s7011_s12 + $0x30] sm:$0xff]   ;;  %v5632_v33 = vld [vmem:[%s7011_s12 + $0x78] sm:$0xff]  }
 0x769   :  { %v5633_v40 = vld [vmem:[%s7011_s12 + $0x38] sm:$0xff]  }
 0x76b   :  { %4691 = vmatpush1.bf16.msra.mxu1 %v4513_v3  ;;  %4855 = vmatpush1.bf16.msra.mxu0 %v4515_v42  ;;  %v4903_v3 = vld [vmem:[#allocation17] sm:$0xf]  ;;  %v4882_v42 = vrot.slane %v4877_v30, %v7090_v38 }
 0x76c   :  { %4692 = vmatprep.subr.bf16.mxu1 %v4518_v2  ;;  %4856 = vmatprep.subr.bf16.mxu0 %v4520_v44  ;;  %v4886_v2 = vrot.slane %v4877_v30, %v7088_v31  ;;  %v4894_v44 = vrot.slane %v4877_v30, %v6836_v56  ;;  %v4908_v4 = vrot.slane %v4903_v3, %v7090_v38  ;;  %v5635_v38 = vld [vmem:[%s7011_s12 + $0x80] sm:$0xff]  }
 0x76f   :  { %4693 = vmatpush1.bf16.msra.mxu1 %v4517_v1  ;;  %4857 = vmatpush1.bf16.msra.mxu0 %v4519_v62  ;;  %v4912_v62 = vrot.slane %v4903_v3, %v7088_v31 }
 0x770   :  { %4694 = vmatprep.subr.bf16.mxu1 %v4522_v12  ;;  %4858 = vmatprep.subr.bf16.mxu0 %v4524_v52  ;;  %v4920_v12 = vrot.slane %v4903_v3, %v6836_v56  ;;  %v5636_v56 = vld [vmem:[%s7011_s12 + $0xc8] sm:$0xff]  }
 0x773   :  { %4695 = vmatpush1.bf16.msra.mxu1 %v4521_v8  ;;  %4859 = vmatpush1.bf16.msra.mxu0 %v4523_v17 }
 0x774   :  { %4696 = vmatprep.subr.bf16.mxu1 %v4526_v16  ;;  %4860 = vmatprep.subr.bf16.mxu0 %v4528_v29 }
 0x777   :  { %4697 = vmatpush1.bf16.msra.mxu1 %v4525_v21  ;;  %4861 = vmatpush1.bf16.msra.mxu0 %v4527_v5 }
 0x778   :  { %4698 = vmatprep.subr.bf16.mxu1 %v4530_v39  ;;  %4862 = vmatprep.subr.bf16.mxu0 %v4532_v27 }
 0x77b   :  { %4699 = vmatpush1.bf16.msra.mxu1 %v4529_v49  ;;  %4863 = vmatpush1.bf16.msra.mxu0 %v4531_v13  ;;  %v5639_v49 = vld [vmem:[%s7011_s12 + $0x90] sm:$0xff]   ;;  %v5640_v13 = vld [vmem:[%s7011_s12 + $0xd8] sm:$0xff]  }
 0x77c   :  { %4700 = vmatprep.subr.bf16.mxu1 %v4534_v58  ;;  %4864 = vmatprep.subr.bf16.mxu0 %v4536_v54  ;;  %v5642_v58 = vld [vmem:[%s7011_s12 + $0xe0] sm:$0xff]  }
 0x77d   :  { %v5643_v54 = vld [vmem:[%s7011_s12 + $0xa0] sm:$0xff]  }
 0x77f   :  { %4701 = vmatpush1.bf16.msra.mxu1 %v4533_v18  ;;  %4865 = vmatpush1.bf16.msra.mxu0 %v4535_v22  ;;  %v4890_v18 = vrot.slane %v4877_v30, %v6849_v47  ;;  %v5646_v22 = vld [vmem:[%s7011_s12 + $0xf0] sm:$0xff]  }
 0x780   :  { %4702 = vmatprep.subr.bf16.mxu1 %v4538_v41  ;;  %4866 = vmatprep.subr.bf16.mxu0 %v4540_v15  ;;  %v4916_v41 = vrot.slane %v4903_v3, %v6849_v47  ;;  %v5648_v15 = vld [vmem:[%s7011_s12 + $0xf8] sm:$0xff]  }
 0x783   :  { %4703 = vmatpush1.bf16.msra.mxu1 %v4537_v36  ;;  %4867 = vmatpush1.bf16.msra.mxu0 %v4539_v59  ;;  %v5649_v36 = vld [vmem:[%s7011_s12 + $0xb8] sm:$0xff]   ;;  %s5894_s12 = scalar_lea.vmem %s5285_s19, 32 }
 0x784   :  { %5365 = vmatprep.subr.bf16.mxu1 %v5618_v28  ;;  %p5895_p4 = scmp.ne.s32.totalorder %s5285_s19, %s5894_s12  ;;  %p5900_p6 = scmp.lt.s32.totalorder %s5894_s12, %s5894_s12 }
 0x786   :  { %4705 = vmatmul.mubr.bf16.vlgmr.msra.gmra.mrb[8].mxu1 %v4547_v48  ;;  %4869 = vmatmul.mubr.bf16.vlgmr.msra.gmra.mrb[16].mxu0 %v4547_v48  ;;  %p5901_p7 = por %p5900_p6, %p5899_p5 }
 0x787   :  { %5366 = vmatpush3.bf16.msra.mxu1 %v5619_v0 }
 0x788   :  { %5367 = vmatprep.subr.bf16.mxu1 %v5620_v63  ;;  %p5902_p8 = pnand %p5901_p7, %p5895_p4 }
 0x78b   :  { %5368 = vmatpush3.bf16.msra.mxu1 %v5621_v35  ;;  %v5332_v35 = vld [vmem:[#allocation19] ss:$0 sm:$0xff] }
 0x78c   :  { %5369 = vmatprep.subr.bf16.mxu1 %v5622_v11 }
 0x78f   :  { %5370 = vmatpush3.bf16.msra.mxu1 %v5623_v51 }
 0x790   :  { %5371 = vmatprep.subr.bf16.mxu1 %v5624_v24 }
 0x793   :  { %5372 = vmatpush3.bf16.msra.mxu1 %v5625_v10 }
 0x794   :  { %5373 = vmatprep.subr.bf16.mxu1 %v5626_v46 }
 0x797   :  { %5374 = vmatpush3.bf16.msra.mxu1 %v5627_v6 }
 0x798   :  { %5375 = vmatprep.subr.bf16.mxu1 %v5628_v45 }
 0x79b   :  { %5376 = vmatpush3.bf16.msra.mxu1 %v5629_v20 }
 0x79c   :  { %5377 = vmatprep.subr.bf16.mxu1 %v5630_v32 }
 0x79f   :  { %5378 = vmatpush3.bf16.msra.mxu1 %v5631_v57 }
 0x7a0   :  { %5379 = vmatprep.subr.bf16.mxu1 %v5632_v33 }
 0x7a3   :  { %5380 = vmatpush3.bf16.msra.mxu1 %v5633_v40 }
 0x7a4   :  { %5387 = vmatprep.subr.bf16.mxu1 %v5634_v19 }
 0x859   :  { %v4706_v50 = vpop.f32.mrb[8].mxu1  ;;  %v4870_v1 = vpop.f32.mrb[16].mxu0 }
 0x85a   :  { %v4899_v52 = vmul.f32 %v4882_v42, %v4706_v50  ;;  %v4708_v37 = vpop.f32.mrb[9].mxu1  ;;  %v4872_v43 = vpop.f32.mrb[17].mxu0  ;;  %v4901_v7 = vmul.f32 %v4890_v18, %v4870_v1 }
 0x85b   :  { %v4900_v8 = vmul.f32 %v4886_v2, %v4708_v37  ;;  %v4902_v17 = vmul.f32 %v4894_v44, %v4872_v43  ;;  %v4710_v16 = vpop.f32.mrb[10].mxu1  ;;  %v4874_v29 = vpop.f32.mrb[18].mxu0 }
 0x85c   :  { %v4925_v61 = vadd.f32 %v4908_v4, %v4899_v52  ;;  %v4711_v9 = vpop.f32.mrb[11].mxu1  ;;  %v4875_v21 = vpop.f32.mrb[19].mxu0  ;;  %v4927_v59 = vadd.f32 %v4916_v41, %v4901_v7 }
 0x85d   :  { %v4926_v5 = vadd.f32 %v4912_v62, %v4900_v8  ;;  %v4928_v60 = vadd.f32 %v4920_v12, %v4902_v17 }
 0x85e   :  { %v4929_v31 = vpack.c.bf16 %v4925_v61, %v4925_v61  ;;  %v4931_v25 = vpack.c.bf16 %v4927_v59, %v4927_v59 }
 0x85f   :  { %v4930_v39 = vpack.c.bf16 %v4926_v5, %v4926_v5  ;;  %v4932_v27 = vpack.c.bf16 %v4928_v60, %v4928_v60 }
 0x861   :  { %5228 = vmatprep.mubr.bf16.mxu1 %v4930_v39 }
 0x862   :  { %5229 = vmatmul.mubr.bf16.vlgmr.msra.gmra.mrb[12].mxu1 %v4929_v31 }
 0x863   :  { %5388 = vmatpush3.bf16.msra.mxu1 %v5635_v38  ;;  %5268 = vmatprep.mubr.bf16.mxu1 %v4932_v27 }
 0x864   :  { %5389 = vmatprep.subr.bf16.mxu1 %v5636_v56 }
 0x867   :  { %5390 = vmatpush3.bf16.msra.mxu1 %v5637_v34 }
 0x868   :  { %5391 = vmatprep.subr.bf16.mxu1 %v5638_v14 }
 0x86b   :  { %5392 = vmatpush3.bf16.msra.mxu1 %v5639_v49 }
 0x86c   :  { %5393 = vmatprep.subr.bf16.mxu1 %v5640_v13 }
 0x86f   :  { %5394 = vmatpush3.bf16.msra.mxu1 %v5641_v26 }
 0x870   :  { %5395 = vmatprep.subr.bf16.mxu1 %v5642_v58 }
 0x873   :  { %5396 = vmatpush3.bf16.msra.mxu1 %v5643_v54 }
 0x874   :  { %5397 = vmatprep.subr.bf16.mxu1 %v5644_v55 }
 0x877   :  { %5398 = vmatpush3.bf16.msra.mxu1 %v5645_v53 }
 0x878   :  { %5399 = vmatprep.subr.bf16.mxu1 %v5646_v22 }
 0x87b   :  { %5400 = vmatpush3.bf16.msra.mxu1 %v5647_v23 }
 0x87c   :  { %5401 = vmatprep.subr.bf16.mxu1 %v5648_v15 }
 0x87f   :  { %5402 = vmatpush3.bf16.msra.mxu1 %v5649_v36 }
 0x882   :  { %5269 = vmatmul.mubr.bf16.vlgmr.msra.gmra.mrb[16].mxu1 %v4931_v25 }
 0x935   :  { %v5381_v28 = vpop.f32.mrb[12].mxu1 }
 0x936   :  { %v5382_v0 = vpop.f32.mrb[13].mxu1 }
 0x937   :  { %v5383_v48 = vadd.f32 %v5382_v0, %v5381_v28  ;;  %v5384_v63 = vpop.f32.mrb[14].mxu1 }
 0x938   :  { %v5385_v47 = vpop.f32.mrb[15].mxu1 }
 0x939   :  { %v5231_v24 = vadd.f32 %v5383_v48, %v5332_v35 }
 0x955   :  { %v5403_v11 = vpop.f32.mrb[16].mxu1 }
 0x956   :  { %v5404_v51 = vpop.f32.mrb[17].mxu1 }
 0x957   :  { %v5405_v10 = vadd.f32 %v5404_v51, %v5403_v11  ;;  %v5406_v46 = vpop.f32.mrb[18].mxu1 }
 0x958   :  { %v5407_v6 = vpop.f32.mrb[19].mxu1 }
 0x959   :  { %v5271_v45 = vadd.f32 %v5405_v10, %v5231_v24 }
 0x95b   :  { %5277 = vst.msk [vmem:[#allocation20] sm:$0x3] %vm5276_vm8, %v5271_v45 }
 0x95c   :  { %5905 = shalt.err (!%p5902_p8)
}
 0x95d   :  { %s5906_s3 = scalar_lea.hbm %s7013_s14, 32 }
 0x95e   :  { %p5907_p9 = scmp.ne.s32.totalorder %s7013_s14, %s5906_s3  ;;  %p5910_p10 = scmp.lt.u32.totalorder %s5906_s3, %s7013_s14 }
 0x960   :  { %p5912_p11 = pnand %p5910_p10, %p5907_p9 }
 0x962   :  { %5915 = shalt.err (!%p5912_p11)
}
 0x963   :  { %5287 = dma.vmem_to_hbm [thread:$0]  %s5285_s19, 32, %s7013_s14, [#allocation4]  }
 0x964   :  { %5928 = dma.done.wait [#allocation4], 32  }
 0x965   :  { %5929 = vsyncadd [#allocation4], 4294967264 }
 0x966   :  { %5291 = vsyncpa [#allocation3], 1 }
 0x967   :  { %5292 = vsyncpa [#allocation6], 1 }
 0x968   :  { %5293 = vsyncpa [#allocation9], 1 }
 0x969   :  { %5294 = vsyncpa [#allocation12], 1 }
 0x96a   :  { %5295 = vsyncpa [#allocation15], 1 }
 0x96b   :  { %5296 = vsyncpa [#allocation18], 1 }
 0x96c   :  { %5297 = vsyncpa [#allocation4], 1 }

</bundles_post_ra>
